<compile_context>
chip_gen: v7x
topology: tpu7x:2x2x1
jax: 0.10.0
libtpu: 0.0.40
codegen_flags: <defaults>
</compile_context>

<pallas_src>
import functools

import jax
import jax.numpy as jnp
from jax.experimental import pallas as pl
from jax.experimental.pallas import tpu as pltpu


# Module geometry constants (kernel, stride, channels) of AtariA2C.
_K1, _S1 = 8, 4
_K2, _S2 = 4, 2
_K3, _S3 = 3, 1
_C1, _C2, _C3 = 32, 64, 64
_HID = 512          # head hidden width
_NPAD = 128         # lane-dense padded width of the fused head output


# ----------------------------------------------------------------------------
# Fused whole-network kernel (one batch tile per grid step).
# ----------------------------------------------------------------------------
def _fused_kernel(p_ref, w1_ref, b1_ref, w2_ref, b2_ref, w3_ref, b3_ref,
                  wh1_ref, bh1_ref, wh2_ref, bh2_ref, out_ref, h1_scr,
                  *, tb, o1, o2):
    """Everything stays in VMEM; only `out_ref` (tb, 128) goes back to HBM."""
    n2 = o2 * o2
    half = o1 // _S2               # parity-split half extent (4 for 36x36 input)

    # ---- conv1 + ReLU.  int8 patch rows (frame - 128, exact in bf16) are cast
    #      in-kernel so only 1 byte/feature crosses HBM; the +128 shift is
    #      pre-folded into b1.  bf16 MXU operands, f32 accumulate + epilogue.
    x = p_ref[...].astype(jnp.float32).astype(jnp.bfloat16)      # (o1*o1*tb, kf)
    h1 = jnp.dot(x, w1_ref[...], preferred_element_type=jnp.float32)
    h1 = jnp.maximum(h1 + b1_ref[...], 0.0)                      # f32 epilogue
    # Parity-major scratch layout: dim0 = (y%2)*half + y//2, dim1 likewise in x,
    # so every conv2 tap below is a contiguous (o2, o2) leading-dim window.
    h1_scr[...] = h1.reshape(o1, o1, tb, _C1).astype(jnp.bfloat16)

    # ---- conv2 + ReLU: 16 taps, each one (o2*o2*tb, 32) x (32, 64) bf16 dot.
    # TODO(synk): group taps into K=128 dots (lane-concat of 4 tap blocks) once
    # the kernel stops being HBM-bound at large batch tiles.
    acc2 = jnp.zeros((n2 * tb, _C2), jnp.float32) + b2_ref[...]
    for t in range(_K2 * _K2):
        i, j = t // _K2, t % _K2
        y0 = (i % _S2) * half + i // _S2
        x0 = (j % _S2) * half + j // _S2
        blk = h1_scr[pl.ds(y0, o2), pl.ds(x0, o2)]               # (o2, o2, tb, 32)
        acc2 = acc2 + jnp.dot(blk.reshape(n2 * tb, _C1),
                              w2_ref[pl.ds(t * _C1, _C1)],
                              preferred_element_type=jnp.float32)
    h2 = jnp.maximum(acc2, 0.0)            # (n2*tb, 64) f32, rows ordered (oy, ox, b)

    # ---- conv3 (NO ReLU, as in the module): the 3x3 kernel covers the whole
    #      3x3 conv2 map (o3 == 1), i.e. a sum over the n2 positions.
    acc3 = jnp.zeros((tb, _C3), jnp.float32) + b3_ref[...]
    for p in range(n2):
        acc3 = acc3 + jnp.dot(h2[p * tb:(p + 1) * tb].astype(jnp.bfloat16),
                              w3_ref[pl.ds(p * _C2, _C2)],
                              preferred_element_type=jnp.float32)
    conv_out = acc3.astype(jnp.bfloat16)                         # == .view(B, -1)

    # ---- merged policy/value heads (bf16 MXU operands, lane-dense output).
    g = jnp.dot(conv_out, wh1_ref[...], preferred_element_type=jnp.float32)
    g = jnp.maximum(g + bh1_ref[...], 0.0).astype(jnp.bfloat16)  # (tb, 1024)
    out = jnp.dot(g, wh2_ref[...], preferred_element_type=jnp.float32)
    out_ref[...] = out + bh2_ref[...]


# ----------------------------------------------------------------------------
# Wrapper-side glue: unique-patch int8 im2col for conv1, ordered so every
# in-kernel conv2-tap gather is a contiguous window; one-time weight prep.
# ----------------------------------------------------------------------------
def _conv1_patch_rows(x_nchw_u8, o1, tb):
    """Unique conv1 patches (no conv2-tap duplication) as int8 rows.

    Row order per batch chunk is (y1%2, y1//2, x1%2, x1//2, b_in_chunk) so the
    kernel's parity-major scratch makes every conv2 tap a contiguous window.
    Features are (kh, kw, cin) to match the (2, 3, 1, 0)-transposed weights.
    Values are frame_u8 - 128 (int8, exact in bf16); the shift is undone by a
    term folded into the conv1 bias.
    """
    B, C, H, W = x_nchw_u8.shape
    x = jnp.transpose(x_nchw_u8, (0, 2, 3, 1))                      # NHWC uint8
    cols = []
    for i in range(_K1):
        for j in range(_K1):
            cols.append(x[:, i:i + _S1 * (o1 - 1) + 1:_S1,
                             j:j + _S1 * (o1 - 1) + 1:_S1, :])
    p = jnp.concatenate(cols, axis=-1)                              # (B, o1, o1, 64*C)
    p = (p.astype(jnp.int16) - 128).astype(jnp.int8)                # u8 -> centered i8
    nb = B // tb
    kf = _K1 * _K1 * C
    half = o1 // _S2
    p = p.reshape(nb, tb, half, _S2, half, _S2, kf)   # (nb, b, yh, yp, xh, xp, f)
    p = jnp.transpose(p, (0, 3, 2, 5, 4, 1, 6))       # (nb, yp, yh, xp, xh, b, f)
    return p.reshape(B * o1 * o1, kf)


def prepare_fused_params(params):
    """One-time reshape / head-merge / bf16 cast of the module parameters."""
    f32, bf16 = jnp.float32, jnp.bfloat16
    c = params
    num_actions = c["pw2"].shape[1]
    # conv weights in (kh, kw, cin) x cout matmul layout; forward()'s /256
    # input scale is folded into the bf16 conv1 weights (pure exponent shift).
    w1 = (jnp.transpose(c["c1w"], (2, 3, 1, 0)).reshape(-1, _C1) / 256.0).astype(bf16)
    # The kernel streams inputs shifted by -128 (int8); fold +128*sum(w1)
    # into the conv1 bias so the math is unchanged.
    b1 = (c["c1b"].reshape(1, _C1).astype(f32)
          + 128.0 * jnp.sum(w1.astype(f32), axis=0, keepdims=True))
    w2 = jnp.transpose(c["c2w"], (2, 3, 1, 0)).reshape(-1, _C2).astype(bf16)
    w3 = jnp.transpose(c["c3w"], (2, 3, 1, 0)).reshape(-1, _C3).astype(bf16)
    b2 = c["c2b"].reshape(1, _C2).astype(f32)
    b3 = c["c3b"].reshape(1, _C3).astype(f32)
    # merged heads: hidden = [policy_hidden | value_hidden]; second layer is a
    # block-diagonal weight zero-padded to a lane-dense 128-wide output.
    wh1 = jnp.concatenate([c["pw1"], c["vw1"]], axis=1).astype(bf16)   # (64, 1024)
    bh1 = jnp.concatenate([c["pb1"], c["vb1"]], axis=1).astype(f32)    # (1, 1024)
    wh2 = jnp.zeros((2 * _HID, _NPAD), f32)
    wh2 = wh2.at[:_HID, :num_actions].set(c["pw2"])
    wh2 = wh2.at[_HID:, num_actions].set(c["vw2"][:, 0])
    bh2 = jnp.zeros((1, _NPAD), f32)
    bh2 = bh2.at[:, :num_actions].set(c["pb2"])
    bh2 = bh2.at[:, num_actions].set(c["vb2"][0, 0])
    return dict(w1=w1, b1=b1, w2=w2, b2=b2, w3=w3, b3=b3,
                wh1=wh1, bh1=bh1, wh2=wh2.astype(bf16), bh2=bh2)


def _choose_tb(B):
    """Batch tile: as large as useful (<=128) while keeping >=2 grid steps
    whenever the batch allows it (so the 'parallel' axis can use both v7x
    TensorCores); always a multiple of 8 (of 16 for B >= 32)."""
    for cand in (128, 64, 32, 16):
        if B >= 2 * cand:
            return cand
    return 8


# ----------------------------------------------------------------------------
# Full AtariA2C forward (single fused pallas_call).
# ----------------------------------------------------------------------------
@functools.partial(jax.jit, static_argnames=("num_actions", "single_buffer_weights"))
def _forward_impl(x_nchw, prep, *, num_actions, single_buffer_weights):
    B, C, H, W = x_nchw.shape
    o1 = (H - _K1) // _S1 + 1
    o2 = (o1 - _K2) // _S2 + 1
    o3 = (o2 - _K3) // _S3 + 1
    # TODO(synk): generalize to o3 > 1 (84x84 frames) and an in-kernel im2col
    # of the raw NHWC u8 frames (memory_space=pl.ANY) to remove the remaining
    # wrapper-side patch blow-up.
    assert o3 == 1, "fused kernel assumes conv3 yields a 1x1 map (e.g. 36x36 input)"
    assert o1 % _S2 == 0 and (o1 - _K2) % _S2 == 0, "parity-split conv2 layout"
    assert num_actions < _NPAD, "merged head packs [policy|value] into 128 lanes"

    tb = _choose_tb(B)
    b_pad = ((B + tb - 1) // tb) * tb            # pad batch to an aligned tile
    if b_pad != B:
        x_nchw = jnp.pad(x_nchw, ((0, b_pad - B), (0, 0), (0, 0), (0, 0)))
    nb = b_pad // tb
    n2 = o2 * o2
    r1 = o1 * o1 * tb                            # unique conv1 patch rows per step
    kf = _K1 * _K1 * C                           # conv1 patch feature width

    patches = _conv1_patch_rows(x_nchw, o1, tb)  # (b_pad*o1*o1, kf) int8

    def wspec(shape):
        if single_buffer_weights:
            # Grid-invariant blocks: no double buffering (VMEM relief on v7x).
            return pl.BlockSpec(shape, lambda b: (0, 0),
                                pipeline_mode=pl.Buffered(1))
        return pl.BlockSpec(shape, lambda b: (0, 0))

    # Raise the scoped VMEM limit (16 MiB v5e / 32 MiB v6e defaults) so big
    # batch tiles keep a double-buffered patch stream; stay under v7x's 64 MiB.
    est = (2 * r1 * kf + 2 * tb * _NPAD * 4 + o1 * o1 * tb * _C1 * 2
           + (1 << 21) + 48 * tb * 1024)
    vmem_limit = int(min(56 << 20, max(32 << 20, 2 * est)))

    kernel = functools.partial(_fused_kernel, tb=tb, o1=o1, o2=o2)
    out = pl.pallas_call(
        kernel,
        out_shape=jax.ShapeDtypeStruct((b_pad, _NPAD), jnp.float32),
        grid_spec=pltpu.PrefetchScalarGridSpec(
            num_scalar_prefetch=0,
            grid=(nb,),
            in_specs=[
                pl.BlockSpec((r1, kf), lambda b: (b, 0)),        # int8 patch stream
                wspec((kf, _C1)), wspec((1, _C1)),               # conv1 w/b (bf16/f32)
                wspec((_K2 * _K2 * _C1, _C2)), wspec((1, _C2)),  # conv2 w/b
                wspec((n2 * _C2, _C3)), wspec((1, _C3)),         # conv3 w/b
                wspec((_C3, 2 * _HID)), wspec((1, 2 * _HID)),    # merged head L1
                wspec((2 * _HID, _NPAD)), wspec((1, _NPAD)),     # merged head L2
            ],
            out_specs=pl.BlockSpec((tb, _NPAD), lambda b: (b, 0)),
            scratch_shapes=[
                pltpu.VMEM((o1, o1, tb, _C1), jnp.bfloat16),     # conv1 activations
            ],
        ),
        compiler_params=pltpu.CompilerParams(
            dimension_semantics=("parallel",),
            vmem_limit_bytes=vmem_limit),
    )(patches, prep["w1"], prep["b1"], prep["w2"], prep["b2"],
      prep["w3"], prep["b3"], prep["wh1"], prep["bh1"],
      prep["wh2"], prep["bh2"])

    policy = out[:B, :num_actions]
    value = out[:B, num_actions:num_actions + 1]
    return policy, value


_SINGLE_BUFFER_OK = None


def atari_a2c_forward(x_nchw, prep, *, num_actions):
    """AtariA2C forward: (policy_logits, value) via one fused Pallas kernel."""
    global _SINGLE_BUFFER_OK
    if _SINGLE_BUFFER_OK is None:
        try:
            out = _forward_impl(x_nchw, prep, num_actions=num_actions,
                                single_buffer_weights=True)
            out = (jax.block_until_ready(out[0]), jax.block_until_ready(out[1]))
            _SINGLE_BUFFER_OK = True
            return out
        except Exception:
            # pipeline_mode / Buffered(1) unsupported in this Pallas build:
            # fall back to default double buffering of the weight blocks.
            _SINGLE_BUFFER_OK = False
    return _forward_impl(x_nchw, prep, num_actions=num_actions,
                         single_buffer_weights=_SINGLE_BUFFER_OK)


# ----------------------------------------------------------------------------
# Pure-JAX reference (sanity check) and parameter construction.
# ----------------------------------------------------------------------------
def ref_forward(x_nchw, params):
    B = x_nchw.shape[0]
    dn = ("NCHW", "OIHW", "NCHW")
    fx = x_nchw.astype(jnp.float32) / 256.0
    h = jax.lax.conv_general_dilated(fx, params["c1w"], (4, 4), "VALID",
                                     dimension_numbers=dn)
    h = jnp.maximum(h + params["c1b"].reshape(1, -1, 1, 1), 0.0)
    h = jax.lax.conv_general_dilated(h, params["c2w"], (2, 2), "VALID",
                                     dimension_numbers=dn)
    h = jnp.maximum(h + params["c2b"].reshape(1, -1, 1, 1), 0.0)
    h = jax.lax.conv_general_dilated(h, params["c3w"], (1, 1), "VALID",
                                     dimension_numbers=dn)
    h = (h + params["c3b"].reshape(1, -1, 1, 1)).reshape(B, -1)
    p = jnp.maximum(h @ params["pw1"] + params["pb1"], 0.0)
    p = p @ params["pw2"] + params["pb2"]
    v = jnp.maximum(h @ params["vw1"] + params["vb1"], 0.0)
    v = v @ params["vw2"] + params["vb2"]
    return p, v


def make_params(key, in_ch, num_actions, conv_out_size):
    ks = jax.random.split(key, 14)
    n = lambda k, s: (0.05 * jax.random.normal(k, s)).astype(jnp.float32)
    return {
        "c1w": n(ks[0], (32, in_ch, 8, 8)), "c1b": n(ks[1], (32,)),
        "c2w": n(ks[2], (64, 32, 4, 4)),    "c2b": n(ks[3], (64,)),
        "c3w": n(ks[4], (64, 64, 3, 3)),    "c3b": n(ks[5], (64,)),
        "pw1": n(ks[6], (conv_out_size, 512)), "pb1": n(ks[7], (1, 512)),
        "pw2": n(ks[8], (512, num_actions)),   "pb2": n(ks[9], (1, num_actions)),
        "vw1": n(ks[10], (conv_out_size, 512)), "vb1": n(ks[11], (1, 512)),
        "vw2": n(ks[12], (512, 1)),             "vb2": n(ks[13], (1, 1)),
    }


if __name__ == "__main__":
    # input_size = (4, 36, 36): conv1 k8s4 -> 8x8, conv2 k4s2 -> 3x3,
    # conv3 k3s1 -> 1x1, conv_out_size = 64.
    B, C, H, W = 2, 4, 36, 36
    NUM_ACTIONS = 6

    o1 = (H - _K1) // _S1 + 1
    o2 = (o1 - _K2) // _S2 + 1
    o3 = (o2 - _K3) // _S3 + 1
    conv_out_size = _C3 * o3 * o3

    key = jax.random.PRNGKey(0)
    kx, kp = jax.random.split(key)
    x = jax.random.randint(kx, (B, C, H, W), 0, 256, dtype=jnp.int32).astype(
        jnp.uint8)
    params = make_params(kp, C, NUM_ACTIONS, conv_out_size)
    prep = prepare_fused_params(params)     # one-time weight merge / bf16 cast

    policy_logits, value = atari_a2c_forward(x, prep, num_actions=NUM_ACTIONS)
    policy_logits = jax.block_until_ready(policy_logits)
    value = jax.block_until_ready(value)

    assert policy_logits.shape == (B, NUM_ACTIONS)
    assert value.shape == (B, 1)
    assert bool(jnp.all(jnp.isfinite(policy_logits)))
    assert bool(jnp.all(jnp.isfinite(value)))

    # Loose sanity check vs. pure-JAX f32 reference (bf16 MXU operands and the
    # folded /256 input scale are a deliberate, in-tolerance precision trade).
    p_ref, v_ref = ref_forward(x, params)
    assert bool(jnp.allclose(policy_logits, p_ref, rtol=1e-1, atol=1e-1))
    assert bool(jnp.allclose(value, v_ref, rtol=1e-1, atol=1e-1))

    print("KERNEL_OK")
</pallas_src>

<mosaic_0001>
module attributes {stable_mosaic.version = 11 : i64} {
  func.func @_fused_kernel(%arg0: i32, %arg1: memref<512x256xi8, #tpu.memory_space<vmem>>, %arg2: memref<256x32xbf16, #tpu.memory_space<vmem>>, %arg3: memref<1x32xf32, #tpu.memory_space<vmem>>, %arg4: memref<512x64xbf16, #tpu.memory_space<vmem>>, %arg5: memref<1x64xf32, #tpu.memory_space<vmem>>, %arg6: memref<576x64xbf16, #tpu.memory_space<vmem>>, %arg7: memref<1x64xf32, #tpu.memory_space<vmem>>, %arg8: memref<64x1024xbf16, #tpu.memory_space<vmem>>, %arg9: memref<1x1024xf32, #tpu.memory_space<vmem>>, %arg10: memref<1024x128xbf16, #tpu.memory_space<vmem>>, %arg11: memref<1x128xf32, #tpu.memory_space<vmem>>, %arg12: memref<8x128xf32, #tpu.memory_space<vmem>>, %arg13: memref<8x8x8x32xbf16, #tpu.memory_space<vmem>>) attributes {dimension_semantics = [#tpu.dimension_semantics<parallel>], iteration_bounds = array<i64: 1>, scalar_prefetch = 0 : i64, scratch_operands = 1 : i64, tpu.core_type = #tpu.core_type<tc>, window_params = [{transform_indices = @transform_0, window_bounds = array<i64: 512, 256>}, {pipeline_mode = #tpu.pipeline_mode<synchronous>, transform_indices = @transform_1, window_bounds = array<i64: 256, 32>}, {pipeline_mode = #tpu.pipeline_mode<synchronous>, transform_indices = @transform_2, window_bounds = array<i64: 1, 32>}, {pipeline_mode = #tpu.pipeline_mode<synchronous>, transform_indices = @transform_3, window_bounds = array<i64: 512, 64>}, {pipeline_mode = #tpu.pipeline_mode<synchronous>, transform_indices = @transform_4, window_bounds = array<i64: 1, 64>}, {pipeline_mode = #tpu.pipeline_mode<synchronous>, transform_indices = @transform_5, window_bounds = array<i64: 576, 64>}, {pipeline_mode = #tpu.pipeline_mode<synchronous>, transform_indices = @transform_6, window_bounds = array<i64: 1, 64>}, {pipeline_mode = #tpu.pipeline_mode<synchronous>, transform_indices = @transform_7, window_bounds = array<i64: 64, 1024>}, {pipeline_mode = #tpu.pipeline_mode<synchronous>, transform_indices = @transform_8, window_bounds = array<i64: 1, 1024>}, {pipeline_mode = #tpu.pipeline_mode<synchronous>, transform_indices = @transform_9, window_bounds = array<i64: 1024, 128>}, {pipeline_mode = #tpu.pipeline_mode<synchronous>, transform_indices = @transform_10, window_bounds = array<i64: 1, 128>}, {transform_indices = @transform_11, window_bounds = array<i64: 8, 128>}]} {
    %c0 = arith.constant 0 : index
    %c0_0 = arith.constant 0 : index
    %0 = vector.load %arg1[%c0, %c0_0] : memref<512x256xi8, #tpu.memory_space<vmem>>, vector<512x256xi8>
    %1 = arith.sitofp %0 : vector<512x256xi8> to vector<512x256xf32>
    %2 = arith.truncf %1 : vector<512x256xf32> to vector<512x256xbf16>
    %c0_1 = arith.constant 0 : index
    %c0_2 = arith.constant 0 : index
    %3 = vector.load %arg2[%c0_1, %c0_2] : memref<256x32xbf16, #tpu.memory_space<vmem>>, vector<256x32xbf16>
    %cst = arith.constant dense<0.000000e+00> : vector<512x32xf32>
    %4 = tpu.matmul %2, %3, %cst {dimension_numbers = #tpu.dot_dimension_numbers<[1], [0], [0], [1], [0, 0, 1, 1], [], []>} : vector<512x256xbf16>, vector<256x32xbf16>, vector<512x32xf32> -> vector<512x32xf32>
    %c0_3 = arith.constant 0 : index
    %c0_4 = arith.constant 0 : index
    %5 = vector.load %arg3[%c0_3, %c0_4] : memref<1x32xf32, #tpu.memory_space<vmem>>, vector<1x32xf32>
    %6 = vector.broadcast %5 : vector<1x32xf32> to vector<512x32xf32>
    %7 = arith.addf %4, %6 : vector<512x32xf32>
    %cst_5 = arith.constant 0.000000e+00 : f32
    %8 = vector.broadcast %cst_5 : f32 to vector<512x32xf32>
    %9 = arith.maximumf %7, %8 : vector<512x32xf32>
    %10 = vector.shape_cast %9 : vector<512x32xf32> to vector<8x8x8x32xf32>
    %11 = arith.truncf %10 : vector<8x8x8x32xf32> to vector<8x8x8x32xbf16>
    %c0_6 = arith.constant 0 : index
    %c0_7 = arith.constant 0 : index
    %c0_8 = arith.constant 0 : index
    %c0_9 = arith.constant 0 : index
    %12 = vector.load %arg13[%c0_6, %c0_7, %c0_8, %c0_9] : memref<8x8x8x32xbf16, #tpu.memory_space<vmem>>, vector<8x8x8x32xbf16>
    tpu.vector_store %arg13[%c0_6, %c0_7, %c0_8, %c0_9], %11 {strides = array<i32>} : memref<8x8x8x32xbf16, #tpu.memory_space<vmem>>, vector<8x8x8x32xbf16>,
    %cst_10 = arith.constant 0.000000e+00 : f32
    %13 = vector.broadcast %cst_10 : f32 to vector<72x64xf32>
    %c0_11 = arith.constant 0 : index
    %c0_12 = arith.constant 0 : index
    %14 = vector.load %arg5[%c0_11, %c0_12] : memref<1x64xf32, #tpu.memory_space<vmem>>, vector<1x64xf32>
    %15 = vector.broadcast %14 : vector<1x64xf32> to vector<72x64xf32>
    %16 = arith.addf %13, %15 : vector<72x64xf32>
    %c0_13 = arith.constant 0 : index
    %c0_14 = arith.constant 0 : index
    %c0_15 = arith.constant 0 : index
    %c0_16 = arith.constant 0 : index
    %17 = vector.load %arg13[%c0_13, %c0_14, %c0_15, %c0_16] : memref<8x8x8x32xbf16, #tpu.memory_space<vmem>>, vector<3x3x8x32xbf16>
    %18 = vector.shape_cast %17 : vector<3x3x8x32xbf16> to vector<72x32xbf16>
    %c0_17 = arith.constant 0 : index
    %c0_18 = arith.constant 0 : index
    %19 = vector.load %arg4[%c0_17, %c0_18] : memref<512x64xbf16, #tpu.memory_space<vmem>>, vector<32x64xbf16>
    %cst_19 = arith.constant dense<0.000000e+00> : vector<72x64xf32>
    %20 = tpu.matmul %18, %19, %cst_19 {dimension_numbers = #tpu.dot_dimension_numbers<[1], [0], [0], [1], [0, 0, 1, 1], [], []>} : vector<72x32xbf16>, vector<32x64xbf16>, vector<72x64xf32> -> vector<72x64xf32>
    %21 = arith.addf %16, %20 : vector<72x64xf32>
    %c0_20 = arith.constant 0 : index
    %c4 = arith.constant 4 : index
    %c0_21 = arith.constant 0 : index
    %c0_22 = arith.constant 0 : index
    %22 = vector.load %arg13[%c0_20, %c4, %c0_21, %c0_22] : memref<8x8x8x32xbf16, #tpu.memory_space<vmem>>, vector<3x3x8x32xbf16>
    %23 = vector.shape_cast %22 : vector<3x3x8x32xbf16> to vector<72x32xbf16>
    %c32 = arith.constant 32 : index
    %c0_23 = arith.constant 0 : index
    %24 = vector.load %arg4[%c32, %c0_23] : memref<512x64xbf16, #tpu.memory_space<vmem>>, vector<32x64xbf16>
    %cst_24 = arith.constant dense<0.000000e+00> : vector<72x64xf32>
    %25 = tpu.matmul %23, %24, %cst_24 {dimension_numbers = #tpu.dot_dimension_numbers<[1], [0], [0], [1], [0, 0, 1, 1], [], []>} : vector<72x32xbf16>, vector<32x64xbf16>, vector<72x64xf32> -> vector<72x64xf32>
    %26 = arith.addf %21, %25 : vector<72x64xf32>
    %c0_25 = arith.constant 0 : index
    %c1 = arith.constant 1 : index
    %c0_26 = arith.constant 0 : index
    %c0_27 = arith.constant 0 : index
    %27 = vector.load %arg13[%c0_25, %c1, %c0_26, %c0_27] : memref<8x8x8x32xbf16, #tpu.memory_space<vmem>>, vector<3x3x8x32xbf16>
    %28 = vector.shape_cast %27 : vector<3x3x8x32xbf16> to vector<72x32xbf16>
    %c64 = arith.constant 64 : index
    %c0_28 = arith.constant 0 : index
    %29 = vector.load %arg4[%c64, %c0_28] : memref<512x64xbf16, #tpu.memory_space<vmem>>, vector<32x64xbf16>
    %cst_29 = arith.constant dense<0.000000e+00> : vector<72x64xf32>
    %30 = tpu.matmul %28, %29, %cst_29 {dimension_numbers = #tpu.dot_dimension_numbers<[1], [0], [0], [1], [0, 0, 1, 1], [], []>} : vector<72x32xbf16>, vector<32x64xbf16>, vector<72x64xf32> -> vector<72x64xf32>
    %31 = arith.addf %26, %30 : vector<72x64xf32>
    %c0_30 = arith.constant 0 : index
    %c5 = arith.constant 5 : index
    %c0_31 = arith.constant 0 : index
    %c0_32 = arith.constant 0 : index
    %32 = vector.load %arg13[%c0_30, %c5, %c0_31, %c0_32] : memref<8x8x8x32xbf16, #tpu.memory_space<vmem>>, vector<3x3x8x32xbf16>
    %33 = vector.shape_cast %32 : vector<3x3x8x32xbf16> to vector<72x32xbf16>
    %c96 = arith.constant 96 : index
    %c0_33 = arith.constant 0 : index
    %34 = vector.load %arg4[%c96, %c0_33] : memref<512x64xbf16, #tpu.memory_space<vmem>>, vector<32x64xbf16>
    %cst_34 = arith.constant dense<0.000000e+00> : vector<72x64xf32>
    %35 = tpu.matmul %33, %34, %cst_34 {dimension_numbers = #tpu.dot_dimension_numbers<[1], [0], [0], [1], [0, 0, 1, 1], [], []>} : vector<72x32xbf16>, vector<32x64xbf16>, vector<72x64xf32> -> vector<72x64xf32>
    %36 = arith.addf %31, %35 : vector<72x64xf32>
    %c4_35 = arith.constant 4 : index
    %c0_36 = arith.constant 0 : index
    %c0_37 = arith.constant 0 : index
    %c0_38 = arith.constant 0 : index
    %37 = vector.load %arg13[%c4_35, %c0_36, %c0_37, %c0_38] : memref<8x8x8x32xbf16, #tpu.memory_space<vmem>>, vector<3x3x8x32xbf16>
    %38 = vector.shape_cast %37 : vector<3x3x8x32xbf16> to vector<72x32xbf16>
    %c128 = arith.constant 128 : index
    %c0_39 = arith.constant 0 : index
    %39 = vector.load %arg4[%c128, %c0_39] : memref<512x64xbf16, #tpu.memory_space<vmem>>, vector<32x64xbf16>
    %cst_40 = arith.constant dense<0.000000e+00> : vector<72x64xf32>
    %40 = tpu.matmul %38, %39, %cst_40 {dimension_numbers = #tpu.dot_dimension_numbers<[1], [0], [0], [1], [0, 0, 1, 1], [], []>} : vector<72x32xbf16>, vector<32x64xbf16>, vector<72x64xf32> -> vector<72x64xf32>
    %41 = arith.addf %36, %40 : vector<72x64xf32>
    %c4_41 = arith.constant 4 : index
    %c4_42 = arith.constant 4 : index
    %c0_43 = arith.constant 0 : index
    %c0_44 = arith.constant 0 : index
    %42 = vector.load %arg13[%c4_41, %c4_42, %c0_43, %c0_44] : memref<8x8x8x32xbf16, #tpu.memory_space<vmem>>, vector<3x3x8x32xbf16>
    %43 = vector.shape_cast %42 : vector<3x3x8x32xbf16> to vector<72x32xbf16>
    %c160 = arith.constant 160 : index
    %c0_45 = arith.constant 0 : index
    %44 = vector.load %arg4[%c160, %c0_45] : memref<512x64xbf16, #tpu.memory_space<vmem>>, vector<32x64xbf16>
    %cst_46 = arith.constant dense<0.000000e+00> : vector<72x64xf32>
    %45 = tpu.matmul %43, %44, %cst_46 {dimension_numbers = #tpu.dot_dimension_numbers<[1], [0], [0], [1], [0, 0, 1, 1], [], []>} : vector<72x32xbf16>, vector<32x64xbf16>, vector<72x64xf32> -> vector<72x64xf32>
    %46 = arith.addf %41, %45 : vector<72x64xf32>
    %c4_47 = arith.constant 4 : index
    %c1_48 = arith.constant 1 : index
    %c0_49 = arith.constant 0 : index
    %c0_50 = arith.constant 0 : index
    %47 = vector.load %arg13[%c4_47, %c1_48, %c0_49, %c0_50] : memref<8x8x8x32xbf16, #tpu.memory_space<vmem>>, vector<3x3x8x32xbf16>
    %48 = vector.shape_cast %47 : vector<3x3x8x32xbf16> to vector<72x32xbf16>
    %c192 = arith.constant 192 : index
    %c0_51 = arith.constant 0 : index
    %49 = vector.load %arg4[%c192, %c0_51] : memref<512x64xbf16, #tpu.memory_space<vmem>>, vector<32x64xbf16>
    %cst_52 = arith.constant dense<0.000000e+00> : vector<72x64xf32>
    %50 = tpu.matmul %48, %49, %cst_52 {dimension_numbers = #tpu.dot_dimension_numbers<[1], [0], [0], [1], [0, 0, 1, 1], [], []>} : vector<72x32xbf16>, vector<32x64xbf16>, vector<72x64xf32> -> vector<72x64xf32>
    %51 = arith.addf %46, %50 : vector<72x64xf32>
    %c4_53 = arith.constant 4 : index
    %c5_54 = arith.constant 5 : index
    %c0_55 = arith.constant 0 : index
    %c0_56 = arith.constant 0 : index
    %52 = vector.load %arg13[%c4_53, %c5_54, %c0_55, %c0_56] : memref<8x8x8x32xbf16, #tpu.memory_space<vmem>>, vector<3x3x8x32xbf16>
    %53 = vector.shape_cast %52 : vector<3x3x8x32xbf16> to vector<72x32xbf16>
    %c224 = arith.constant 224 : index
    %c0_57 = arith.constant 0 : index
    %54 = vector.load %arg4[%c224, %c0_57] : memref<512x64xbf16, #tpu.memory_space<vmem>>, vector<32x64xbf16>
    %cst_58 = arith.constant dense<0.000000e+00> : vector<72x64xf32>
    %55 = tpu.matmul %53, %54, %cst_58 {dimension_numbers = #tpu.dot_dimension_numbers<[1], [0], [0], [1], [0, 0, 1, 1], [], []>} : vector<72x32xbf16>, vector<32x64xbf16>, vector<72x64xf32> -> vector<72x64xf32>
    %56 = arith.addf %51, %55 : vector<72x64xf32>
    %c1_59 = arith.constant 1 : index
    %c0_60 = arith.constant 0 : index
    %c0_61 = arith.constant 0 : index
    %c0_62 = arith.constant 0 : index
    %57 = vector.load %arg13[%c1_59, %c0_60, %c0_61, %c0_62] : memref<8x8x8x32xbf16, #tpu.memory_space<vmem>>, vector<3x3x8x32xbf16>
    %58 = vector.shape_cast %57 : vector<3x3x8x32xbf16> to vector<72x32xbf16>
    %c256 = arith.constant 256 : index
    %c0_63 = arith.constant 0 : index
    %59 = vector.load %arg4[%c256, %c0_63] : memref<512x64xbf16, #tpu.memory_space<vmem>>, vector<32x64xbf16>
    %cst_64 = arith.constant dense<0.000000e+00> : vector<72x64xf32>
    %60 = tpu.matmul %58, %59, %cst_64 {dimension_numbers = #tpu.dot_dimension_numbers<[1], [0], [0], [1], [0, 0, 1, 1], [], []>} : vector<72x32xbf16>, vector<32x64xbf16>, vector<72x64xf32> -> vector<72x64xf32>
    %61 = arith.addf %56, %60 : vector<72x64xf32>
    %c1_65 = arith.constant 1 : index
    %c4_66 = arith.constant 4 : index
    %c0_67 = arith.constant 0 : index
    %c0_68 = arith.constant 0 : index
    %62 = vector.load %arg13[%c1_65, %c4_66, %c0_67, %c0_68] : memref<8x8x8x32xbf16, #tpu.memory_space<vmem>>, vector<3x3x8x32xbf16>
    %63 = vector.shape_cast %62 : vector<3x3x8x32xbf16> to vector<72x32xbf16>
    %c288 = arith.constant 288 : index
    %c0_69 = arith.constant 0 : index
    %64 = vector.load %arg4[%c288, %c0_69] : memref<512x64xbf16, #tpu.memory_space<vmem>>, vector<32x64xbf16>
    %cst_70 = arith.constant dense<0.000000e+00> : vector<72x64xf32>
    %65 = tpu.matmul %63, %64, %cst_70 {dimension_numbers = #tpu.dot_dimension_numbers<[1], [0], [0], [1], [0, 0, 1, 1], [], []>} : vector<72x32xbf16>, vector<32x64xbf16>, vector<72x64xf32> -> vector<72x64xf32>
    %66 = arith.addf %61, %65 : vector<72x64xf32>
    %c1_71 = arith.constant 1 : index
    %c1_72 = arith.constant 1 : index
    %c0_73 = arith.constant 0 : index
    %c0_74 = arith.constant 0 : index
    %67 = vector.load %arg13[%c1_71, %c1_72, %c0_73, %c0_74] : memref<8x8x8x32xbf16, #tpu.memory_space<vmem>>, vector<3x3x8x32xbf16>
    %68 = vector.shape_cast %67 : vector<3x3x8x32xbf16> to vector<72x32xbf16>
    %c320 = arith.constant 320 : index
    %c0_75 = arith.constant 0 : index
    %69 = vector.load %arg4[%c320, %c0_75] : memref<512x64xbf16, #tpu.memory_space<vmem>>, vector<32x64xbf16>
    %cst_76 = arith.constant dense<0.000000e+00> : vector<72x64xf32>
    %70 = tpu.matmul %68, %69, %cst_76 {dimension_numbers = #tpu.dot_dimension_numbers<[1], [0], [0], [1], [0, 0, 1, 1], [], []>} : vector<72x32xbf16>, vector<32x64xbf16>, vector<72x64xf32> -> vector<72x64xf32>
    %71 = arith.addf %66, %70 : vector<72x64xf32>
    %c1_77 = arith.constant 1 : index
    %c5_78 = arith.constant 5 : index
    %c0_79 = arith.constant 0 : index
    %c0_80 = arith.constant 0 : index
    %72 = vector.load %arg13[%c1_77, %c5_78, %c0_79, %c0_80] : memref<8x8x8x32xbf16, #tpu.memory_space<vmem>>, vector<3x3x8x32xbf16>
    %73 = vector.shape_cast %72 : vector<3x3x8x32xbf16> to vector<72x32xbf16>
    %c352 = arith.constant 352 : index
    %c0_81 = arith.constant 0 : index
    %74 = vector.load %arg4[%c352, %c0_81] : memref<512x64xbf16, #tpu.memory_space<vmem>>, vector<32x64xbf16>
    %cst_82 = arith.constant dense<0.000000e+00> : vector<72x64xf32>
    %75 = tpu.matmul %73, %74, %cst_82 {dimension_numbers = #tpu.dot_dimension_numbers<[1], [0], [0], [1], [0, 0, 1, 1], [], []>} : vector<72x32xbf16>, vector<32x64xbf16>, vector<72x64xf32> -> vector<72x64xf32>
    %76 = arith.addf %71, %75 : vector<72x64xf32>
    %c5_83 = arith.constant 5 : index
    %c0_84 = arith.constant 0 : index
    %c0_85 = arith.constant 0 : index
    %c0_86 = arith.constant 0 : index
    %77 = vector.load %arg13[%c5_83, %c0_84, %c0_85, %c0_86] : memref<8x8x8x32xbf16, #tpu.memory_space<vmem>>, vector<3x3x8x32xbf16>
    %78 = vector.shape_cast %77 : vector<3x3x8x32xbf16> to vector<72x32xbf16>
    %c384 = arith.constant 384 : index
    %c0_87 = arith.constant 0 : index
    %79 = vector.load %arg4[%c384, %c0_87] : memref<512x64xbf16, #tpu.memory_space<vmem>>, vector<32x64xbf16>
    %cst_88 = arith.constant dense<0.000000e+00> : vector<72x64xf32>
    %80 = tpu.matmul %78, %79, %cst_88 {dimension_numbers = #tpu.dot_dimension_numbers<[1], [0], [0], [1], [0, 0, 1, 1], [], []>} : vector<72x32xbf16>, vector<32x64xbf16>, vector<72x64xf32> -> vector<72x64xf32>
    %81 = arith.addf %76, %80 : vector<72x64xf32>
    %c5_89 = arith.constant 5 : index
    %c4_90 = arith.constant 4 : index
    %c0_91 = arith.constant 0 : index
    %c0_92 = arith.constant 0 : index
    %82 = vector.load %arg13[%c5_89, %c4_90, %c0_91, %c0_92] : memref<8x8x8x32xbf16, #tpu.memory_space<vmem>>, vector<3x3x8x32xbf16>
    %83 = vector.shape_cast %82 : vector<3x3x8x32xbf16> to vector<72x32xbf16>
    %c416 = arith.constant 416 : index
    %c0_93 = arith.constant 0 : index
    %84 = vector.load %arg4[%c416, %c0_93] : memref<512x64xbf16, #tpu.memory_space<vmem>>, vector<32x64xbf16>
    %cst_94 = arith.constant dense<0.000000e+00> : vector<72x64xf32>
    %85 = tpu.matmul %83, %84, %cst_94 {dimension_numbers = #tpu.dot_dimension_numbers<[1], [0], [0], [1], [0, 0, 1, 1], [], []>} : vector<72x32xbf16>, vector<32x64xbf16>, vector<72x64xf32> -> vector<72x64xf32>
    %86 = arith.addf %81, %85 : vector<72x64xf32>
    %c5_95 = arith.constant 5 : index
    %c1_96 = arith.constant 1 : index
    %c0_97 = arith.constant 0 : index
    %c0_98 = arith.constant 0 : index
    %87 = vector.load %arg13[%c5_95, %c1_96, %c0_97, %c0_98] : memref<8x8x8x32xbf16, #tpu.memory_space<vmem>>, vector<3x3x8x32xbf16>
    %88 = vector.shape_cast %87 : vector<3x3x8x32xbf16> to vector<72x32xbf16>
    %c448 = arith.constant 448 : index
    %c0_99 = arith.constant 0 : index
    %89 = vector.load %arg4[%c448, %c0_99] : memref<512x64xbf16, #tpu.memory_space<vmem>>, vector<32x64xbf16>
    %cst_100 = arith.constant dense<0.000000e+00> : vector<72x64xf32>
    %90 = tpu.matmul %88, %89, %cst_100 {dimension_numbers = #tpu.dot_dimension_numbers<[1], [0], [0], [1], [0, 0, 1, 1], [], []>} : vector<72x32xbf16>, vector<32x64xbf16>, vector<72x64xf32> -> vector<72x64xf32>
    %91 = arith.addf %86, %90 : vector<72x64xf32>
    %c5_101 = arith.constant 5 : index
    %c5_102 = arith.constant 5 : index
    %c0_103 = arith.constant 0 : index
    %c0_104 = arith.constant 0 : index
    %92 = vector.load %arg13[%c5_101, %c5_102, %c0_103, %c0_104] : memref<8x8x8x32xbf16, #tpu.memory_space<vmem>>, vector<3x3x8x32xbf16>
    %93 = vector.shape_cast %92 : vector<3x3x8x32xbf16> to vector<72x32xbf16>
    %c480 = arith.constant 480 : index
    %c0_105 = arith.constant 0 : index
    %94 = vector.load %arg4[%c480, %c0_105] : memref<512x64xbf16, #tpu.memory_space<vmem>>, vector<32x64xbf16>
    %cst_106 = arith.constant dense<0.000000e+00> : vector<72x64xf32>
    %95 = tpu.matmul %93, %94, %cst_106 {dimension_numbers = #tpu.dot_dimension_numbers<[1], [0], [0], [1], [0, 0, 1, 1], [], []>} : vector<72x32xbf16>, vector<32x64xbf16>, vector<72x64xf32> -> vector<72x64xf32>
    %96 = arith.addf %91, %95 : vector<72x64xf32>
    %cst_107 = arith.constant 0.000000e+00 : f32
    %97 = vector.broadcast %cst_107 : f32 to vector<72x64xf32>
    %98 = arith.maximumf %96, %97 : vector<72x64xf32>
    %cst_108 = arith.constant 0.000000e+00 : f32
    %99 = vector.broadcast %cst_108 : f32 to vector<8x64xf32>
    %c0_109 = arith.constant 0 : index
    %c0_110 = arith.constant 0 : index
    %100 = vector.load %arg7[%c0_109, %c0_110] : memref<1x64xf32, #tpu.memory_space<vmem>>, vector<1x64xf32>
    %101 = vector.broadcast %100 : vector<1x64xf32> to vector<8x64xf32>
    %102 = arith.addf %99, %101 : vector<8x64xf32>
    %103 = vector.extract_strided_slice %98 {offsets = [0, 0], sizes = [8, 64], strides = [1, 1]} : vector<72x64xf32> to vector<8x64xf32>
    %104 = arith.truncf %103 : vector<8x64xf32> to vector<8x64xbf16>
    %c0_111 = arith.constant 0 : index
    %c0_112 = arith.constant 0 : index
    %105 = vector.load %arg6[%c0_111, %c0_112] : memref<576x64xbf16, #tpu.memory_space<vmem>>, vector<64x64xbf16>
    %cst_113 = arith.constant dense<0.000000e+00> : vector<8x64xf32>
    %106 = tpu.matmul %104, %105, %cst_113 {dimension_numbers = #tpu.dot_dimension_numbers<[1], [0], [0], [1], [0, 0, 1, 1], [], []>} : vector<8x64xbf16>, vector<64x64xbf16>, vector<8x64xf32> -> vector<8x64xf32>
    %107 = arith.addf %102, %106 : vector<8x64xf32>
    %108 = vector.extract_strided_slice %98 {offsets = [8, 0], sizes = [8, 64], strides = [1, 1]} : vector<72x64xf32> to vector<8x64xf32>
    %109 = arith.truncf %108 : vector<8x64xf32> to vector<8x64xbf16>
    %c64_114 = arith.constant 64 : index
    %c0_115 = arith.constant 0 : index
    %110 = vector.load %arg6[%c64_114, %c0_115] : memref<576x64xbf16, #tpu.memory_space<vmem>>, vector<64x64xbf16>
    %cst_116 = arith.constant dense<0.000000e+00> : vector<8x64xf32>
    %111 = tpu.matmul %109, %110, %cst_116 {dimension_numbers = #tpu.dot_dimension_numbers<[1], [0], [0], [1], [0, 0, 1, 1], [], []>} : vector<8x64xbf16>, vector<64x64xbf16>, vector<8x64xf32> -> vector<8x64xf32>
    %112 = arith.addf %107, %111 : vector<8x64xf32>
    %113 = vector.extract_strided_slice %98 {offsets = [16, 0], sizes = [8, 64], strides = [1, 1]} : vector<72x64xf32> to vector<8x64xf32>
    %114 = arith.truncf %113 : vector<8x64xf32> to vector<8x64xbf16>
    %c128_117 = arith.constant 128 : index
    %c0_118 = arith.constant 0 : index
    %115 = vector.load %arg6[%c128_117, %c0_118] : memref<576x64xbf16, #tpu.memory_space<vmem>>, vector<64x64xbf16>
    %cst_119 = arith.constant dense<0.000000e+00> : vector<8x64xf32>
    %116 = tpu.matmul %114, %115, %cst_119 {dimension_numbers = #tpu.dot_dimension_numbers<[1], [0], [0], [1], [0, 0, 1, 1], [], []>} : vector<8x64xbf16>, vector<64x64xbf16>, vector<8x64xf32> -> vector<8x64xf32>
    %117 = arith.addf %112, %116 : vector<8x64xf32>
    %118 = vector.extract_strided_slice %98 {offsets = [24, 0], sizes = [8, 64], strides = [1, 1]} : vector<72x64xf32> to vector<8x64xf32>
    %119 = arith.truncf %118 : vector<8x64xf32> to vector<8x64xbf16>
    %c192_120 = arith.constant 192 : index
    %c0_121 = arith.constant 0 : index
    %120 = vector.load %arg6[%c192_120, %c0_121] : memref<576x64xbf16, #tpu.memory_space<vmem>>, vector<64x64xbf16>
    %cst_122 = arith.constant dense<0.000000e+00> : vector<8x64xf32>
    %121 = tpu.matmul %119, %120, %cst_122 {dimension_numbers = #tpu.dot_dimension_numbers<[1], [0], [0], [1], [0, 0, 1, 1], [], []>} : vector<8x64xbf16>, vector<64x64xbf16>, vector<8x64xf32> -> vector<8x64xf32>
    %122 = arith.addf %117, %121 : vector<8x64xf32>
    %123 = vector.extract_strided_slice %98 {offsets = [32, 0], sizes = [8, 64], strides = [1, 1]} : vector<72x64xf32> to vector<8x64xf32>
    %124 = arith.truncf %123 : vector<8x64xf32> to vector<8x64xbf16>
    %c256_123 = arith.constant 256 : index
    %c0_124 = arith.constant 0 : index
    %125 = vector.load %arg6[%c256_123, %c0_124] : memref<576x64xbf16, #tpu.memory_space<vmem>>, vector<64x64xbf16>
    %cst_125 = arith.constant dense<0.000000e+00> : vector<8x64xf32>
    %126 = tpu.matmul %124, %125, %cst_125 {dimension_numbers = #tpu.dot_dimension_numbers<[1], [0], [0], [1], [0, 0, 1, 1], [], []>} : vector<8x64xbf16>, vector<64x64xbf16>, vector<8x64xf32> -> vector<8x64xf32>
    %127 = arith.addf %122, %126 : vector<8x64xf32>
    %128 = vector.extract_strided_slice %98 {offsets = [40, 0], sizes = [8, 64], strides = [1, 1]} : vector<72x64xf32> to vector<8x64xf32>
    %129 = arith.truncf %128 : vector<8x64xf32> to vector<8x64xbf16>
    %c320_126 = arith.constant 320 : index
    %c0_127 = arith.constant 0 : index
    %130 = vector.load %arg6[%c320_126, %c0_127] : memref<576x64xbf16, #tpu.memory_space<vmem>>, vector<64x64xbf16>
    %cst_128 = arith.constant dense<0.000000e+00> : vector<8x64xf32>
    %131 = tpu.matmul %129, %130, %cst_128 {dimension_numbers = #tpu.dot_dimension_numbers<[1], [0], [0], [1], [0, 0, 1, 1], [], []>} : vector<8x64xbf16>, vector<64x64xbf16>, vector<8x64xf32> -> vector<8x64xf32>
    %132 = arith.addf %127, %131 : vector<8x64xf32>
    %133 = vector.extract_strided_slice %98 {offsets = [48, 0], sizes = [8, 64], strides = [1, 1]} : vector<72x64xf32> to vector<8x64xf32>
    %134 = arith.truncf %133 : vector<8x64xf32> to vector<8x64xbf16>
    %c384_129 = arith.constant 384 : index
    %c0_130 = arith.constant 0 : index
    %135 = vector.load %arg6[%c384_129, %c0_130] : memref<576x64xbf16, #tpu.memory_space<vmem>>, vector<64x64xbf16>
    %cst_131 = arith.constant dense<0.000000e+00> : vector<8x64xf32>
    %136 = tpu.matmul %134, %135, %cst_131 {dimension_numbers = #tpu.dot_dimension_numbers<[1], [0], [0], [1], [0, 0, 1, 1], [], []>} : vector<8x64xbf16>, vector<64x64xbf16>, vector<8x64xf32> -> vector<8x64xf32>
    %137 = arith.addf %132, %136 : vector<8x64xf32>
    %138 = vector.extract_strided_slice %98 {offsets = [56, 0], sizes = [8, 64], strides = [1, 1]} : vector<72x64xf32> to vector<8x64xf32>
    %139 = arith.truncf %138 : vector<8x64xf32> to vector<8x64xbf16>
    %c448_132 = arith.constant 448 : index
    %c0_133 = arith.constant 0 : index
    %140 = vector.load %arg6[%c448_132, %c0_133] : memref<576x64xbf16, #tpu.memory_space<vmem>>, vector<64x64xbf16>
    %cst_134 = arith.constant dense<0.000000e+00> : vector<8x64xf32>
    %141 = tpu.matmul %139, %140, %cst_134 {dimension_numbers = #tpu.dot_dimension_numbers<[1], [0], [0], [1], [0, 0, 1, 1], [], []>} : vector<8x64xbf16>, vector<64x64xbf16>, vector<8x64xf32> -> vector<8x64xf32>
    %142 = arith.addf %137, %141 : vector<8x64xf32>
    %143 = vector.extract_strided_slice %98 {offsets = [64, 0], sizes = [8, 64], strides = [1, 1]} : vector<72x64xf32> to vector<8x64xf32>
    %144 = arith.truncf %143 : vector<8x64xf32> to vector<8x64xbf16>
    %c512 = arith.constant 512 : index
    %c0_135 = arith.constant 0 : index
    %145 = vector.load %arg6[%c512, %c0_135] : memref<576x64xbf16, #tpu.memory_space<vmem>>, vector<64x64xbf16>
    %cst_136 = arith.constant dense<0.000000e+00> : vector<8x64xf32>
    %146 = tpu.matmul %144, %145, %cst_136 {dimension_numbers = #tpu.dot_dimension_numbers<[1], [0], [0], [1], [0, 0, 1, 1], [], []>} : vector<8x64xbf16>, vector<64x64xbf16>, vector<8x64xf32> -> vector<8x64xf32>
    %147 = arith.addf %142, %146 : vector<8x64xf32>
    %148 = arith.truncf %147 : vector<8x64xf32> to vector<8x64xbf16>
    %c0_137 = arith.constant 0 : index
    %c0_138 = arith.constant 0 : index
    %149 = vector.load %arg8[%c0_137, %c0_138] : memref<64x1024xbf16, #tpu.memory_space<vmem>>, vector<64x1024xbf16>
    %cst_139 = arith.constant dense<0.000000e+00> : vector<8x1024xf32>
    %150 = tpu.matmul %148, %149, %cst_139 {dimension_numbers = #tpu.dot_dimension_numbers<[1], [0], [0], [1], [0, 0, 1, 1], [], []>} : vector<8x64xbf16>, vector<64x1024xbf16>, vector<8x1024xf32> -> vector<8x1024xf32>
    %c0_140 = arith.constant 0 : index
    %c0_141 = arith.constant 0 : index
    %151 = vector.load %arg9[%c0_140, %c0_141] : memref<1x1024xf32, #tpu.memory_space<vmem>>, vector<1x1024xf32>
    %152 = vector.broadcast %151 : vector<1x1024xf32> to vector<8x1024xf32>
    %153 = arith.addf %150, %152 : vector<8x1024xf32>
    %cst_142 = arith.constant 0.000000e+00 : f32
    %154 = vector.broadcast %cst_142 : f32 to vector<8x1024xf32>
    %155 = arith.maximumf %153, %154 : vector<8x1024xf32>
    %156 = arith.truncf %155 : vector<8x1024xf32> to vector<8x1024xbf16>
    %c0_143 = arith.constant 0 : index
    %c0_144 = arith.constant 0 : index
    %157 = vector.load %arg10[%c0_143, %c0_144] : memref<1024x128xbf16, #tpu.memory_space<vmem>>, vector<1024x128xbf16>
    %cst_145 = arith.constant dense<0.000000e+00> : vector<8x128xf32>
    %158 = tpu.matmul %156, %157, %cst_145 {dimension_numbers = #tpu.dot_dimension_numbers<[1], [0], [0], [1], [0, 0, 1, 1], [], []>} : vector<8x1024xbf16>, vector<1024x128xbf16>, vector<8x128xf32> -> vector<8x128xf32>
    %c0_146 = arith.constant 0 : index
    %c0_147 = arith.constant 0 : index
    %159 = vector.load %arg11[%c0_146, %c0_147] : memref<1x128xf32, #tpu.memory_space<vmem>>, vector<1x128xf32>
    %160 = vector.broadcast %159 : vector<1x128xf32> to vector<8x128xf32>
    %161 = arith.addf %158, %160 : vector<8x128xf32>
    %c0_148 = arith.constant 0 : index
    %c0_149 = arith.constant 0 : index
    %162 = vector.load %arg12[%c0_148, %c0_149] : memref<8x128xf32, #tpu.memory_space<vmem>>, vector<8x128xf32>
    tpu.vector_store %arg12[%c0_148, %c0_149], %161 {strides = array<i32>} : memref<8x128xf32, #tpu.memory_space<vmem>>, vector<8x128xf32>,
    return
  }
  func.func @transform_0(%arg0: i32) -> (i32, i32) {
    %c0_i32 = arith.constant 0 : i32
    %c0_i32_0 = arith.constant 0 : i32
    return %arg0, %c0_i32 : i32, i32
  }
  func.func @transform_1(%arg0: i32) -> (i32, i32) {
    %c0_i32 = arith.constant 0 : i32
    %c0_i32_0 = arith.constant 0 : i32
    %c0_i32_1 = arith.constant 0 : i32
    return %c0_i32, %c0_i32_0 : i32, i32
  }
  func.func @transform_2(%arg0: i32) -> (i32, i32) {
    %c0_i32 = arith.constant 0 : i32
    %c0_i32_0 = arith.constant 0 : i32
    %c0_i32_1 = arith.constant 0 : i32
    return %c0_i32, %c0_i32_0 : i32, i32
  }
  func.func @transform_3(%arg0: i32) -> (i32, i32) {
    %c0_i32 = arith.constant 0 : i32
    %c0_i32_0 = arith.constant 0 : i32
    %c0_i32_1 = arith.constant 0 : i32
    return %c0_i32, %c0_i32_0 : i32, i32
  }
  func.func @transform_4(%arg0: i32) -> (i32, i32) {
    %c0_i32 = arith.constant 0 : i32
    %c0_i32_0 = arith.constant 0 : i32
    %c0_i32_1 = arith.constant 0 : i32
    return %c0_i32, %c0_i32_0 : i32, i32
  }
  func.func @transform_5(%arg0: i32) -> (i32, i32) {
    %c0_i32 = arith.constant 0 : i32
    %c0_i32_0 = arith.constant 0 : i32
    %c0_i32_1 = arith.constant 0 : i32
    return %c0_i32, %c0_i32_0 : i32, i32
  }
  func.func @transform_6(%arg0: i32) -> (i32, i32) {
    %c0_i32 = arith.constant 0 : i32
    %c0_i32_0 = arith.constant 0 : i32
    %c0_i32_1 = arith.constant 0 : i32
    return %c0_i32, %c0_i32_0 : i32, i32
  }
  func.func @transform_7(%arg0: i32) -> (i32, i32) {
    %c0_i32 = arith.constant 0 : i32
    %c0_i32_0 = arith.constant 0 : i32
    %c0_i32_1 = arith.constant 0 : i32
    return %c0_i32, %c0_i32_0 : i32, i32
  }
  func.func @transform_8(%arg0: i32) -> (i32, i32) {
    %c0_i32 = arith.constant 0 : i32
    %c0_i32_0 = arith.constant 0 : i32
    %c0_i32_1 = arith.constant 0 : i32
    return %c0_i32, %c0_i32_0 : i32, i32
  }
  func.func @transform_9(%arg0: i32) -> (i32, i32) {
    %c0_i32 = arith.constant 0 : i32
    %c0_i32_0 = arith.constant 0 : i32
    %c0_i32_1 = arith.constant 0 : i32
    return %c0_i32, %c0_i32_0 : i32, i32
  }
  func.func @transform_10(%arg0: i32) -> (i32, i32) {
    %c0_i32 = arith.constant 0 : i32
    %c0_i32_0 = arith.constant 0 : i32
    %c0_i32_1 = arith.constant 0 : i32
    return %c0_i32, %c0_i32_0 : i32, i32
  }
  func.func @transform_11(%arg0: i32) -> (i32, i32) {
    %c0_i32 = arith.constant 0 : i32
    %c0_i32_0 = arith.constant 0 : i32
    return %arg0, %c0_i32 : i32, i32
  }
}

module attributes {stable_mosaic.version = 11 : i64} {
  func.func @_fused_kernel(%arg0: i32, %arg1: memref<512x256xi8, #tpu.memory_space<vmem>>, %arg2: memref<256x32xbf16, #tpu.memory_space<vmem>>, %arg3: memref<1x32xf32, #tpu.memory_space<vmem>>, %arg4: memref<512x64xbf16, #tpu.memory_space<vmem>>, %arg5: memref<1x64xf32, #tpu.memory_space<vmem>>, %arg6: memref<576x64xbf16, #tpu.memory_space<vmem>>, %arg7: memref<1x64xf32, #tpu.memory_space<vmem>>, %arg8: memref<64x1024xbf16, #tpu.memory_space<vmem>>, %arg9: memref<1x1024xf32, #tpu.memory_space<vmem>>, %arg10: memref<1024x128xbf16, #tpu.memory_space<vmem>>, %arg11: memref<1x128xf32, #tpu.memory_space<vmem>>, %arg12: memref<8x128xf32, #tpu.memory_space<vmem>>, %arg13: memref<8x8x8x32xbf16, #tpu.memory_space<vmem>>) attributes {dimension_semantics = [#tpu.dimension_semantics<parallel>], iteration_bounds = array<i64: 1>, scalar_prefetch = 0 : i64, scratch_operands = 1 : i64, tpu.core_type = #tpu.core_type<tc>, window_params = [{transform_indices = @transform_0, window_bounds = array<i64: 512, 256>}, {pipeline_mode = #tpu.pipeline_mode<synchronous>, transform_indices = @transform_1, window_bounds = array<i64: 256, 32>}, {pipeline_mode = #tpu.pipeline_mode<synchronous>, transform_indices = @transform_2, window_bounds = array<i64: 1, 32>}, {pipeline_mode = #tpu.pipeline_mode<synchronous>, transform_indices = @transform_3, window_bounds = array<i64: 512, 64>}, {pipeline_mode = #tpu.pipeline_mode<synchronous>, transform_indices = @transform_4, window_bounds = array<i64: 1, 64>}, {pipeline_mode = #tpu.pipeline_mode<synchronous>, transform_indices = @transform_5, window_bounds = array<i64: 576, 64>}, {pipeline_mode = #tpu.pipeline_mode<synchronous>, transform_indices = @transform_6, window_bounds = array<i64: 1, 64>}, {pipeline_mode = #tpu.pipeline_mode<synchronous>, transform_indices = @transform_7, window_bounds = array<i64: 64, 1024>}, {pipeline_mode = #tpu.pipeline_mode<synchronous>, transform_indices = @transform_8, window_bounds = array<i64: 1, 1024>}, {pipeline_mode = #tpu.pipeline_mode<synchronous>, transform_indices = @transform_9, window_bounds = array<i64: 1024, 128>}, {pipeline_mode = #tpu.pipeline_mode<synchronous>, transform_indices = @transform_10, window_bounds = array<i64: 1, 128>}, {transform_indices = @transform_11, window_bounds = array<i64: 8, 128>}]} {
    %c0 = arith.constant 0 : index
    %c0_0 = arith.constant 0 : index
    %0 = vector.load %arg1[%c0, %c0_0] : memref<512x256xi8, #tpu.memory_space<vmem>>, vector<512x256xi8>
    %1 = arith.sitofp %0 : vector<512x256xi8> to vector<512x256xf32>
    %2 = arith.truncf %1 : vector<512x256xf32> to vector<512x256xbf16>
    %c0_1 = arith.constant 0 : index
    %c0_2 = arith.constant 0 : index
    %3 = vector.load %arg2[%c0_1, %c0_2] : memref<256x32xbf16, #tpu.memory_space<vmem>>, vector<256x32xbf16>
    %cst = arith.constant dense<0.000000e+00> : vector<512x32xf32>
    %4 = tpu.matmul %2, %3, %cst {dimension_numbers = #tpu.dot_dimension_numbers<[1], [0], [0], [1], [0, 0, 1, 1], [], []>} : vector<512x256xbf16>, vector<256x32xbf16>, vector<512x32xf32> -> vector<512x32xf32>
    %c0_3 = arith.constant 0 : index
    %c0_4 = arith.constant 0 : index
    %5 = vector.load %arg3[%c0_3, %c0_4] : memref<1x32xf32, #tpu.memory_space<vmem>>, vector<1x32xf32>
    %6 = vector.broadcast %5 : vector<1x32xf32> to vector<512x32xf32>
    %7 = arith.addf %4, %6 : vector<512x32xf32>
    %cst_5 = arith.constant 0.000000e+00 : f32
    %8 = vector.broadcast %cst_5 : f32 to vector<512x32xf32>
    %9 = arith.maximumf %7, %8 : vector<512x32xf32>
    %10 = vector.shape_cast %9 : vector<512x32xf32> to vector<8x8x8x32xf32>
    %11 = arith.truncf %10 : vector<8x8x8x32xf32> to vector<8x8x8x32xbf16>
    %c0_6 = arith.constant 0 : index
    %c0_7 = arith.constant 0 : index
    %c0_8 = arith.constant 0 : index
    %c0_9 = arith.constant 0 : index
    %12 = vector.load %arg13[%c0_6, %c0_7, %c0_8, %c0_9] : memref<8x8x8x32xbf16, #tpu.memory_space<vmem>>, vector<8x8x8x32xbf16>
    tpu.vector_store %arg13[%c0_6, %c0_7, %c0_8, %c0_9], %11 {strides = array<i32>} : memref<8x8x8x32xbf16, #tpu.memory_space<vmem>>, vector<8x8x8x32xbf16>,
    %cst_10 = arith.constant 0.000000e+00 : f32
    %13 = vector.broadcast %cst_10 : f32 to vector<72x64xf32>
    %c0_11 = arith.constant 0 : index
    %c0_12 = arith.constant 0 : index
    %14 = vector.load %arg5[%c0_11, %c0_12] : memref<1x64xf32, #tpu.memory_space<vmem>>, vector<1x64xf32>
    %15 = vector.broadcast %14 : vector<1x64xf32> to vector<72x64xf32>
    %16 = arith.addf %13, %15 : vector<72x64xf32>
    %c0_13 = arith.constant 0 : index
    %c0_14 = arith.constant 0 : index
    %c0_15 = arith.constant 0 : index
    %c0_16 = arith.constant 0 : index
    %17 = vector.load %arg13[%c0_13, %c0_14, %c0_15, %c0_16] : memref<8x8x8x32xbf16, #tpu.memory_space<vmem>>, vector<3x3x8x32xbf16>
    %18 = vector.shape_cast %17 : vector<3x3x8x32xbf16> to vector<72x32xbf16>
    %c0_17 = arith.constant 0 : index
    %c0_18 = arith.constant 0 : index
    %19 = vector.load %arg4[%c0_17, %c0_18] : memref<512x64xbf16, #tpu.memory_space<vmem>>, vector<32x64xbf16>
    %cst_19 = arith.constant dense<0.000000e+00> : vector<72x64xf32>
    %20 = tpu.matmul %18, %19, %cst_19 {dimension_numbers = #tpu.dot_dimension_numbers<[1], [0], [0], [1], [0, 0, 1, 1], [], []>} : vector<72x32xbf16>, vector<32x64xbf16>, vector<72x64xf32> -> vector<72x64xf32>
    %21 = arith.addf %16, %20 : vector<72x64xf32>
    %c0_20 = arith.constant 0 : index
    %c4 = arith.constant 4 : index
    %c0_21 = arith.constant 0 : index
    %c0_22 = arith.constant 0 : index
    %22 = vector.load %arg13[%c0_20, %c4, %c0_21, %c0_22] : memref<8x8x8x32xbf16, #tpu.memory_space<vmem>>, vector<3x3x8x32xbf16>
    %23 = vector.shape_cast %22 : vector<3x3x8x32xbf16> to vector<72x32xbf16>
    %c32 = arith.constant 32 : index
    %c0_23 = arith.constant 0 : index
    %24 = vector.load %arg4[%c32, %c0_23] : memref<512x64xbf16, #tpu.memory_space<vmem>>, vector<32x64xbf16>
    %cst_24 = arith.constant dense<0.000000e+00> : vector<72x64xf32>
    %25 = tpu.matmul %23, %24, %cst_24 {dimension_numbers = #tpu.dot_dimension_numbers<[1], [0], [0], [1], [0, 0, 1, 1], [], []>} : vector<72x32xbf16>, vector<32x64xbf16>, vector<72x64xf32> -> vector<72x64xf32>
    %26 = arith.addf %21, %25 : vector<72x64xf32>
    %c0_25 = arith.constant 0 : index
    %c1 = arith.constant 1 : index
    %c0_26 = arith.constant 0 : index
    %c0_27 = arith.constant 0 : index
    %27 = vector.load %arg13[%c0_25, %c1, %c0_26, %c0_27] : memref<8x8x8x32xbf16, #tpu.memory_space<vmem>>, vector<3x3x8x32xbf16>
    %28 = vector.shape_cast %27 : vector<3x3x8x32xbf16> to vector<72x32xbf16>
    %c64 = arith.constant 64 : index
    %c0_28 = arith.constant 0 : index
    %29 = vector.load %arg4[%c64, %c0_28] : memref<512x64xbf16, #tpu.memory_space<vmem>>, vector<32x64xbf16>
    %cst_29 = arith.constant dense<0.000000e+00> : vector<72x64xf32>
    %30 = tpu.matmul %28, %29, %cst_29 {dimension_numbers = #tpu.dot_dimension_numbers<[1], [0], [0], [1], [0, 0, 1, 1], [], []>} : vector<72x32xbf16>, vector<32x64xbf16>, vector<72x64xf32> -> vector<72x64xf32>
    %31 = arith.addf %26, %30 : vector<72x64xf32>
    %c0_30 = arith.constant 0 : index
    %c5 = arith.constant 5 : index
    %c0_31 = arith.constant 0 : index
    %c0_32 = arith.constant 0 : index
    %32 = vector.load %arg13[%c0_30, %c5, %c0_31, %c0_32] : memref<8x8x8x32xbf16, #tpu.memory_space<vmem>>, vector<3x3x8x32xbf16>
    %33 = vector.shape_cast %32 : vector<3x3x8x32xbf16> to vector<72x32xbf16>
    %c96 = arith.constant 96 : index
    %c0_33 = arith.constant 0 : index
    %34 = vector.load %arg4[%c96, %c0_33] : memref<512x64xbf16, #tpu.memory_space<vmem>>, vector<32x64xbf16>
    %cst_34 = arith.constant dense<0.000000e+00> : vector<72x64xf32>
    %35 = tpu.matmul %33, %34, %cst_34 {dimension_numbers = #tpu.dot_dimension_numbers<[1], [0], [0], [1], [0, 0, 1, 1], [], []>} : vector<72x32xbf16>, vector<32x64xbf16>, vector<72x64xf32> -> vector<72x64xf32>
    %36 = arith.addf %31, %35 : vector<72x64xf32>
    %c4_35 = arith.constant 4 : index
    %c0_36 = arith.constant 0 : index
    %c0_37 = arith.constant 0 : index
    %c0_38 = arith.constant 0 : index
    %37 = vector.load %arg13[%c4_35, %c0_36, %c0_37, %c0_38] : memref<8x8x8x32xbf16, #tpu.memory_space<vmem>>, vector<3x3x8x32xbf16>
    %38 = vector.shape_cast %37 : vector<3x3x8x32xbf16> to vector<72x32xbf16>
    %c128 = arith.constant 128 : index
    %c0_39 = arith.constant 0 : index
    %39 = vector.load %arg4[%c128, %c0_39] : memref<512x64xbf16, #tpu.memory_space<vmem>>, vector<32x64xbf16>
    %cst_40 = arith.constant dense<0.000000e+00> : vector<72x64xf32>
    %40 = tpu.matmul %38, %39, %cst_40 {dimension_numbers = #tpu.dot_dimension_numbers<[1], [0], [0], [1], [0, 0, 1, 1], [], []>} : vector<72x32xbf16>, vector<32x64xbf16>, vector<72x64xf32> -> vector<72x64xf32>
    %41 = arith.addf %36, %40 : vector<72x64xf32>
    %c4_41 = arith.constant 4 : index
    %c4_42 = arith.constant 4 : index
    %c0_43 = arith.constant 0 : index
    %c0_44 = arith.constant 0 : index
    %42 = vector.load %arg13[%c4_41, %c4_42, %c0_43, %c0_44] : memref<8x8x8x32xbf16, #tpu.memory_space<vmem>>, vector<3x3x8x32xbf16>
    %43 = vector.shape_cast %42 : vector<3x3x8x32xbf16> to vector<72x32xbf16>
    %c160 = arith.constant 160 : index
    %c0_45 = arith.constant 0 : index
    %44 = vector.load %arg4[%c160, %c0_45] : memref<512x64xbf16, #tpu.memory_space<vmem>>, vector<32x64xbf16>
    %cst_46 = arith.constant dense<0.000000e+00> : vector<72x64xf32>
    %45 = tpu.matmul %43, %44, %cst_46 {dimension_numbers = #tpu.dot_dimension_numbers<[1], [0], [0], [1], [0, 0, 1, 1], [], []>} : vector<72x32xbf16>, vector<32x64xbf16>, vector<72x64xf32> -> vector<72x64xf32>
    %46 = arith.addf %41, %45 : vector<72x64xf32>
    %c4_47 = arith.constant 4 : index
    %c1_48 = arith.constant 1 : index
    %c0_49 = arith.constant 0 : index
    %c0_50 = arith.constant 0 : index
    %47 = vector.load %arg13[%c4_47, %c1_48, %c0_49, %c0_50] : memref<8x8x8x32xbf16, #tpu.memory_space<vmem>>, vector<3x3x8x32xbf16>
    %48 = vector.shape_cast %47 : vector<3x3x8x32xbf16> to vector<72x32xbf16>
    %c192 = arith.constant 192 : index
    %c0_51 = arith.constant 0 : index
    %49 = vector.load %arg4[%c192, %c0_51] : memref<512x64xbf16, #tpu.memory_space<vmem>>, vector<32x64xbf16>
    %cst_52 = arith.constant dense<0.000000e+00> : vector<72x64xf32>
    %50 = tpu.matmul %48, %49, %cst_52 {dimension_numbers = #tpu.dot_dimension_numbers<[1], [0], [0], [1], [0, 0, 1, 1], [], []>} : vector<72x32xbf16>, vector<32x64xbf16>, vector<72x64xf32> -> vector<72x64xf32>
    %51 = arith.addf %46, %50 : vector<72x64xf32>
    %c4_53 = arith.constant 4 : index
    %c5_54 = arith.constant 5 : index
    %c0_55 = arith.constant 0 : index
    %c0_56 = arith.constant 0 : index
    %52 = vector.load %arg13[%c4_53, %c5_54, %c0_55, %c0_56] : memref<8x8x8x32xbf16, #tpu.memory_space<vmem>>, vector<3x3x8x32xbf16>
    %53 = vector.shape_cast %52 : vector<3x3x8x32xbf16> to vector<72x32xbf16>
    %c224 = arith.constant 224 : index
    %c0_57 = arith.constant 0 : index
    %54 = vector.load %arg4[%c224, %c0_57] : memref<512x64xbf16, #tpu.memory_space<vmem>>, vector<32x64xbf16>
    %cst_58 = arith.constant dense<0.000000e+00> : vector<72x64xf32>
    %55 = tpu.matmul %53, %54, %cst_58 {dimension_numbers = #tpu.dot_dimension_numbers<[1], [0], [0], [1], [0, 0, 1, 1], [], []>} : vector<72x32xbf16>, vector<32x64xbf16>, vector<72x64xf32> -> vector<72x64xf32>
    %56 = arith.addf %51, %55 : vector<72x64xf32>
    %c1_59 = arith.constant 1 : index
    %c0_60 = arith.constant 0 : index
    %c0_61 = arith.constant 0 : index
    %c0_62 = arith.constant 0 : index
    %57 = vector.load %arg13[%c1_59, %c0_60, %c0_61, %c0_62] : memref<8x8x8x32xbf16, #tpu.memory_space<vmem>>, vector<3x3x8x32xbf16>
    %58 = vector.shape_cast %57 : vector<3x3x8x32xbf16> to vector<72x32xbf16>
    %c256 = arith.constant 256 : index
    %c0_63 = arith.constant 0 : index
    %59 = vector.load %arg4[%c256, %c0_63] : memref<512x64xbf16, #tpu.memory_space<vmem>>, vector<32x64xbf16>
    %cst_64 = arith.constant dense<0.000000e+00> : vector<72x64xf32>
    %60 = tpu.matmul %58, %59, %cst_64 {dimension_numbers = #tpu.dot_dimension_numbers<[1], [0], [0], [1], [0, 0, 1, 1], [], []>} : vector<72x32xbf16>, vector<32x64xbf16>, vector<72x64xf32> -> vector<72x64xf32>
    %61 = arith.addf %56, %60 : vector<72x64xf32>
    %c1_65 = arith.constant 1 : index
    %c4_66 = arith.constant 4 : index
    %c0_67 = arith.constant 0 : index
    %c0_68 = arith.constant 0 : index
    %62 = vector.load %arg13[%c1_65, %c4_66, %c0_67, %c0_68] : memref<8x8x8x32xbf16, #tpu.memory_space<vmem>>, vector<3x3x8x32xbf16>
    %63 = vector.shape_cast %62 : vector<3x3x8x32xbf16> to vector<72x32xbf16>
    %c288 = arith.constant 288 : index
    %c0_69 = arith.constant 0 : index
    %64 = vector.load %arg4[%c288, %c0_69] : memref<512x64xbf16, #tpu.memory_space<vmem>>, vector<32x64xbf16>
    %cst_70 = arith.constant dense<0.000000e+00> : vector<72x64xf32>
    %65 = tpu.matmul %63, %64, %cst_70 {dimension_numbers = #tpu.dot_dimension_numbers<[1], [0], [0], [1], [0, 0, 1, 1], [], []>} : vector<72x32xbf16>, vector<32x64xbf16>, vector<72x64xf32> -> vector<72x64xf32>
    %66 = arith.addf %61, %65 : vector<72x64xf32>
    %c1_71 = arith.constant 1 : index
    %c1_72 = arith.constant 1 : index
    %c0_73 = arith.constant 0 : index
    %c0_74 = arith.constant 0 : index
    %67 = vector.load %arg13[%c1_71, %c1_72, %c0_73, %c0_74] : memref<8x8x8x32xbf16, #tpu.memory_space<vmem>>, vector<3x3x8x32xbf16>
    %68 = vector.shape_cast %67 : vector<3x3x8x32xbf16> to vector<72x32xbf16>
    %c320 = arith.constant 320 : index
    %c0_75 = arith.constant 0 : index
    %69 = vector.load %arg4[%c320, %c0_75] : memref<512x64xbf16, #tpu.memory_space<vmem>>, vector<32x64xbf16>
    %cst_76 = arith.constant dense<0.000000e+00> : vector<72x64xf32>
    %70 = tpu.matmul %68, %69, %cst_76 {dimension_numbers = #tpu.dot_dimension_numbers<[1], [0], [0], [1], [0, 0, 1, 1], [], []>} : vector<72x32xbf16>, vector<32x64xbf16>, vector<72x64xf32> -> vector<72x64xf32>
    %71 = arith.addf %66, %70 : vector<72x64xf32>
    %c1_77 = arith.constant 1 : index
    %c5_78 = arith.constant 5 : index
    %c0_79 = arith.constant 0 : index
    %c0_80 = arith.constant 0 : index
    %72 = vector.load %arg13[%c1_77, %c5_78, %c0_79, %c0_80] : memref<8x8x8x32xbf16, #tpu.memory_space<vmem>>, vector<3x3x8x32xbf16>
    %73 = vector.shape_cast %72 : vector<3x3x8x32xbf16> to vector<72x32xbf16>
    %c352 = arith.constant 352 : index
    %c0_81 = arith.constant 0 : index
    %74 = vector.load %arg4[%c352, %c0_81] : memref<512x64xbf16, #tpu.memory_space<vmem>>, vector<32x64xbf16>
    %cst_82 = arith.constant dense<0.000000e+00> : vector<72x64xf32>
    %75 = tpu.matmul %73, %74, %cst_82 {dimension_numbers = #tpu.dot_dimension_numbers<[1], [0], [0], [1], [0, 0, 1, 1], [], []>} : vector<72x32xbf16>, vector<32x64xbf16>, vector<72x64xf32> -> vector<72x64xf32>
    %76 = arith.addf %71, %75 : vector<72x64xf32>
    %c5_83 = arith.constant 5 : index
    %c0_84 = arith.constant 0 : index
    %c0_85 = arith.constant 0 : index
    %c0_86 = arith.constant 0 : index
    %77 = vector.load %arg13[%c5_83, %c0_84, %c0_85, %c0_86] : memref<8x8x8x32xbf16, #tpu.memory_space<vmem>>, vector<3x3x8x32xbf16>
    %78 = vector.shape_cast %77 : vector<3x3x8x32xbf16> to vector<72x32xbf16>
    %c384 = arith.constant 384 : index
    %c0_87 = arith.constant 0 : index
    %79 = vector.load %arg4[%c384, %c0_87] : memref<512x64xbf16, #tpu.memory_space<vmem>>, vector<32x64xbf16>
    %cst_88 = arith.constant dense<0.000000e+00> : vector<72x64xf32>
    %80 = tpu.matmul %78, %79, %cst_88 {dimension_numbers = #tpu.dot_dimension_numbers<[1], [0], [0], [1], [0, 0, 1, 1], [], []>} : vector<72x32xbf16>, vector<32x64xbf16>, vector<72x64xf32> -> vector<72x64xf32>
    %81 = arith.addf %76, %80 : vector<72x64xf32>
    %c5_89 = arith.constant 5 : index
    %c4_90 = arith.constant 4 : index
    %c0_91 = arith.constant 0 : index
    %c0_92 = arith.constant 0 : index
    %82 = vector.load %arg13[%c5_89, %c4_90, %c0_91, %c0_92] : memref<8x8x8x32xbf16, #tpu.memory_space<vmem>>, vector<3x3x8x32xbf16>
    %83 = vector.shape_cast %82 : vector<3x3x8x32xbf16> to vector<72x32xbf16>
    %c416 = arith.constant 416 : index
    %c0_93 = arith.constant 0 : index
    %84 = vector.load %arg4[%c416, %c0_93] : memref<512x64xbf16, #tpu.memory_space<vmem>>, vector<32x64xbf16>
    %cst_94 = arith.constant dense<0.000000e+00> : vector<72x64xf32>
    %85 = tpu.matmul %83, %84, %cst_94 {dimension_numbers = #tpu.dot_dimension_numbers<[1], [0], [0], [1], [0, 0, 1, 1], [], []>} : vector<72x32xbf16>, vector<32x64xbf16>, vector<72x64xf32> -> vector<72x64xf32>
    %86 = arith.addf %81, %85 : vector<72x64xf32>
    %c5_95 = arith.constant 5 : index
    %c1_96 = arith.constant 1 : index
    %c0_97 = arith.constant 0 : index
    %c0_98 = arith.constant 0 : index
    %87 = vector.load %arg13[%c5_95, %c1_96, %c0_97, %c0_98] : memref<8x8x8x32xbf16, #tpu.memory_space<vmem>>, vector<3x3x8x32xbf16>
    %88 = vector.shape_cast %87 : vector<3x3x8x32xbf16> to vector<72x32xbf16>
    %c448 = arith.constant 448 : index
    %c0_99 = arith.constant 0 : index
    %89 = vector.load %arg4[%c448, %c0_99] : memref<512x64xbf16, #tpu.memory_space<vmem>>, vector<32x64xbf16>
    %cst_100 = arith.constant dense<0.000000e+00> : vector<72x64xf32>
    %90 = tpu.matmul %88, %89, %cst_100 {dimension_numbers = #tpu.dot_dimension_numbers<[1], [0], [0], [1], [0, 0, 1, 1], [], []>} : vector<72x32xbf16>, vector<32x64xbf16>, vector<72x64xf32> -> vector<72x64xf32>
    %91 = arith.addf %86, %90 : vector<72x64xf32>
    %c5_101 = arith.constant 5 : index
    %c5_102 = arith.constant 5 : index
    %c0_103 = arith.constant 0 : index
    %c0_104 = arith.constant 0 : index
    %92 = vector.load %arg13[%c5_101, %c5_102, %c0_103, %c0_104] : memref<8x8x8x32xbf16, #tpu.memory_space<vmem>>, vector<3x3x8x32xbf16>
    %93 = vector.shape_cast %92 : vector<3x3x8x32xbf16> to vector<72x32xbf16>
    %c480 = arith.constant 480 : index
    %c0_105 = arith.constant 0 : index
    %94 = vector.load %arg4[%c480, %c0_105] : memref<512x64xbf16, #tpu.memory_space<vmem>>, vector<32x64xbf16>
    %cst_106 = arith.constant dense<0.000000e+00> : vector<72x64xf32>
    %95 = tpu.matmul %93, %94, %cst_106 {dimension_numbers = #tpu.dot_dimension_numbers<[1], [0], [0], [1], [0, 0, 1, 1], [], []>} : vector<72x32xbf16>, vector<32x64xbf16>, vector<72x64xf32> -> vector<72x64xf32>
    %96 = arith.addf %91, %95 : vector<72x64xf32>
    %cst_107 = arith.constant 0.000000e+00 : f32
    %97 = vector.broadcast %cst_107 : f32 to vector<72x64xf32>
    %98 = arith.maximumf %96, %97 : vector<72x64xf32>
    %cst_108 = arith.constant 0.000000e+00 : f32
    %99 = vector.broadcast %cst_108 : f32 to vector<8x64xf32>
    %c0_109 = arith.constant 0 : index
    %c0_110 = arith.constant 0 : index
    %100 = vector.load %arg7[%c0_109, %c0_110] : memref<1x64xf32, #tpu.memory_space<vmem>>, vector<1x64xf32>
    %101 = vector.broadcast %100 : vector<1x64xf32> to vector<8x64xf32>
    %102 = arith.addf %99, %101 : vector<8x64xf32>
    %103 = vector.extract_strided_slice %98 {offsets = [0, 0], sizes = [8, 64], strides = [1, 1]} : vector<72x64xf32> to vector<8x64xf32>
    %104 = arith.truncf %103 : vector<8x64xf32> to vector<8x64xbf16>
    %c0_111 = arith.constant 0 : index
    %c0_112 = arith.constant 0 : index
    %105 = vector.load %arg6[%c0_111, %c0_112] : memref<576x64xbf16, #tpu.memory_space<vmem>>, vector<64x64xbf16>
    %cst_113 = arith.constant dense<0.000000e+00> : vector<8x64xf32>
    %106 = tpu.matmul %104, %105, %cst_113 {dimension_numbers = #tpu.dot_dimension_numbers<[1], [0], [0], [1], [0, 0, 1, 1], [], []>} : vector<8x64xbf16>, vector<64x64xbf16>, vector<8x64xf32> -> vector<8x64xf32>
    %107 = arith.addf %102, %106 : vector<8x64xf32>
    %108 = vector.extract_strided_slice %98 {offsets = [8, 0], sizes = [8, 64], strides = [1, 1]} : vector<72x64xf32> to vector<8x64xf32>
    %109 = arith.truncf %108 : vector<8x64xf32> to vector<8x64xbf16>
    %c64_114 = arith.constant 64 : index
    %c0_115 = arith.constant 0 : index
    %110 = vector.load %arg6[%c64_114, %c0_115] : memref<576x64xbf16, #tpu.memory_space<vmem>>, vector<64x64xbf16>
    %cst_116 = arith.constant dense<0.000000e+00> : vector<8x64xf32>
    %111 = tpu.matmul %109, %110, %cst_116 {dimension_numbers = #tpu.dot_dimension_numbers<[1], [0], [0], [1], [0, 0, 1, 1], [], []>} : vector<8x64xbf16>, vector<64x64xbf16>, vector<8x64xf32> -> vector<8x64xf32>
    %112 = arith.addf %107, %111 : vector<8x64xf32>
    %113 = vector.extract_strided_slice %98 {offsets = [16, 0], sizes = [8, 64], strides = [1, 1]} : vector<72x64xf32> to vector<8x64xf32>
    %114 = arith.truncf %113 : vector<8x64xf32> to vector<8x64xbf16>
    %c128_117 = arith.constant 128 : index
    %c0_118 = arith.constant 0 : index
    %115 = vector.load %arg6[%c128_117, %c0_118] : memref<576x64xbf16, #tpu.memory_space<vmem>>, vector<64x64xbf16>
    %cst_119 = arith.constant dense<0.000000e+00> : vector<8x64xf32>
    %116 = tpu.matmul %114, %115, %cst_119 {dimension_numbers = #tpu.dot_dimension_numbers<[1], [0], [0], [1], [0, 0, 1, 1], [], []>} : vector<8x64xbf16>, vector<64x64xbf16>, vector<8x64xf32> -> vector<8x64xf32>
    %117 = arith.addf %112, %116 : vector<8x64xf32>
    %118 = vector.extract_strided_slice %98 {offsets = [24, 0], sizes = [8, 64], strides = [1, 1]} : vector<72x64xf32> to vector<8x64xf32>
    %119 = arith.truncf %118 : vector<8x64xf32> to vector<8x64xbf16>
    %c192_120 = arith.constant 192 : index
    %c0_121 = arith.constant 0 : index
    %120 = vector.load %arg6[%c192_120, %c0_121] : memref<576x64xbf16, #tpu.memory_space<vmem>>, vector<64x64xbf16>
    %cst_122 = arith.constant dense<0.000000e+00> : vector<8x64xf32>
    %121 = tpu.matmul %119, %120, %cst_122 {dimension_numbers = #tpu.dot_dimension_numbers<[1], [0], [0], [1], [0, 0, 1, 1], [], []>} : vector<8x64xbf16>, vector<64x64xbf16>, vector<8x64xf32> -> vector<8x64xf32>
    %122 = arith.addf %117, %121 : vector<8x64xf32>
    %123 = vector.extract_strided_slice %98 {offsets = [32, 0], sizes = [8, 64], strides = [1, 1]} : vector<72x64xf32> to vector<8x64xf32>
    %124 = arith.truncf %123 : vector<8x64xf32> to vector<8x64xbf16>
    %c256_123 = arith.constant 256 : index
    %c0_124 = arith.constant 0 : index
    %125 = vector.load %arg6[%c256_123, %c0_124] : memref<576x64xbf16, #tpu.memory_space<vmem>>, vector<64x64xbf16>
    %cst_125 = arith.constant dense<0.000000e+00> : vector<8x64xf32>
    %126 = tpu.matmul %124, %125, %cst_125 {dimension_numbers = #tpu.dot_dimension_numbers<[1], [0], [0], [1], [0, 0, 1, 1], [], []>} : vector<8x64xbf16>, vector<64x64xbf16>, vector<8x64xf32> -> vector<8x64xf32>
    %127 = arith.addf %122, %126 : vector<8x64xf32>
    %128 = vector.extract_strided_slice %98 {offsets = [40, 0], sizes = [8, 64], strides = [1, 1]} : vector<72x64xf32> to vector<8x64xf32>
    %129 = arith.truncf %128 : vector<8x64xf32> to vector<8x64xbf16>
    %c320_126 = arith.constant 320 : index
    %c0_127 = arith.constant 0 : index
    %130 = vector.load %arg6[%c320_126, %c0_127] : memref<576x64xbf16, #tpu.memory_space<vmem>>, vector<64x64xbf16>
    %cst_128 = arith.constant dense<0.000000e+00> : vector<8x64xf32>
    %131 = tpu.matmul %129, %130, %cst_128 {dimension_numbers = #tpu.dot_dimension_numbers<[1], [0], [0], [1], [0, 0, 1, 1], [], []>} : vector<8x64xbf16>, vector<64x64xbf16>, vector<8x64xf32> -> vector<8x64xf32>
    %132 = arith.addf %127, %131 : vector<8x64xf32>
    %133 = vector.extract_strided_slice %98 {offsets = [48, 0], sizes = [8, 64], strides = [1, 1]} : vector<72x64xf32> to vector<8x64xf32>
    %134 = arith.truncf %133 : vector<8x64xf32> to vector<8x64xbf16>
    %c384_129 = arith.constant 384 : index
    %c0_130 = arith.constant 0 : index
    %135 = vector.load %arg6[%c384_129, %c0_130] : memref<576x64xbf16, #tpu.memory_space<vmem>>, vector<64x64xbf16>
    %cst_131 = arith.constant dense<0.000000e+00> : vector<8x64xf32>
    %136 = tpu.matmul %134, %135, %cst_131 {dimension_numbers = #tpu.dot_dimension_numbers<[1], [0], [0], [1], [0, 0, 1, 1], [], []>} : vector<8x64xbf16>, vector<64x64xbf16>, vector<8x64xf32> -> vector<8x64xf32>
    %137 = arith.addf %132, %136 : vector<8x64xf32>
    %138 = vector.extract_strided_slice %98 {offsets = [56, 0], sizes = [8, 64], strides = [1, 1]} : vector<72x64xf32> to vector<8x64xf32>
    %139 = arith.truncf %138 : vector<8x64xf32> to vector<8x64xbf16>
    %c448_132 = arith.constant 448 : index
    %c0_133 = arith.constant 0 : index
    %140 = vector.load %arg6[%c448_132, %c0_133] : memref<576x64xbf16, #tpu.memory_space<vmem>>, vector<64x64xbf16>
    %cst_134 = arith.constant dense<0.000000e+00> : vector<8x64xf32>
    %141 = tpu.matmul %139, %140, %cst_134 {dimension_numbers = #tpu.dot_dimension_numbers<[1], [0], [0], [1], [0, 0, 1, 1], [], []>} : vector<8x64xbf16>, vector<64x64xbf16>, vector<8x64xf32> -> vector<8x64xf32>
    %142 = arith.addf %137, %141 : vector<8x64xf32>
    %143 = vector.extract_strided_slice %98 {offsets = [64, 0], sizes = [8, 64], strides = [1, 1]} : vector<72x64xf32> to vector<8x64xf32>
    %144 = arith.truncf %143 : vector<8x64xf32> to vector<8x64xbf16>
    %c512 = arith.constant 512 : index
    %c0_135 = arith.constant 0 : index
    %145 = vector.load %arg6[%c512, %c0_135] : memref<576x64xbf16, #tpu.memory_space<vmem>>, vector<64x64xbf16>
    %cst_136 = arith.constant dense<0.000000e+00> : vector<8x64xf32>
    %146 = tpu.matmul %144, %145, %cst_136 {dimension_numbers = #tpu.dot_dimension_numbers<[1], [0], [0], [1], [0, 0, 1, 1], [], []>} : vector<8x64xbf16>, vector<64x64xbf16>, vector<8x64xf32> -> vector<8x64xf32>
    %147 = arith.addf %142, %146 : vector<8x64xf32>
    %148 = arith.truncf %147 : vector<8x64xf32> to vector<8x64xbf16>
    %c0_137 = arith.constant 0 : index
    %c0_138 = arith.constant 0 : index
    %149 = vector.load %arg8[%c0_137, %c0_138] : memref<64x1024xbf16, #tpu.memory_space<vmem>>, vector<64x1024xbf16>
    %cst_139 = arith.constant dense<0.000000e+00> : vector<8x1024xf32>
    %150 = tpu.matmul %148, %149, %cst_139 {dimension_numbers = #tpu.dot_dimension_numbers<[1], [0], [0], [1], [0, 0, 1, 1], [], []>} : vector<8x64xbf16>, vector<64x1024xbf16>, vector<8x1024xf32> -> vector<8x1024xf32>
    %c0_140 = arith.constant 0 : index
    %c0_141 = arith.constant 0 : index
    %151 = vector.load %arg9[%c0_140, %c0_141] : memref<1x1024xf32, #tpu.memory_space<vmem>>, vector<1x1024xf32>
    %152 = vector.broadcast %151 : vector<1x1024xf32> to vector<8x1024xf32>
    %153 = arith.addf %150, %152 : vector<8x1024xf32>
    %cst_142 = arith.constant 0.000000e+00 : f32
    %154 = vector.broadcast %cst_142 : f32 to vector<8x1024xf32>
    %155 = arith.maximumf %153, %154 : vector<8x1024xf32>
    %156 = arith.truncf %155 : vector<8x1024xf32> to vector<8x1024xbf16>
    %c0_143 = arith.constant 0 : index
    %c0_144 = arith.constant 0 : index
    %157 = vector.load %arg10[%c0_143, %c0_144] : memref<1024x128xbf16, #tpu.memory_space<vmem>>, vector<1024x128xbf16>
    %cst_145 = arith.constant dense<0.000000e+00> : vector<8x128xf32>
    %158 = tpu.matmul %156, %157, %cst_145 {dimension_numbers = #tpu.dot_dimension_numbers<[1], [0], [0], [1], [0, 0, 1, 1], [], []>} : vector<8x1024xbf16>, vector<1024x128xbf16>, vector<8x128xf32> -> vector<8x128xf32>
    %c0_146 = arith.constant 0 : index
    %c0_147 = arith.constant 0 : index
    %159 = vector.load %arg11[%c0_146, %c0_147] : memref<1x128xf32, #tpu.memory_space<vmem>>, vector<1x128xf32>
    %160 = vector.broadcast %159 : vector<1x128xf32> to vector<8x128xf32>
    %161 = arith.addf %158, %160 : vector<8x128xf32>
    %c0_148 = arith.constant 0 : index
    %c0_149 = arith.constant 0 : index
    %162 = vector.load %arg12[%c0_148, %c0_149] : memref<8x128xf32, #tpu.memory_space<vmem>>, vector<8x128xf32>
    tpu.vector_store %arg12[%c0_148, %c0_149], %161 {strides = array<i32>} : memref<8x128xf32, #tpu.memory_space<vmem>>, vector<8x128xf32>,
    return
  }
  func.func @transform_0(%arg0: i32) -> (i32, i32) {
    %c0_i32 = arith.constant 0 : i32
    %c0_i32_0 = arith.constant 0 : i32
    return %arg0, %c0_i32 : i32, i32
  }
  func.func @transform_1(%arg0: i32) -> (i32, i32) {
    %c0_i32 = arith.constant 0 : i32
    %c0_i32_0 = arith.constant 0 : i32
    %c0_i32_1 = arith.constant 0 : i32
    return %c0_i32, %c0_i32_0 : i32, i32
  }
  func.func @transform_2(%arg0: i32) -> (i32, i32) {
    %c0_i32 = arith.constant 0 : i32
    %c0_i32_0 = arith.constant 0 : i32
    %c0_i32_1 = arith.constant 0 : i32
    return %c0_i32, %c0_i32_0 : i32, i32
  }
  func.func @transform_3(%arg0: i32) -> (i32, i32) {
    %c0_i32 = arith.constant 0 : i32
    %c0_i32_0 = arith.constant 0 : i32
    %c0_i32_1 = arith.constant 0 : i32
    return %c0_i32, %c0_i32_0 : i32, i32
  }
  func.func @transform_4(%arg0: i32) -> (i32, i32) {
    %c0_i32 = arith.constant 0 : i32
    %c0_i32_0 = arith.constant 0 : i32
    %c0_i32_1 = arith.constant 0 : i32
    return %c0_i32, %c0_i32_0 : i32, i32
  }
  func.func @transform_5(%arg0: i32) -> (i32, i32) {
    %c0_i32 = arith.constant 0 : i32
    %c0_i32_0 = arith.constant 0 : i32
    %c0_i32_1 = arith.constant 0 : i32
    return %c0_i32, %c0_i32_0 : i32, i32
  }
  func.func @transform_6(%arg0: i32) -> (i32, i32) {
    %c0_i32 = arith.constant 0 : i32
    %c0_i32_0 = arith.constant 0 : i32
    %c0_i32_1 = arith.constant 0 : i32
    return %c0_i32, %c0_i32_0 : i32, i32
  }
  func.func @transform_7(%arg0: i32) -> (i32, i32) {
    %c0_i32 = arith.constant 0 : i32
    %c0_i32_0 = arith.constant 0 : i32
    %c0_i32_1 = arith.constant 0 : i32
    return %c0_i32, %c0_i32_0 : i32, i32
  }
  func.func @transform_8(%arg0: i32) -> (i32, i32) {
    %c0_i32 = arith.constant 0 : i32
    %c0_i32_0 = arith.constant 0 : i32
    %c0_i32_1 = arith.constant 0 : i32
    return %c0_i32, %c0_i32_0 : i32, i32
  }
  func.func @transform_9(%arg0: i32) -> (i32, i32) {
    %c0_i32 = arith.constant 0 : i32
    %c0_i32_0 = arith.constant 0 : i32
    %c0_i32_1 = arith.constant 0 : i32
    return %c0_i32, %c0_i32_0 : i32, i32
  }
  func.func @transform_10(%arg0: i32) -> (i32, i32) {
    %c0_i32 = arith.constant 0 : i32
    %c0_i32_0 = arith.constant 0 : i32
    %c0_i32_1 = arith.constant 0 : i32
    return %c0_i32, %c0_i32_0 : i32, i32
  }
  func.func @transform_11(%arg0: i32) -> (i32, i32) {
    %c0_i32 = arith.constant 0 : i32
    %c0_i32_0 = arith.constant 0 : i32
    return %arg0, %c0_i32 : i32, i32
  }
}

</mosaic_0001>

<bundles_post_ra>
// kernel: _forward_impl.1
= control target key start
LH: loop header
LB: loop body
LE: loop exit
PB: predicated region body
PF: predicated region fallthrough
CT: control target
= control target key end

     0   :  { %v6977_v0 = vmov 0   ;;  %vm6979_vm0 = vmmov 0   ;;  %vm1039_vm1 = vcmask 257024   ;;  %vm1160_vm2 = vcmask 261120   ;;  %s8243_s1 = inlined_call_operand.vmem [shape: bf16[256,32], index: 1, kind: input, shape index: {}]   ;;  %s8244_s0 = inlined_call_operand.vmem [shape: s8[512,256], index: 0, kind: input, shape index: {}]   ;;  %s8245_s3 = inlined_call_operand.vmem [shape: bf16[512,64], index: 3, kind: input, shape index: {}]   ;;  %s8246_s2 = inlined_call_operand.vmem [shape: f32[1,32], index: 2, kind: input, shape index: {}]   ;;  %s8247_s5 = inlined_call_operand.vmem [shape: bf16[576,64], index: 5, kind: input, shape index: {}]   ;;  %s8248_s4 = inlined_call_operand.vmem [shape: f32[1,64], index: 4, kind: input, shape index: {}]   ;;  %s8249_s7 = inlined_call_operand.vmem [shape: bf16[64,1024], index: 7, kind: input, shape index: {}]   ;;  %s8250_s9 = inlined_call_operand.vmem [shape: bf16[1024,128], index: 9, kind: input, shape index: {}]   ;;  %s8251_s6 = inlined_call_operand.vmem [shape: f32[1,64], index: 6, kind: input, shape index: {}]   ;;  %s8252_s8 = inlined_call_operand.vmem [shape: f32[1,1024], index: 8, kind: input, shape index: {}]   ;;  %s8253_s10 = inlined_call_operand.vmem [shape: f32[1,128], index: 10, kind: input, shape index: {}]   ;;  %s8254_s11 = inlined_call_operand.vmem [shape: f32[8,128], index: 11, kind: output, shape index: {}]  }
   0x1   :  { %622 = vmatprep.subr.bf16.mxu0 %v6977_v0  ;;  %v6748_v1 = vld [vmem:[%s8243_s1] sm:$0xff]   ;;  %v6749_v2 = vld [vmem:[%s8243_s1 + $0x8] sm:$0xff]   ;;  %v6750_v3 = vld [vmem:[%s8243_s1 + $0x10] sm:$0xff]   ;;  %vm3482_vm3 = vcmask 523264  }
   0x2   :  { %623 = vmatpush1.bf16.msra.mxu0 %v6748_v1  ;;  %v6751_v4 = vld [vmem:[%s8243_s1 + $0x18] sm:$0xff]   ;;  %v6752_v5 = vld [vmem:[%s8243_s1 + $0x20] sm:$0xff]   ;;  %v6753_v9 = vld [vmem:[%s8243_s1 + $0x28] sm:$0xff]  }
   0x3   :  { %624 = vmatprep.subr.bf16.mxu0 %v6977_v0  ;;  %v39_v6 = vld [vmem:[%s8244_s0] sm:$0xff]   ;;  %v6754_v11 = vld [vmem:[%s8243_s1 + $0x30] sm:$0xff]   ;;  %v6755_v12 = vld [vmem:[%s8243_s1 + $0x38] sm:$0xff]  }
   0x4   :  { %v103_v7 = vunpack.c.l.s8.bf16 %v39_v6  ;;  %v104_v8 = vunpack.c.h.s8.bf16 %v39_v6  ;;  %v6756_v13 = vld [vmem:[%s8243_s1 + $0x40] sm:$0xff]   ;;  %v6757_v14 = vld [vmem:[%s8243_s1 + $0x48] sm:$0xff]   ;;  %v6758_v15 = vld [vmem:[%s8243_s1 + $0x50] sm:$0xff]  }
   0x5   :  { %v6759_v16 = vld [vmem:[%s8243_s1 + $0x58] sm:$0xff]   ;;  %v6760_v17 = vld [vmem:[%s8243_s1 + $0x60] sm:$0xff]   ;;  %v6761_v18 = vld [vmem:[%s8243_s1 + $0x68] sm:$0xff]  }
   0x6   :  { %625 = vmatpush1.bf16.msra.mxu0 %v6749_v2  ;;  %v5247_v10 = vcombine.high %v103_v7, %v104_v8  ;;  %v6762_v19 = vld [vmem:[%s8243_s1 + $0x70] sm:$0xff]   ;;  %v41_v20 = vld [vmem:[%s8244_s0 + $0x8] sm:$0xff]   ;;  %v6763_v21 = vld [vmem:[%s8243_s1 + $0x78] sm:$0xff]   ;;  %v5246_v24 = vcombine.low %v103_v7, %v104_v8 }
   0x7   :  { %626 = vmatprep.subr.bf16.mxu0 %v6977_v0  ;;  %v105_v22 = vunpack.c.l.s8.bf16 %v41_v20  ;;  %v106_v23 = vunpack.c.h.s8.bf16 %v41_v20  ;;  %v43_v26 = vld [vmem:[%s8244_s0 + $0x10] sm:$0xff]   ;;  %v45_v31 = vld [vmem:[%s8244_s0 + $0x18] sm:$0xff]   ;;  %v47_v36 = vld [vmem:[%s8244_s0 + $0x20] sm:$0xff]  }
   0x8   :  { %654 = vmatprep.mubr.bf16.mxu0 %v5247_v10  ;;  %v107_v27 = vunpack.c.l.s8.bf16 %v43_v26  ;;  %v108_v28 = vunpack.c.h.s8.bf16 %v43_v26  ;;  %v109_v32 = vunpack.c.l.s8.bf16 %v45_v31  ;;  %v110_v33 = vunpack.c.h.s8.bf16 %v45_v31  ;;  %v49_v41 = vld [vmem:[%s8244_s0 + $0x28] sm:$0xff]   ;;  %v51_v46 = vld [vmem:[%s8244_s0 + $0x30] sm:$0xff]   ;;  %v53_v51 = vld [vmem:[%s8244_s0 + $0x38] sm:$0xff]  }
   0x9   :  { %v5249_v25 = vcombine.high %v105_v22, %v106_v23  ;;  %v5248_v29 = vcombine.low %v105_v22, %v106_v23  ;;  %v111_v37 = vunpack.c.l.s8.bf16 %v47_v36  ;;  %v112_v38 = vunpack.c.h.s8.bf16 %v47_v36  ;;  %v55_v56 = vld [vmem:[%s8244_s0 + $0x40] sm:$0xff]   ;;  %v57_v61 = vld [vmem:[%s8244_s0 + $0x48] sm:$0xff]   ;;  %v61_v8 = vld [vmem:[%s8244_s0 + $0x58] sm:$0xff]  }
   0xa   :  { %627 = vmatpush1.bf16.msra.mxu0 %v6750_v3  ;;  %v5251_v30 = vcombine.high %v107_v27, %v108_v28  ;;  %v5250_v34 = vcombine.low %v107_v27, %v108_v28  ;;  %v5253_v35 = vcombine.high %v109_v32, %v110_v33  ;;  %v5252_v39 = vcombine.low %v109_v32, %v110_v33  ;;  %v59_v3 = vld [vmem:[%s8244_s0 + $0x50] sm:$0xff]   ;;  %v6764_v23 = vld [vmem:[%s8245_s3] sm:$0xff]   ;;  %v6765_v26 = vld [vmem:[%s8245_s3 + $0x8] sm:$0xff]  }
   0xb   :  { %628 = vmatprep.subr.bf16.mxu0 %v6977_v0  ;;  %v5255_v40 = vcombine.high %v111_v37, %v112_v38  ;;  %v113_v42 = vunpack.c.l.s8.bf16 %v49_v41  ;;  %v114_v43 = vunpack.c.h.s8.bf16 %v49_v41  ;;  %v5254_v44 = vcombine.low %v111_v37, %v112_v38  ;;  %v67_v22 = vld [vmem:[%s8244_s0 + $0x70] sm:$0xff]   ;;  %v73_v41 = vld [vmem:[%s8244_s0 + $0x88] sm:$0xff]  }
   0xc   :  { %v115_v47 = vunpack.c.l.s8.bf16 %v51_v46  ;;  %v116_v48 = vunpack.c.h.s8.bf16 %v51_v46  ;;  %v117_v52 = vunpack.c.l.s8.bf16 %v53_v51  ;;  %v118_v53 = vunpack.c.h.s8.bf16 %v53_v51  ;;  %v75_v46 = vld [vmem:[%s8244_s0 + $0x90] sm:$0xff]   ;;  %v77_v51 = vld [vmem:[%s8244_s0 + $0x98] sm:$0xff]  }
   0xd   :  { %v5257_v45 = vcombine.high %v113_v42, %v114_v43  ;;  %v5256_v49 = vcombine.low %v113_v42, %v114_v43  ;;  %v119_v57 = vunpack.c.l.s8.bf16 %v55_v56  ;;  %v120_v58 = vunpack.c.h.s8.bf16 %v55_v56  ;;  %v79_v56 = vld [vmem:[%s8244_s0 + $0xa0] sm:$0xff]  }
   0xe   :  { %629 = vmatpush1.bf16.msra.mxu0 %v6751_v4  ;;  %v5259_v50 = vcombine.high %v115_v47, %v116_v48  ;;  %v5258_v54 = vcombine.low %v115_v47, %v116_v48  ;;  %v5261_v55 = vcombine.high %v117_v52, %v118_v53  ;;  %v5260_v59 = vcombine.low %v117_v52, %v118_v53 }
   0xf   :  { %630 = vmatprep.subr.bf16.mxu0 %v6977_v0  ;;  %v5263_v60 = vcombine.high %v119_v57, %v120_v58  ;;  %v121_v62 = vunpack.c.l.s8.bf16 %v57_v61  ;;  %v122_v63 = vunpack.c.h.s8.bf16 %v57_v61  ;;  %v5262_v1 = vcombine.low %v119_v57, %v120_v58  ;;  %v81_v61 = vld [vmem:[%s8244_s0 + $0xa8] sm:$0xff]  }
  0x10   :  { %v123_v4 = vunpack.c.l.s8.bf16 %v59_v3  ;;  %v126_v10 = vunpack.c.h.s8.bf16 %v61_v8  ;;  %v131_v27 = vunpack.c.l.s8.bf16 %v67_v22  ;;  %v132_v28 = vunpack.c.h.s8.bf16 %v67_v22 }
  0x11   :  { %v5265_v2 = vcombine.high %v121_v62, %v122_v63  ;;  %v5264_v6 = vcombine.low %v121_v62, %v122_v63  ;;  %v137_v42 = vunpack.c.l.s8.bf16 %v73_v41  ;;  %v138_v43 = vunpack.c.h.s8.bf16 %v73_v41 }
  0x12   :  { %631 = vmatpush1.bf16.msra.mxu0 %v6752_v5  ;;  %v124_v5 = vunpack.c.h.s8.bf16 %v59_v3  ;;  %v5275_v31 = vcombine.high %v131_v27, %v132_v28  ;;  %v139_v47 = vunpack.c.l.s8.bf16 %v75_v46  ;;  %v140_v48 = vunpack.c.h.s8.bf16 %v75_v46  ;;  %v83_v3 = vld [vmem:[%s8244_s0 + $0xb0] sm:$0xff]  }
  0x13   :  { %632 = vmatprep.subr.bf16.mxu0 %v6977_v0  ;;  %v141_v52 = vunpack.c.l.s8.bf16 %v77_v51  ;;  %v142_v53 = vunpack.c.h.s8.bf16 %v77_v51  ;;  %v143_v57 = vunpack.c.l.s8.bf16 %v79_v56  ;;  %v144_v58 = vunpack.c.h.s8.bf16 %v79_v56  ;;  %v6769_v56 = vld [vmem:[%s8245_s3 + $0x10] sm:$0xff]  }
  0x14   :  { %v5267_v7 = vcombine.high %v123_v4, %v124_v5  ;;  %v145_v62 = vunpack.c.l.s8.bf16 %v81_v61  ;;  %v146_v63 = vunpack.c.h.s8.bf16 %v81_v61 }
  0x16   :  { %633 = vmatpush1.bf16.msra.mxu0 %v6753_v9  ;;  %v125_v9 = vunpack.c.l.s8.bf16 %v61_v8  ;;  %v85_v8 = vld [vmem:[%s8244_s0 + $0xb8] sm:$0xff]  }
  0x17   :  { %634 = vmatprep.subr.bf16.mxu0 %v6977_v0 }
  0x1a   :  { %635 = vmatpush1.bf16.msra.mxu0 %v6754_v11  ;;  %v5266_v11 = vcombine.low %v123_v4, %v124_v5  ;;  %v147_v4 = vunpack.c.l.s8.bf16 %v83_v3  ;;  %v148_v5 = vunpack.c.h.s8.bf16 %v83_v3 }
  0x1b   :  { %636 = vmatprep.subr.bf16.mxu0 %v6977_v0 }
  0x1e   :  { %637 = vmatpush1.bf16.msra.mxu0 %v6755_v12  ;;  %v5269_v12 = vcombine.high %v125_v9, %v126_v10 }
  0x1f   :  { %638 = vmatprep.subr.bf16.mxu0 %v6977_v0 }
  0x22   :  { %639 = vmatpush1.bf16.msra.mxu0 %v6756_v13  ;;  %v63_v13 = vld [vmem:[%s8244_s0 + $0x60] sm:$0xff]  }
  0x23   :  { %640 = vmatprep.subr.bf16.mxu0 %v6977_v0 }
  0x26   :  { %641 = vmatpush1.bf16.msra.mxu0 %v6757_v14  ;;  %v127_v14 = vunpack.c.l.s8.bf16 %v63_v13 }
  0x27   :  { %642 = vmatprep.subr.bf16.mxu0 %v6977_v0 }
  0x2a   :  { %643 = vmatpush1.bf16.msra.mxu0 %v6758_v15  ;;  %v128_v15 = vunpack.c.h.s8.bf16 %v63_v13  ;;  %v87_v13 = vld [vmem:[%s8244_s0 + $0xc0] sm:$0xff]  }
  0x2b   :  { %644 = vmatprep.subr.bf16.mxu0 %v6977_v0 }
  0x2e   :  { %645 = vmatpush1.bf16.msra.mxu0 %v6759_v16  ;;  %v5268_v16 = vcombine.low %v125_v9, %v126_v10  ;;  %v149_v9 = vunpack.c.l.s8.bf16 %v85_v8  ;;  %v150_v10 = vunpack.c.h.s8.bf16 %v85_v8 }
  0x2f   :  { %646 = vmatprep.subr.bf16.mxu0 %v6977_v0 }
  0x32   :  { %647 = vmatpush1.bf16.msra.mxu0 %v6760_v17  ;;  %v5271_v17 = vcombine.high %v127_v14, %v128_v15 }
  0x33   :  { %648 = vmatprep.subr.bf16.mxu0 %v6977_v0 }
  0x36   :  { %649 = vmatpush1.bf16.msra.mxu0 %v6761_v18  ;;  %v65_v18 = vld [vmem:[%s8244_s0 + $0x68] sm:$0xff]  }
  0x37   :  { %650 = vmatprep.subr.bf16.mxu0 %v6977_v0  ;;  %v130_v20 = vunpack.c.h.s8.bf16 %v65_v18 }
  0x3a   :  { %651 = vmatpush1.bf16.msra.mxu0 %v6762_v19  ;;  %v129_v19 = vunpack.c.l.s8.bf16 %v65_v18  ;;  %v89_v18 = vld [vmem:[%s8244_s0 + $0xc8] sm:$0xff]  }
  0x3b   :  { %652 = vmatprep.subr.bf16.mxu0 %v6977_v0 }
  0x3e   :  { %653 = vmatpush1.bf16.msra.mxu0 %v6763_v21  ;;  %v5270_v21 = vcombine.low %v127_v14, %v128_v15  ;;  %v151_v14 = vunpack.c.l.s8.bf16 %v87_v13  ;;  %v152_v15 = vunpack.c.h.s8.bf16 %v87_v13 }
  0x41   :  { %655 = vmatmul.mubr.bf16.vlgmr.msra.gmra.mrb[0].mxu0 %v5246_v24  ;;  %v5273_v24 = vcombine.high %v129_v19, %v130_v20 }
  0x42   :  { %662 = vmatprep.mubr.bf16.mxu0 %v5249_v25  ;;  %v6978_v25 = vmov 0.0  }
  0x43   :  { %5911 = vmatprep.subr.bf16.mxu1 %v6978_v25  ;;  %6295 = vmatprep.subr.bf16.mxu0 %v6978_v25 }
  0x44   :  { %5912 = vmatpush3.bf16.msra.mxu1 %v6764_v23  ;;  %5915 = vmatprep.mubr.msk.bf16.mxu1 %vm6979_vm0, %v6978_v25  ;;  %v91_v23 = vld [vmem:[%s8244_s0 + $0xd0] sm:$0xff]  }
  0x45   :  { %5913 = vmatprep.subr.bf16.mxu1 %v6978_v25 }
  0x48   :  { %5914 = vmatpush3.bf16.msra.mxu1 %v6765_v26  ;;  %v156_v26 = vunpack.c.h.s8.bf16 %v91_v23 }
  0x49   :  { %663 = vmatmul.mubr.bf16.gmra.mrb[4].mxu0 %v5248_v29  ;;  %5935 = vmatprep.subr.bf16.mxu1 %v6978_v25  ;;  %v5272_v29 = vcombine.low %v129_v19, %v130_v20  ;;  %v153_v19 = vunpack.c.l.s8.bf16 %v89_v18  ;;  %v154_v20 = vunpack.c.h.s8.bf16 %v89_v18 }
  0x4a   :  { %670 = vmatprep.mubr.bf16.mxu0 %v5251_v30  ;;  %v69_v30 = vld [vmem:[%s8244_s0 + $0x78] sm:$0xff]  }
  0x4b   :  { %v133_v32 = vunpack.c.l.s8.bf16 %v69_v30  ;;  %v134_v33 = vunpack.c.h.s8.bf16 %v69_v30  ;;  %v5297_v22 = vcombine.high %v153_v19, %v154_v20 }
  0x4d   :  { %v5277_v36 = vcombine.high %v133_v32, %v134_v33 }
  0x51   :  { %671 = vmatmul.mubr.bf16.gmra.mrb[8].mxu0 %v5250_v34  ;;  %v5274_v34 = vcombine.low %v131_v27, %v132_v28  ;;  %v5296_v27 = vcombine.low %v153_v19, %v154_v20 }
  0x52   :  { %678 = vmatprep.mubr.bf16.mxu0 %v5253_v35  ;;  %v71_v35 = vld [vmem:[%s8244_s0 + $0x80] sm:$0xff]  }
  0x53   :  { %v135_v37 = vunpack.c.l.s8.bf16 %v71_v35  ;;  %v136_v38 = vunpack.c.h.s8.bf16 %v71_v35 }
  0x59   :  { %679 = vmatmul.mubr.bf16.gmra.mrb[12].mxu0 %v5252_v39  ;;  %v5276_v39 = vcombine.low %v133_v32, %v134_v33 }
  0x5a   :  { %686 = vmatprep.mubr.bf16.mxu0 %v5255_v40  ;;  %v5279_v40 = vcombine.high %v135_v37, %v136_v38 }
  0x61   :  { %687 = vmatmul.mubr.bf16.gmra.mrb[16].mxu0 %v5254_v44  ;;  %v5278_v44 = vcombine.low %v135_v37, %v136_v38 }
  0x62   :  { %694 = vmatprep.mubr.bf16.mxu0 %v5257_v45  ;;  %v5281_v45 = vcombine.high %v137_v42, %v138_v43 }
  0x69   :  { %695 = vmatmul.mubr.bf16.gmra.mrb[20].mxu0 %v5256_v49  ;;  %v5280_v49 = vcombine.low %v137_v42, %v138_v43 }
  0x6a   :  { %702 = vmatprep.mubr.bf16.mxu0 %v5259_v50  ;;  %v5283_v50 = vcombine.high %v139_v47, %v140_v48 }
  0x71   :  { %703 = vmatmul.mubr.bf16.gmra.mrb[24].mxu0 %v5258_v54  ;;  %v5282_v54 = vcombine.low %v139_v47, %v140_v48 }
  0x72   :  { %710 = vmatprep.mubr.bf16.mxu0 %v5261_v55  ;;  %v5285_v55 = vcombine.high %v141_v52, %v142_v53 }
  0x79   :  { %711 = vmatmul.mubr.bf16.gmra.mrb[28].mxu0 %v5260_v59  ;;  %v5284_v59 = vcombine.low %v141_v52, %v142_v53 }
  0x7a   :  { %718 = vmatprep.mubr.bf16.mxu0 %v5263_v60  ;;  %v5287_v60 = vcombine.high %v143_v57, %v144_v58 }
  0x81   :  { %719 = vmatmul.mubr.bf16.gmra.mrb[32].mxu0 %v5262_v1  ;;  %v5286_v1 = vcombine.low %v143_v57, %v144_v58 }
  0x82   :  { %726 = vmatprep.mubr.bf16.mxu0 %v5265_v2  ;;  %v5289_v2 = vcombine.high %v145_v62, %v146_v63 }
  0x89   :  { %727 = vmatmul.mubr.bf16.gmra.mrb[36].mxu0 %v5264_v6  ;;  %v5288_v6 = vcombine.low %v145_v62, %v146_v63 }
  0x8a   :  { %734 = vmatprep.mubr.bf16.mxu0 %v5267_v7  ;;  %v5291_v7 = vcombine.high %v147_v4, %v148_v5 }
  0x91   :  { %735 = vmatmul.mubr.bf16.gmra.mrb[40].mxu0 %v5266_v11  ;;  %v5290_v11 = vcombine.low %v147_v4, %v148_v5 }
  0x92   :  { %742 = vmatprep.mubr.bf16.mxu0 %v5269_v12  ;;  %v5293_v12 = vcombine.high %v149_v9, %v150_v10 }
  0x99   :  { %743 = vmatmul.mubr.bf16.gmra.mrb[44].mxu0 %v5268_v16  ;;  %v5292_v16 = vcombine.low %v149_v9, %v150_v10 }
  0x9a   :  { %750 = vmatprep.mubr.bf16.mxu0 %v5271_v17  ;;  %v5295_v17 = vcombine.high %v151_v14, %v152_v15 }
  0xa1   :  { %751 = vmatmul.mubr.bf16.gmra.mrb[48].mxu0 %v5270_v21  ;;  %v5294_v21 = vcombine.low %v151_v14, %v152_v15 }
  0xa2   :  { %758 = vmatprep.mubr.bf16.mxu0 %v5273_v24  ;;  %v155_v24 = vunpack.c.l.s8.bf16 %v91_v23 }
  0xa4   :  { %v5299_v28 = vcombine.high %v155_v24, %v156_v26  ;;  %v5298_v32 = vcombine.low %v155_v24, %v156_v26 }
  0xa9   :  { %759 = vmatmul.mubr.bf16.gmra.mrb[52].mxu0 %v5272_v29  ;;  %v93_v29 = vld [vmem:[%s8244_s0 + $0xd8] sm:$0xff]  }
  0xaa   :  { %766 = vmatprep.mubr.bf16.mxu0 %v5275_v31  ;;  %v157_v30 = vunpack.c.l.s8.bf16 %v93_v29  ;;  %v158_v31 = vunpack.c.h.s8.bf16 %v93_v29 }
  0xac   :  { %v5301_v33 = vcombine.high %v157_v30, %v158_v31  ;;  %v5300_v38 = vcombine.low %v157_v30, %v158_v31 }
  0xb1   :  { %767 = vmatmul.mubr.bf16.gmra.mrb[56].mxu0 %v5274_v34  ;;  %v7203_v34 = vld [vmem:[%s8246_s2] ss:$0 sm:$0xff] }
  0xb2   :  { %774 = vmatprep.mubr.bf16.mxu0 %v5277_v36 }
  0xb9   :  { %775 = vmatmul.mubr.bf16.gmra.mrb[60].mxu0 %v5276_v39 }
  0xba   :  { %782 = vmatprep.mubr.bf16.mxu0 %v5279_v40 }
  0xc1   :  { %783 = vmatmul.mubr.bf16.gmra.mrb[64].mxu0 %v5278_v44 }
  0xc2   :  { %790 = vmatprep.mubr.bf16.mxu0 %v5281_v45 }
  0xc9   :  { %791 = vmatmul.mubr.bf16.gmra.mrb[68].mxu0 %v5280_v49 }
  0xca   :  { %798 = vmatprep.mubr.bf16.mxu0 %v5283_v50 }
  0xd1   :  { %799 = vmatmul.mubr.bf16.gmra.mrb[72].mxu0 %v5282_v54 }
  0xd2   :  { %806 = vmatprep.mubr.bf16.mxu0 %v5285_v55 }
  0xd9   :  { %807 = vmatmul.mubr.bf16.gmra.mrb[76].mxu0 %v5284_v59 }
  0xda   :  { %814 = vmatprep.mubr.bf16.mxu0 %v5287_v60 }
  0xe1   :  { %815 = vmatmul.mubr.bf16.gmra.mrb[80].mxu0 %v5286_v1 }
  0xe2   :  { %822 = vmatprep.mubr.bf16.mxu0 %v5289_v2  ;;  %v6770_v2 = vld [vmem:[%s8245_s3 + $0x18] sm:$0xff]  }
  0xe9   :  { %823 = vmatmul.mubr.bf16.gmra.mrb[84].mxu0 %v5288_v6 }
  0xea   :  { %830 = vmatprep.mubr.bf16.mxu0 %v5291_v7 }
  0xf1   :  { %831 = vmatmul.mubr.bf16.gmra.mrb[88].mxu0 %v5290_v11 }
  0xf2   :  { %838 = vmatprep.mubr.bf16.mxu0 %v5293_v12 }
  0xf9   :  { %839 = vmatmul.mubr.bf16.gmra.mrb[92].mxu0 %v5292_v16 }
  0xfa   :  { %846 = vmatprep.mubr.bf16.mxu0 %v5295_v17 }
 0x101   :  { %847 = vmatmul.mubr.bf16.gmra.mrb[96].mxu0 %v5294_v21 }
 0x102   :  { %854 = vmatprep.mubr.bf16.mxu0 %v5297_v22 }
 0x109   :  { %855 = vmatmul.mubr.bf16.gmra.mrb[100].mxu0 %v5296_v27 }
 0x10a   :  { %862 = vmatprep.mubr.bf16.mxu0 %v5299_v28 }
 0x111   :  { %863 = vmatmul.mubr.bf16.gmra.mrb[104].mxu0 %v5298_v32 }
 0x112   :  { %870 = vmatprep.mubr.bf16.mxu0 %v5301_v33 }
 0x114   :  { %v656_v35 = vpop.f32.mrb[0].mxu0 }
 0x115   :  { %v657_v36 = vadd.f32 %v7203_v34, %v656_v35  ;;  %v658_v37 = vpop.f32.mrb[1].mxu0 }
 0x116   :  { %v659_v39 = vpop.f32.mrb[2].mxu0 }
 0x117   :  { %v911_v40 = vmax.f32 %v657_v36, 0.0  ;;  %v660_v41 = vadd.f32 %v7203_v34, %v659_v39  ;;  %v661_v42 = vpop.f32.mrb[3].mxu0 }
 0x119   :  { %v975_v43 = vpack.c.bf16 %v911_v40, %v911_v40  ;;  %v912_v44 = vmax.f32 %v660_v41, 0.0  ;;  %871 = vmatmul.mubr.bf16.gmra.mrb[108].mxu0 %v5300_v38 }
 0x11b   :  { %1040 = vst.msk [vmem:[#allocation2] sm:$0xf] %vm1039_vm1, %v975_v43  ;;  %v976_v45 = vpack.c.bf16 %v912_v44, %v912_v44 }
 0x11c   :  { %v664_v46 = vpop.f32.mrb[4].mxu0 }
 0x11d   :  { %1041 = vst.msk [vmem:[#allocation2 + $0x4] sm:$0xf] %vm1039_vm1, %v976_v45  ;;  %v665_v47 = vadd.f32 %v7203_v34, %v664_v46  ;;  %v666_v48 = vpop.f32.mrb[5].mxu0 }
 0x11e   :  { %v667_v49 = vpop.f32.mrb[6].mxu0 }
 0x11f   :  { %v913_v50 = vmax.f32 %v665_v47, 0.0  ;;  %v668_v51 = vadd.f32 %v7203_v34, %v667_v49  ;;  %v669_v52 = vpop.f32.mrb[7].mxu0 }
 0x121   :  { %v977_v53 = vpack.c.bf16 %v913_v50, %v913_v50  ;;  %v914_v54 = vmax.f32 %v668_v51, 0.0 }
 0x123   :  { %1042 = vst.msk [vmem:[#allocation2 + $0x8] sm:$0xf] %vm1039_vm1, %v977_v53  ;;  %v978_v55 = vpack.c.bf16 %v914_v54, %v914_v54 }
 0x124   :  { %v672_v57 = vpop.f32.mrb[8].mxu0  ;;  %v6766_v58 = vld [vmem:[#allocation2] sm:$0xff]  }
 0x125   :  { %1043 = vst.msk [vmem:[#allocation2 + $0xc] sm:$0xf] %vm1039_vm1, %v978_v55  ;;  %v673_v59 = vadd.f32 %v7203_v34, %v672_v57  ;;  %v674_v60 = vpop.f32.mrb[9].mxu0  ;;  %5916 = vmatmul.mubr.msk.bf16.vlgmr.msra.gmra.mrb[0].mxu1 %vm1160_vm2, %v6766_v58 }
 0x126   :  { %v675_v61 = vpop.f32.mrb[10].mxu0  ;;  %5919 = vmatprep.mubr.msk.bf16.mxu1 %vm6979_vm0, %v6978_v25  ;;  %5936 = vmatpush3.bf16.msra.mxu1 %v6769_v56 }
 0x127   :  { %v915_v62 = vmax.f32 %v673_v59, 0.0  ;;  %v676_v63 = vadd.f32 %v7203_v34, %v675_v61  ;;  %v677_v1 = vpop.f32.mrb[11].mxu0  ;;  %5937 = vmatprep.subr.bf16.mxu1 %v6978_v25 }
 0x129   :  { %v979_v3 = vpack.c.bf16 %v915_v62, %v915_v62  ;;  %v916_v4 = vmax.f32 %v676_v63, 0.0 }
 0x12a   :  { %5938 = vmatpush3.bf16.msra.mxu1 %v6770_v2 }
 0x12b   :  { %1044 = vst.msk [vmem:[#allocation2 + $0x10] sm:$0xf] %vm1039_vm1, %v979_v3  ;;  %v980_v5 = vpack.c.bf16 %v916_v4, %v916_v4  ;;  %5959 = vmatprep.subr.bf16.mxu1 %v6978_v25 }
 0x12c   :  { %v680_v6 = vpop.f32.mrb[12].mxu0 }
 0x12d   :  { %1045 = vst.msk [vmem:[#allocation2 + $0x14] sm:$0xf] %vm1039_vm1, %v980_v5  ;;  %v681_v7 = vadd.f32 %v7203_v34, %v680_v6  ;;  %v682_v8 = vpop.f32.mrb[13].mxu0 }
 0x12e   :  { %v683_v9 = vpop.f32.mrb[14].mxu0 }
 0x12f   :  { %v917_v10 = vmax.f32 %v681_v7, 0.0  ;;  %v684_v11 = vadd.f32 %v7203_v34, %v683_v9  ;;  %v685_v12 = vpop.f32.mrb[15].mxu0 }
 0x131   :  { %v981_v13 = vpack.c.bf16 %v917_v10, %v917_v10  ;;  %v918_v14 = vmax.f32 %v684_v11, 0.0 }
 0x133   :  { %1046 = vst.msk [vmem:[#allocation2 + $0x18] sm:$0xf] %vm1039_vm1, %v981_v13  ;;  %v982_v15 = vpack.c.bf16 %v918_v14, %v918_v14 }
 0x134   :  { %v688_v16 = vpop.f32.mrb[16].mxu0 }
 0x135   :  { %1047 = vst.msk [vmem:[#allocation2 + $0x1c] sm:$0xf] %vm1039_vm1, %v982_v15  ;;  %v689_v17 = vadd.f32 %v7203_v34, %v688_v16  ;;  %v690_v18 = vpop.f32.mrb[17].mxu0 }
 0x136   :  { %v691_v19 = vpop.f32.mrb[18].mxu0 }
 0x137   :  { %v919_v20 = vmax.f32 %v689_v17, 0.0  ;;  %v692_v21 = vadd.f32 %v7203_v34, %v691_v19  ;;  %v693_v22 = vpop.f32.mrb[19].mxu0 }
 0x139   :  { %v983_v23 = vpack.c.bf16 %v919_v20, %v919_v20  ;;  %v920_v24 = vmax.f32 %v692_v21, 0.0 }
 0x13b   :  { %1048 = vst.msk [vmem:[#allocation2 + $0x20] sm:$0xf] %vm1039_vm1, %v983_v23  ;;  %v984_v26 = vpack.c.bf16 %v920_v24, %v920_v24 }
 0x13c   :  { %v696_v27 = vpop.f32.mrb[20].mxu0 }
 0x13d   :  { %1049 = vst.msk [vmem:[#allocation2 + $0x24] sm:$0xf] %vm1039_vm1, %v984_v26  ;;  %v697_v28 = vadd.f32 %v7203_v34, %v696_v27  ;;  %v698_v29 = vpop.f32.mrb[21].mxu0 }
 0x13e   :  { %v699_v30 = vpop.f32.mrb[22].mxu0 }
 0x13f   :  { %v921_v31 = vmax.f32 %v697_v28, 0.0  ;;  %v700_v32 = vadd.f32 %v7203_v34, %v699_v30  ;;  %v701_v33 = vpop.f32.mrb[23].mxu0 }
 0x141   :  { %v985_v35 = vpack.c.bf16 %v921_v31, %v921_v31  ;;  %v922_v36 = vmax.f32 %v700_v32, 0.0 }
 0x142   :  { %v6767_v37 = vld [vmem:[#allocation2 + $0x8] ss:$24 sps:$4 sm:$0xff]  }
 0x143   :  { %1050 = vst.msk [vmem:[#allocation2 + $0x28] sm:$0xf] %vm1039_vm1, %v985_v35  ;;  %v986_v38 = vpack.c.bf16 %v922_v36, %v922_v36  ;;  %5920 = vmatmul.mubr.msk.bf16.gmra.mrb[4].mxu1 %vm1160_vm2, %v6767_v37 }
 0x144   :  { %v704_v39 = vpop.f32.mrb[24].mxu0  ;;  %5923 = vmatprep.mubr.msk.bf16.mxu1 %vm6979_vm0, %v6978_v25 }
 0x145   :  { %1051 = vst.msk [vmem:[#allocation2 + $0x2c] sm:$0xf] %vm1039_vm1, %v986_v38  ;;  %v705_v40 = vadd.f32 %v7203_v34, %v704_v39  ;;  %v706_v41 = vpop.f32.mrb[25].mxu0 }
 0x146   :  { %v707_v42 = vpop.f32.mrb[26].mxu0 }
 0x147   :  { %v923_v43 = vmax.f32 %v705_v40, 0.0  ;;  %v708_v44 = vadd.f32 %v7203_v34, %v707_v42  ;;  %v709_v45 = vpop.f32.mrb[27].mxu0  ;;  %v6774_v40 = vld [vmem:[%s8245_s3 + $0x20] sm:$0xff]   ;;  %v6773_v42 = vld [vmem:[#allocation2 + $0x10] sm:$0xff]  }
 0x149   :  { %v987_v46 = vpack.c.bf16 %v923_v43, %v923_v43  ;;  %v924_v47 = vmax.f32 %v708_v44, 0.0 }
 0x14a   :  { %v6768_v48 = vld [vmem:[#allocation2 + $0x24] sm:$0xff]  }
 0x14b   :  { %1052 = vst.msk [vmem:[#allocation2 + $0x30] sm:$0xf] %vm1039_vm1, %v987_v46  ;;  %v988_v49 = vpack.c.bf16 %v924_v47, %v924_v47  ;;  %5924 = vmatmul.mubr.msk.bf16.gmra.mrb[8].mxu1 %vm1160_vm2, %v6768_v48  ;;  %v6777_v47 = vld [vmem:[%s8245_s3 + $0x28] sm:$0xff]  }
 0x14c   :  { %v712_v50 = vpop.f32.mrb[28].mxu0  ;;  %5927 = vmatprep.mubr.msk.bf16.mxu1 %vm6979_vm0, %v6978_v25 }
 0x14d   :  { %1053 = vst.msk [vmem:[#allocation2 + $0x34] sm:$0xf] %vm1039_vm1, %v988_v49  ;;  %v713_v51 = vadd.f32 %v7203_v34, %v712_v50  ;;  %v714_v52 = vpop.f32.mrb[29].mxu0 }
 0x14e   :  { %v715_v53 = vpop.f32.mrb[30].mxu0 }
 0x14f   :  { %v925_v54 = vmax.f32 %v713_v51, 0.0  ;;  %v716_v55 = vadd.f32 %v7203_v34, %v715_v53  ;;  %v717_v56 = vpop.f32.mrb[31].mxu0 }
 0x151   :  { %v989_v57 = vpack.c.bf16 %v925_v54, %v925_v54  ;;  %v926_v58 = vmax.f32 %v716_v55, 0.0 }
 0x152   :  { %v6775_v54 = vld [vmem:[#allocation2 + $0x18] ss:$24 sps:$4 sm:$0xff]  }
 0x153   :  { %1054 = vst.msk [vmem:[#allocation2 + $0x38] sm:$0xf] %vm1039_vm1, %v989_v57  ;;  %v990_v59 = vpack.c.bf16 %v926_v58, %v926_v58 }
 0x154   :  { %v720_v60 = vpop.f32.mrb[32].mxu0 }
 0x155   :  { %1055 = vst.msk [vmem:[#allocation2 + $0x3c] sm:$0xf] %vm1039_vm1, %v990_v59  ;;  %v721_v61 = vadd.f32 %v7203_v34, %v720_v60  ;;  %v722_v62 = vpop.f32.mrb[33].mxu0 }
 0x156   :  { %v723_v63 = vpop.f32.mrb[34].mxu0 }
 0x157   :  { %v927_v1 = vmax.f32 %v721_v61, 0.0  ;;  %v724_v2 = vadd.f32 %v7203_v34, %v723_v63  ;;  %v725_v3 = vpop.f32.mrb[35].mxu0 }
 0x159   :  { %v991_v4 = vpack.c.bf16 %v927_v1, %v927_v1  ;;  %v928_v5 = vmax.f32 %v724_v2, 0.0 }
 0x15a   :  { %v6776_v2 = vld [vmem:[#allocation2 + $0x34] sm:$0xff]  }
 0x15b   :  { %1056 = vst.msk [vmem:[#allocation2 + $0x40] sm:$0xf] %vm1039_vm1, %v991_v4  ;;  %v992_v6 = vpack.c.bf16 %v928_v5, %v928_v5 }
 0x15c   :  { %v728_v7 = vpop.f32.mrb[36].mxu0 }
 0x15d   :  { %1057 = vst.msk [vmem:[#allocation2 + $0x44] sm:$0xf] %vm1039_vm1, %v992_v6  ;;  %v729_v8 = vadd.f32 %v7203_v34, %v728_v7  ;;  %v730_v9 = vpop.f32.mrb[37].mxu0 }
 0x15e   :  { %v731_v10 = vpop.f32.mrb[38].mxu0 }
 0x15f   :  { %v929_v11 = vmax.f32 %v729_v8, 0.0  ;;  %v732_v12 = vadd.f32 %v7203_v34, %v731_v10  ;;  %v733_v13 = vpop.f32.mrb[39].mxu0 }
 0x161   :  { %v993_v14 = vpack.c.bf16 %v929_v11, %v929_v11  ;;  %v930_v15 = vmax.f32 %v732_v12, 0.0 }
 0x163   :  { %1058 = vst.msk [vmem:[#allocation2 + $0x48] sm:$0xf] %vm1039_vm1, %v993_v14  ;;  %v994_v16 = vpack.c.bf16 %v930_v15, %v930_v15 }
 0x164   :  { %v736_v17 = vpop.f32.mrb[40].mxu0  ;;  %v6771_v18 = vld [vmem:[#allocation2 + $0x40] sm:$0xff]  }
 0x165   :  { %1059 = vst.msk [vmem:[#allocation2 + $0x4c] sm:$0xf] %vm1039_vm1, %v994_v16  ;;  %v737_v19 = vadd.f32 %v7203_v34, %v736_v17  ;;  %v738_v20 = vpop.f32.mrb[41].mxu0  ;;  %5928 = vmatmul.mubr.msk.bf16.gmra.mrb[12].mxu1 %vm1160_vm2, %v6771_v18 }
 0x166   :  { %v739_v21 = vpop.f32.mrb[42].mxu0  ;;  %5931 = vmatprep.mubr.msk.bf16.mxu1 %vm6979_vm0, %v6978_v25 }
 0x167   :  { %v931_v22 = vmax.f32 %v737_v19, 0.0  ;;  %v740_v23 = vadd.f32 %v7203_v34, %v739_v21  ;;  %v741_v24 = vpop.f32.mrb[43].mxu0 }
 0x169   :  { %v995_v26 = vpack.c.bf16 %v931_v22, %v931_v22  ;;  %v932_v27 = vmax.f32 %v740_v23, 0.0 }
 0x16a   :  { %v6772_v28 = vld [vmem:[#allocation2 + $0x48] ss:$0 sps:$4 sm:$0xff]  }
 0x16b   :  { %1060 = vst.msk [vmem:[#allocation2 + $0x50] sm:$0xf] %vm1039_vm1, %v995_v26  ;;  %v996_v29 = vpack.c.bf16 %v932_v27, %v932_v27 }
 0x16c   :  { %v744_v30 = vpop.f32.mrb[44].mxu0 }
 0x16d   :  { %1061 = vst.msk [vmem:[#allocation2 + $0x54] sm:$0xf] %vm1039_vm1, %v996_v29  ;;  %v745_v31 = vadd.f32 %v7203_v34, %v744_v30  ;;  %v746_v32 = vpop.f32.mrb[45].mxu0  ;;  %5932 = vmatmul.mubr.msk.bf16.gmra.mrb[16].mxu1 %vm1160_vm2, %v6772_v28 }
 0x16e   :  { %v747_v33 = vpop.f32.mrb[46].mxu0  ;;  %5939 = vmatprep.mubr.msk.bf16.mxu1 %vm6979_vm0, %v6978_v25 }
 0x16f   :  { %v933_v35 = vmax.f32 %v745_v31, 0.0  ;;  %v748_v36 = vadd.f32 %v7203_v34, %v747_v33  ;;  %v749_v37 = vpop.f32.mrb[47].mxu0 }
 0x171   :  { %v997_v38 = vpack.c.bf16 %v933_v35, %v933_v35  ;;  %v934_v39 = vmax.f32 %v748_v36, 0.0  ;;  %v6781_v36 = vld [vmem:[%s8245_s3 + $0x30] sm:$0xff]  }
 0x173   :  { %1062 = vst.msk [vmem:[#allocation2 + $0x58] sm:$0xf] %vm1039_vm1, %v997_v38  ;;  %v998_v41 = vpack.c.bf16 %v934_v39, %v934_v39  ;;  %v6780_v38 = vld [vmem:[#allocation2 + $0x4] sm:$0xff]  }
 0x174   :  { %v752_v43 = vpop.f32.mrb[48].mxu0  ;;  %v6778_v13 = vld [vmem:[#allocation2 + $0x50] sm:$0xff]  }
 0x175   :  { %1063 = vst.msk [vmem:[#allocation2 + $0x5c] sm:$0xf] %vm1039_vm1, %v998_v41  ;;  %v753_v44 = vadd.f32 %v7203_v34, %v752_v43  ;;  %v754_v45 = vpop.f32.mrb[49].mxu0  ;;  %5940 = vmatmul.mubr.msk.bf16.vlgmr.msra.gmra.mrb[0].mxu1 %vm1160_vm2, %v6773_v42 }
 0x176   :  { %v755_v46 = vpop.f32.mrb[50].mxu0  ;;  %5960 = vmatpush3.bf16.msra.mxu1 %v6774_v40  ;;  %5943 = vmatprep.mubr.msk.bf16.mxu1 %vm6979_vm0, %v6978_v25 }
 0x177   :  { %v935_v48 = vmax.f32 %v753_v44, 0.0  ;;  %v756_v49 = vadd.f32 %v7203_v34, %v755_v46  ;;  %v757_v50 = vpop.f32.mrb[51].mxu0  ;;  %5961 = vmatprep.subr.bf16.mxu1 %v6978_v25  ;;  %v6784_v46 = vld [vmem:[%s8245_s3 + $0x38] sm:$0xff]  }
 0x179   :  { %v999_v51 = vpack.c.bf16 %v935_v48, %v935_v48  ;;  %v936_v52 = vmax.f32 %v756_v49, 0.0  ;;  %v6782_v49 = vld [vmem:[#allocation2 + $0xc] ss:$24 sps:$4 sm:$0xff]  }
 0x17a   :  { %5962 = vmatpush3.bf16.msra.mxu1 %v6777_v47  ;;  %v6779_v23 = vld [vmem:[#allocation2 + $0x58] ss:$0 sps:$4 sm:$0xff]  }
 0x17b   :  { %1064 = vst.msk [vmem:[#allocation2 + $0x60] sm:$0xf] %vm1039_vm1, %v999_v51  ;;  %v1000_v53 = vpack.c.bf16 %v936_v52, %v936_v52  ;;  %5983 = vmatprep.subr.bf16.mxu1 %v6978_v25 }
 0x17c   :  { %v760_v55 = vpop.f32.mrb[52].mxu0 }
 0x17d   :  { %1065 = vst.msk [vmem:[#allocation2 + $0x64] sm:$0xf] %vm1039_vm1, %v1000_v53  ;;  %v761_v56 = vadd.f32 %v7203_v34, %v760_v55  ;;  %v762_v57 = vpop.f32.mrb[53].mxu0  ;;  %5944 = vmatmul.mubr.msk.bf16.gmra.mrb[4].mxu1 %vm1160_vm2, %v6775_v54 }
 0x17e   :  { %v763_v58 = vpop.f32.mrb[54].mxu0  ;;  %5947 = vmatprep.mubr.msk.bf16.mxu1 %vm6979_vm0, %v6978_v25 }
 0x17f   :  { %v937_v59 = vmax.f32 %v761_v56, 0.0  ;;  %v764_v60 = vadd.f32 %v7203_v34, %v763_v58  ;;  %v765_v61 = vpop.f32.mrb[55].mxu0 }
 0x180   :  { %v6783_v61 = vld [vmem:[#allocation2 + $0x28] sm:$0xff]  }
 0x181   :  { %v1001_v62 = vpack.c.bf16 %v937_v59, %v937_v59  ;;  %v938_v63 = vmax.f32 %v764_v60, 0.0 }
 0x183   :  { %1066 = vst.msk [vmem:[#allocation2 + $0x68] sm:$0xf] %vm1039_vm1, %v1001_v62  ;;  %v1002_v1 = vpack.c.bf16 %v938_v63, %v938_v63 }
 0x184   :  { %v768_v3 = vpop.f32.mrb[56].mxu0 }
 0x185   :  { %1067 = vst.msk [vmem:[#allocation2 + $0x6c] sm:$0xf] %vm1039_vm1, %v1002_v1  ;;  %v769_v4 = vadd.f32 %v7203_v34, %v768_v3  ;;  %v770_v5 = vpop.f32.mrb[57].mxu0  ;;  %5948 = vmatmul.mubr.msk.bf16.gmra.mrb[8].mxu1 %vm1160_vm2, %v6776_v2 }
 0x186   :  { %v771_v6 = vpop.f32.mrb[58].mxu0  ;;  %5951 = vmatprep.mubr.msk.bf16.mxu1 %vm6979_vm0, %v6978_v25 }
 0x187   :  { %v939_v7 = vmax.f32 %v769_v4, 0.0  ;;  %v772_v8 = vadd.f32 %v7203_v34, %v771_v6  ;;  %v773_v9 = vpop.f32.mrb[59].mxu0 }
 0x188   :  { %v6785_v9 = vld [vmem:[#allocation2 + $0x44] sm:$0xff]  }
 0x189   :  { %v1003_v10 = vpack.c.bf16 %v939_v7, %v939_v7  ;;  %v940_v11 = vmax.f32 %v772_v8, 0.0 }
 0x18b   :  { %1068 = vst.msk [vmem:[#allocation2 + $0x70] sm:$0xf] %vm1039_vm1, %v1003_v10  ;;  %v1004_v12 = vpack.c.bf16 %v940_v11, %v940_v11 }
 0x18c   :  { %v776_v14 = vpop.f32.mrb[60].mxu0 }
 0x18d   :  { %1069 = vst.msk [vmem:[#allocation2 + $0x74] sm:$0xf] %vm1039_vm1, %v1004_v12  ;;  %v777_v15 = vadd.f32 %v7203_v34, %v776_v14  ;;  %v778_v16 = vpop.f32.mrb[61].mxu0  ;;  %5952 = vmatmul.mubr.msk.bf16.gmra.mrb[12].mxu1 %vm1160_vm2, %v6778_v13 }
 0x18e   :  { %v779_v17 = vpop.f32.mrb[62].mxu0  ;;  %5955 = vmatprep.mubr.msk.bf16.mxu1 %vm6979_vm0, %v6978_v25 }
 0x18f   :  { %v941_v18 = vmax.f32 %v777_v15, 0.0  ;;  %v780_v19 = vadd.f32 %v7203_v34, %v779_v17  ;;  %v781_v20 = vpop.f32.mrb[63].mxu0 }
 0x190   :  { %v6786_v20 = vld [vmem:[#allocation2 + $0x4c] ss:$0 sps:$4 sm:$0xff]  }
 0x191   :  { %v1005_v21 = vpack.c.bf16 %v941_v18, %v941_v18  ;;  %v942_v22 = vmax.f32 %v780_v19, 0.0 }
 0x193   :  { %1070 = vst.msk [vmem:[#allocation2 + $0x78] sm:$0xf] %vm1039_vm1, %v1005_v21  ;;  %v1006_v24 = vpack.c.bf16 %v942_v22, %v942_v22 }
 0x194   :  { %v784_v26 = vpop.f32.mrb[64].mxu0 }
 0x195   :  { %1071 = vst.msk [vmem:[#allocation2 + $0x7c] sm:$0xf] %vm1039_vm1, %v1006_v24  ;;  %v785_v27 = vadd.f32 %v7203_v34, %v784_v26  ;;  %v786_v28 = vpop.f32.mrb[65].mxu0  ;;  %5956 = vmatmul.mubr.msk.bf16.gmra.mrb[16].mxu1 %vm1160_vm2, %v6779_v23 }
 0x196   :  { %v787_v29 = vpop.f32.mrb[66].mxu0  ;;  %5963 = vmatprep.mubr.msk.bf16.mxu1 %vm6979_vm0, %v6978_v25 }
 0x197   :  { %v943_v30 = vmax.f32 %v785_v27, 0.0  ;;  %v788_v31 = vadd.f32 %v7203_v34, %v787_v29  ;;  %v789_v32 = vpop.f32.mrb[67].mxu0 }
 0x199   :  { %v1007_v33 = vpack.c.bf16 %v943_v30, %v943_v30  ;;  %v944_v35 = vmax.f32 %v788_v31, 0.0  ;;  %v6788_v31 = vld [vmem:[%s8245_s3 + $0x40] sm:$0xff]  }
 0x19b   :  { %1072 = vst.msk [vmem:[#allocation2 + $0x80] sm:$0xf] %vm1039_vm1, %v1007_v33  ;;  %v1008_v37 = vpack.c.bf16 %v944_v35, %v944_v35  ;;  %v6787_v33 = vld [vmem:[#allocation2 + $0x14] sm:$0xff]  }
 0x19c   :  { %v792_v39 = vpop.f32.mrb[68].mxu0 }
 0x19d   :  { %1073 = vst.msk [vmem:[#allocation2 + $0x84] sm:$0xf] %vm1039_vm1, %v1008_v37  ;;  %v793_v40 = vadd.f32 %v7203_v34, %v792_v39  ;;  %v794_v41 = vpop.f32.mrb[69].mxu0  ;;  %5964 = vmatmul.mubr.msk.bf16.vlgmr.msra.gmra.mrb[0].mxu1 %vm1160_vm2, %v6780_v38 }
 0x19e   :  { %v795_v42 = vpop.f32.mrb[70].mxu0  ;;  %5984 = vmatpush3.bf16.msra.mxu1 %v6781_v36  ;;  %5967 = vmatprep.mubr.msk.bf16.mxu1 %vm6979_vm0, %v6978_v25 }
 0x19f   :  { %v945_v43 = vmax.f32 %v793_v40, 0.0  ;;  %v796_v44 = vadd.f32 %v7203_v34, %v795_v42  ;;  %v797_v45 = vpop.f32.mrb[71].mxu0  ;;  %5985 = vmatprep.subr.bf16.mxu1 %v6978_v25  ;;  %v6791_v42 = vld [vmem:[%s8245_s3 + $0x48] sm:$0xff]  }
 0x1a1   :  { %v1009_v47 = vpack.c.bf16 %v945_v43, %v945_v43  ;;  %v946_v48 = vmax.f32 %v796_v44, 0.0 }
 0x1a2   :  { %5986 = vmatpush3.bf16.msra.mxu1 %v6784_v46  ;;  %v6789_v46 = vld [vmem:[#allocation2 + $0x1c] ss:$24 sps:$4 sm:$0xff]  }
 0x1a3   :  { %1074 = vst.msk [vmem:[#allocation2 + $0x88] sm:$0xf] %vm1039_vm1, %v1009_v47  ;;  %v1010_v50 = vpack.c.bf16 %v946_v48, %v946_v48  ;;  %6007 = vmatprep.subr.bf16.mxu1 %v6978_v25 }
 0x1a4   :  { %v800_v51 = vpop.f32.mrb[72].mxu0 }
 0x1a5   :  { %1075 = vst.msk [vmem:[#allocation2 + $0x8c] sm:$0xf] %vm1039_vm1, %v1010_v50  ;;  %v801_v52 = vadd.f32 %v7203_v34, %v800_v51  ;;  %v802_v53 = vpop.f32.mrb[73].mxu0  ;;  %5968 = vmatmul.mubr.msk.bf16.gmra.mrb[4].mxu1 %vm1160_vm2, %v6782_v49 }
 0x1a6   :  { %v803_v54 = vpop.f32.mrb[74].mxu0  ;;  %5971 = vmatprep.mubr.msk.bf16.mxu1 %vm6979_vm0, %v6978_v25 }
 0x1a7   :  { %v947_v55 = vmax.f32 %v801_v52, 0.0  ;;  %v804_v56 = vadd.f32 %v7203_v34, %v803_v54  ;;  %v805_v57 = vpop.f32.mrb[75].mxu0 }
 0x1a9   :  { %v1011_v58 = vpack.c.bf16 %v947_v55, %v947_v55  ;;  %v948_v59 = vmax.f32 %v804_v56, 0.0  ;;  %v6790_v56 = vld [vmem:[#allocation2 + $0x38] sm:$0xff]  }
 0x1ab   :  { %1076 = vst.msk [vmem:[#allocation2 + $0x90] sm:$0xf] %vm1039_vm1, %v1011_v58  ;;  %v1012_v60 = vpack.c.bf16 %v948_v59, %v948_v59  ;;  %v95_v59 = vld [vmem:[%s8244_s0 + $0xe0] sm:$0xff]  }
 0x1ac   :  { %v808_v62 = vpop.f32.mrb[76].mxu0 }
 0x1ad   :  { %1077 = vst.msk [vmem:[#allocation2 + $0x94] sm:$0xf] %vm1039_vm1, %v1012_v60  ;;  %v809_v63 = vadd.f32 %v7203_v34, %v808_v62  ;;  %v810_v1 = vpop.f32.mrb[77].mxu0  ;;  %5972 = vmatmul.mubr.msk.bf16.gmra.mrb[8].mxu1 %vm1160_vm2, %v6783_v61  ;;  %v159_v62 = vunpack.c.l.s8.bf16 %v95_v59 }
 0x1ae   :  { %v811_v2 = vpop.f32.mrb[78].mxu0  ;;  %5975 = vmatprep.mubr.msk.bf16.mxu1 %vm6979_vm0, %v6978_v25 }
 0x1af   :  { %v949_v3 = vmax.f32 %v809_v63, 0.0  ;;  %v812_v4 = vadd.f32 %v7203_v34, %v811_v2  ;;  %v813_v5 = vpop.f32.mrb[79].mxu0  ;;  %v160_v63 = vunpack.c.h.s8.bf16 %v95_v59 }
 0x1b1   :  { %v1013_v6 = vpack.c.bf16 %v949_v3, %v949_v3  ;;  %v950_v7 = vmax.f32 %v812_v4, 0.0  ;;  %v5303_v5 = vcombine.high %v159_v62, %v160_v63 }
 0x1b3   :  { %1078 = vst.msk [vmem:[#allocation2 + $0x98] sm:$0xf] %vm1039_vm1, %v1013_v6  ;;  %v1014_v8 = vpack.c.bf16 %v950_v7, %v950_v7  ;;  %v5302_v6 = vcombine.low %v159_v62, %v160_v63  ;;  %878 = vmatprep.mubr.bf16.mxu0 %v5303_v5  ;;  %v6805_v5 = vld [vmem:[%s8245_s3 + $0x68] sm:$0xff]  }
 0x1b4   :  { %v816_v10 = vpop.f32.mrb[80].mxu0 }
 0x1b5   :  { %1079 = vst.msk [vmem:[#allocation2 + $0x9c] sm:$0xf] %vm1039_vm1, %v1014_v8  ;;  %v817_v11 = vadd.f32 %v7203_v34, %v816_v10  ;;  %v818_v12 = vpop.f32.mrb[81].mxu0  ;;  %5976 = vmatmul.mubr.msk.bf16.gmra.mrb[12].mxu1 %vm1160_vm2, %v6785_v9  ;;  %879 = vmatmul.mubr.bf16.gmra.mrb[112].mxu0 %v5302_v6  ;;  %v6792_v10 = vld [vmem:[#allocation2 + $0x54] sm:$0xff]  }
 0x1b6   :  { %v819_v13 = vpop.f32.mrb[82].mxu0  ;;  %5979 = vmatprep.mubr.msk.bf16.mxu1 %vm6979_vm0, %v6978_v25  ;;  %v97_v12 = vld [vmem:[%s8244_s0 + $0xe8] sm:$0xff]  }
 0x1b7   :  { %v951_v14 = vmax.f32 %v817_v11, 0.0  ;;  %v820_v15 = vadd.f32 %v7203_v34, %v819_v13  ;;  %v821_v16 = vpop.f32.mrb[83].mxu0 }
 0x1b8   :  { %v162_v16 = vunpack.c.h.s8.bf16 %v97_v12 }
 0x1b9   :  { %v1015_v17 = vpack.c.bf16 %v951_v14, %v951_v14  ;;  %v952_v18 = vmax.f32 %v820_v15, 0.0  ;;  %v161_v15 = vunpack.c.l.s8.bf16 %v97_v12  ;;  %v6812_v12 = vld [vmem:[%s8245_s3 + $0x78] sm:$0xff]  }
 0x1bb   :  { %1080 = vst.msk [vmem:[#allocation2 + $0xa0] sm:$0xf] %vm1039_vm1, %v1015_v17  ;;  %v1016_v19 = vpack.c.bf16 %v952_v18, %v952_v18 }
 0x1bc   :  { %v824_v21 = vpop.f32.mrb[84].mxu0 }
 0x1bd   :  { %1081 = vst.msk [vmem:[#allocation2 + $0xa4] sm:$0xf] %vm1039_vm1, %v1016_v19  ;;  %v825_v22 = vadd.f32 %v7203_v34, %v824_v21  ;;  %v826_v23 = vpop.f32.mrb[85].mxu0  ;;  %5980 = vmatmul.mubr.msk.bf16.gmra.mrb[16].mxu1 %vm1160_vm2, %v6786_v20  ;;  %v5305_v21 = vcombine.high %v161_v15, %v162_v16 }
 0x1be   :  { %v827_v24 = vpop.f32.mrb[86].mxu0  ;;  %5987 = vmatprep.mubr.msk.bf16.mxu1 %vm6979_vm0, %v6978_v25 }
 0x1bf   :  { %v953_v26 = vmax.f32 %v825_v22, 0.0  ;;  %v828_v27 = vadd.f32 %v7203_v34, %v827_v24  ;;  %v829_v28 = vpop.f32.mrb[87].mxu0  ;;  %v5304_v22 = vcombine.low %v161_v15, %v162_v16  ;;  %886 = vmatprep.mubr.bf16.mxu0 %v5305_v21 }
 0x1c1   :  { %v1017_v29 = vpack.c.bf16 %v953_v26, %v953_v26  ;;  %v954_v30 = vmax.f32 %v828_v27, 0.0  ;;  %887 = vmatmul.mubr.bf16.gmra.mrb[116].mxu0 %v5304_v22  ;;  %v6793_v26 = vld [vmem:[#allocation2 + $0x5c] ss:$0 sps:$4 sm:$0xff]  }
 0x1c3   :  { %1082 = vst.msk [vmem:[#allocation2 + $0xa8] sm:$0xf] %vm1039_vm1, %v1017_v29  ;;  %v1018_v32 = vpack.c.bf16 %v954_v30, %v954_v30  ;;  %v7407_v29 = vld [vmem:[%s8246_s2] ss:$0 sm:$0xff] }
 0x1c4   :  { %v832_v35 = vpop.f32.mrb[88].mxu0 }
 0x1c5   :  { %1083 = vst.msk [vmem:[#allocation2 + $0xac] sm:$0xf] %vm1039_vm1, %v1018_v32  ;;  %v833_v36 = vadd.f32 %v7203_v34, %v832_v35  ;;  %v834_v37 = vpop.f32.mrb[89].mxu0  ;;  %5988 = vmatmul.mubr.msk.bf16.vlgmr.msra.gmra.mrb[0].mxu1 %vm1160_vm2, %v6787_v33 }
 0x1c6   :  { %v835_v38 = vpop.f32.mrb[90].mxu0  ;;  %6008 = vmatpush3.bf16.msra.mxu1 %v6788_v31  ;;  %5991 = vmatprep.mubr.msk.bf16.mxu1 %vm6979_vm0, %v6978_v25 }
 0x1c7   :  { %v955_v39 = vmax.f32 %v833_v36, 0.0  ;;  %v836_v40 = vadd.f32 %v7203_v34, %v835_v38  ;;  %v837_v41 = vpop.f32.mrb[91].mxu0  ;;  %6009 = vmatprep.subr.bf16.mxu1 %v6978_v25 }
 0x1c9   :  { %v1019_v43 = vpack.c.bf16 %v955_v39, %v955_v39  ;;  %v956_v44 = vmax.f32 %v836_v40, 0.0  ;;  %v6795_v39 = vld [vmem:[%s8245_s3 + $0x50] sm:$0xff]   ;;  %v6794_v40 = vld [vmem:[#allocation2 + $0x80] sm:$0xff]  }
 0x1ca   :  { %6010 = vmatpush3.bf16.msra.mxu1 %v6791_v42 }
 0x1cb   :  { %1084 = vst.msk [vmem:[#allocation2 + $0xb0] sm:$0xf] %vm1039_vm1, %v1019_v43  ;;  %v1020_v45 = vpack.c.bf16 %v956_v44, %v956_v44  ;;  %6031 = vmatprep.subr.bf16.mxu1 %v6978_v25 }
 0x1cc   :  { %v840_v47 = vpop.f32.mrb[92].mxu0 }
 0x1cd   :  { %1085 = vst.msk [vmem:[#allocation2 + $0xb4] sm:$0xf] %vm1039_vm1, %v1020_v45  ;;  %v841_v48 = vadd.f32 %v7203_v34, %v840_v47  ;;  %v842_v49 = vpop.f32.mrb[93].mxu0  ;;  %5992 = vmatmul.mubr.msk.bf16.gmra.mrb[4].mxu1 %vm1160_vm2, %v6789_v46  ;;  %v6798_v45 = vld [vmem:[%s8245_s3 + $0x58] sm:$0xff]  }
 0x1ce   :  { %v843_v50 = vpop.f32.mrb[94].mxu0  ;;  %5995 = vmatprep.mubr.msk.bf16.mxu1 %vm6979_vm0, %v6978_v25 }
 0x1cf   :  { %v957_v51 = vmax.f32 %v841_v48, 0.0  ;;  %v844_v52 = vadd.f32 %v7203_v34, %v843_v50  ;;  %v845_v53 = vpop.f32.mrb[95].mxu0 }
 0x1d0   :  { %v6797_v53 = vld [vmem:[#allocation2 + $0xa4] sm:$0xff]  }
 0x1d1   :  { %v1021_v54 = vpack.c.bf16 %v957_v51, %v957_v51  ;;  %v958_v55 = vmax.f32 %v844_v52, 0.0  ;;  %v6796_v52 = vld [vmem:[#allocation2 + $0x88] ss:$24 sps:$4 sm:$0xff]  }
 0x1d2   :  { %v6803_v6 = vld [vmem:[#allocation2 + $0x98] ss:$24 sps:$4 sm:$0xff]  }
 0x1d3   :  { %1086 = vst.msk [vmem:[#allocation2 + $0xb8] sm:$0xf] %vm1039_vm1, %v1021_v54  ;;  %v1022_v57 = vpack.c.bf16 %v958_v55, %v958_v55  ;;  %v99_v54 = vld [vmem:[%s8244_s0 + $0xf0] sm:$0xff]  }
 0x1d4   :  { %v848_v58 = vpop.f32.mrb[96].mxu0  ;;  %v163_v55 = vunpack.c.l.s8.bf16 %v99_v54 }
 0x1d5   :  { %1087 = vst.msk [vmem:[#allocation2 + $0xbc] sm:$0xf] %vm1039_vm1, %v1022_v57  ;;  %v849_v60 = vadd.f32 %v7203_v34, %v848_v58  ;;  %v850_v61 = vpop.f32.mrb[97].mxu0  ;;  %5996 = vmatmul.mubr.msk.bf16.gmra.mrb[8].mxu1 %vm1160_vm2, %v6790_v56  ;;  %v164_v56 = vunpack.c.h.s8.bf16 %v99_v54 }
 0x1d6   :  { %v851_v1 = vpop.f32.mrb[98].mxu0  ;;  %5999 = vmatprep.mubr.msk.bf16.mxu1 %vm6979_vm0, %v6978_v25 }
 0x1d7   :  { %v959_v2 = vmax.f32 %v849_v60, 0.0  ;;  %v852_v3 = vadd.f32 %v7203_v34, %v851_v1  ;;  %v853_v4 = vpop.f32.mrb[99].mxu0  ;;  %v5307_v57 = vcombine.high %v163_v55, %v164_v56  ;;  %v5306_v58 = vcombine.low %v163_v55, %v164_v56  ;;  %v101_v60 = vld [vmem:[%s8244_s0 + $0xf8] sm:$0xff]  }
 0x1d8   :  { %v165_v61 = vunpack.c.l.s8.bf16 %v101_v60  ;;  %v166_v62 = vunpack.c.h.s8.bf16 %v101_v60  ;;  %v6801_v4 = vld [vmem:[#allocation2 + $0x90] sm:$0xff]  }
 0x1d9   :  { %v1023_v7 = vpack.c.bf16 %v959_v2, %v959_v2  ;;  %v960_v8 = vmax.f32 %v852_v3, 0.0  ;;  %894 = vmatprep.mubr.bf16.mxu0 %v5307_v57  ;;  %v6802_v3 = vld [vmem:[%s8245_s3 + $0x60] sm:$0xff]   ;;  %v6831_v55 = vld [vmem:[#allocation2 + $0x38] ss:$24 sps:$4 sm:$0xff]  }
 0x1da   :  { %895 = vmatmul.mubr.bf16.gmra.mrb[120].mxu0 %v5306_v58  ;;  %v5309_v63 = vcombine.high %v165_v61, %v166_v62  ;;  %v5308_v1 = vcombine.low %v165_v61, %v166_v62  ;;  %v6832_v57 = vld [vmem:[#allocation2 + $0x54] sm:$0xff]  }
 0x1db   :  { %1088 = vst.msk [vmem:[#allocation2 + $0xc0] sm:$0xf] %vm1039_vm1, %v1023_v7  ;;  %v1024_v9 = vpack.c.bf16 %v960_v8, %v960_v8  ;;  %v6804_v7 = vld [vmem:[#allocation2 + $0xb4] sm:$0xff]  }
 0x1dc   :  { %v856_v11 = vpop.f32.mrb[100].mxu0  ;;  %902 = vmatprep.mubr.bf16.mxu0 %v5309_v63  ;;  %v6818_v21 = vld [vmem:[#allocation2 + $0xb8] sm:$0xff]   ;;  %v6834_v58 = vld [vmem:[#allocation2 + $0x70] sm:$0xff]  }
 0x1dd   :  { %1089 = vst.msk [vmem:[#allocation2 + $0xc4] sm:$0xf] %vm1039_vm1, %v1024_v9  ;;  %v857_v13 = vadd.f32 %v7203_v34, %v856_v11  ;;  %v858_v14 = vpop.f32.mrb[101].mxu0  ;;  %6000 = vmatmul.mubr.msk.bf16.gmra.mrb[12].mxu1 %vm1160_vm2, %v6792_v10  ;;  %v6809_v10 = vld [vmem:[%s8245_s3 + $0x70] sm:$0xff]   ;;  %v6808_v11 = vld [vmem:[#allocation2 + $0x84] sm:$0xff]  }
 0x1de   :  { %v859_v17 = vpop.f32.mrb[102].mxu0  ;;  %6003 = vmatprep.mubr.msk.bf16.mxu1 %vm6979_vm0, %v6978_v25  ;;  %v6811_v14 = vld [vmem:[#allocation2 + $0xa8] sm:$0xff]  }
 0x1df   :  { %v961_v18 = vmax.f32 %v857_v13, 0.0  ;;  %v860_v19 = vadd.f32 %v7203_v34, %v859_v17  ;;  %v861_v20 = vpop.f32.mrb[103].mxu0  ;;  %v6810_v13 = vld [vmem:[#allocation2 + $0x8c] ss:$24 sps:$4 sm:$0xff]  }
 0x1e0   :  { %v6816_v17 = vld [vmem:[%s8245_s3 + $0x80] sm:$0xff]   ;;  %v6817_v20 = vld [vmem:[#allocation2 + $0x9c] ss:$24 sps:$4 sm:$0xff]  }
 0x1e1   :  { %v1025_v23 = vpack.c.bf16 %v961_v18, %v961_v18  ;;  %v962_v24 = vmax.f32 %v860_v19, 0.0  ;;  %v6815_v18 = vld [vmem:[#allocation2 + $0x94] sm:$0xff]   ;;  %v6819_v19 = vld [vmem:[%s8245_s3 + $0x88] sm:$0xff]  }
 0x1e2   :  { %903 = vmatmul.mubr.bf16.gmra.mrb[124].mxu0 %v5308_v1 }
 0x1e3   :  { %1090 = vst.msk [vmem:[#allocation2 + $0xc8] sm:$0xf] %vm1039_vm1, %v1025_v23  ;;  %v1026_v27 = vpack.c.bf16 %v962_v24, %v962_v24  ;;  %6303 = vmatprep.mubr.msk.bf16.mxu0 %vm6979_vm0, %v6978_v25  ;;  %v6823_v24 = vld [vmem:[%s8245_s3 + $0x90] sm:$0xff]  }
 0x1e4   :  { %v864_v28 = vpop.f32.mrb[104].mxu0  ;;  %v6799_v59 = vld [vmem:[#allocation2 + $0xc0] sm:$0xff]  }
 0x1e5   :  { %1091 = vst.msk [vmem:[#allocation2 + $0xcc] sm:$0xf] %vm1039_vm1, %v1026_v27  ;;  %v865_v34 = vadd.f32 %v7407_v29, %v864_v28  ;;  %v866_v30 = vpop.f32.mrb[105].mxu0  ;;  %6004 = vmatmul.mubr.msk.bf16.gmra.mrb[16].mxu1 %vm1160_vm2, %v6793_v26  ;;  %v6822_v26 = vld [vmem:[#allocation2 + $0x20] sm:$0xff]   ;;  %v6826_v27 = vld [vmem:[%s8245_s3 + $0x98] sm:$0xff]  }
 0x1e6   :  { %v867_v31 = vpop.f32.mrb[106].mxu0  ;;  %6011 = vmatprep.mubr.msk.bf16.mxu1 %vm6979_vm0, %v6978_v25  ;;  %v6824_v28 = vld [vmem:[#allocation2 + $0x28] ss:$24 sps:$4 sm:$0xff]  }
 0x1e7   :  { %v963_v32 = vmax.f32 %v865_v34, 0.0  ;;  %v868_v33 = vadd.f32 %v7407_v29, %v867_v31  ;;  %v869_v35 = vpop.f32.mrb[107].mxu0  ;;  %v6825_v34 = vld [vmem:[#allocation2 + $0x44] sm:$0xff]  }
 0x1e8   :  { %v6827_v30 = vld [vmem:[#allocation2 + $0x60] sm:$0xff]   ;;  %v6828_v31 = vld [vmem:[#allocation2 + $0x68] ss:$0 sps:$4 sm:$0xff]  }
 0x1e9   :  { %v1027_v36 = vpack.c.bf16 %v963_v32, %v963_v32  ;;  %v964_v37 = vmax.f32 %v868_v33, 0.0 }
 0x1ea   :  { %v6800_v2 = vld [vmem:[#allocation2 + $0xc8] ss:$0 sps:$4 sm:$0xff]  }
 0x1eb   :  { %1092 = vst.msk [vmem:[#allocation2 + $0xd0] sm:$0xf] %vm1039_vm1, %v1027_v36  ;;  %v1028_v38 = vpack.c.bf16 %v964_v37, %v964_v37  ;;  %v6813_v15 = vld [vmem:[#allocation2 + $0xc4] sm:$0xff]  }
 0x1ec   :  { %v872_v41 = vpop.f32.mrb[108].mxu0  ;;  %v6814_v16 = vld [vmem:[#allocation2 + $0xcc] ss:$0 sps:$4 sm:$0xff]  }
 0x1ed   :  { %1093 = vst.msk [vmem:[#allocation2 + $0xd4] sm:$0xf] %vm1039_vm1, %v1028_v38  ;;  %v873_v42 = vadd.f32 %v7407_v29, %v872_v41  ;;  %v874_v43 = vpop.f32.mrb[109].mxu0  ;;  %6012 = vmatmul.mubr.msk.bf16.vlgmr.msra.gmra.mrb[0].mxu1 %vm1160_vm2, %v6794_v40  ;;  %v6830_v40 = vld [vmem:[%s8245_s3 + $0xa0] sm:$0xff]   ;;  %v6829_v41 = vld [vmem:[#allocation2 + $0x30] sm:$0xff]  }
 0x1ee   :  { %v875_v44 = vpop.f32.mrb[110].mxu0  ;;  %6032 = vmatpush3.bf16.msra.mxu1 %v6795_v39  ;;  %6015 = vmatprep.mubr.msk.bf16.mxu1 %vm6979_vm0, %v6978_v25 }
 0x1ef   :  { %v965_v46 = vmax.f32 %v873_v42, 0.0  ;;  %v876_v47 = vadd.f32 %v7407_v29, %v875_v44  ;;  %v877_v48 = vpop.f32.mrb[111].mxu0  ;;  %6033 = vmatprep.subr.bf16.mxu1 %v6978_v25 }
 0x1f0   :  { %v6833_v48 = vld [vmem:[%s8245_s3 + $0xa8] sm:$0xff]  }
 0x1f1   :  { %v1029_v49 = vpack.c.bf16 %v965_v46, %v965_v46  ;;  %v966_v50 = vmax.f32 %v876_v47, 0.0 }
 0x1f2   :  { %6034 = vmatpush3.bf16.msra.mxu1 %v6798_v45 }
 0x1f3   :  { %1094 = vst.msk [vmem:[#allocation2 + $0xd8] sm:$0xf] %vm1039_vm1, %v1029_v49  ;;  %v1030_v51 = vpack.c.bf16 %v966_v50, %v966_v50  ;;  %6055 = vmatprep.subr.bf16.mxu1 %v6978_v25 }
 0x1f4   :  { %v6806_v8 = vld [vmem:[#allocation2 + $0xd0] sm:$0xff]  }
 0x1f5   :  { %1095 = vst.msk [vmem:[#allocation2 + $0xdc] sm:$0xf] %vm1039_vm1, %v1030_v51  ;;  %6016 = vmatmul.mubr.msk.bf16.gmra.mrb[4].mxu1 %vm1160_vm2, %v6796_v52 }
 0x1f6   :  { %6019 = vmatprep.mubr.msk.bf16.mxu1 %vm6979_vm0, %v6978_v25 }
 0x1fa   :  { %v6807_v9 = vld [vmem:[#allocation2 + $0xd8] ss:$0 sps:$4 sm:$0xff]  }
 0x1fb   :  { %v6820_v22 = vld [vmem:[#allocation2 + $0xd4] sm:$0xff]  }
 0x1fc   :  { %v6821_v23 = vld [vmem:[#allocation2 + $0xdc] ss:$0 sps:$4 sm:$0xff]  }
 0x1fd   :  { %6020 = vmatmul.mubr.msk.bf16.gmra.mrb[8].mxu1 %vm1160_vm2, %v6797_v53 }
 0x1fe   :  { %6023 = vmatprep.mubr.msk.bf16.mxu1 %vm6979_vm0, %v6978_v25 }
 0x205   :  { %6024 = vmatmul.mubr.msk.bf16.gmra.mrb[12].mxu1 %vm1160_vm2, %v6799_v59  ;;  %v6835_v59 = vld [vmem:[#allocation2 + $0x78] ss:$0 sps:$4 sm:$0xff]  }
 0x206   :  { %6027 = vmatprep.mubr.msk.bf16.mxu1 %vm6979_vm0, %v6978_v25 }
 0x20d   :  { %6028 = vmatmul.mubr.msk.bf16.gmra.mrb[16].mxu1 %vm1160_vm2, %v6800_v2 }
 0x20e   :  { %6035 = vmatprep.mubr.msk.bf16.mxu1 %vm6979_vm0, %v6978_v25 }
 0x215   :  { %6036 = vmatmul.mubr.msk.bf16.vlgmr.msra.gmra.mrb[0].mxu1 %vm1160_vm2, %v6801_v4  ;;  %v6837_v4 = vld [vmem:[%s8245_s3 + $0xb0] sm:$0xff]  }
 0x216   :  { %6056 = vmatpush3.bf16.msra.mxu1 %v6802_v3  ;;  %6039 = vmatprep.mubr.msk.bf16.mxu1 %vm6979_vm0, %v6978_v25 }
 0x217   :  { %6057 = vmatprep.subr.bf16.mxu1 %v6978_v25 }
 0x21a   :  { %6058 = vmatpush3.bf16.msra.mxu1 %v6805_v5  ;;  %v6836_v5 = vld [vmem:[#allocation2 + $0x24] sm:$0xff]  }
 0x21b   :  { %6079 = vmatprep.subr.bf16.mxu1 %v6978_v25 }
 0x21d   :  { %6040 = vmatmul.mubr.msk.bf16.gmra.mrb[4].mxu1 %vm1160_vm2, %v6803_v6 }
 0x21e   :  { %6043 = vmatprep.mubr.msk.bf16.mxu1 %vm6979_vm0, %v6978_v25 }
 0x225   :  { %6044 = vmatmul.mubr.msk.bf16.gmra.mrb[8].mxu1 %vm1160_vm2, %v6804_v7 }
 0x226   :  { %6047 = vmatprep.mubr.msk.bf16.mxu1 %vm6979_vm0, %v6978_v25 }
 0x22d   :  { %6048 = vmatmul.mubr.msk.bf16.gmra.mrb[12].mxu1 %vm1160_vm2, %v6806_v8 }
 0x22e   :  { %6051 = vmatprep.mubr.msk.bf16.mxu1 %vm6979_vm0, %v6978_v25 }
 0x235   :  { %6052 = vmatmul.mubr.msk.bf16.gmra.mrb[16].mxu1 %vm1160_vm2, %v6807_v9 }
 0x236   :  { %6059 = vmatprep.mubr.msk.bf16.mxu1 %vm6979_vm0, %v6978_v25 }
 0x23d   :  { %6060 = vmatmul.mubr.msk.bf16.vlgmr.msra.gmra.mrb[0].mxu1 %vm1160_vm2, %v6808_v11 }
 0x23e   :  { %6080 = vmatpush3.bf16.msra.mxu1 %v6809_v10  ;;  %6063 = vmatprep.mubr.msk.bf16.mxu1 %vm6979_vm0, %v6978_v25 }
 0x23f   :  { %6081 = vmatprep.subr.bf16.mxu1 %v6978_v25 }
 0x242   :  { %6082 = vmatpush3.bf16.msra.mxu1 %v6812_v12  ;;  %v6840_v12 = vld [vmem:[%s8245_s3 + $0xb8] sm:$0xff]  }
 0x243   :  { %6103 = vmatprep.subr.bf16.mxu1 %v6978_v25 }
 0x245   :  { %6064 = vmatmul.mubr.msk.bf16.gmra.mrb[4].mxu1 %vm1160_vm2, %v6810_v13 }
 0x246   :  { %6067 = vmatprep.mubr.msk.bf16.mxu1 %vm6979_vm0, %v6978_v25 }
 0x24d   :  { %6068 = vmatmul.mubr.msk.bf16.gmra.mrb[8].mxu1 %vm1160_vm2, %v6811_v14 }
 0x24e   :  { %6071 = vmatprep.mubr.msk.bf16.mxu1 %vm6979_vm0, %v6978_v25 }
 0x255   :  { %6072 = vmatmul.mubr.msk.bf16.gmra.mrb[12].mxu1 %vm1160_vm2, %v6813_v15 }
 0x256   :  { %6075 = vmatprep.mubr.msk.bf16.mxu1 %vm6979_vm0, %v6978_v25 }
 0x25d   :  { %6076 = vmatmul.mubr.msk.bf16.gmra.mrb[16].mxu1 %vm1160_vm2, %v6814_v16 }
 0x25e   :  { %6083 = vmatprep.mubr.msk.bf16.mxu1 %vm6979_vm0, %v6978_v25 }
 0x265   :  { %6084 = vmatmul.mubr.msk.bf16.vlgmr.msra.gmra.mrb[0].mxu1 %vm1160_vm2, %v6815_v18 }
 0x266   :  { %6104 = vmatpush3.bf16.msra.mxu1 %v6816_v17  ;;  %6087 = vmatprep.mubr.msk.bf16.mxu1 %vm6979_vm0, %v6978_v25 }
 0x267   :  { %6105 = vmatprep.subr.bf16.mxu1 %v6978_v25 }
 0x26a   :  { %6106 = vmatpush3.bf16.msra.mxu1 %v6819_v19  ;;  %v6838_v19 = vld [vmem:[#allocation2 + $0x2c] ss:$24 sps:$4 sm:$0xff]  }
 0x26b   :  { %6127 = vmatprep.subr.bf16.mxu1 %v6978_v25 }
 0x26d   :  { %6088 = vmatmul.mubr.msk.bf16.gmra.mrb[4].mxu1 %vm1160_vm2, %v6817_v20 }
 0x26e   :  { %6091 = vmatprep.mubr.msk.bf16.mxu1 %vm6979_vm0, %v6978_v25 }
 0x275   :  { %6092 = vmatmul.mubr.msk.bf16.gmra.mrb[8].mxu1 %vm1160_vm2, %v6818_v21  ;;  %v6839_v21 = vld [vmem:[#allocation2 + $0x48] sm:$0xff]  }
 0x276   :  { %6095 = vmatprep.mubr.msk.bf16.mxu1 %vm6979_vm0, %v6978_v25 }
 0x27d   :  { %6096 = vmatmul.mubr.msk.bf16.gmra.mrb[12].mxu1 %vm1160_vm2, %v6820_v22  ;;  %v6842_v22 = vld [vmem:[#allocation2 + $0x6c] ss:$0 sps:$4 sm:$0xff]  }
 0x27e   :  { %6099 = vmatprep.mubr.msk.bf16.mxu1 %vm6979_vm0, %v6978_v25 }
 0x285   :  { %6100 = vmatmul.mubr.msk.bf16.gmra.mrb[16].mxu1 %vm1160_vm2, %v6821_v23  ;;  %v6866_v23 = vld [vmem:[%s8247_s5] sm:$0xff]  }
 0x286   :  { %6107 = vmatprep.mubr.msk.bf16.mxu1 %vm6979_vm0, %v6978_v25  ;;  %6296 = vmatpush3.bf16.msra.mxu0 %v6866_v23 }
 0x287   :  { %6297 = vmatprep.subr.bf16.mxu0 %v6978_v25 }
 0x288   :  { %v880_v32 = vpop.f32.mrb[112].mxu0 }
 0x289   :  { %v881_v33 = vadd.f32 %v7407_v29, %v880_v32  ;;  %v882_v35 = vpop.f32.mrb[113].mxu0  ;;  %v6851_v32 = vld [vmem:[%s8245_s3 + $0xd0] sm:$0xff]  }
 0x28a   :  { %v883_v36 = vpop.f32.mrb[114].mxu0  ;;  %v6854_v35 = vld [vmem:[%s8245_s3 + $0xd8] sm:$0xff]  }
 0x28b   :  { %v967_v37 = vmax.f32 %v881_v33, 0.0  ;;  %v884_v38 = vadd.f32 %v7407_v29, %v883_v36  ;;  %v885_v39 = vpop.f32.mrb[115].mxu0  ;;  %v6850_v33 = vld [vmem:[#allocation2 + $0xa0] sm:$0xff]  }
 0x28c   :  { %v6852_v36 = vld [vmem:[#allocation2 + $0xa8] ss:$24 sps:$4 sm:$0xff]  }
 0x28d   :  { %6108 = vmatmul.mubr.msk.bf16.vlgmr.msra.gmra.mrb[0].mxu1 %vm1160_vm2, %v6822_v26  ;;  %v1031_v42 = vpack.c.bf16 %v967_v37, %v967_v37  ;;  %v968_v43 = vmax.f32 %v884_v38, 0.0  ;;  %v6843_v26 = vld [vmem:[#allocation2 + $0x34] sm:$0xff]   ;;  %v6853_v37 = vld [vmem:[#allocation2 + $0xc4] sm:$0xff]  }
 0x28e   :  { %6128 = vmatpush3.bf16.msra.mxu1 %v6823_v24  ;;  %6111 = vmatprep.mubr.msk.bf16.mxu1 %vm6979_vm0, %v6978_v25  ;;  %v6844_v24 = vld [vmem:[%s8245_s3 + $0xc0] sm:$0xff]   ;;  %v6876_v38 = vld [vmem:[%s8247_s5 + $0x8] sm:$0xff]  }
 0x28f   :  { %6129 = vmatprep.subr.bf16.mxu1 %v6978_v25  ;;  %1096 = vst.msk [vmem:[#allocation2 + $0xe0] sm:$0xf] %vm1039_vm1, %v1031_v42  ;;  %v1032_v45 = vpack.c.bf16 %v968_v43, %v968_v43  ;;  %6298 = vmatpush3.bf16.msra.mxu0 %v6876_v38  ;;  %v6858_v43 = vld [vmem:[%s8245_s3 + $0xe0] sm:$0xff]  }
 0x290   :  { %6299 = vmatprep.subr.bf16.mxu0 %v6978_v25 }
 0x291   :  { %1097 = vst.msk [vmem:[#allocation2 + $0xe4] sm:$0xf] %vm1039_vm1, %v1032_v45  ;;  %v6861_v45 = vld [vmem:[%s8245_s3 + $0xe8] sm:$0xff]  }
 0x292   :  { %6130 = vmatpush3.bf16.msra.mxu1 %v6826_v27  ;;  %v6847_v27 = vld [vmem:[%s8245_s3 + $0xc8] sm:$0xff]  }
 0x293   :  { %6151 = vmatprep.subr.bf16.mxu1 %v6978_v25 }
 0x294   :  { %v888_v44 = vpop.f32.mrb[116].mxu0 }
 0x295   :  { %6112 = vmatmul.mubr.msk.bf16.gmra.mrb[4].mxu1 %vm1160_vm2, %v6824_v28  ;;  %v889_v46 = vadd.f32 %v7407_v29, %v888_v44  ;;  %v890_v47 = vpop.f32.mrb[117].mxu0  ;;  %v6845_v28 = vld [vmem:[#allocation2 + $0x3c] ss:$24 sps:$4 sm:$0xff]  }
 0x296   :  { %6115 = vmatprep.mubr.msk.bf16.mxu1 %vm6979_vm0, %v6978_v25  ;;  %v891_v49 = vpop.f32.mrb[118].mxu0  ;;  %v6857_v44 = vld [vmem:[#allocation2 + $0xb0] sm:$0xff]  }
 0x297   :  { %v969_v50 = vmax.f32 %v889_v46, 0.0  ;;  %v892_v51 = vadd.f32 %v7407_v29, %v891_v49  ;;  %v893_v52 = vpop.f32.mrb[119].mxu0  ;;  %v6859_v46 = vld [vmem:[#allocation2 + $0xb8] ss:$24 sps:$4 sm:$0xff]  }
 0x298   :  { %v6855_v39 = vld [vmem:[#allocation2 + $0xe0] sm:$0xff]   ;;  %v6860_v47 = vld [vmem:[#allocation2 + $0xd4] sm:$0xff]  }
 0x299   :  { %v1033_v53 = vpack.c.bf16 %v969_v50, %v969_v50  ;;  %v970_v54 = vmax.f32 %v892_v51, 0.0  ;;  %v6865_v50 = vld [vmem:[%s8245_s3 + $0xf0] sm:$0xff]   ;;  %v6864_v51 = vld [vmem:[#allocation2 + $0xa4] sm:$0xff]   ;;  %v6869_v52 = vld [vmem:[%s8245_s3 + $0xf8] sm:$0xff]  }
 0x29b   :  { %1098 = vst.msk [vmem:[#allocation2 + $0xe8] sm:$0xf] %vm1039_vm1, %v1033_v53  ;;  %v1034_v56 = vpack.c.bf16 %v970_v54, %v970_v54  ;;  %v6867_v53 = vld [vmem:[#allocation2 + $0xac] ss:$24 sps:$4 sm:$0xff]  }
 0x29c   :  { %v6868_v54 = vld [vmem:[#allocation2 + $0xc8] sm:$0xff]  }
 0x29d   :  { %6116 = vmatmul.mubr.msk.bf16.gmra.mrb[8].mxu1 %vm1160_vm2, %v6825_v34  ;;  %1099 = vst.msk [vmem:[#allocation2 + $0xec] sm:$0xf] %vm1039_vm1, %v1034_v56  ;;  %v6846_v34 = vld [vmem:[#allocation2 + $0x58] sm:$0xff]  }
 0x29e   :  { %6119 = vmatprep.mubr.msk.bf16.mxu1 %vm6979_vm0, %v6978_v25 }
 0x2a2   :  { %v6856_v42 = vld [vmem:[#allocation2 + $0xe8] ss:$0 sps:$4 sm:$0xff]  }
 0x2a4   :  { %v6871_v56 = vld [vmem:[#allocation2 + $0xec] ss:$0 sps:$4 sm:$0xff]  }
 0x2a5   :  { %6120 = vmatmul.mubr.msk.bf16.gmra.mrb[12].mxu1 %vm1160_vm2, %v6827_v30  ;;  %v6848_v30 = vld [vmem:[#allocation2 + $0x74] sm:$0xff]  }
 0x2a6   :  { %6123 = vmatprep.mubr.msk.bf16.mxu1 %vm6979_vm0, %v6978_v25 }
 0x2ad   :  { %6124 = vmatmul.mubr.msk.bf16.gmra.mrb[16].mxu1 %vm1160_vm2, %v6828_v31  ;;  %v896_v60 = vpop.f32.mrb[120].mxu0  ;;  %v6849_v31 = vld [vmem:[#allocation2 + $0x7c] ss:$0 sps:$4 sm:$0xff]  }
 0x2ae   :  { %6131 = vmatprep.mubr.msk.bf16.mxu1 %vm6979_vm0, %v6978_v25  ;;  %v897_v61 = vadd.f32 %v7407_v29, %v896_v60  ;;  %v898_v62 = vpop.f32.mrb[121].mxu0 }
 0x2af   :  { %v899_v63 = vpop.f32.mrb[122].mxu0  ;;  %v7728_v62 = vld [vmem:[%s8248_s4] ss:$0 sm:$0xff] }
 0x2b0   :  { %v971_v1 = vmax.f32 %v897_v61, 0.0  ;;  %v900_v2 = vadd.f32 %v7407_v29, %v899_v63  ;;  %v901_v3 = vpop.f32.mrb[123].mxu0 }
 0x2b2   :  { %v1035_v6 = vpack.c.bf16 %v971_v1, %v971_v1  ;;  %v972_v7 = vmax.f32 %v900_v2, 0.0 }
 0x2b4   :  { %1100 = vst.msk [vmem:[#allocation2 + $0xf0] sm:$0xf] %vm1039_vm1, %v1035_v6  ;;  %v1036_v9 = vpack.c.bf16 %v972_v7, %v972_v7  ;;  %v6880_v6 = vld [vmem:[%s8247_s5 + $0x20] sm:$0xff]  }
 0x2b5   :  { %6132 = vmatmul.mubr.msk.bf16.vlgmr.msra.gmra.mrb[0].mxu1 %vm1160_vm2, %v6829_v41  ;;  %v904_v8 = vpop.f32.mrb[124].mxu0  ;;  %v6879_v41 = vld [vmem:[%s8247_s5 + $0x18] sm:$0xff]  }
 0x2b6   :  { %6152 = vmatpush3.bf16.msra.mxu1 %v6830_v40  ;;  %6135 = vmatprep.mubr.msk.bf16.mxu1 %vm6979_vm0, %v6978_v25  ;;  %v905_v10 = vadd.f32 %v7407_v29, %v904_v8  ;;  %v906_v11 = vpop.f32.mrb[125].mxu0  ;;  %1101 = vst.msk [vmem:[#allocation2 + $0xf4] sm:$0xf] %vm1039_vm1, %v1036_v9  ;;  %v6878_v40 = vld [vmem:[%s8247_s5 + $0x10] sm:$0xff]   ;;  %v6881_v9 = vld [vmem:[%s8247_s5 + $0x28] sm:$0xff]  }
 0x2b7   :  { %6153 = vmatprep.subr.bf16.mxu1 %v6978_v25  ;;  %v907_v13 = vpop.f32.mrb[126].mxu0  ;;  %6300 = vmatpush3.bf16.msra.mxu0 %v6878_v40 }
 0x2b8   :  { %v973_v14 = vmax.f32 %v905_v10, 0.0  ;;  %v908_v15 = vadd.f32 %v7407_v29, %v907_v13  ;;  %v909_v16 = vpop.f32.mrb[127].mxu0  ;;  %v6841_v29 = vld [vmem:[#allocation2 + $0x64] sm:$0xff]   ;;  %6301 = vmatprep.subr.bf16.mxu0 %v6978_v25  ;;  %v6882_v13 = vld [vmem:[%s8247_s5 + $0x30] sm:$0xff]  }
 0x2b9   :  { %v6883_v16 = vld [vmem:[%s8247_s5 + $0x38] sm:$0xff]  }
 0x2ba   :  { %6154 = vmatpush3.bf16.msra.mxu1 %v6833_v48  ;;  %v1037_v17 = vpack.c.bf16 %v973_v14, %v973_v14  ;;  %v974_v18 = vmax.f32 %v908_v15, 0.0 }
 0x2bb   :  { %6175 = vmatprep.subr.bf16.mxu1 %v6978_v25  ;;  %6302 = vmatpush3.bf16.msra.mxu0 %v6879_v41 }
 0x2bc   :  { %1102 = vst.msk [vmem:[#allocation2 + $0xf8] sm:$0xf] %vm1039_vm1, %v1037_v17  ;;  %v1038_v20 = vpack.c.bf16 %v974_v18, %v974_v18  ;;  %6307 = vmatprep.subr.bf16.mxu0 %v6978_v25 }
 0x2bd   :  { %6136 = vmatmul.mubr.msk.bf16.gmra.mrb[4].mxu1 %vm1160_vm2, %v6831_v55  ;;  %v6862_v48 = vld [vmem:[#allocation2 + $0xf0] sm:$0xff]   ;;  %v6870_v55 = vld [vmem:[#allocation2 + $0xe4] sm:$0xff]  }
 0x2be   :  { %6139 = vmatprep.mubr.msk.bf16.mxu1 %vm6979_vm0, %v6978_v25  ;;  %1103 = vst.msk [vmem:[#allocation2 + $0xfc] sm:$0xf] %vm1039_vm1, %v1038_v20 }
 0x2c3   :  { %v6863_v49 = vld [vmem:[#allocation2 + $0xf8] ss:$0 sps:$4 sm:$0xff]  }
 0x2c4   :  { %v6875_v60 = vld [vmem:[#allocation2 + $0xf4] sm:$0xff]  }
 0x2c5   :  { %6140 = vmatmul.mubr.msk.bf16.gmra.mrb[8].mxu1 %vm1160_vm2, %v6832_v57  ;;  %v6872_v57 = vld [vmem:[#allocation2 + $0xb4] sm:$0xff]   ;;  %v6877_v61 = vld [vmem:[#allocation2 + $0xfc] ss:$0 sps:$4 sm:$0xff]  }
 0x2c6   :  { %6143 = vmatprep.mubr.msk.bf16.mxu1 %vm6979_vm0, %v6978_v25 }
 0x2cd   :  { %6144 = vmatmul.mubr.msk.bf16.gmra.mrb[12].mxu1 %vm1160_vm2, %v6834_v58  ;;  %v6873_v58 = vld [vmem:[#allocation2 + $0xbc] ss:$24 sps:$4 sm:$0xff]  }
 0x2ce   :  { %6147 = vmatprep.mubr.msk.bf16.mxu1 %vm6979_vm0, %v6978_v25 }
 0x2d5   :  { %6148 = vmatmul.mubr.msk.bf16.gmra.mrb[16].mxu1 %vm1160_vm2, %v6835_v59  ;;  %v6874_v59 = vld [vmem:[#allocation2 + $0xd8] sm:$0xff]  }
 0x2d6   :  { %6155 = vmatprep.mubr.msk.bf16.mxu1 %vm6979_vm0, %v6978_v25 }
 0x2dd   :  { %6156 = vmatmul.mubr.msk.bf16.vlgmr.msra.gmra.mrb[0].mxu1 %vm1160_vm2, %v6836_v5 }
 0x2de   :  { %6176 = vmatpush3.bf16.msra.mxu1 %v6837_v4  ;;  %6159 = vmatprep.mubr.msk.bf16.mxu1 %vm6979_vm0, %v6978_v25 }
 0x2df   :  { %6177 = vmatprep.subr.bf16.mxu1 %v6978_v25 }
 0x2e2   :  { %6178 = vmatpush3.bf16.msra.mxu1 %v6840_v12 }
 0x2e3   :  { %6199 = vmatprep.subr.bf16.mxu1 %v6978_v25 }
 0x2e5   :  { %6160 = vmatmul.mubr.msk.bf16.gmra.mrb[4].mxu1 %vm1160_vm2, %v6838_v19 }
 0x2e6   :  { %6163 = vmatprep.mubr.msk.bf16.mxu1 %vm6979_vm0, %v6978_v25 }
 0x2ed   :  { %6164 = vmatmul.mubr.msk.bf16.gmra.mrb[8].mxu1 %vm1160_vm2, %v6839_v21 }
 0x2ee   :  { %6167 = vmatprep.mubr.msk.bf16.mxu1 %vm6979_vm0, %v6978_v25 }
 0x2f5   :  { %6168 = vmatmul.mubr.msk.bf16.gmra.mrb[12].mxu1 %vm1160_vm2, %v6841_v29 }
 0x2f6   :  { %6171 = vmatprep.mubr.msk.bf16.mxu1 %vm6979_vm0, %v6978_v25 }
 0x2fd   :  { %6172 = vmatmul.mubr.msk.bf16.gmra.mrb[16].mxu1 %vm1160_vm2, %v6842_v22  ;;  %v6884_v22 = vld [vmem:[%s8247_s5 + $0x40] sm:$0xff]  }
 0x2fe   :  { %6179 = vmatprep.mubr.msk.bf16.mxu1 %vm6979_vm0, %v6978_v25 }
 0x305   :  { %6180 = vmatmul.mubr.msk.bf16.vlgmr.msra.gmra.mrb[0].mxu1 %vm1160_vm2, %v6843_v26  ;;  %v6885_v26 = vld [vmem:[%s8247_s5 + $0x48] sm:$0xff]  }
 0x306   :  { %6200 = vmatpush3.bf16.msra.mxu1 %v6844_v24  ;;  %6183 = vmatprep.mubr.msk.bf16.mxu1 %vm6979_vm0, %v6978_v25 }
 0x307   :  { %6201 = vmatprep.subr.bf16.mxu1 %v6978_v25 }
 0x30a   :  { %6202 = vmatpush3.bf16.msra.mxu1 %v6847_v27 }
 0x30b   :  { %6223 = vmatprep.subr.bf16.mxu1 %v6978_v25 }
 0x30d   :  { %6184 = vmatmul.mubr.msk.bf16.gmra.mrb[4].mxu1 %vm1160_vm2, %v6845_v28 }
 0x30e   :  { %6187 = vmatprep.mubr.msk.bf16.mxu1 %vm6979_vm0, %v6978_v25 }
 0x315   :  { %6188 = vmatmul.mubr.msk.bf16.gmra.mrb[8].mxu1 %vm1160_vm2, %v6846_v34 }
 0x316   :  { %6191 = vmatprep.mubr.msk.bf16.mxu1 %vm6979_vm0, %v6978_v25 }
 0x31d   :  { %6192 = vmatmul.mubr.msk.bf16.gmra.mrb[12].mxu1 %vm1160_vm2, %v6848_v30 }
 0x31e   :  { %6195 = vmatprep.mubr.msk.bf16.mxu1 %vm6979_vm0, %v6978_v25 }
 0x325   :  { %6196 = vmatmul.mubr.msk.bf16.gmra.mrb[16].mxu1 %vm1160_vm2, %v6849_v31 }
 0x326   :  { %6203 = vmatprep.mubr.msk.bf16.mxu1 %vm6979_vm0, %v6978_v25 }
 0x32d   :  { %6204 = vmatmul.mubr.msk.bf16.vlgmr.msra.gmra.mrb[0].mxu1 %vm1160_vm2, %v6850_v33 }
 0x32e   :  { %6224 = vmatpush3.bf16.msra.mxu1 %v6851_v32  ;;  %6207 = vmatprep.mubr.msk.bf16.mxu1 %vm6979_vm0, %v6978_v25  ;;  %v6886_v32 = vld [vmem:[%s8247_s5 + $0x50] sm:$0xff]  }
 0x32f   :  { %6225 = vmatprep.subr.bf16.mxu1 %v6978_v25 }
 0x332   :  { %6226 = vmatpush3.bf16.msra.mxu1 %v6854_v35 }
 0x333   :  { %6247 = vmatprep.subr.bf16.mxu1 %v6978_v25 }
 0x335   :  { %6208 = vmatmul.mubr.msk.bf16.gmra.mrb[4].mxu1 %vm1160_vm2, %v6852_v36  ;;  %v6887_v36 = vld [vmem:[%s8247_s5 + $0x58] sm:$0xff]  }
 0x336   :  { %6211 = vmatprep.mubr.msk.bf16.mxu1 %vm6979_vm0, %v6978_v25 }
 0x33d   :  { %6212 = vmatmul.mubr.msk.bf16.gmra.mrb[8].mxu1 %vm1160_vm2, %v6853_v37 }
 0x33e   :  { %6215 = vmatprep.mubr.msk.bf16.mxu1 %vm6979_vm0, %v6978_v25 }
 0x345   :  { %6216 = vmatmul.mubr.msk.bf16.gmra.mrb[12].mxu1 %vm1160_vm2, %v6855_v39 }
 0x346   :  { %6219 = vmatprep.mubr.msk.bf16.mxu1 %vm6979_vm0, %v6978_v25 }
 0x34d   :  { %6220 = vmatmul.mubr.msk.bf16.gmra.mrb[16].mxu1 %vm1160_vm2, %v6856_v42  ;;  %v6888_v42 = vld [vmem:[%s8247_s5 + $0x60] sm:$0xff]  }
 0x34e   :  { %6227 = vmatprep.mubr.msk.bf16.mxu1 %vm6979_vm0, %v6978_v25 }
 0x355   :  { %6228 = vmatmul.mubr.msk.bf16.vlgmr.msra.gmra.mrb[0].mxu1 %vm1160_vm2, %v6857_v44  ;;  %v6889_v44 = vld [vmem:[%s8247_s5 + $0x68] sm:$0xff]  }
 0x356   :  { %6248 = vmatpush3.bf16.msra.mxu1 %v6858_v43  ;;  %6231 = vmatprep.mubr.msk.bf16.mxu1 %vm6979_vm0, %v6978_v25 }
 0x357   :  { %6249 = vmatprep.subr.bf16.mxu1 %v6978_v25 }
 0x35a   :  { %6250 = vmatpush3.bf16.msra.mxu1 %v6861_v45  ;;  %v6890_v45 = vld [vmem:[%s8247_s5 + $0x70] sm:$0xff]  }
 0x35b   :  { %6271 = vmatprep.subr.bf16.mxu1 %v6978_v25 }
 0x35d   :  { %6232 = vmatmul.mubr.msk.bf16.gmra.mrb[4].mxu1 %vm1160_vm2, %v6859_v46 }
 0x35e   :  { %6235 = vmatprep.mubr.msk.bf16.mxu1 %vm6979_vm0, %v6978_v25 }
 0x365   :  { %6236 = vmatmul.mubr.msk.bf16.gmra.mrb[8].mxu1 %vm1160_vm2, %v6860_v47  ;;  %v6891_v47 = vld [vmem:[%s8247_s5 + $0x78] sm:$0xff]  }
 0x366   :  { %6239 = vmatprep.mubr.msk.bf16.mxu1 %vm6979_vm0, %v6978_v25 }
 0x36d   :  { %6240 = vmatmul.mubr.msk.bf16.gmra.mrb[12].mxu1 %vm1160_vm2, %v6862_v48 }
 0x36e   :  { %6243 = vmatprep.mubr.msk.bf16.mxu1 %vm6979_vm0, %v6978_v25 }
 0x375   :  { %6244 = vmatmul.mubr.msk.bf16.gmra.mrb[16].mxu1 %vm1160_vm2, %v6863_v49  ;;  %v6892_v49 = vld [vmem:[%s8247_s5 + $0x80] sm:$0xff]  }
 0x376   :  { %6251 = vmatprep.mubr.msk.bf16.mxu1 %vm6979_vm0, %v6978_v25 }
 0x37d   :  { %6252 = vmatmul.mubr.msk.bf16.vlgmr.msra.gmra.mrb[0].mxu1 %vm1160_vm2, %v6864_v51  ;;  %v6893_v51 = vld [vmem:[%s8247_s5 + $0x88] sm:$0xff]  }
 0x37e   :  { %6272 = vmatpush3.bf16.msra.mxu1 %v6865_v50  ;;  %6255 = vmatprep.mubr.msk.bf16.mxu1 %vm6979_vm0, %v6978_v25 }
 0x37f   :  { %6273 = vmatprep.subr.bf16.mxu1 %v6978_v25 }
 0x382   :  { %6274 = vmatpush3.bf16.msra.mxu1 %v6869_v52  ;;  %v6894_v52 = vld [vmem:[%s8247_s5 + $0x90] sm:$0xff]  }
 0x385   :  { %6256 = vmatmul.mubr.msk.bf16.gmra.mrb[4].mxu1 %vm1160_vm2, %v6867_v53  ;;  %v6895_v53 = vld [vmem:[%s8247_s5 + $0x98] sm:$0xff]  }
 0x386   :  { %6259 = vmatprep.mubr.msk.bf16.mxu1 %vm6979_vm0, %v6978_v25 }
 0x38d   :  { %6260 = vmatmul.mubr.msk.bf16.gmra.mrb[8].mxu1 %vm1160_vm2, %v6868_v54 }
 0x38e   :  { %6263 = vmatprep.mubr.msk.bf16.mxu1 %vm6979_vm0, %v6978_v25 }
 0x395   :  { %6264 = vmatmul.mubr.msk.bf16.gmra.mrb[12].mxu1 %vm1160_vm2, %v6870_v55  ;;  %v6896_v55 = vld [vmem:[%s8247_s5 + $0xa0] sm:$0xff]  }
 0x396   :  { %6267 = vmatprep.mubr.msk.bf16.mxu1 %vm6979_vm0, %v6978_v25 }
 0x39d   :  { %6268 = vmatmul.mubr.msk.bf16.gmra.mrb[16].mxu1 %vm1160_vm2, %v6871_v56 }
 0x39e   :  { %6275 = vmatprep.mubr.msk.bf16.mxu1 %vm6979_vm0, %v6978_v25 }
 0x3a5   :  { %6276 = vmatmul.mubr.msk.bf16.vlgmr.msra.gmra.mrb[0].mxu1 %vm1160_vm2, %v6872_v57  ;;  %v6897_v57 = vld [vmem:[%s8247_s5 + $0xa8] sm:$0xff]  }
 0x3a6   :  { %6279 = vmatprep.mubr.msk.bf16.mxu1 %vm6979_vm0, %v6978_v25 }
 0x3ad   :  { %6280 = vmatmul.mubr.msk.bf16.gmra.mrb[4].mxu1 %vm1160_vm2, %v6873_v58  ;;  %v6898_v58 = vld [vmem:[%s8247_s5 + $0xb0] sm:$0xff]  }
 0x3ae   :  { %6283 = vmatprep.mubr.msk.bf16.mxu1 %vm6979_vm0, %v6978_v25 }
 0x3b5   :  { %6284 = vmatmul.mubr.msk.bf16.gmra.mrb[8].mxu1 %vm1160_vm2, %v6874_v59  ;;  %v6899_v59 = vld [vmem:[%s8247_s5 + $0xb8] sm:$0xff]  }
 0x3b6   :  { %6287 = vmatprep.mubr.msk.bf16.mxu1 %vm6979_vm0, %v6978_v25 }
 0x3bd   :  { %6288 = vmatmul.mubr.msk.bf16.gmra.mrb[12].mxu1 %vm1160_vm2, %v6875_v60 }
 0x3be   :  { %6291 = vmatprep.mubr.msk.bf16.mxu1 %vm6979_vm0, %v6978_v25 }
 0x3c5   :  { %6292 = vmatmul.mubr.msk.bf16.gmra.mrb[16].mxu1 %vm1160_vm2, %v6877_v61  ;;  %v6900_v61 = vld [vmem:[%s8247_s5 + $0xc0] sm:$0xff]  }
 0x478   :  { %v3385_v63 = vpop.f32.mrb[0].mxu1 }
 0x479   :  { %v6403_v1 = vadd.f32 %v7728_v62, %v3385_v63  ;;  %v6277_v2 = vpop.f32.mrb[1].mxu1  ;;  %v6901_v63 = vld [vmem:[%s8247_s5 + $0xc8] sm:$0xff]  }
 0x47a   :  { %v3388_v3 = vpop.f32.mrb[2].mxu1  ;;  %v6903_v2 = vld [vmem:[%s8247_s5 + $0xd8] sm:$0xff]  }
 0x47b   :  { %v3432_v4 = vmax.f32 %v6403_v1, 0.0  ;;  %v6278_v5 = vpop.f32.mrb[3].mxu1  ;;  %v6404_v14 = vadd.f32 %v7728_v62, %v3388_v3  ;;  %v6902_v1 = vld [vmem:[%s8247_s5 + $0xd0] sm:$0xff]  }
 0x47d   :  { %v3449_v7 = vpack.c.bf16 %v3432_v4, %v3432_v4  ;;  %v3433_v17 = vmax.f32 %v6404_v14, 0.0  ;;  %v6904_v4 = vld [vmem:[%s8247_s5 + $0xe0] sm:$0xff]  }
 0x47e   :  { %v4144_v14 = vld [vmem:[%s8249_s7] sm:$0xff] }
 0x47f   :  { %6304 = vmatmul.mubr.msk.bf16.vlgmr.msra.gmra.mrb[128].mxu0 %vm3482_vm3, %v3449_v7  ;;  %v3527_v23 = vpack.c.bf16 %v3433_v17, %v3433_v17  ;;  %v6906_v7 = vld [vmem:[%s8247_s5 + $0xf0] sm:$0xff]  }
 0x480   :  { %6308 = vmatpush3.bf16.msra.mxu0 %v6880_v6  ;;  %v3393_v8 = vpop.f32.mrb[4].mxu1  ;;  %6315 = vmatprep.mubr.msk.bf16.mxu0 %vm6979_vm0, %v6978_v25  ;;  %v6905_v6 = vld [vmem:[%s8247_s5 + $0xe8] sm:$0xff]  }
 0x481   :  { %v6281_v10 = vpop.f32.mrb[5].mxu1  ;;  %6309 = vmatprep.subr.bf16.mxu0 %v6978_v25  ;;  %v6405_v33 = vadd.f32 %v7728_v62, %v3393_v8  ;;  %v6907_v8 = vld [vmem:[%s8247_s5 + $0xf8] sm:$0xff]  }
 0x482   :  { %v3396_v11 = vpop.f32.mrb[6].mxu1  ;;  %v6908_v10 = vld [vmem:[%s8247_s5 + $0x100] sm:$0xff]  }
 0x483   :  { %v6282_v12 = vpop.f32.mrb[7].mxu1  ;;  %v3434_v37 = vmax.f32 %v6405_v33, 0.0  ;;  %v6406_v46 = vadd.f32 %v7728_v62, %v3396_v11  ;;  %v4149_v33 = vld [vmem:[%s8249_s7 + $0x28] sm:$0xff] }
 0x484   :  { %6310 = vmatpush3.bf16.msra.mxu0 %v6881_v9  ;;  %v6909_v12 = vld [vmem:[%s8247_s5 + $0x108] sm:$0xff]  }
 0x485   :  { %6311 = vmatprep.subr.bf16.mxu0 %v6978_v25  ;;  %v3604_v43 = vpack.c.bf16 %v3434_v37, %v3434_v37  ;;  %v3435_v48 = vmax.f32 %v6406_v46, 0.0  ;;  %v5519_v37 = vld [vmem:[%s8251_s6] ss:$0 sm:$0xff] }
 0x487   :  { %v3681_v50 = vpack.c.bf16 %v3435_v48, %v3435_v48  ;;  %v4165_v48 = vld [vmem:[%s8249_s7 + $0xa8] sm:$0xff] }
 0x488   :  { %6312 = vmatpush3.bf16.msra.mxu0 %v6882_v13  ;;  %v3401_v15 = vpop.f32.mrb[8].mxu1  ;;  %v6910_v13 = vld [vmem:[%s8247_s5 + $0x110] sm:$0xff]  }
 0x489   :  { %v7750_v18 = vadd.f32 %v7728_v62, %v3401_v15  ;;  %v6285_v19 = vpop.f32.mrb[9].mxu1  ;;  %6313 = vmatprep.subr.bf16.mxu0 %v6978_v25  ;;  %v4148_v15 = vld [vmem:[%s8249_s7 + $0x20] sm:$0xff] }
 0x48a   :  { %v3404_v20 = vpop.f32.mrb[10].mxu1  ;;  %v4152_v19 = vld [vmem:[%s8249_s7 + $0x40] sm:$0xff] }
 0x48b   :  { %v7754_v21 = vadd.f32 %v7728_v62, %v3404_v20  ;;  %v6286_v29 = vpop.f32.mrb[11].mxu1  ;;  %v3436_v54 = vmax.f32 %v7750_v18, 0.0  ;;  %v5566_v18 = vcombine.high %v4144_v14, %v4148_v15  ;;  %v4156_v20 = vld [vmem:[%s8249_s7 + $0x60] sm:$0xff] }
 0x48c   :  { %6314 = vmatpush3.bf16.msra.mxu0 %v6883_v16  ;;  %v6911_v16 = vld [vmem:[%s8247_s5 + $0x118] sm:$0xff]  }
 0x48d   :  { %6319 = vmatprep.subr.bf16.mxu0 %v6978_v25  ;;  %v3758_v56 = vpack.c.bf16 %v3436_v54, %v3436_v54  ;;  %v3437_v60 = vmax.f32 %v7754_v21, 0.0  ;;  %v5565_v21 = vcombine.low %v4144_v14, %v4148_v15 }
 0x48f   :  { %6316 = vmatmul.mubr.msk.bf16.vlgmr.msra.gmra.mrb[128].mxu0 %vm3482_vm3, %v3527_v23  ;;  %v4160_v23 = vld [vmem:[%s8249_s7 + $0x80] sm:$0xff] }
 0x490   :  { %6320 = vmatpush3.bf16.msra.mxu0 %v6884_v22  ;;  %v3409_v24 = vpop.f32.mrb[12].mxu1  ;;  %6327 = vmatprep.mubr.msk.bf16.mxu0 %vm6979_vm0, %v6978_v25  ;;  %v5574_v22 = vcombine.high %v4152_v19, %v4156_v20 }
 0x491   :  { %v7767_v27 = vadd.f32 %v7728_v62, %v3409_v24  ;;  %v6289_v28 = vpop.f32.mrb[13].mxu1  ;;  %6321 = vmatprep.subr.bf16.mxu0 %v6978_v25  ;;  %v5573_v24 = vcombine.low %v4152_v19, %v4156_v20  ;;  %v4171_v20 = vld [vmem:[%s8249_s7 + $0xd8] sm:$0xff] }
 0x492   :  { %v3412_v34 = vpop.f32.mrb[14].mxu1  ;;  %v4168_v28 = vld [vmem:[%s8249_s7 + $0xc0] sm:$0xff] }
 0x493   :  { %v7771_v30 = vadd.f32 %v7728_v62, %v3412_v34  ;;  %v6290_v31 = vpop.f32.mrb[15].mxu1  ;;  %v3438_v3 = vmax.f32 %v7767_v27, 0.0  ;;  %v4172_v34 = vld [vmem:[%s8249_s7 + $0xe0] sm:$0xff] }
 0x494   :  { %6322 = vmatpush3.bf16.msra.mxu0 %v6885_v26  ;;  %v5589_v31 = vcombine.low %v4168_v28, %v4172_v34 }
 0x495   :  { %6323 = vmatprep.subr.bf16.mxu0 %v6978_v25  ;;  %v3912_v5 = vpack.c.bf16 %v3438_v3, %v3438_v3  ;;  %v3439_v9 = vmax.f32 %v7771_v30, 0.0  ;;  %v5590_v30 = vcombine.high %v4168_v28, %v4172_v34  ;;  %v6917_v28 = vld [vmem:[%s8250_s9 + $0x10] sm:$0xff]   ;;  %v6918_v34 = vld [vmem:[%s8250_s9 + $0x58] sm:$0xff]  }
 0x497   :  { %v3989_v11 = vpack.c.bf16 %v3439_v9, %v3439_v9  ;;  %v4151_v9 = vld [vmem:[%s8249_s7 + $0x38] sm:$0xff] }
 0x498   :  { %6324 = vmatpush3.bf16.msra.mxu0 %v6886_v32  ;;  %v3417_v35 = vpop.f32.mrb[16].mxu1  ;;  %v4145_v32 = vld [vmem:[%s8249_s7 + $0x8] sm:$0xff] }
 0x499   :  { %v7782_v38 = vadd.f32 %v7728_v62, %v3417_v35  ;;  %v6293_v39 = vpop.f32.mrb[17].mxu1  ;;  %6325 = vmatprep.subr.bf16.mxu0 %v6978_v25  ;;  %v3835_v62 = vpack.c.bf16 %v3437_v60, %v3437_v60  ;;  %v5567_v35 = vcombine.low %v4145_v32, %v4149_v33  ;;  %v4158_v60 = vld [vmem:[%s8249_s7 + $0x70] sm:$0xff] }
 0x49a   :  { %v3420_v40 = vpop.f32.mrb[18].mxu1  ;;  %v4153_v39 = vld [vmem:[%s8249_s7 + $0x48] sm:$0xff] }
 0x49b   :  { %v6294_v41 = vpop.f32.mrb[19].mxu1  ;;  %v3440_v17 = vmax.f32 %v7782_v38, 0.0  ;;  %v4157_v40 = vld [vmem:[%s8249_s7 + $0x68] sm:$0xff] }
 0x49c   :  { %6326 = vmatpush3.bf16.msra.mxu0 %v6887_v36  ;;  %v5568_v36 = vcombine.high %v4145_v32, %v4149_v33  ;;  %v5576_v46 = vcombine.high %v4153_v39, %v4157_v40  ;;  %v6921_v32 = vld [vmem:[%s8250_s9 + $0x20] sm:$0xff]   ;;  %v6922_v33 = vld [vmem:[%s8250_s9 + $0x68] sm:$0xff]  }
 0x49d   :  { %6331 = vmatprep.subr.bf16.mxu0 %v6978_v25  ;;  %v4066_v29 = vpack.c.bf16 %v3440_v17, %v3440_v17  ;;  %v4167_v17 = vld [vmem:[%s8249_s7 + $0xb8] sm:$0xff] }
 0x49f   :  { %6328 = vmatmul.mubr.msk.bf16.vlgmr.msra.gmra.mrb[128].mxu0 %vm3482_vm3, %v3604_v43 }
 0x4a0   :  { %6332 = vmatpush3.bf16.msra.mxu0 %v6888_v42  ;;  %6339 = vmatprep.mubr.msk.bf16.mxu0 %vm6979_vm0, %v6978_v25 }
 0x4a1   :  { %6333 = vmatprep.subr.bf16.mxu0 %v6978_v25 }
 0x4a4   :  { %6334 = vmatpush3.bf16.msra.mxu0 %v6889_v44 }
 0x4a5   :  { %6335 = vmatprep.subr.bf16.mxu0 %v6978_v25 }
 0x4a8   :  { %6336 = vmatpush3.bf16.msra.mxu0 %v6890_v45 }
 0x4a9   :  { %6337 = vmatprep.subr.bf16.mxu0 %v6978_v25 }
 0x4ac   :  { %6338 = vmatpush3.bf16.msra.mxu0 %v6891_v47  ;;  %v4161_v47 = vld [vmem:[%s8249_s7 + $0x88] sm:$0xff] }
 0x4ad   :  { %6343 = vmatprep.subr.bf16.mxu0 %v6978_v25 }
 0x4af   :  { %6340 = vmatmul.mubr.msk.bf16.vlgmr.msra.gmra.mrb[128].mxu0 %vm3482_vm3, %v3681_v50  ;;  %v5584_v50 = vcombine.high %v4161_v47, %v4165_v48 }
 0x4b0   :  { %6344 = vmatpush3.bf16.msra.mxu0 %v6892_v49  ;;  %6351 = vmatprep.mubr.msk.bf16.mxu0 %vm6979_vm0, %v6978_v25  ;;  %v5575_v49 = vcombine.low %v4153_v39, %v4157_v40  ;;  %v6927_v39 = vld [vmem:[%s8250_s9 + $0x38] sm:$0xff]   ;;  %v6928_v40 = vld [vmem:[%s8250_s9 + $0xc0] sm:$0xff]  }
 0x4b1   :  { %6345 = vmatprep.subr.bf16.mxu0 %v6978_v25 }
 0x4b4   :  { %6346 = vmatpush3.bf16.msra.mxu0 %v6893_v51  ;;  %v4169_v51 = vld [vmem:[%s8249_s7 + $0xc8] sm:$0xff] }
 0x4b5   :  { %6347 = vmatprep.subr.bf16.mxu0 %v6978_v25 }
 0x4b8   :  { %6348 = vmatpush3.bf16.msra.mxu0 %v6894_v52  ;;  %v4173_v52 = vld [vmem:[%s8249_s7 + $0xe8] sm:$0xff] }
 0x4b9   :  { %6349 = vmatprep.subr.bf16.mxu0 %v6978_v25  ;;  %v5592_v54 = vcombine.high %v4169_v51, %v4173_v52 }
 0x4bc   :  { %6350 = vmatpush3.bf16.msra.mxu0 %v6895_v53  ;;  %v5583_v53 = vcombine.low %v4161_v47, %v4165_v48 }
 0x4bd   :  { %6355 = vmatprep.subr.bf16.mxu0 %v6978_v25 }
 0x4bf   :  { %6352 = vmatmul.mubr.msk.bf16.vlgmr.msra.gmra.mrb[128].mxu0 %vm3482_vm3, %v3758_v56  ;;  %v4150_v56 = vld [vmem:[%s8249_s7 + $0x30] sm:$0xff] }
 0x4c0   :  { %6356 = vmatpush3.bf16.msra.mxu0 %v6896_v55  ;;  %6363 = vmatprep.mubr.msk.bf16.mxu0 %vm6979_vm0, %v6978_v25  ;;  %v4146_v55 = vld [vmem:[%s8249_s7 + $0x10] sm:$0xff] }
 0x4c1   :  { %6357 = vmatprep.subr.bf16.mxu0 %v6978_v25 }
 0x4c4   :  { %6358 = vmatpush3.bf16.msra.mxu0 %v6897_v57  ;;  %v5591_v57 = vcombine.low %v4169_v51, %v4173_v52 }
 0x4c5   :  { %6359 = vmatprep.subr.bf16.mxu0 %v6978_v25 }
 0x4c8   :  { %6360 = vmatpush3.bf16.msra.mxu0 %v6898_v58  ;;  %v5570_v58 = vcombine.high %v4146_v55, %v4150_v56 }
 0x4c9   :  { %6361 = vmatprep.subr.bf16.mxu0 %v6978_v25 }
 0x4cc   :  { %6362 = vmatpush3.bf16.msra.mxu0 %v6899_v59  ;;  %v4154_v59 = vld [vmem:[%s8249_s7 + $0x50] sm:$0xff] }
 0x4cd   :  { %6367 = vmatprep.subr.bf16.mxu0 %v6978_v25 }
 0x4cf   :  { %6364 = vmatmul.mubr.msk.bf16.vlgmr.msra.gmra.mrb[128].mxu0 %vm3482_vm3, %v3835_v62  ;;  %v5578_v62 = vcombine.high %v4154_v59, %v4158_v60 }
 0x4d0   :  { %6368 = vmatpush3.bf16.msra.mxu0 %v6900_v61  ;;  %6375 = vmatprep.mubr.msk.bf16.mxu0 %vm6979_vm0, %v6978_v25  ;;  %v5569_v61 = vcombine.low %v4146_v55, %v4150_v56 }
 0x4d1   :  { %6369 = vmatprep.subr.bf16.mxu0 %v6978_v25 }
 0x4d4   :  { %6370 = vmatpush3.bf16.msra.mxu0 %v6901_v63  ;;  %v4162_v63 = vld [vmem:[%s8249_s7 + $0x90] sm:$0xff] }
 0x4d5   :  { %6371 = vmatprep.subr.bf16.mxu0 %v6978_v25 }
 0x4d8   :  { %6372 = vmatpush3.bf16.msra.mxu0 %v6902_v1  ;;  %v4166_v1 = vld [vmem:[%s8249_s7 + $0xb0] sm:$0xff] }
 0x4d9   :  { %6373 = vmatprep.subr.bf16.mxu0 %v6978_v25  ;;  %v5586_v3 = vcombine.high %v4162_v63, %v4166_v1 }
 0x4dc   :  { %6374 = vmatpush3.bf16.msra.mxu0 %v6903_v2  ;;  %v5577_v2 = vcombine.low %v4154_v59, %v4158_v60  ;;  %v6930_v59 = vld [vmem:[%s8250_s9 + $0xc8] sm:$0xff]  }
 0x4dd   :  { %6379 = vmatprep.subr.bf16.mxu0 %v6978_v25  ;;  %v6931_v60 = vld [vmem:[%s8250_s9 + $0x88] sm:$0xff]  }
 0x4df   :  { %6376 = vmatmul.mubr.msk.bf16.vlgmr.msra.gmra.mrb[128].mxu0 %vm3482_vm3, %v3912_v5  ;;  %v4174_v5 = vld [vmem:[%s8249_s7 + $0xf0] sm:$0xff] }
 0x4e0   :  { %6380 = vmatpush3.bf16.msra.mxu0 %v6904_v4  ;;  %6387 = vmatprep.mubr.msk.bf16.mxu0 %vm6979_vm0, %v6978_v25  ;;  %v4170_v4 = vld [vmem:[%s8249_s7 + $0xd0] sm:$0xff] }
 0x4e1   :  { %6381 = vmatprep.subr.bf16.mxu0 %v6978_v25 }
 0x4e4   :  { %6382 = vmatpush3.bf16.msra.mxu0 %v6905_v6  ;;  %v5585_v6 = vcombine.low %v4162_v63, %v4166_v1  ;;  %v6933_v1 = vld [vmem:[%s8250_s9 + $0x90] sm:$0xff]  }
 0x4e5   :  { %6383 = vmatprep.subr.bf16.mxu0 %v6978_v25 }
 0x4e8   :  { %6384 = vmatpush3.bf16.msra.mxu0 %v6906_v7  ;;  %v5594_v7 = vcombine.high %v4170_v4, %v4174_v5 }
 0x4e9   :  { %6385 = vmatprep.subr.bf16.mxu0 %v6978_v25 }
 0x4ec   :  { %6386 = vmatpush3.bf16.msra.mxu0 %v6907_v8  ;;  %v4147_v8 = vld [vmem:[%s8249_s7 + $0x18] sm:$0xff] }
 0x4ed   :  { %6391 = vmatprep.subr.bf16.mxu0 %v6978_v25  ;;  %v5571_v14 = vcombine.low %v4147_v8, %v4151_v9 }
 0x4ef   :  { %6388 = vmatmul.mubr.msk.bf16.vlgmr.msra.gmra.mrb[128].mxu0 %vm3482_vm3, %v3989_v11  ;;  %v5572_v11 = vcombine.high %v4147_v8, %v4151_v9  ;;  %v6936_v9 = vld [vmem:[%s8250_s9 + $0xe0] sm:$0xff]  }
 0x4f0   :  { %6392 = vmatpush3.bf16.msra.mxu0 %v6908_v10  ;;  %6399 = vmatprep.mubr.msk.bf16.mxu0 %vm6979_vm0, %v6978_v25  ;;  %v5593_v10 = vcombine.low %v4170_v4, %v4174_v5 }
 0x4f1   :  { %6393 = vmatprep.subr.bf16.mxu0 %v6978_v25 }
 0x4f4   :  { %6394 = vmatpush3.bf16.msra.mxu0 %v6909_v12  ;;  %v4155_v12 = vld [vmem:[%s8249_s7 + $0x58] sm:$0xff] }
 0x4f5   :  { %6395 = vmatprep.subr.bf16.mxu0 %v6978_v25 }
 0x4f8   :  { %6396 = vmatpush3.bf16.msra.mxu0 %v6910_v13  ;;  %v4159_v13 = vld [vmem:[%s8249_s7 + $0x78] sm:$0xff] }
 0x4f9   :  { %6397 = vmatprep.subr.bf16.mxu0 %v6978_v25  ;;  %v4164_v25 = vld [vmem:[%s8249_s7 + $0xa0] sm:$0xff]  ;;  %v5580_v15 = vcombine.high %v4155_v12, %v4159_v13 }
 0x4fa   :  { %v5582_v26 = vcombine.high %v4160_v23, %v4164_v25  ;;  %v5581_v27 = vcombine.low %v4160_v23, %v4164_v25  ;;  %v6913_v25 = vld [vmem:[%s8250_s9] sm:$0xff]  }
 0x4fc   :  { %6398 = vmatpush3.bf16.msra.mxu0 %v6911_v16  ;;  %v4163_v16 = vld [vmem:[%s8249_s7 + $0x98] sm:$0xff] }
 0x4fd   :  { %4381 = vmatprep.subr.bf16.mxu0 %v5566_v18  ;;  %v5579_v18 = vcombine.low %v4155_v12, %v4159_v13  ;;  %v5588_v19 = vcombine.high %v4163_v16, %v4167_v17  ;;  %v6937_v12 = vld [vmem:[%s8250_s9 + $0xa0] sm:$0xff]  }
 0x4ff   :  { %6400 = vmatmul.mubr.msk.bf16.vlgmr.msra.gmra.mrb[128].mxu0 %vm3482_vm3, %v4066_v29  ;;  %v5587_v29 = vcombine.low %v4163_v16, %v4167_v17 }
 0x500   :  { %4382 = vmatpush1.bf16.msra.mxu0 %v5565_v21  ;;  %4413 = vmatprep.mubr.bf16.mxu0 %v6977_v0  ;;  %v4175_v21 = vld [vmem:[%s8249_s7 + $0xf8] sm:$0xff] }
 0x501   :  { %4383 = vmatprep.subr.bf16.mxu0 %v5574_v22  ;;  %v5596_v22 = vcombine.high %v4171_v20, %v4175_v21  ;;  %v5595_v23 = vcombine.low %v4171_v20, %v4175_v21  ;;  %v6941_v20 = vld [vmem:[%s8250_s9 + $0xb0] sm:$0xff]  }
 0x504   :  { %4384 = vmatpush1.bf16.msra.mxu0 %v5573_v24  ;;  %v6914_v24 = vld [vmem:[%s8250_s9 + $0x48] sm:$0xff]  }
 0x505   :  { %4385 = vmatprep.subr.bf16.mxu0 %v5582_v26  ;;  %v6915_v26 = vld [vmem:[%s8250_s9 + $0x8] sm:$0xff]  }
 0x508   :  { %4386 = vmatpush1.bf16.msra.mxu0 %v5581_v27  ;;  %v6916_v27 = vld [vmem:[%s8250_s9 + $0x50] sm:$0xff]  }
 0x509   :  { %4387 = vmatprep.subr.bf16.mxu0 %v5590_v30  ;;  %v6919_v30 = vld [vmem:[%s8250_s9 + $0x18] sm:$0xff]  }
 0x50c   :  { %4388 = vmatpush1.bf16.msra.mxu0 %v5589_v31  ;;  %v6920_v31 = vld [vmem:[%s8250_s9 + $0x60] sm:$0xff]  }
 0x50d   :  { %4422 = vmatprep.subr.bf16.mxu0 %v5568_v36  ;;  %v6924_v36 = vld [vmem:[%s8250_s9 + $0x70] sm:$0xff]  }
 0x5d2   :  { %v4136_v38 = vpop.f32.mrb[128].mxu0 }
 0x5d3   :  { %v6412_v41 = vadd.f32 %v5519_v37, %v4136_v38  ;;  %v6401_v42 = vpop.f32.mrb[129].mxu0  ;;  %v6925_v37 = vld [vmem:[%s8250_s9 + $0x30] sm:$0xff]   ;;  %v6926_v38 = vld [vmem:[%s8250_s9 + $0x78] sm:$0xff]  }
 0x5d4   :  { %v4139_v43 = vpop.f32.mrb[130].mxu0 }
 0x5d5   :  { %v7946_v44 = vpack.c.bf16 %v6412_v41, %v6412_v41  ;;  %v6402_v45 = vpop.f32.mrb[131].mxu0  ;;  %v4178_v41 = vlaneseq }
 0x5d7   :  { %5597 = vmatmul.mubr.msk.bf16.vlgmr.msra.gmra.mrb[132].mxu0 %vm3482_vm3, %v7946_v44  ;;  %v8070_v42 = vshrl.u32 %v4178_v41, 7 }
 0x5d8   :  { %4423 = vmatpush1.bf16.msra.mxu0 %v5567_v35  ;;  %4454 = vmatprep.mubr.bf16.mxu0 %v6977_v0  ;;  %v6923_v35 = vld [vmem:[%s8250_s9 + $0x28] sm:$0xff]  }
 0x5d9   :  { %4424 = vmatprep.subr.bf16.mxu0 %v5576_v46  ;;  %v4180_v43 = vsub.s32 0, %v8070_v42  ;;  %v4184_v45 = vsub.s32 1, %v8070_v42  ;;  %v4188_v13 = vsub.s32 2, %v8070_v42  ;;  %v4200_v16 = vsub.s32 5, %v8070_v42 }
 0x5dc   :  { %4425 = vmatpush1.bf16.msra.mxu0 %v5575_v49 }
 0x5dd   :  { %4426 = vmatprep.subr.bf16.mxu0 %v5584_v50 }
 0x5e0   :  { %4427 = vmatpush1.bf16.msra.mxu0 %v5583_v53 }
 0x5e1   :  { %4428 = vmatprep.subr.bf16.mxu0 %v5592_v54 }
 0x5e4   :  { %4429 = vmatpush1.bf16.msra.mxu0 %v5591_v57  ;;  %v6929_v57 = vld [vmem:[%s8250_s9 + $0x80] sm:$0xff]  }
 0x5e5   :  { %4463 = vmatprep.subr.bf16.mxu0 %v5570_v58 }
 0x5e7   :  { %5598 = vmatmul.mubr.msk.bf16.vlgmr.msra.gmra.mrb[136].mxu0 %vm3482_vm3, %v7946_v44 }
 0x5e8   :  { %4464 = vmatpush1.bf16.msra.mxu0 %v5569_v61  ;;  %4495 = vmatprep.mubr.bf16.mxu0 %v6977_v0  ;;  %v4192_v61 = vsub.s32 3, %v8070_v42 }
 0x5e9   :  { %4465 = vmatprep.subr.bf16.mxu0 %v5578_v62  ;;  %v6932_v62 = vld [vmem:[%s8250_s9 + $0xd0] sm:$0xff]  }
 0x5ec   :  { %4466 = vmatpush1.bf16.msra.mxu0 %v5577_v2  ;;  %v6934_v2 = vld [vmem:[%s8250_s9 + $0xd8] sm:$0xff]  }
 0x5ed   :  { %4467 = vmatprep.subr.bf16.mxu0 %v5586_v3 }
 0x5f0   :  { %4468 = vmatpush1.bf16.msra.mxu0 %v5585_v6 }
 0x5f1   :  { %4469 = vmatprep.subr.bf16.mxu0 %v5594_v7  ;;  %v6935_v7 = vld [vmem:[%s8250_s9 + $0x98] sm:$0xff]  }
 0x5f4   :  { %4470 = vmatpush1.bf16.msra.mxu0 %v5593_v10 }
 0x5f5   :  { %4504 = vmatprep.subr.bf16.mxu0 %v5572_v11 }
 0x5f7   :  { %5599 = vmatmul.mubr.msk.bf16.vlgmr.msra.gmra.mrb[140].mxu0 %vm3482_vm3, %v7946_v44 }
 0x5f8   :  { %4505 = vmatpush1.bf16.msra.mxu0 %v5571_v14  ;;  %4536 = vmatprep.mubr.bf16.mxu0 %v6977_v0  ;;  %v6912_v0 = vld [vmem:[%s8250_s9 + $0x40] sm:$0xff]   ;;  %v6938_v14 = vld [vmem:[%s8250_s9 + $0xe8] sm:$0xff]  }
 0x5f9   :  { %4506 = vmatprep.subr.bf16.mxu0 %v5580_v15  ;;  %v6939_v15 = vld [vmem:[%s8250_s9 + $0xa8] sm:$0xff]  }
 0x5fc   :  { %4507 = vmatpush1.bf16.msra.mxu0 %v5579_v18  ;;  %v6940_v18 = vld [vmem:[%s8250_s9 + $0xf0] sm:$0xff]  }
 0x5fd   :  { %4508 = vmatprep.subr.bf16.mxu0 %v5588_v19 }
 0x600   :  { %4509 = vmatpush1.bf16.msra.mxu0 %v5587_v29  ;;  %v6942_v29 = vld [vmem:[%s8250_s9 + $0xf8] sm:$0xff]  }
 0x601   :  { %4510 = vmatprep.subr.bf16.mxu0 %v5596_v22 }
 0x604   :  { %4511 = vmatpush1.bf16.msra.mxu0 %v5595_v23 }
 0x605   :  { %5823 = vmatprep.subr.bf16.mxu0 %v6912_v0 }
 0x607   :  { %5600 = vmatmul.mubr.msk.bf16.vlgmr.msra.gmra.mrb[144].mxu0 %vm3482_vm3, %v7946_v44  ;;  %v8076_v44 = vld [vmem:[%s8252_s8] sm:$0xff] }
 0x608   :  { %5824 = vmatpush3.bf16.msra.mxu0 %v6913_v25  ;;  %v4181_v46 = vrot.slane %v8076_v44, %v4180_v43  ;;  %v4185_v47 = vrot.slane %v8076_v44, %v4184_v45  ;;  %v4193_v63 = vrot.slane %v8076_v44, %v4192_v61  ;;  %v4189_v17 = vrot.slane %v8076_v44, %v4188_v13  ;;  %v6951_v43 = vld [vmem:[%s8250_s9 + $0x118] sm:$0xff]   ;;  %v6960_v61 = vld [vmem:[%s8250_s9 + $0x1c0] sm:$0xff]   ;;  %v6971_v13 = vld [vmem:[%s8250_s9 + $0x1a8] sm:$0xff]  }
 0x609   :  { %5825 = vmatprep.subr.bf16.mxu0 %v6914_v24  ;;  %v4201_v19 = vrot.slane %v8076_v44, %v4200_v16  ;;  %v6943_v24 = vld [vmem:[%s8250_s9 + $0xb8] sm:$0xff]  }
 0x60c   :  { %5826 = vmatpush3.bf16.msra.mxu0 %v6915_v26 }
 0x60d   :  { %5827 = vmatprep.subr.bf16.mxu0 %v6916_v27 }
 0x610   :  { %5828 = vmatpush3.bf16.msra.mxu0 %v6917_v28  ;;  %v6944_v28 = vld [vmem:[%s8250_s9 + $0x140] sm:$0xff]  }
 0x611   :  { %5829 = vmatprep.subr.bf16.mxu0 %v6918_v34 }
 0x614   :  { %5830 = vmatpush3.bf16.msra.mxu0 %v6919_v30  ;;  %v6945_v30 = vld [vmem:[%s8250_s9 + $0x100] sm:$0xff]  }
 0x615   :  { %5831 = vmatprep.subr.bf16.mxu0 %v6920_v31 }
 0x618   :  { %5832 = vmatpush3.bf16.msra.mxu0 %v6921_v32  ;;  %v6946_v32 = vld [vmem:[%s8250_s9 + $0x148] sm:$0xff]  }
 0x619   :  { %5833 = vmatprep.subr.bf16.mxu0 %v6922_v33 }
 0x61c   :  { %5834 = vmatpush3.bf16.msra.mxu0 %v6923_v35  ;;  %v6947_v35 = vld [vmem:[%s8250_s9 + $0x108] sm:$0xff]  }
 0x61d   :  { %5835 = vmatprep.subr.bf16.mxu0 %v6924_v36  ;;  %v6948_v36 = vld [vmem:[%s8250_s9 + $0x150] sm:$0xff]  }
 0x620   :  { %5836 = vmatpush3.bf16.msra.mxu0 %v6925_v37  ;;  %v6949_v37 = vld [vmem:[%s8250_s9 + $0x110] sm:$0xff]  }
 0x621   :  { %5837 = vmatprep.subr.bf16.mxu0 %v6926_v38  ;;  %v6950_v38 = vld [vmem:[%s8250_s9 + $0x158] sm:$0xff]  }
 0x624   :  { %5838 = vmatpush3.bf16.msra.mxu0 %v6927_v39 }
 0x625   :  { %5845 = vmatprep.subr.bf16.mxu0 %v6928_v40 }
 0x6aa   :  { %v4415_v48 = vpop.f32.mrb[132].mxu0 }
 0x6ab   :  { %v4416_v49 = vadd.f32 %v4415_v48, %v4181_v46  ;;  %v4417_v50 = vpop.f32.mrb[133].mxu0  ;;  %v6952_v46 = vld [vmem:[%s8250_s9 + $0x160] sm:$0xff]   ;;  %v4196_v48 = vsub.s32 4, %v8070_v42 }
 0x6ac   :  { %v4418_v51 = vadd.f32 %v4417_v50, %v4185_v47  ;;  %v4419_v52 = vpop.f32.mrb[134].mxu0  ;;  %v6953_v47 = vld [vmem:[%s8250_s9 + $0x120] sm:$0xff]   ;;  %v4208_v50 = vsub.s32 7, %v8070_v42 }
 0x6ad   :  { %v4545_v53 = vmax.f32 %v4416_v49, 0.0  ;;  %v4420_v54 = vpop.f32.mrb[135].mxu0  ;;  %v6954_v49 = vld [vmem:[%s8250_s9 + $0x168] sm:$0xff]   ;;  %v4197_v52 = vrot.slane %v8076_v44, %v4196_v48 }
 0x6ae   :  { %v4546_v55 = vmax.f32 %v4418_v51, 0.0  ;;  %v6955_v51 = vld [vmem:[%s8250_s9 + $0x128] sm:$0xff]   ;;  %v4209_v54 = vrot.slane %v8076_v44, %v4208_v50 }
 0x6af   :  { %v4553_v58 = vpack.c.bf16 %v4545_v53, %v4545_v53  ;;  %v6956_v53 = vld [vmem:[%s8250_s9 + $0x170] sm:$0xff]  }
 0x6b0   :  { %v4554_v56 = vpack.c.bf16 %v4546_v55, %v4546_v55  ;;  %v6957_v55 = vld [vmem:[%s8250_s9 + $0x130] sm:$0xff]  }
 0x6b2   :  { %5112 = vmatprep.mubr.bf16.mxu0 %v4554_v56 }
 0x6b3   :  { %5113 = vmatmul.mubr.bf16.vlgmr.msra.gmra.mrb[148].mxu0 %v4553_v58 }
 0x6b4   :  { %5846 = vmatpush3.bf16.msra.mxu0 %v6929_v57  ;;  %v6958_v57 = vld [vmem:[%s8250_s9 + $0x178] sm:$0xff]  }
 0x6b5   :  { %5847 = vmatprep.subr.bf16.mxu0 %v6930_v59  ;;  %v6959_v59 = vld [vmem:[%s8250_s9 + $0x138] sm:$0xff]  }
 0x6b8   :  { %5848 = vmatpush3.bf16.msra.mxu0 %v6931_v60 }
 0x6b9   :  { %5849 = vmatprep.subr.bf16.mxu0 %v6932_v62 }
 0x6ba   :  { %v4456_v3 = vpop.f32.mrb[136].mxu0 }
 0x6bb   :  { %v4458_v4 = vpop.f32.mrb[137].mxu0  ;;  %v4457_v21 = vadd.f32 %v4456_v3, %v4189_v17  ;;  %v6974_v17 = vld [vmem:[%s8250_s9 + $0x1f8] sm:$0xff]  }
 0x6bc   :  { %v4459_v5 = vadd.f32 %v4458_v4, %v4193_v63  ;;  %v4460_v6 = vpop.f32.mrb[138].mxu0  ;;  %5850 = vmatpush3.bf16.msra.mxu0 %v6933_v1  ;;  %v6961_v63 = vld [vmem:[%s8250_s9 + $0x180] sm:$0xff]   ;;  %v6963_v4 = vld [vmem:[%s8250_s9 + $0x188] sm:$0xff]  }
 0x6bd   :  { %v4461_v8 = vpop.f32.mrb[139].mxu0  ;;  %5851 = vmatprep.subr.bf16.mxu0 %v6934_v2  ;;  %v4547_v26 = vmax.f32 %v4457_v21, 0.0  ;;  %v6962_v2 = vld [vmem:[%s8250_s9 + $0x1c8] sm:$0xff]   ;;  %v6965_v6 = vld [vmem:[%s8250_s9 + $0x190] sm:$0xff]  }
 0x6be   :  { %v4548_v10 = vmax.f32 %v4459_v5, 0.0  ;;  %v6964_v5 = vld [vmem:[%s8250_s9 + $0x1d0] sm:$0xff]   ;;  %v6967_v8 = vld [vmem:[%s8250_s9 + $0x198] sm:$0xff]  }
 0x6bf   :  { %v4555_v31 = vpack.c.bf16 %v4547_v26, %v4547_v26 }
 0x6c0   :  { %v4556_v11 = vpack.c.bf16 %v4548_v10, %v4548_v10  ;;  %5852 = vmatpush3.bf16.msra.mxu0 %v6935_v7  ;;  %v6966_v7 = vld [vmem:[%s8250_s9 + $0x1d8] sm:$0xff]   ;;  %v6969_v10 = vld [vmem:[%s8250_s9 + $0x1a0] sm:$0xff]  }
 0x6c1   :  { %5853 = vmatprep.subr.bf16.mxu0 %v6936_v9  ;;  %v6968_v9 = vld [vmem:[%s8250_s9 + $0x1e0] sm:$0xff]  }
 0x6c2   :  { %5152 = vmatprep.mubr.bf16.mxu0 %v4556_v11  ;;  %v4204_v11 = vsub.s32 6, %v8070_v42  ;;  %v6973_v42 = vld [vmem:[%s8250_s9 + $0x1b0] sm:$0xff]  }
 0x6c4   :  { %5854 = vmatpush3.bf16.msra.mxu0 %v6937_v12  ;;  %v6970_v12 = vld [vmem:[%s8250_s9 + $0x1e8] sm:$0xff]  }
 0x6c5   :  { %5855 = vmatprep.subr.bf16.mxu0 %v6938_v14  ;;  %v4205_v14 = vrot.slane %v8076_v44, %v4204_v11  ;;  %v6975_v44 = vld [vmem:[%s8250_s9 + $0x1b8] sm:$0xff]  }
 0x6c8   :  { %5856 = vmatpush3.bf16.msra.mxu0 %v6939_v15  ;;  %v6972_v15 = vld [vmem:[%s8250_s9 + $0x1f0] sm:$0xff]  }
 0x6c9   :  { %5857 = vmatprep.subr.bf16.mxu0 %v6940_v18 }
 0x6ca   :  { %v4497_v22 = vpop.f32.mrb[140].mxu0 }
 0x6cb   :  { %v4499_v23 = vpop.f32.mrb[141].mxu0  ;;  %v4498_v56 = vadd.f32 %v4497_v22, %v4197_v52 }
 0x6cc   :  { %v4500_v0 = vadd.f32 %v4499_v23, %v4201_v19  ;;  %v4501_v25 = vpop.f32.mrb[142].mxu0  ;;  %5858 = vmatpush3.bf16.msra.mxu0 %v6941_v20 }
 0x6cd   :  { %v4502_v27 = vpop.f32.mrb[143].mxu0  ;;  %5859 = vmatprep.subr.bf16.mxu0 %v6942_v29  ;;  %v4549_v60 = vmax.f32 %v4498_v56, 0.0 }
 0x6ce   :  { %v4550_v34 = vmax.f32 %v4500_v0, 0.0  ;;  %v5601_v0 = vld [vmem:[%s8253_s10] ss:$0 sm:$0xff] }
 0x6cf   :  { %v4557_v1 = vpack.c.bf16 %v4549_v60, %v4549_v60 }
 0x6d0   :  { %5860 = vmatpush3.bf16.msra.mxu0 %v6943_v24  ;;  %v4558_v33 = vpack.c.bf16 %v4550_v34, %v4550_v34 }
 0x6d1   :  { %5867 = vmatprep.subr.bf16.mxu0 %v6944_v28 }
 0x6d3   :  { %5153 = vmatmul.mubr.bf16.vlgmr.msra.gmra.mrb[152].mxu0 %v4555_v31 }
 0x6d4   :  { %5868 = vmatpush3.bf16.msra.mxu0 %v6945_v30  ;;  %5192 = vmatprep.mubr.bf16.mxu0 %v4558_v33 }
 0x6d5   :  { %5869 = vmatprep.subr.bf16.mxu0 %v6946_v32 }
 0x6d8   :  { %5870 = vmatpush3.bf16.msra.mxu0 %v6947_v35 }
 0x6d9   :  { %5871 = vmatprep.subr.bf16.mxu0 %v6948_v36 }
 0x6da   :  { %v8153_v39 = vpop.f32.mrb[144].mxu0 }
 0x6db   :  { %v4540_v40 = vpop.f32.mrb[145].mxu0  ;;  %v4539_v16 = vadd.f32 %v8153_v39, %v4205_v14 }
 0x6dc   :  { %v4542_v41 = vpop.f32.mrb[146].mxu0  ;;  %5872 = vmatpush3.bf16.msra.mxu0 %v6949_v37  ;;  %v4541_v58 = vadd.f32 %v4540_v40, %v4209_v54 }
 0x6dd   :  { %v4543_v45 = vpop.f32.mrb[147].mxu0  ;;  %5873 = vmatprep.subr.bf16.mxu0 %v6950_v38  ;;  %v4551_v18 = vmax.f32 %v4539_v16, 0.0 }
 0x6de   :  { %v4552_v62 = vmax.f32 %v4541_v58, 0.0 }
 0x6df   :  { %v4559_v19 = vpack.c.bf16 %v4551_v18, %v4551_v18 }
 0x6e0   :  { %5874 = vmatpush3.bf16.msra.mxu0 %v6951_v43  ;;  %v4560_v3 = vpack.c.bf16 %v4552_v62, %v4552_v62 }
 0x6e1   :  { %5875 = vmatprep.subr.bf16.mxu0 %v6952_v46 }
 0x6e4   :  { %5876 = vmatpush3.bf16.msra.mxu0 %v6953_v47 }
 0x6e5   :  { %5877 = vmatprep.subr.bf16.mxu0 %v6954_v49 }
 0x6e8   :  { %5878 = vmatpush3.bf16.msra.mxu0 %v6955_v51 }
 0x6e9   :  { %5879 = vmatprep.subr.bf16.mxu0 %v6956_v53 }
 0x6ec   :  { %5880 = vmatpush3.bf16.msra.mxu0 %v6957_v55 }
 0x6ed   :  { %5881 = vmatprep.subr.bf16.mxu0 %v6958_v57 }
 0x6f0   :  { %5882 = vmatpush3.bf16.msra.mxu0 %v6959_v59 }
 0x6f1   :  { %5889 = vmatprep.subr.bf16.mxu0 %v6960_v61 }
 0x6f3   :  { %5193 = vmatmul.mubr.bf16.vlgmr.msra.gmra.mrb[156].mxu0 %v4557_v1 }
 0x6f4   :  { %5890 = vmatpush3.bf16.msra.mxu0 %v6961_v63  ;;  %5232 = vmatprep.mubr.bf16.mxu0 %v4560_v3 }
 0x6f5   :  { %5891 = vmatprep.subr.bf16.mxu0 %v6962_v2 }
 0x6f8   :  { %5892 = vmatpush3.bf16.msra.mxu0 %v6963_v4 }
 0x6f9   :  { %5893 = vmatprep.subr.bf16.mxu0 %v6964_v5 }
 0x6fc   :  { %5894 = vmatpush3.bf16.msra.mxu0 %v6965_v6 }
 0x6fd   :  { %5895 = vmatprep.subr.bf16.mxu0 %v6966_v7 }
 0x700   :  { %5896 = vmatpush3.bf16.msra.mxu0 %v6967_v8 }
 0x701   :  { %5897 = vmatprep.subr.bf16.mxu0 %v6968_v9 }
 0x704   :  { %5898 = vmatpush3.bf16.msra.mxu0 %v6969_v10 }
 0x705   :  { %5899 = vmatprep.subr.bf16.mxu0 %v6970_v12 }
 0x708   :  { %5900 = vmatpush3.bf16.msra.mxu0 %v6971_v13 }
 0x709   :  { %5901 = vmatprep.subr.bf16.mxu0 %v6972_v15 }
 0x70c   :  { %5902 = vmatpush3.bf16.msra.mxu0 %v6973_v42 }
 0x70d   :  { %5903 = vmatprep.subr.bf16.mxu0 %v6974_v17 }
 0x710   :  { %5904 = vmatpush3.bf16.msra.mxu0 %v6975_v44 }
 0x713   :  { %5233 = vmatmul.mubr.bf16.vlgmr.msra.gmra.mrb[160].mxu0 %v4559_v19 }
 0x786   :  { %v5839_v20 = vpop.f32.mrb[148].mxu0 }
 0x787   :  { %v5840_v21 = vpop.f32.mrb[149].mxu0 }
 0x788   :  { %v5841_v29 = vadd.f32 %v5840_v21, %v5839_v20  ;;  %v5842_v22 = vpop.f32.mrb[150].mxu0 }
 0x789   :  { %v5843_v23 = vpop.f32.mrb[151].mxu0 }
 0x78a   :  { %v5115_v26 = vadd.f32 %v5841_v29, %v5601_v0 }
 0x7a6   :  { %v5861_v25 = vpop.f32.mrb[152].mxu0 }
 0x7a7   :  { %v5862_v24 = vpop.f32.mrb[153].mxu0 }
 0x7a8   :  { %v5863_v27 = vadd.f32 %v5862_v24, %v5861_v25  ;;  %v5864_v28 = vpop.f32.mrb[154].mxu0 }
 0x7a9   :  { %v5865_v34 = vpop.f32.mrb[155].mxu0 }
 0x7aa   :  { %v5155_v30 = vadd.f32 %v5863_v27, %v5115_v26 }
 0x7c6   :  { %v5883_v31 = vpop.f32.mrb[156].mxu0 }
 0x7c7   :  { %v5884_v32 = vpop.f32.mrb[157].mxu0 }
 0x7c8   :  { %v5885_v33 = vadd.f32 %v5884_v32, %v5883_v31  ;;  %v5886_v35 = vpop.f32.mrb[158].mxu0 }
 0x7c9   :  { %v5887_v36 = vpop.f32.mrb[159].mxu0 }
 0x7ca   :  { %v5195_v37 = vadd.f32 %v5885_v33, %v5155_v30 }
 0x7e6   :  { %v5905_v38 = vpop.f32.mrb[160].mxu0 }
 0x7e7   :  { %v5906_v39 = vpop.f32.mrb[161].mxu0 }
 0x7e8   :  { %v5907_v40 = vadd.f32 %v5906_v39, %v5905_v38  ;;  %v5908_v41 = vpop.f32.mrb[162].mxu0 }
 0x7e9   :  { %v5909_v43 = vpop.f32.mrb[163].mxu0 }
 0x7ea   :  { %v5235_v45 = vadd.f32 %v5907_v40, %v5195_v37 }
 0x7ec   :  { %5240 = vst [vmem:[%s8254_s11] sm:$0xff] %v5235_v45 }

// kernel: _forward_impl.1
= control target key start
LH: loop header
LB: loop body
LE: loop exit
PB: predicated region body
PF: predicated region fallthrough
CT: control target
= control target key end

     0   :  { %v6977_v0 = vmov 0   ;;  %vm6979_vm0 = vmmov 0   ;;  %vm1039_vm1 = vcmask 257024   ;;  %vm1160_vm2 = vcmask 261120   ;;  %s8243_s1 = inlined_call_operand.vmem [shape: bf16[256,32], index: 1, kind: input, shape index: {}]   ;;  %s8244_s0 = inlined_call_operand.vmem [shape: s8[512,256], index: 0, kind: input, shape index: {}]   ;;  %s8245_s3 = inlined_call_operand.vmem [shape: bf16[512,64], index: 3, kind: input, shape index: {}]   ;;  %s8246_s2 = inlined_call_operand.vmem [shape: f32[1,32], index: 2, kind: input, shape index: {}]   ;;  %s8247_s5 = inlined_call_operand.vmem [shape: bf16[576,64], index: 5, kind: input, shape index: {}]   ;;  %s8248_s4 = inlined_call_operand.vmem [shape: f32[1,64], index: 4, kind: input, shape index: {}]   ;;  %s8249_s7 = inlined_call_operand.vmem [shape: bf16[64,1024], index: 7, kind: input, shape index: {}]   ;;  %s8250_s9 = inlined_call_operand.vmem [shape: bf16[1024,128], index: 9, kind: input, shape index: {}]   ;;  %s8251_s6 = inlined_call_operand.vmem [shape: f32[1,64], index: 6, kind: input, shape index: {}]   ;;  %s8252_s8 = inlined_call_operand.vmem [shape: f32[1,1024], index: 8, kind: input, shape index: {}]   ;;  %s8253_s10 = inlined_call_operand.vmem [shape: f32[1,128], index: 10, kind: input, shape index: {}]   ;;  %s8254_s11 = inlined_call_operand.vmem [shape: f32[8,128], index: 11, kind: output, shape index: {}]  }
   0x1   :  { %622 = vmatprep.subr.bf16.mxu0 %v6977_v0  ;;  %v6748_v1 = vld [vmem:[%s8243_s1] sm:$0xff]   ;;  %v6749_v2 = vld [vmem:[%s8243_s1 + $0x8] sm:$0xff]   ;;  %v6750_v3 = vld [vmem:[%s8243_s1 + $0x10] sm:$0xff]   ;;  %vm3482_vm3 = vcmask 523264  }
   0x2   :  { %623 = vmatpush1.bf16.msra.mxu0 %v6748_v1  ;;  %v6751_v4 = vld [vmem:[%s8243_s1 + $0x18] sm:$0xff]   ;;  %v6752_v5 = vld [vmem:[%s8243_s1 + $0x20] sm:$0xff]   ;;  %v6753_v9 = vld [vmem:[%s8243_s1 + $0x28] sm:$0xff]  }
   0x3   :  { %624 = vmatprep.subr.bf16.mxu0 %v6977_v0  ;;  %v39_v6 = vld [vmem:[%s8244_s0] sm:$0xff]   ;;  %v6754_v11 = vld [vmem:[%s8243_s1 + $0x30] sm:$0xff]   ;;  %v6755_v12 = vld [vmem:[%s8243_s1 + $0x38] sm:$0xff]  }
   0x4   :  { %v103_v7 = vunpack.c.l.s8.bf16 %v39_v6  ;;  %v104_v8 = vunpack.c.h.s8.bf16 %v39_v6  ;;  %v6756_v13 = vld [vmem:[%s8243_s1 + $0x40] sm:$0xff]   ;;  %v6757_v14 = vld [vmem:[%s8243_s1 + $0x48] sm:$0xff]   ;;  %v6758_v15 = vld [vmem:[%s8243_s1 + $0x50] sm:$0xff]  }
   0x5   :  { %v6759_v16 = vld [vmem:[%s8243_s1 + $0x58] sm:$0xff]   ;;  %v6760_v17 = vld [vmem:[%s8243_s1 + $0x60] sm:$0xff]   ;;  %v6761_v18 = vld [vmem:[%s8243_s1 + $0x68] sm:$0xff]  }
   0x6   :  { %625 = vmatpush1.bf16.msra.mxu0 %v6749_v2  ;;  %v5247_v10 = vcombine.high %v103_v7, %v104_v8  ;;  %v6762_v19 = vld [vmem:[%s8243_s1 + $0x70] sm:$0xff]   ;;  %v41_v20 = vld [vmem:[%s8244_s0 + $0x8] sm:$0xff]   ;;  %v6763_v21 = vld [vmem:[%s8243_s1 + $0x78] sm:$0xff]   ;;  %v5246_v24 = vcombine.low %v103_v7, %v104_v8 }
   0x7   :  { %626 = vmatprep.subr.bf16.mxu0 %v6977_v0  ;;  %v105_v22 = vunpack.c.l.s8.bf16 %v41_v20  ;;  %v106_v23 = vunpack.c.h.s8.bf16 %v41_v20  ;;  %v43_v26 = vld [vmem:[%s8244_s0 + $0x10] sm:$0xff]   ;;  %v45_v31 = vld [vmem:[%s8244_s0 + $0x18] sm:$0xff]   ;;  %v47_v36 = vld [vmem:[%s8244_s0 + $0x20] sm:$0xff]  }
   0x8   :  { %654 = vmatprep.mubr.bf16.mxu0 %v5247_v10  ;;  %v107_v27 = vunpack.c.l.s8.bf16 %v43_v26  ;;  %v108_v28 = vunpack.c.h.s8.bf16 %v43_v26  ;;  %v109_v32 = vunpack.c.l.s8.bf16 %v45_v31  ;;  %v110_v33 = vunpack.c.h.s8.bf16 %v45_v31  ;;  %v49_v41 = vld [vmem:[%s8244_s0 + $0x28] sm:$0xff]   ;;  %v51_v46 = vld [vmem:[%s8244_s0 + $0x30] sm:$0xff]   ;;  %v53_v51 = vld [vmem:[%s8244_s0 + $0x38] sm:$0xff]  }
   0x9   :  { %v5249_v25 = vcombine.high %v105_v22, %v106_v23  ;;  %v5248_v29 = vcombine.low %v105_v22, %v106_v23  ;;  %v111_v37 = vunpack.c.l.s8.bf16 %v47_v36  ;;  %v112_v38 = vunpack.c.h.s8.bf16 %v47_v36  ;;  %v55_v56 = vld [vmem:[%s8244_s0 + $0x40] sm:$0xff]   ;;  %v57_v61 = vld [vmem:[%s8244_s0 + $0x48] sm:$0xff]   ;;  %v61_v8 = vld [vmem:[%s8244_s0 + $0x58] sm:$0xff]  }
   0xa   :  { %627 = vmatpush1.bf16.msra.mxu0 %v6750_v3  ;;  %v5251_v30 = vcombine.high %v107_v27, %v108_v28  ;;  %v5250_v34 = vcombine.low %v107_v27, %v108_v28  ;;  %v5253_v35 = vcombine.high %v109_v32, %v110_v33  ;;  %v5252_v39 = vcombine.low %v109_v32, %v110_v33  ;;  %v59_v3 = vld [vmem:[%s8244_s0 + $0x50] sm:$0xff]   ;;  %v6764_v23 = vld [vmem:[%s8245_s3] sm:$0xff]   ;;  %v6765_v26 = vld [vmem:[%s8245_s3 + $0x8] sm:$0xff]  }
   0xb   :  { %628 = vmatprep.subr.bf16.mxu0 %v6977_v0  ;;  %v5255_v40 = vcombine.high %v111_v37, %v112_v38  ;;  %v113_v42 = vunpack.c.l.s8.bf16 %v49_v41  ;;  %v114_v43 = vunpack.c.h.s8.bf16 %v49_v41  ;;  %v5254_v44 = vcombine.low %v111_v37, %v112_v38  ;;  %v67_v22 = vld [vmem:[%s8244_s0 + $0x70] sm:$0xff]   ;;  %v73_v41 = vld [vmem:[%s8244_s0 + $0x88] sm:$0xff]  }
   0xc   :  { %v115_v47 = vunpack.c.l.s8.bf16 %v51_v46  ;;  %v116_v48 = vunpack.c.h.s8.bf16 %v51_v46  ;;  %v117_v52 = vunpack.c.l.s8.bf16 %v53_v51  ;;  %v118_v53 = vunpack.c.h.s8.bf16 %v53_v51  ;;  %v75_v46 = vld [vmem:[%s8244_s0 + $0x90] sm:$0xff]   ;;  %v77_v51 = vld [vmem:[%s8244_s0 + $0x98] sm:$0xff]  }
   0xd   :  { %v5257_v45 = vcombine.high %v113_v42, %v114_v43  ;;  %v5256_v49 = vcombine.low %v113_v42, %v114_v43  ;;  %v119_v57 = vunpack.c.l.s8.bf16 %v55_v56  ;;  %v120_v58 = vunpack.c.h.s8.bf16 %v55_v56  ;;  %v79_v56 = vld [vmem:[%s8244_s0 + $0xa0] sm:$0xff]  }
   0xe   :  { %629 = vmatpush1.bf16.msra.mxu0 %v6751_v4  ;;  %v5259_v50 = vcombine.high %v115_v47, %v116_v48  ;;  %v5258_v54 = vcombine.low %v115_v47, %v116_v48  ;;  %v5261_v55 = vcombine.high %v117_v52, %v118_v53  ;;  %v5260_v59 = vcombine.low %v117_v52, %v118_v53 }
   0xf   :  { %630 = vmatprep.subr.bf16.mxu0 %v6977_v0  ;;  %v5263_v60 = vcombine.high %v119_v57, %v120_v58  ;;  %v121_v62 = vunpack.c.l.s8.bf16 %v57_v61  ;;  %v122_v63 = vunpack.c.h.s8.bf16 %v57_v61  ;;  %v5262_v1 = vcombine.low %v119_v57, %v120_v58  ;;  %v81_v61 = vld [vmem:[%s8244_s0 + $0xa8] sm:$0xff]  }
  0x10   :  { %v123_v4 = vunpack.c.l.s8.bf16 %v59_v3  ;;  %v126_v10 = vunpack.c.h.s8.bf16 %v61_v8  ;;  %v131_v27 = vunpack.c.l.s8.bf16 %v67_v22  ;;  %v132_v28 = vunpack.c.h.s8.bf16 %v67_v22 }
  0x11   :  { %v5265_v2 = vcombine.high %v121_v62, %v122_v63  ;;  %v5264_v6 = vcombine.low %v121_v62, %v122_v63  ;;  %v137_v42 = vunpack.c.l.s8.bf16 %v73_v41  ;;  %v138_v43 = vunpack.c.h.s8.bf16 %v73_v41 }
  0x12   :  { %631 = vmatpush1.bf16.msra.mxu0 %v6752_v5  ;;  %v124_v5 = vunpack.c.h.s8.bf16 %v59_v3  ;;  %v5275_v31 = vcombine.high %v131_v27, %v132_v28  ;;  %v139_v47 = vunpack.c.l.s8.bf16 %v75_v46  ;;  %v140_v48 = vunpack.c.h.s8.bf16 %v75_v46  ;;  %v83_v3 = vld [vmem:[%s8244_s0 + $0xb0] sm:$0xff]  }
  0x13   :  { %632 = vmatprep.subr.bf16.mxu0 %v6977_v0  ;;  %v141_v52 = vunpack.c.l.s8.bf16 %v77_v51  ;;  %v142_v53 = vunpack.c.h.s8.bf16 %v77_v51  ;;  %v143_v57 = vunpack.c.l.s8.bf16 %v79_v56  ;;  %v144_v58 = vunpack.c.h.s8.bf16 %v79_v56  ;;  %v6769_v56 = vld [vmem:[%s8245_s3 + $0x10] sm:$0xff]  }
  0x14   :  { %v5267_v7 = vcombine.high %v123_v4, %v124_v5  ;;  %v145_v62 = vunpack.c.l.s8.bf16 %v81_v61  ;;  %v146_v63 = vunpack.c.h.s8.bf16 %v81_v61 }
  0x16   :  { %633 = vmatpush1.bf16.msra.mxu0 %v6753_v9  ;;  %v125_v9 = vunpack.c.l.s8.bf16 %v61_v8  ;;  %v85_v8 = vld [vmem:[%s8244_s0 + $0xb8] sm:$0xff]  }
  0x17   :  { %634 = vmatprep.subr.bf16.mxu0 %v6977_v0 }
  0x1a   :  { %635 = vmatpush1.bf16.msra.mxu0 %v6754_v11  ;;  %v5266_v11 = vcombine.low %v123_v4, %v124_v5  ;;  %v147_v4 = vunpack.c.l.s8.bf16 %v83_v3  ;;  %v148_v5 = vunpack.c.h.s8.bf16 %v83_v3 }
  0x1b   :  { %636 = vmatprep.subr.bf16.mxu0 %v6977_v0 }
  0x1e   :  { %637 = vmatpush1.bf16.msra.mxu0 %v6755_v12  ;;  %v5269_v12 = vcombine.high %v125_v9, %v126_v10 }
  0x1f   :  { %638 = vmatprep.subr.bf16.mxu0 %v6977_v0 }
  0x22   :  { %639 = vmatpush1.bf16.msra.mxu0 %v6756_v13  ;;  %v63_v13 = vld [vmem:[%s8244_s0 + $0x60] sm:$0xff]  }
  0x23   :  { %640 = vmatprep.subr.bf16.mxu0 %v6977_v0 }
  0x26   :  { %641 = vmatpush1.bf16.msra.mxu0 %v6757_v14  ;;  %v127_v14 = vunpack.c.l.s8.bf16 %v63_v13 }
  0x27   :  { %642 = vmatprep.subr.bf16.mxu0 %v6977_v0 }
  0x2a   :  { %643 = vmatpush1.bf16.msra.mxu0 %v6758_v15  ;;  %v128_v15 = vunpack.c.h.s8.bf16 %v63_v13  ;;  %v87_v13 = vld [vmem:[%s8244_s0 + $0xc0] sm:$0xff]  }
  0x2b   :  { %644 = vmatprep.subr.bf16.mxu0 %v6977_v0 }
  0x2e   :  { %645 = vmatpush1.bf16.msra.mxu0 %v6759_v16  ;;  %v5268_v16 = vcombine.low %v125_v9, %v126_v10  ;;  %v149_v9 = vunpack.c.l.s8.bf16 %v85_v8  ;;  %v150_v10 = vunpack.c.h.s8.bf16 %v85_v8 }
  0x2f   :  { %646 = vmatprep.subr.bf16.mxu0 %v6977_v0 }
  0x32   :  { %647 = vmatpush1.bf16.msra.mxu0 %v6760_v17  ;;  %v5271_v17 = vcombine.high %v127_v14, %v128_v15 }
  0x33   :  { %648 = vmatprep.subr.bf16.mxu0 %v6977_v0 }
  0x36   :  { %649 = vmatpush1.bf16.msra.mxu0 %v6761_v18  ;;  %v65_v18 = vld [vmem:[%s8244_s0 + $0x68] sm:$0xff]  }
  0x37   :  { %650 = vmatprep.subr.bf16.mxu0 %v6977_v0  ;;  %v130_v20 = vunpack.c.h.s8.bf16 %v65_v18 }
  0x3a   :  { %651 = vmatpush1.bf16.msra.mxu0 %v6762_v19  ;;  %v129_v19 = vunpack.c.l.s8.bf16 %v65_v18  ;;  %v89_v18 = vld [vmem:[%s8244_s0 + $0xc8] sm:$0xff]  }
  0x3b   :  { %652 = vmatprep.subr.bf16.mxu0 %v6977_v0 }
  0x3e   :  { %653 = vmatpush1.bf16.msra.mxu0 %v6763_v21  ;;  %v5270_v21 = vcombine.low %v127_v14, %v128_v15  ;;  %v151_v14 = vunpack.c.l.s8.bf16 %v87_v13  ;;  %v152_v15 = vunpack.c.h.s8.bf16 %v87_v13 }
  0x41   :  { %655 = vmatmul.mubr.bf16.vlgmr.msra.gmra.mrb[0].mxu0 %v5246_v24  ;;  %v5273_v24 = vcombine.high %v129_v19, %v130_v20 }
  0x42   :  { %662 = vmatprep.mubr.bf16.mxu0 %v5249_v25  ;;  %v6978_v25 = vmov 0.0  }
  0x43   :  { %5911 = vmatprep.subr.bf16.mxu1 %v6978_v25  ;;  %6295 = vmatprep.subr.bf16.mxu0 %v6978_v25 }
  0x44   :  { %5912 = vmatpush3.bf16.msra.mxu1 %v6764_v23  ;;  %5915 = vmatprep.mubr.msk.bf16.mxu1 %vm6979_vm0, %v6978_v25  ;;  %v91_v23 = vld [vmem:[%s8244_s0 + $0xd0] sm:$0xff]  }
  0x45   :  { %5913 = vmatprep.subr.bf16.mxu1 %v6978_v25 }
  0x48   :  { %5914 = vmatpush3.bf16.msra.mxu1 %v6765_v26  ;;  %v156_v26 = vunpack.c.h.s8.bf16 %v91_v23 }
  0x49   :  { %663 = vmatmul.mubr.bf16.gmra.mrb[4].mxu0 %v5248_v29  ;;  %5935 = vmatprep.subr.bf16.mxu1 %v6978_v25  ;;  %v5272_v29 = vcombine.low %v129_v19, %v130_v20  ;;  %v153_v19 = vunpack.c.l.s8.bf16 %v89_v18  ;;  %v154_v20 = vunpack.c.h.s8.bf16 %v89_v18 }
  0x4a   :  { %670 = vmatprep.mubr.bf16.mxu0 %v5251_v30  ;;  %v69_v30 = vld [vmem:[%s8244_s0 + $0x78] sm:$0xff]  }
  0x4b   :  { %v133_v32 = vunpack.c.l.s8.bf16 %v69_v30  ;;  %v134_v33 = vunpack.c.h.s8.bf16 %v69_v30  ;;  %v5297_v22 = vcombine.high %v153_v19, %v154_v20 }
  0x4d   :  { %v5277_v36 = vcombine.high %v133_v32, %v134_v33 }
  0x51   :  { %671 = vmatmul.mubr.bf16.gmra.mrb[8].mxu0 %v5250_v34  ;;  %v5274_v34 = vcombine.low %v131_v27, %v132_v28  ;;  %v5296_v27 = vcombine.low %v153_v19, %v154_v20 }
  0x52   :  { %678 = vmatprep.mubr.bf16.mxu0 %v5253_v35  ;;  %v71_v35 = vld [vmem:[%s8244_s0 + $0x80] sm:$0xff]  }
  0x53   :  { %v135_v37 = vunpack.c.l.s8.bf16 %v71_v35  ;;  %v136_v38 = vunpack.c.h.s8.bf16 %v71_v35 }
  0x59   :  { %679 = vmatmul.mubr.bf16.gmra.mrb[12].mxu0 %v5252_v39  ;;  %v5276_v39 = vcombine.low %v133_v32, %v134_v33 }
  0x5a   :  { %686 = vmatprep.mubr.bf16.mxu0 %v5255_v40  ;;  %v5279_v40 = vcombine.high %v135_v37, %v136_v38 }
  0x61   :  { %687 = vmatmul.mubr.bf16.gmra.mrb[16].mxu0 %v5254_v44  ;;  %v5278_v44 = vcombine.low %v135_v37, %v136_v38 }
  0x62   :  { %694 = vmatprep.mubr.bf16.mxu0 %v5257_v45  ;;  %v5281_v45 = vcombine.high %v137_v42, %v138_v43 }
  0x69   :  { %695 = vmatmul.mubr.bf16.gmra.mrb[20].mxu0 %v5256_v49  ;;  %v5280_v49 = vcombine.low %v137_v42, %v138_v43 }
  0x6a   :  { %702 = vmatprep.mubr.bf16.mxu0 %v5259_v50  ;;  %v5283_v50 = vcombine.high %v139_v47, %v140_v48 }
  0x71   :  { %703 = vmatmul.mubr.bf16.gmra.mrb[24].mxu0 %v5258_v54  ;;  %v5282_v54 = vcombine.low %v139_v47, %v140_v48 }
  0x72   :  { %710 = vmatprep.mubr.bf16.mxu0 %v5261_v55  ;;  %v5285_v55 = vcombine.high %v141_v52, %v142_v53 }
  0x79   :  { %711 = vmatmul.mubr.bf16.gmra.mrb[28].mxu0 %v5260_v59  ;;  %v5284_v59 = vcombine.low %v141_v52, %v142_v53 }
  0x7a   :  { %718 = vmatprep.mubr.bf16.mxu0 %v5263_v60  ;;  %v5287_v60 = vcombine.high %v143_v57, %v144_v58 }
  0x81   :  { %719 = vmatmul.mubr.bf16.gmra.mrb[32].mxu0 %v5262_v1  ;;  %v5286_v1 = vcombine.low %v143_v57, %v144_v58 }
  0x82   :  { %726 = vmatprep.mubr.bf16.mxu0 %v5265_v2  ;;  %v5289_v2 = vcombine.high %v145_v62, %v146_v63 }
  0x89   :  { %727 = vmatmul.mubr.bf16.gmra.mrb[36].mxu0 %v5264_v6  ;;  %v5288_v6 = vcombine.low %v145_v62, %v146_v63 }
  0x8a   :  { %734 = vmatprep.mubr.bf16.mxu0 %v5267_v7  ;;  %v5291_v7 = vcombine.high %v147_v4, %v148_v5 }
  0x91   :  { %735 = vmatmul.mubr.bf16.gmra.mrb[40].mxu0 %v5266_v11  ;;  %v5290_v11 = vcombine.low %v147_v4, %v148_v5 }
  0x92   :  { %742 = vmatprep.mubr.bf16.mxu0 %v5269_v12  ;;  %v5293_v12 = vcombine.high %v149_v9, %v150_v10 }
  0x99   :  { %743 = vmatmul.mubr.bf16.gmra.mrb[44].mxu0 %v5268_v16  ;;  %v5292_v16 = vcombine.low %v149_v9, %v150_v10 }
  0x9a   :  { %750 = vmatprep.mubr.bf16.mxu0 %v5271_v17  ;;  %v5295_v17 = vcombine.high %v151_v14, %v152_v15 }
  0xa1   :  { %751 = vmatmul.mubr.bf16.gmra.mrb[48].mxu0 %v5270_v21  ;;  %v5294_v21 = vcombine.low %v151_v14, %v152_v15 }
  0xa2   :  { %758 = vmatprep.mubr.bf16.mxu0 %v5273_v24  ;;  %v155_v24 = vunpack.c.l.s8.bf16 %v91_v23 }
  0xa4   :  { %v5299_v28 = vcombine.high %v155_v24, %v156_v26  ;;  %v5298_v32 = vcombine.low %v155_v24, %v156_v26 }
  0xa9   :  { %759 = vmatmul.mubr.bf16.gmra.mrb[52].mxu0 %v5272_v29  ;;  %v93_v29 = vld [vmem:[%s8244_s0 + $0xd8] sm:$0xff]  }
  0xaa   :  { %766 = vmatprep.mubr.bf16.mxu0 %v5275_v31  ;;  %v157_v30 = vunpack.c.l.s8.bf16 %v93_v29  ;;  %v158_v31 = vunpack.c.h.s8.bf16 %v93_v29 }
  0xac   :  { %v5301_v33 = vcombine.high %v157_v30, %v158_v31  ;;  %v5300_v38 = vcombine.low %v157_v30, %v158_v31 }
  0xb1   :  { %767 = vmatmul.mubr.bf16.gmra.mrb[56].mxu0 %v5274_v34  ;;  %v7203_v34 = vld [vmem:[%s8246_s2] ss:$0 sm:$0xff] }
  0xb2   :  { %774 = vmatprep.mubr.bf16.mxu0 %v5277_v36 }
  0xb9   :  { %775 = vmatmul.mubr.bf16.gmra.mrb[60].mxu0 %v5276_v39 }
  0xba   :  { %782 = vmatprep.mubr.bf16.mxu0 %v5279_v40 }
  0xc1   :  { %783 = vmatmul.mubr.bf16.gmra.mrb[64].mxu0 %v5278_v44 }
  0xc2   :  { %790 = vmatprep.mubr.bf16.mxu0 %v5281_v45 }
  0xc9   :  { %791 = vmatmul.mubr.bf16.gmra.mrb[68].mxu0 %v5280_v49 }
  0xca   :  { %798 = vmatprep.mubr.bf16.mxu0 %v5283_v50 }
  0xd1   :  { %799 = vmatmul.mubr.bf16.gmra.mrb[72].mxu0 %v5282_v54 }
  0xd2   :  { %806 = vmatprep.mubr.bf16.mxu0 %v5285_v55 }
  0xd9   :  { %807 = vmatmul.mubr.bf16.gmra.mrb[76].mxu0 %v5284_v59 }
  0xda   :  { %814 = vmatprep.mubr.bf16.mxu0 %v5287_v60 }
  0xe1   :  { %815 = vmatmul.mubr.bf16.gmra.mrb[80].mxu0 %v5286_v1 }
  0xe2   :  { %822 = vmatprep.mubr.bf16.mxu0 %v5289_v2  ;;  %v6770_v2 = vld [vmem:[%s8245_s3 + $0x18] sm:$0xff]  }
  0xe9   :  { %823 = vmatmul.mubr.bf16.gmra.mrb[84].mxu0 %v5288_v6 }
  0xea   :  { %830 = vmatprep.mubr.bf16.mxu0 %v5291_v7 }
  0xf1   :  { %831 = vmatmul.mubr.bf16.gmra.mrb[88].mxu0 %v5290_v11 }
  0xf2   :  { %838 = vmatprep.mubr.bf16.mxu0 %v5293_v12 }
  0xf9   :  { %839 = vmatmul.mubr.bf16.gmra.mrb[92].mxu0 %v5292_v16 }
  0xfa   :  { %846 = vmatprep.mubr.bf16.mxu0 %v5295_v17 }
 0x101   :  { %847 = vmatmul.mubr.bf16.gmra.mrb[96].mxu0 %v5294_v21 }
 0x102   :  { %854 = vmatprep.mubr.bf16.mxu0 %v5297_v22 }
 0x109   :  { %855 = vmatmul.mubr.bf16.gmra.mrb[100].mxu0 %v5296_v27 }
 0x10a   :  { %862 = vmatprep.mubr.bf16.mxu0 %v5299_v28 }
 0x111   :  { %863 = vmatmul.mubr.bf16.gmra.mrb[104].mxu0 %v5298_v32 }
 0x112   :  { %870 = vmatprep.mubr.bf16.mxu0 %v5301_v33 }
 0x114   :  { %v656_v35 = vpop.f32.mrb[0].mxu0 }
 0x115   :  { %v657_v36 = vadd.f32 %v7203_v34, %v656_v35  ;;  %v658_v37 = vpop.f32.mrb[1].mxu0 }
 0x116   :  { %v659_v39 = vpop.f32.mrb[2].mxu0 }
 0x117   :  { %v911_v40 = vmax.f32 %v657_v36, 0.0  ;;  %v660_v41 = vadd.f32 %v7203_v34, %v659_v39  ;;  %v661_v42 = vpop.f32.mrb[3].mxu0 }
 0x119   :  { %v975_v43 = vpack.c.bf16 %v911_v40, %v911_v40  ;;  %v912_v44 = vmax.f32 %v660_v41, 0.0  ;;  %871 = vmatmul.mubr.bf16.gmra.mrb[108].mxu0 %v5300_v38 }
 0x11b   :  { %1040 = vst.msk [vmem:[#allocation2] sm:$0xf] %vm1039_vm1, %v975_v43  ;;  %v976_v45 = vpack.c.bf16 %v912_v44, %v912_v44 }
 0x11c   :  { %v664_v46 = vpop.f32.mrb[4].mxu0 }
 0x11d   :  { %1041 = vst.msk [vmem:[#allocation2 + $0x4] sm:$0xf] %vm1039_vm1, %v976_v45  ;;  %v665_v47 = vadd.f32 %v7203_v34, %v664_v46  ;;  %v666_v48 = vpop.f32.mrb[5].mxu0 }
 0x11e   :  { %v667_v49 = vpop.f32.mrb[6].mxu0 }
 0x11f   :  { %v913_v50 = vmax.f32 %v665_v47, 0.0  ;;  %v668_v51 = vadd.f32 %v7203_v34, %v667_v49  ;;  %v669_v52 = vpop.f32.mrb[7].mxu0 }
 0x121   :  { %v977_v53 = vpack.c.bf16 %v913_v50, %v913_v50  ;;  %v914_v54 = vmax.f32 %v668_v51, 0.0 }
 0x123   :  { %1042 = vst.msk [vmem:[#allocation2 + $0x8] sm:$0xf] %vm1039_vm1, %v977_v53  ;;  %v978_v55 = vpack.c.bf16 %v914_v54, %v914_v54 }
 0x124   :  { %v672_v57 = vpop.f32.mrb[8].mxu0  ;;  %v6766_v58 = vld [vmem:[#allocation2] sm:$0xff]  }
 0x125   :  { %1043 = vst.msk [vmem:[#allocation2 + $0xc] sm:$0xf] %vm1039_vm1, %v978_v55  ;;  %v673_v59 = vadd.f32 %v7203_v34, %v672_v57  ;;  %v674_v60 = vpop.f32.mrb[9].mxu0  ;;  %5916 = vmatmul.mubr.msk.bf16.vlgmr.msra.gmra.mrb[0].mxu1 %vm1160_vm2, %v6766_v58 }
 0x126   :  { %v675_v61 = vpop.f32.mrb[10].mxu0  ;;  %5919 = vmatprep.mubr.msk.bf16.mxu1 %vm6979_vm0, %v6978_v25  ;;  %5936 = vmatpush3.bf16.msra.mxu1 %v6769_v56 }
 0x127   :  { %v915_v62 = vmax.f32 %v673_v59, 0.0  ;;  %v676_v63 = vadd.f32 %v7203_v34, %v675_v61  ;;  %v677_v1 = vpop.f32.mrb[11].mxu0  ;;  %5937 = vmatprep.subr.bf16.mxu1 %v6978_v25 }
 0x129   :  { %v979_v3 = vpack.c.bf16 %v915_v62, %v915_v62  ;;  %v916_v4 = vmax.f32 %v676_v63, 0.0 }
 0x12a   :  { %5938 = vmatpush3.bf16.msra.mxu1 %v6770_v2 }
 0x12b   :  { %1044 = vst.msk [vmem:[#allocation2 + $0x10] sm:$0xf] %vm1039_vm1, %v979_v3  ;;  %v980_v5 = vpack.c.bf16 %v916_v4, %v916_v4  ;;  %5959 = vmatprep.subr.bf16.mxu1 %v6978_v25 }
 0x12c   :  { %v680_v6 = vpop.f32.mrb[12].mxu0 }
 0x12d   :  { %1045 = vst.msk [vmem:[#allocation2 + $0x14] sm:$0xf] %vm1039_vm1, %v980_v5  ;;  %v681_v7 = vadd.f32 %v7203_v34, %v680_v6  ;;  %v682_v8 = vpop.f32.mrb[13].mxu0 }
 0x12e   :  { %v683_v9 = vpop.f32.mrb[14].mxu0 }
 0x12f   :  { %v917_v10 = vmax.f32 %v681_v7, 0.0  ;;  %v684_v11 = vadd.f32 %v7203_v34, %v683_v9  ;;  %v685_v12 = vpop.f32.mrb[15].mxu0 }
 0x131   :  { %v981_v13 = vpack.c.bf16 %v917_v10, %v917_v10  ;;  %v918_v14 = vmax.f32 %v684_v11, 0.0 }
 0x133   :  { %1046 = vst.msk [vmem:[#allocation2 + $0x18] sm:$0xf] %vm1039_vm1, %v981_v13  ;;  %v982_v15 = vpack.c.bf16 %v918_v14, %v918_v14 }
 0x134   :  { %v688_v16 = vpop.f32.mrb[16].mxu0 }
 0x135   :  { %1047 = vst.msk [vmem:[#allocation2 + $0x1c] sm:$0xf] %vm1039_vm1, %v982_v15  ;;  %v689_v17 = vadd.f32 %v7203_v34, %v688_v16  ;;  %v690_v18 = vpop.f32.mrb[17].mxu0 }
 0x136   :  { %v691_v19 = vpop.f32.mrb[18].mxu0 }
 0x137   :  { %v919_v20 = vmax.f32 %v689_v17, 0.0  ;;  %v692_v21 = vadd.f32 %v7203_v34, %v691_v19  ;;  %v693_v22 = vpop.f32.mrb[19].mxu0 }
 0x139   :  { %v983_v23 = vpack.c.bf16 %v919_v20, %v919_v20  ;;  %v920_v24 = vmax.f32 %v692_v21, 0.0 }
 0x13b   :  { %1048 = vst.msk [vmem:[#allocation2 + $0x20] sm:$0xf] %vm1039_vm1, %v983_v23  ;;  %v984_v26 = vpack.c.bf16 %v920_v24, %v920_v24 }
 0x13c   :  { %v696_v27 = vpop.f32.mrb[20].mxu0 }
 0x13d   :  { %1049 = vst.msk [vmem:[#allocation2 + $0x24] sm:$0xf] %vm1039_vm1, %v984_v26  ;;  %v697_v28 = vadd.f32 %v7203_v34, %v696_v27  ;;  %v698_v29 = vpop.f32.mrb[21].mxu0 }
 0x13e   :  { %v699_v30 = vpop.f32.mrb[22].mxu0 }
 0x13f   :  { %v921_v31 = vmax.f32 %v697_v28, 0.0  ;;  %v700_v32 = vadd.f32 %v7203_v34, %v699_v30  ;;  %v701_v33 = vpop.f32.mrb[23].mxu0 }
 0x141   :  { %v985_v35 = vpack.c.bf16 %v921_v31, %v921_v31  ;;  %v922_v36 = vmax.f32 %v700_v32, 0.0 }
 0x142   :  { %v6767_v37 = vld [vmem:[#allocation2 + $0x8] ss:$24 sps:$4 sm:$0xff]  }
 0x143   :  { %1050 = vst.msk [vmem:[#allocation2 + $0x28] sm:$0xf] %vm1039_vm1, %v985_v35  ;;  %v986_v38 = vpack.c.bf16 %v922_v36, %v922_v36  ;;  %5920 = vmatmul.mubr.msk.bf16.gmra.mrb[4].mxu1 %vm1160_vm2, %v6767_v37 }
 0x144   :  { %v704_v39 = vpop.f32.mrb[24].mxu0  ;;  %5923 = vmatprep.mubr.msk.bf16.mxu1 %vm6979_vm0, %v6978_v25 }
 0x145   :  { %1051 = vst.msk [vmem:[#allocation2 + $0x2c] sm:$0xf] %vm1039_vm1, %v986_v38  ;;  %v705_v40 = vadd.f32 %v7203_v34, %v704_v39  ;;  %v706_v41 = vpop.f32.mrb[25].mxu0 }
 0x146   :  { %v707_v42 = vpop.f32.mrb[26].mxu0 }
 0x147   :  { %v923_v43 = vmax.f32 %v705_v40, 0.0  ;;  %v708_v44 = vadd.f32 %v7203_v34, %v707_v42  ;;  %v709_v45 = vpop.f32.mrb[27].mxu0  ;;  %v6774_v40 = vld [vmem:[%s8245_s3 + $0x20] sm:$0xff]   ;;  %v6773_v42 = vld [vmem:[#allocation2 + $0x10] sm:$0xff]  }
 0x149   :  { %v987_v46 = vpack.c.bf16 %v923_v43, %v923_v43  ;;  %v924_v47 = vmax.f32 %v708_v44, 0.0 }
 0x14a   :  { %v6768_v48 = vld [vmem:[#allocation2 + $0x24] sm:$0xff]  }
 0x14b   :  { %1052 = vst.msk [vmem:[#allocation2 + $0x30] sm:$0xf] %vm1039_vm1, %v987_v46  ;;  %v988_v49 = vpack.c.bf16 %v924_v47, %v924_v47  ;;  %5924 = vmatmul.mubr.msk.bf16.gmra.mrb[8].mxu1 %vm1160_vm2, %v6768_v48  ;;  %v6777_v47 = vld [vmem:[%s8245_s3 + $0x28] sm:$0xff]  }
 0x14c   :  { %v712_v50 = vpop.f32.mrb[28].mxu0  ;;  %5927 = vmatprep.mubr.msk.bf16.mxu1 %vm6979_vm0, %v6978_v25 }
 0x14d   :  { %1053 = vst.msk [vmem:[#allocation2 + $0x34] sm:$0xf] %vm1039_vm1, %v988_v49  ;;  %v713_v51 = vadd.f32 %v7203_v34, %v712_v50  ;;  %v714_v52 = vpop.f32.mrb[29].mxu0 }
 0x14e   :  { %v715_v53 = vpop.f32.mrb[30].mxu0 }
 0x14f   :  { %v925_v54 = vmax.f32 %v713_v51, 0.0  ;;  %v716_v55 = vadd.f32 %v7203_v34, %v715_v53  ;;  %v717_v56 = vpop.f32.mrb[31].mxu0 }
 0x151   :  { %v989_v57 = vpack.c.bf16 %v925_v54, %v925_v54  ;;  %v926_v58 = vmax.f32 %v716_v55, 0.0 }
 0x152   :  { %v6775_v54 = vld [vmem:[#allocation2 + $0x18] ss:$24 sps:$4 sm:$0xff]  }
 0x153   :  { %1054 = vst.msk [vmem:[#allocation2 + $0x38] sm:$0xf] %vm1039_vm1, %v989_v57  ;;  %v990_v59 = vpack.c.bf16 %v926_v58, %v926_v58 }
 0x154   :  { %v720_v60 = vpop.f32.mrb[32].mxu0 }
 0x155   :  { %1055 = vst.msk [vmem:[#allocation2 + $0x3c] sm:$0xf] %vm1039_vm1, %v990_v59  ;;  %v721_v61 = vadd.f32 %v7203_v34, %v720_v60  ;;  %v722_v62 = vpop.f32.mrb[33].mxu0 }
 0x156   :  { %v723_v63 = vpop.f32.mrb[34].mxu0 }
 0x157   :  { %v927_v1 = vmax.f32 %v721_v61, 0.0  ;;  %v724_v2 = vadd.f32 %v7203_v34, %v723_v63  ;;  %v725_v3 = vpop.f32.mrb[35].mxu0 }
 0x159   :  { %v991_v4 = vpack.c.bf16 %v927_v1, %v927_v1  ;;  %v928_v5 = vmax.f32 %v724_v2, 0.0 }
 0x15a   :  { %v6776_v2 = vld [vmem:[#allocation2 + $0x34] sm:$0xff]  }
 0x15b   :  { %1056 = vst.msk [vmem:[#allocation2 + $0x40] sm:$0xf] %vm1039_vm1, %v991_v4  ;;  %v992_v6 = vpack.c.bf16 %v928_v5, %v928_v5 }
 0x15c   :  { %v728_v7 = vpop.f32.mrb[36].mxu0 }
 0x15d   :  { %1057 = vst.msk [vmem:[#allocation2 + $0x44] sm:$0xf] %vm1039_vm1, %v992_v6  ;;  %v729_v8 = vadd.f32 %v7203_v34, %v728_v7  ;;  %v730_v9 = vpop.f32.mrb[37].mxu0 }
 0x15e   :  { %v731_v10 = vpop.f32.mrb[38].mxu0 }
 0x15f   :  { %v929_v11 = vmax.f32 %v729_v8, 0.0  ;;  %v732_v12 = vadd.f32 %v7203_v34, %v731_v10  ;;  %v733_v13 = vpop.f32.mrb[39].mxu0 }
 0x161   :  { %v993_v14 = vpack.c.bf16 %v929_v11, %v929_v11  ;;  %v930_v15 = vmax.f32 %v732_v12, 0.0 }
 0x163   :  { %1058 = vst.msk [vmem:[#allocation2 + $0x48] sm:$0xf] %vm1039_vm1, %v993_v14  ;;  %v994_v16 = vpack.c.bf16 %v930_v15, %v930_v15 }
 0x164   :  { %v736_v17 = vpop.f32.mrb[40].mxu0  ;;  %v6771_v18 = vld [vmem:[#allocation2 + $0x40] sm:$0xff]  }
 0x165   :  { %1059 = vst.msk [vmem:[#allocation2 + $0x4c] sm:$0xf] %vm1039_vm1, %v994_v16  ;;  %v737_v19 = vadd.f32 %v7203_v34, %v736_v17  ;;  %v738_v20 = vpop.f32.mrb[41].mxu0  ;;  %5928 = vmatmul.mubr.msk.bf16.gmra.mrb[12].mxu1 %vm1160_vm2, %v6771_v18 }
 0x166   :  { %v739_v21 = vpop.f32.mrb[42].mxu0  ;;  %5931 = vmatprep.mubr.msk.bf16.mxu1 %vm6979_vm0, %v6978_v25 }
 0x167   :  { %v931_v22 = vmax.f32 %v737_v19, 0.0  ;;  %v740_v23 = vadd.f32 %v7203_v34, %v739_v21  ;;  %v741_v24 = vpop.f32.mrb[43].mxu0 }
 0x169   :  { %v995_v26 = vpack.c.bf16 %v931_v22, %v931_v22  ;;  %v932_v27 = vmax.f32 %v740_v23, 0.0 }
 0x16a   :  { %v6772_v28 = vld [vmem:[#allocation2 + $0x48] ss:$0 sps:$4 sm:$0xff]  }
 0x16b   :  { %1060 = vst.msk [vmem:[#allocation2 + $0x50] sm:$0xf] %vm1039_vm1, %v995_v26  ;;  %v996_v29 = vpack.c.bf16 %v932_v27, %v932_v27 }
 0x16c   :  { %v744_v30 = vpop.f32.mrb[44].mxu0 }
 0x16d   :  { %1061 = vst.msk [vmem:[#allocation2 + $0x54] sm:$0xf] %vm1039_vm1, %v996_v29  ;;  %v745_v31 = vadd.f32 %v7203_v34, %v744_v30  ;;  %v746_v32 = vpop.f32.mrb[45].mxu0  ;;  %5932 = vmatmul.mubr.msk.bf16.gmra.mrb[16].mxu1 %vm1160_vm2, %v6772_v28 }
 0x16e   :  { %v747_v33 = vpop.f32.mrb[46].mxu0  ;;  %5939 = vmatprep.mubr.msk.bf16.mxu1 %vm6979_vm0, %v6978_v25 }
 0x16f   :  { %v933_v35 = vmax.f32 %v745_v31, 0.0  ;;  %v748_v36 = vadd.f32 %v7203_v34, %v747_v33  ;;  %v749_v37 = vpop.f32.mrb[47].mxu0 }
 0x171   :  { %v997_v38 = vpack.c.bf16 %v933_v35, %v933_v35  ;;  %v934_v39 = vmax.f32 %v748_v36, 0.0  ;;  %v6781_v36 = vld [vmem:[%s8245_s3 + $0x30] sm:$0xff]  }
 0x173   :  { %1062 = vst.msk [vmem:[#allocation2 + $0x58] sm:$0xf] %vm1039_vm1, %v997_v38  ;;  %v998_v41 = vpack.c.bf16 %v934_v39, %v934_v39  ;;  %v6780_v38 = vld [vmem:[#allocation2 + $0x4] sm:$0xff]  }
 0x174   :  { %v752_v43 = vpop.f32.mrb[48].mxu0  ;;  %v6778_v13 = vld [vmem:[#allocation2 + $0x50] sm:$0xff]  }
 0x175   :  { %1063 = vst.msk [vmem:[#allocation2 + $0x5c] sm:$0xf] %vm1039_vm1, %v998_v41  ;;  %v753_v44 = vadd.f32 %v7203_v34, %v752_v43  ;;  %v754_v45 = vpop.f32.mrb[49].mxu0  ;;  %5940 = vmatmul.mubr.msk.bf16.vlgmr.msra.gmra.mrb[0].mxu1 %vm1160_vm2, %v6773_v42 }
 0x176   :  { %v755_v46 = vpop.f32.mrb[50].mxu0  ;;  %5960 = vmatpush3.bf16.msra.mxu1 %v6774_v40  ;;  %5943 = vmatprep.mubr.msk.bf16.mxu1 %vm6979_vm0, %v6978_v25 }
 0x177   :  { %v935_v48 = vmax.f32 %v753_v44, 0.0  ;;  %v756_v49 = vadd.f32 %v7203_v34, %v755_v46  ;;  %v757_v50 = vpop.f32.mrb[51].mxu0  ;;  %5961 = vmatprep.subr.bf16.mxu1 %v6978_v25  ;;  %v6784_v46 = vld [vmem:[%s8245_s3 + $0x38] sm:$0xff]  }
 0x179   :  { %v999_v51 = vpack.c.bf16 %v935_v48, %v935_v48  ;;  %v936_v52 = vmax.f32 %v756_v49, 0.0  ;;  %v6782_v49 = vld [vmem:[#allocation2 + $0xc] ss:$24 sps:$4 sm:$0xff]  }
 0x17a   :  { %5962 = vmatpush3.bf16.msra.mxu1 %v6777_v47  ;;  %v6779_v23 = vld [vmem:[#allocation2 + $0x58] ss:$0 sps:$4 sm:$0xff]  }
 0x17b   :  { %1064 = vst.msk [vmem:[#allocation2 + $0x60] sm:$0xf] %vm1039_vm1, %v999_v51  ;;  %v1000_v53 = vpack.c.bf16 %v936_v52, %v936_v52  ;;  %5983 = vmatprep.subr.bf16.mxu1 %v6978_v25 }
 0x17c   :  { %v760_v55 = vpop.f32.mrb[52].mxu0 }
 0x17d   :  { %1065 = vst.msk [vmem:[#allocation2 + $0x64] sm:$0xf] %vm1039_vm1, %v1000_v53  ;;  %v761_v56 = vadd.f32 %v7203_v34, %v760_v55  ;;  %v762_v57 = vpop.f32.mrb[53].mxu0  ;;  %5944 = vmatmul.mubr.msk.bf16.gmra.mrb[4].mxu1 %vm1160_vm2, %v6775_v54 }
 0x17e   :  { %v763_v58 = vpop.f32.mrb[54].mxu0  ;;  %5947 = vmatprep.mubr.msk.bf16.mxu1 %vm6979_vm0, %v6978_v25 }
 0x17f   :  { %v937_v59 = vmax.f32 %v761_v56, 0.0  ;;  %v764_v60 = vadd.f32 %v7203_v34, %v763_v58  ;;  %v765_v61 = vpop.f32.mrb[55].mxu0 }
 0x180   :  { %v6783_v61 = vld [vmem:[#allocation2 + $0x28] sm:$0xff]  }
 0x181   :  { %v1001_v62 = vpack.c.bf16 %v937_v59, %v937_v59  ;;  %v938_v63 = vmax.f32 %v764_v60, 0.0 }
 0x183   :  { %1066 = vst.msk [vmem:[#allocation2 + $0x68] sm:$0xf] %vm1039_vm1, %v1001_v62  ;;  %v1002_v1 = vpack.c.bf16 %v938_v63, %v938_v63 }
 0x184   :  { %v768_v3 = vpop.f32.mrb[56].mxu0 }
 0x185   :  { %1067 = vst.msk [vmem:[#allocation2 + $0x6c] sm:$0xf] %vm1039_vm1, %v1002_v1  ;;  %v769_v4 = vadd.f32 %v7203_v34, %v768_v3  ;;  %v770_v5 = vpop.f32.mrb[57].mxu0  ;;  %5948 = vmatmul.mubr.msk.bf16.gmra.mrb[8].mxu1 %vm1160_vm2, %v6776_v2 }
 0x186   :  { %v771_v6 = vpop.f32.mrb[58].mxu0  ;;  %5951 = vmatprep.mubr.msk.bf16.mxu1 %vm6979_vm0, %v6978_v25 }
 0x187   :  { %v939_v7 = vmax.f32 %v769_v4, 0.0  ;;  %v772_v8 = vadd.f32 %v7203_v34, %v771_v6  ;;  %v773_v9 = vpop.f32.mrb[59].mxu0 }
 0x188   :  { %v6785_v9 = vld [vmem:[#allocation2 + $0x44] sm:$0xff]  }
 0x189   :  { %v1003_v10 = vpack.c.bf16 %v939_v7, %v939_v7  ;;  %v940_v11 = vmax.f32 %v772_v8, 0.0 }
 0x18b   :  { %1068 = vst.msk [vmem:[#allocation2 + $0x70] sm:$0xf] %vm1039_vm1, %v1003_v10  ;;  %v1004_v12 = vpack.c.bf16 %v940_v11, %v940_v11 }
 0x18c   :  { %v776_v14 = vpop.f32.mrb[60].mxu0 }
 0x18d   :  { %1069 = vst.msk [vmem:[#allocation2 + $0x74] sm:$0xf] %vm1039_vm1, %v1004_v12  ;;  %v777_v15 = vadd.f32 %v7203_v34, %v776_v14  ;;  %v778_v16 = vpop.f32.mrb[61].mxu0  ;;  %5952 = vmatmul.mubr.msk.bf16.gmra.mrb[12].mxu1 %vm1160_vm2, %v6778_v13 }
 0x18e   :  { %v779_v17 = vpop.f32.mrb[62].mxu0  ;;  %5955 = vmatprep.mubr.msk.bf16.mxu1 %vm6979_vm0, %v6978_v25 }
 0x18f   :  { %v941_v18 = vmax.f32 %v777_v15, 0.0  ;;  %v780_v19 = vadd.f32 %v7203_v34, %v779_v17  ;;  %v781_v20 = vpop.f32.mrb[63].mxu0 }
 0x190   :  { %v6786_v20 = vld [vmem:[#allocation2 + $0x4c] ss:$0 sps:$4 sm:$0xff]  }
 0x191   :  { %v1005_v21 = vpack.c.bf16 %v941_v18, %v941_v18  ;;  %v942_v22 = vmax.f32 %v780_v19, 0.0 }
 0x193   :  { %1070 = vst.msk [vmem:[#allocation2 + $0x78] sm:$0xf] %vm1039_vm1, %v1005_v21  ;;  %v1006_v24 = vpack.c.bf16 %v942_v22, %v942_v22 }
 0x194   :  { %v784_v26 = vpop.f32.mrb[64].mxu0 }
 0x195   :  { %1071 = vst.msk [vmem:[#allocation2 + $0x7c] sm:$0xf] %vm1039_vm1, %v1006_v24  ;;  %v785_v27 = vadd.f32 %v7203_v34, %v784_v26  ;;  %v786_v28 = vpop.f32.mrb[65].mxu0  ;;  %5956 = vmatmul.mubr.msk.bf16.gmra.mrb[16].mxu1 %vm1160_vm2, %v6779_v23 }
 0x196   :  { %v787_v29 = vpop.f32.mrb[66].mxu0  ;;  %5963 = vmatprep.mubr.msk.bf16.mxu1 %vm6979_vm0, %v6978_v25 }
 0x197   :  { %v943_v30 = vmax.f32 %v785_v27, 0.0  ;;  %v788_v31 = vadd.f32 %v7203_v34, %v787_v29  ;;  %v789_v32 = vpop.f32.mrb[67].mxu0 }
 0x199   :  { %v1007_v33 = vpack.c.bf16 %v943_v30, %v943_v30  ;;  %v944_v35 = vmax.f32 %v788_v31, 0.0  ;;  %v6788_v31 = vld [vmem:[%s8245_s3 + $0x40] sm:$0xff]  }
 0x19b   :  { %1072 = vst.msk [vmem:[#allocation2 + $0x80] sm:$0xf] %vm1039_vm1, %v1007_v33  ;;  %v1008_v37 = vpack.c.bf16 %v944_v35, %v944_v35  ;;  %v6787_v33 = vld [vmem:[#allocation2 + $0x14] sm:$0xff]  }
 0x19c   :  { %v792_v39 = vpop.f32.mrb[68].mxu0 }
 0x19d   :  { %1073 = vst.msk [vmem:[#allocation2 + $0x84] sm:$0xf] %vm1039_vm1, %v1008_v37  ;;  %v793_v40 = vadd.f32 %v7203_v34, %v792_v39  ;;  %v794_v41 = vpop.f32.mrb[69].mxu0  ;;  %5964 = vmatmul.mubr.msk.bf16.vlgmr.msra.gmra.mrb[0].mxu1 %vm1160_vm2, %v6780_v38 }
 0x19e   :  { %v795_v42 = vpop.f32.mrb[70].mxu0  ;;  %5984 = vmatpush3.bf16.msra.mxu1 %v6781_v36  ;;  %5967 = vmatprep.mubr.msk.bf16.mxu1 %vm6979_vm0, %v6978_v25 }
 0x19f   :  { %v945_v43 = vmax.f32 %v793_v40, 0.0  ;;  %v796_v44 = vadd.f32 %v7203_v34, %v795_v42  ;;  %v797_v45 = vpop.f32.mrb[71].mxu0  ;;  %5985 = vmatprep.subr.bf16.mxu1 %v6978_v25  ;;  %v6791_v42 = vld [vmem:[%s8245_s3 + $0x48] sm:$0xff]  }
 0x1a1   :  { %v1009_v47 = vpack.c.bf16 %v945_v43, %v945_v43  ;;  %v946_v48 = vmax.f32 %v796_v44, 0.0 }
 0x1a2   :  { %5986 = vmatpush3.bf16.msra.mxu1 %v6784_v46  ;;  %v6789_v46 = vld [vmem:[#allocation2 + $0x1c] ss:$24 sps:$4 sm:$0xff]  }
 0x1a3   :  { %1074 = vst.msk [vmem:[#allocation2 + $0x88] sm:$0xf] %vm1039_vm1, %v1009_v47  ;;  %v1010_v50 = vpack.c.bf16 %v946_v48, %v946_v48  ;;  %6007 = vmatprep.subr.bf16.mxu1 %v6978_v25 }
 0x1a4   :  { %v800_v51 = vpop.f32.mrb[72].mxu0 }
 0x1a5   :  { %1075 = vst.msk [vmem:[#allocation2 + $0x8c] sm:$0xf] %vm1039_vm1, %v1010_v50  ;;  %v801_v52 = vadd.f32 %v7203_v34, %v800_v51  ;;  %v802_v53 = vpop.f32.mrb[73].mxu0  ;;  %5968 = vmatmul.mubr.msk.bf16.gmra.mrb[4].mxu1 %vm1160_vm2, %v6782_v49 }
 0x1a6   :  { %v803_v54 = vpop.f32.mrb[74].mxu0  ;;  %5971 = vmatprep.mubr.msk.bf16.mxu1 %vm6979_vm0, %v6978_v25 }
 0x1a7   :  { %v947_v55 = vmax.f32 %v801_v52, 0.0  ;;  %v804_v56 = vadd.f32 %v7203_v34, %v803_v54  ;;  %v805_v57 = vpop.f32.mrb[75].mxu0 }
 0x1a9   :  { %v1011_v58 = vpack.c.bf16 %v947_v55, %v947_v55  ;;  %v948_v59 = vmax.f32 %v804_v56, 0.0  ;;  %v6790_v56 = vld [vmem:[#allocation2 + $0x38] sm:$0xff]  }
 0x1ab   :  { %1076 = vst.msk [vmem:[#allocation2 + $0x90] sm:$0xf] %vm1039_vm1, %v1011_v58  ;;  %v1012_v60 = vpack.c.bf16 %v948_v59, %v948_v59  ;;  %v95_v59 = vld [vmem:[%s8244_s0 + $0xe0] sm:$0xff]  }
 0x1ac   :  { %v808_v62 = vpop.f32.mrb[76].mxu0 }
 0x1ad   :  { %1077 = vst.msk [vmem:[#allocation2 + $0x94] sm:$0xf] %vm1039_vm1, %v1012_v60  ;;  %v809_v63 = vadd.f32 %v7203_v34, %v808_v62  ;;  %v810_v1 = vpop.f32.mrb[77].mxu0  ;;  %5972 = vmatmul.mubr.msk.bf16.gmra.mrb[8].mxu1 %vm1160_vm2, %v6783_v61  ;;  %v159_v62 = vunpack.c.l.s8.bf16 %v95_v59 }
 0x1ae   :  { %v811_v2 = vpop.f32.mrb[78].mxu0  ;;  %5975 = vmatprep.mubr.msk.bf16.mxu1 %vm6979_vm0, %v6978_v25 }
 0x1af   :  { %v949_v3 = vmax.f32 %v809_v63, 0.0  ;;  %v812_v4 = vadd.f32 %v7203_v34, %v811_v2  ;;  %v813_v5 = vpop.f32.mrb[79].mxu0  ;;  %v160_v63 = vunpack.c.h.s8.bf16 %v95_v59 }
 0x1b1   :  { %v1013_v6 = vpack.c.bf16 %v949_v3, %v949_v3  ;;  %v950_v7 = vmax.f32 %v812_v4, 0.0  ;;  %v5303_v5 = vcombine.high %v159_v62, %v160_v63 }
 0x1b3   :  { %1078 = vst.msk [vmem:[#allocation2 + $0x98] sm:$0xf] %vm1039_vm1, %v1013_v6  ;;  %v1014_v8 = vpack.c.bf16 %v950_v7, %v950_v7  ;;  %v5302_v6 = vcombine.low %v159_v62, %v160_v63  ;;  %878 = vmatprep.mubr.bf16.mxu0 %v5303_v5  ;;  %v6805_v5 = vld [vmem:[%s8245_s3 + $0x68] sm:$0xff]  }
 0x1b4   :  { %v816_v10 = vpop.f32.mrb[80].mxu0 }
 0x1b5   :  { %1079 = vst.msk [vmem:[#allocation2 + $0x9c] sm:$0xf] %vm1039_vm1, %v1014_v8  ;;  %v817_v11 = vadd.f32 %v7203_v34, %v816_v10  ;;  %v818_v12 = vpop.f32.mrb[81].mxu0  ;;  %5976 = vmatmul.mubr.msk.bf16.gmra.mrb[12].mxu1 %vm1160_vm2, %v6785_v9  ;;  %879 = vmatmul.mubr.bf16.gmra.mrb[112].mxu0 %v5302_v6  ;;  %v6792_v10 = vld [vmem:[#allocation2 + $0x54] sm:$0xff]  }
 0x1b6   :  { %v819_v13 = vpop.f32.mrb[82].mxu0  ;;  %5979 = vmatprep.mubr.msk.bf16.mxu1 %vm6979_vm0, %v6978_v25  ;;  %v97_v12 = vld [vmem:[%s8244_s0 + $0xe8] sm:$0xff]  }
 0x1b7   :  { %v951_v14 = vmax.f32 %v817_v11, 0.0  ;;  %v820_v15 = vadd.f32 %v7203_v34, %v819_v13  ;;  %v821_v16 = vpop.f32.mrb[83].mxu0 }
 0x1b8   :  { %v162_v16 = vunpack.c.h.s8.bf16 %v97_v12 }
 0x1b9   :  { %v1015_v17 = vpack.c.bf16 %v951_v14, %v951_v14  ;;  %v952_v18 = vmax.f32 %v820_v15, 0.0  ;;  %v161_v15 = vunpack.c.l.s8.bf16 %v97_v12  ;;  %v6812_v12 = vld [vmem:[%s8245_s3 + $0x78] sm:$0xff]  }
 0x1bb   :  { %1080 = vst.msk [vmem:[#allocation2 + $0xa0] sm:$0xf] %vm1039_vm1, %v1015_v17  ;;  %v1016_v19 = vpack.c.bf16 %v952_v18, %v952_v18 }
 0x1bc   :  { %v824_v21 = vpop.f32.mrb[84].mxu0 }
 0x1bd   :  { %1081 = vst.msk [vmem:[#allocation2 + $0xa4] sm:$0xf] %vm1039_vm1, %v1016_v19  ;;  %v825_v22 = vadd.f32 %v7203_v34, %v824_v21  ;;  %v826_v23 = vpop.f32.mrb[85].mxu0  ;;  %5980 = vmatmul.mubr.msk.bf16.gmra.mrb[16].mxu1 %vm1160_vm2, %v6786_v20  ;;  %v5305_v21 = vcombine.high %v161_v15, %v162_v16 }
 0x1be   :  { %v827_v24 = vpop.f32.mrb[86].mxu0  ;;  %5987 = vmatprep.mubr.msk.bf16.mxu1 %vm6979_vm0, %v6978_v25 }
 0x1bf   :  { %v953_v26 = vmax.f32 %v825_v22, 0.0  ;;  %v828_v27 = vadd.f32 %v7203_v34, %v827_v24  ;;  %v829_v28 = vpop.f32.mrb[87].mxu0  ;;  %v5304_v22 = vcombine.low %v161_v15, %v162_v16  ;;  %886 = vmatprep.mubr.bf16.mxu0 %v5305_v21 }
 0x1c1   :  { %v1017_v29 = vpack.c.bf16 %v953_v26, %v953_v26  ;;  %v954_v30 = vmax.f32 %v828_v27, 0.0  ;;  %887 = vmatmul.mubr.bf16.gmra.mrb[116].mxu0 %v5304_v22  ;;  %v6793_v26 = vld [vmem:[#allocation2 + $0x5c] ss:$0 sps:$4 sm:$0xff]  }
 0x1c3   :  { %1082 = vst.msk [vmem:[#allocation2 + $0xa8] sm:$0xf] %vm1039_vm1, %v1017_v29  ;;  %v1018_v32 = vpack.c.bf16 %v954_v30, %v954_v30  ;;  %v7407_v29 = vld [vmem:[%s8246_s2] ss:$0 sm:$0xff] }
 0x1c4   :  { %v832_v35 = vpop.f32.mrb[88].mxu0 }
 0x1c5   :  { %1083 = vst.msk [vmem:[#allocation2 + $0xac] sm:$0xf] %vm1039_vm1, %v1018_v32  ;;  %v833_v36 = vadd.f32 %v7203_v34, %v832_v35  ;;  %v834_v37 = vpop.f32.mrb[89].mxu0  ;;  %5988 = vmatmul.mubr.msk.bf16.vlgmr.msra.gmra.mrb[0].mxu1 %vm1160_vm2, %v6787_v33 }
 0x1c6   :  { %v835_v38 = vpop.f32.mrb[90].mxu0  ;;  %6008 = vmatpush3.bf16.msra.mxu1 %v6788_v31  ;;  %5991 = vmatprep.mubr.msk.bf16.mxu1 %vm6979_vm0, %v6978_v25 }
 0x1c7   :  { %v955_v39 = vmax.f32 %v833_v36, 0.0  ;;  %v836_v40 = vadd.f32 %v7203_v34, %v835_v38  ;;  %v837_v41 = vpop.f32.mrb[91].mxu0  ;;  %6009 = vmatprep.subr.bf16.mxu1 %v6978_v25 }
 0x1c9   :  { %v1019_v43 = vpack.c.bf16 %v955_v39, %v955_v39  ;;  %v956_v44 = vmax.f32 %v836_v40, 0.0  ;;  %v6795_v39 = vld [vmem:[%s8245_s3 + $0x50] sm:$0xff]   ;;  %v6794_v40 = vld [vmem:[#allocation2 + $0x80] sm:$0xff]  }
 0x1ca   :  { %6010 = vmatpush3.bf16.msra.mxu1 %v6791_v42 }
 0x1cb   :  { %1084 = vst.msk [vmem:[#allocation2 + $0xb0] sm:$0xf] %vm1039_vm1, %v1019_v43  ;;  %v1020_v45 = vpack.c.bf16 %v956_v44, %v956_v44  ;;  %6031 = vmatprep.subr.bf16.mxu1 %v6978_v25 }
 0x1cc   :  { %v840_v47 = vpop.f32.mrb[92].mxu0 }
 0x1cd   :  { %1085 = vst.msk [vmem:[#allocation2 + $0xb4] sm:$0xf] %vm1039_vm1, %v1020_v45  ;;  %v841_v48 = vadd.f32 %v7203_v34, %v840_v47  ;;  %v842_v49 = vpop.f32.mrb[93].mxu0  ;;  %5992 = vmatmul.mubr.msk.bf16.gmra.mrb[4].mxu1 %vm1160_vm2, %v6789_v46  ;;  %v6798_v45 = vld [vmem:[%s8245_s3 + $0x58] sm:$0xff]  }
 0x1ce   :  { %v843_v50 = vpop.f32.mrb[94].mxu0  ;;  %5995 = vmatprep.mubr.msk.bf16.mxu1 %vm6979_vm0, %v6978_v25 }
 0x1cf   :  { %v957_v51 = vmax.f32 %v841_v48, 0.0  ;;  %v844_v52 = vadd.f32 %v7203_v34, %v843_v50  ;;  %v845_v53 = vpop.f32.mrb[95].mxu0 }
 0x1d0   :  { %v6797_v53 = vld [vmem:[#allocation2 + $0xa4] sm:$0xff]  }
 0x1d1   :  { %v1021_v54 = vpack.c.bf16 %v957_v51, %v957_v51  ;;  %v958_v55 = vmax.f32 %v844_v52, 0.0  ;;  %v6796_v52 = vld [vmem:[#allocation2 + $0x88] ss:$24 sps:$4 sm:$0xff]  }
 0x1d2   :  { %v6803_v6 = vld [vmem:[#allocation2 + $0x98] ss:$24 sps:$4 sm:$0xff]  }
 0x1d3   :  { %1086 = vst.msk [vmem:[#allocation2 + $0xb8] sm:$0xf] %vm1039_vm1, %v1021_v54  ;;  %v1022_v57 = vpack.c.bf16 %v958_v55, %v958_v55  ;;  %v99_v54 = vld [vmem:[%s8244_s0 + $0xf0] sm:$0xff]  }
 0x1d4   :  { %v848_v58 = vpop.f32.mrb[96].mxu0  ;;  %v163_v55 = vunpack.c.l.s8.bf16 %v99_v54 }
 0x1d5   :  { %1087 = vst.msk [vmem:[#allocation2 + $0xbc] sm:$0xf] %vm1039_vm1, %v1022_v57  ;;  %v849_v60 = vadd.f32 %v7203_v34, %v848_v58  ;;  %v850_v61 = vpop.f32.mrb[97].mxu0  ;;  %5996 = vmatmul.mubr.msk.bf16.gmra.mrb[8].mxu1 %vm1160_vm2, %v6790_v56  ;;  %v164_v56 = vunpack.c.h.s8.bf16 %v99_v54 }
 0x1d6   :  { %v851_v1 = vpop.f32.mrb[98].mxu0  ;;  %5999 = vmatprep.mubr.msk.bf16.mxu1 %vm6979_vm0, %v6978_v25 }
 0x1d7   :  { %v959_v2 = vmax.f32 %v849_v60, 0.0  ;;  %v852_v3 = vadd.f32 %v7203_v34, %v851_v1  ;;  %v853_v4 = vpop.f32.mrb[99].mxu0  ;;  %v5307_v57 = vcombine.high %v163_v55, %v164_v56  ;;  %v5306_v58 = vcombine.low %v163_v55, %v164_v56  ;;  %v101_v60 = vld [vmem:[%s8244_s0 + $0xf8] sm:$0xff]  }
 0x1d8   :  { %v165_v61 = vunpack.c.l.s8.bf16 %v101_v60  ;;  %v166_v62 = vunpack.c.h.s8.bf16 %v101_v60  ;;  %v6801_v4 = vld [vmem:[#allocation2 + $0x90] sm:$0xff]  }
 0x1d9   :  { %v1023_v7 = vpack.c.bf16 %v959_v2, %v959_v2  ;;  %v960_v8 = vmax.f32 %v852_v3, 0.0  ;;  %894 = vmatprep.mubr.bf16.mxu0 %v5307_v57  ;;  %v6802_v3 = vld [vmem:[%s8245_s3 + $0x60] sm:$0xff]   ;;  %v6831_v55 = vld [vmem:[#allocation2 + $0x38] ss:$24 sps:$4 sm:$0xff]  }
 0x1da   :  { %895 = vmatmul.mubr.bf16.gmra.mrb[120].mxu0 %v5306_v58  ;;  %v5309_v63 = vcombine.high %v165_v61, %v166_v62  ;;  %v5308_v1 = vcombine.low %v165_v61, %v166_v62  ;;  %v6832_v57 = vld [vmem:[#allocation2 + $0x54] sm:$0xff]  }
 0x1db   :  { %1088 = vst.msk [vmem:[#allocation2 + $0xc0] sm:$0xf] %vm1039_vm1, %v1023_v7  ;;  %v1024_v9 = vpack.c.bf16 %v960_v8, %v960_v8  ;;  %v6804_v7 = vld [vmem:[#allocation2 + $0xb4] sm:$0xff]  }
 0x1dc   :  { %v856_v11 = vpop.f32.mrb[100].mxu0  ;;  %902 = vmatprep.mubr.bf16.mxu0 %v5309_v63  ;;  %v6818_v21 = vld [vmem:[#allocation2 + $0xb8] sm:$0xff]   ;;  %v6834_v58 = vld [vmem:[#allocation2 + $0x70] sm:$0xff]  }
 0x1dd   :  { %1089 = vst.msk [vmem:[#allocation2 + $0xc4] sm:$0xf] %vm1039_vm1, %v1024_v9  ;;  %v857_v13 = vadd.f32 %v7203_v34, %v856_v11  ;;  %v858_v14 = vpop.f32.mrb[101].mxu0  ;;  %6000 = vmatmul.mubr.msk.bf16.gmra.mrb[12].mxu1 %vm1160_vm2, %v6792_v10  ;;  %v6809_v10 = vld [vmem:[%s8245_s3 + $0x70] sm:$0xff]   ;;  %v6808_v11 = vld [vmem:[#allocation2 + $0x84] sm:$0xff]  }
 0x1de   :  { %v859_v17 = vpop.f32.mrb[102].mxu0  ;;  %6003 = vmatprep.mubr.msk.bf16.mxu1 %vm6979_vm0, %v6978_v25  ;;  %v6811_v14 = vld [vmem:[#allocation2 + $0xa8] sm:$0xff]  }
 0x1df   :  { %v961_v18 = vmax.f32 %v857_v13, 0.0  ;;  %v860_v19 = vadd.f32 %v7203_v34, %v859_v17  ;;  %v861_v20 = vpop.f32.mrb[103].mxu0  ;;  %v6810_v13 = vld [vmem:[#allocation2 + $0x8c] ss:$24 sps:$4 sm:$0xff]  }
 0x1e0   :  { %v6816_v17 = vld [vmem:[%s8245_s3 + $0x80] sm:$0xff]   ;;  %v6817_v20 = vld [vmem:[#allocation2 + $0x9c] ss:$24 sps:$4 sm:$0xff]  }
 0x1e1   :  { %v1025_v23 = vpack.c.bf16 %v961_v18, %v961_v18  ;;  %v962_v24 = vmax.f32 %v860_v19, 0.0  ;;  %v6815_v18 = vld [vmem:[#allocation2 + $0x94] sm:$0xff]   ;;  %v6819_v19 = vld [vmem:[%s8245_s3 + $0x88] sm:$0xff]  }
 0x1e2   :  { %903 = vmatmul.mubr.bf16.gmra.mrb[124].mxu0 %v5308_v1 }
 0x1e3   :  { %1090 = vst.msk [vmem:[#allocation2 + $0xc8] sm:$0xf] %vm1039_vm1, %v1025_v23  ;;  %v1026_v27 = vpack.c.bf16 %v962_v24, %v962_v24  ;;  %6303 = vmatprep.mubr.msk.bf16.mxu0 %vm6979_vm0, %v6978_v25  ;;  %v6823_v24 = vld [vmem:[%s8245_s3 + $0x90] sm:$0xff]  }
 0x1e4   :  { %v864_v28 = vpop.f32.mrb[104].mxu0  ;;  %v6799_v59 = vld [vmem:[#allocation2 + $0xc0] sm:$0xff]  }
 0x1e5   :  { %1091 = vst.msk [vmem:[#allocation2 + $0xcc] sm:$0xf] %vm1039_vm1, %v1026_v27  ;;  %v865_v34 = vadd.f32 %v7407_v29, %v864_v28  ;;  %v866_v30 = vpop.f32.mrb[105].mxu0  ;;  %6004 = vmatmul.mubr.msk.bf16.gmra.mrb[16].mxu1 %vm1160_vm2, %v6793_v26  ;;  %v6822_v26 = vld [vmem:[#allocation2 + $0x20] sm:$0xff]   ;;  %v6826_v27 = vld [vmem:[%s8245_s3 + $0x98] sm:$0xff]  }
 0x1e6   :  { %v867_v31 = vpop.f32.mrb[106].mxu0  ;;  %6011 = vmatprep.mubr.msk.bf16.mxu1 %vm6979_vm0, %v6978_v25  ;;  %v6824_v28 = vld [vmem:[#allocation2 + $0x28] ss:$24 sps:$4 sm:$0xff]  }
 0x1e7   :  { %v963_v32 = vmax.f32 %v865_v34, 0.0  ;;  %v868_v33 = vadd.f32 %v7407_v29, %v867_v31  ;;  %v869_v35 = vpop.f32.mrb[107].mxu0  ;;  %v6825_v34 = vld [vmem:[#allocation2 + $0x44] sm:$0xff]  }
 0x1e8   :  { %v6827_v30 = vld [vmem:[#allocation2 + $0x60] sm:$0xff]   ;;  %v6828_v31 = vld [vmem:[#allocation2 + $0x68] ss:$0 sps:$4 sm:$0xff]  }
 0x1e9   :  { %v1027_v36 = vpack.c.bf16 %v963_v32, %v963_v32  ;;  %v964_v37 = vmax.f32 %v868_v33, 0.0 }
 0x1ea   :  { %v6800_v2 = vld [vmem:[#allocation2 + $0xc8] ss:$0 sps:$4 sm:$0xff]  }
 0x1eb   :  { %1092 = vst.msk [vmem:[#allocation2 + $0xd0] sm:$0xf] %vm1039_vm1, %v1027_v36  ;;  %v1028_v38 = vpack.c.bf16 %v964_v37, %v964_v37  ;;  %v6813_v15 = vld [vmem:[#allocation2 + $0xc4] sm:$0xff]  }
 0x1ec   :  { %v872_v41 = vpop.f32.mrb[108].mxu0  ;;  %v6814_v16 = vld [vmem:[#allocation2 + $0xcc] ss:$0 sps:$4 sm:$0xff]  }
 0x1ed   :  { %1093 = vst.msk [vmem:[#allocation2 + $0xd4] sm:$0xf] %vm1039_vm1, %v1028_v38  ;;  %v873_v42 = vadd.f32 %v7407_v29, %v872_v41  ;;  %v874_v43 = vpop.f32.mrb[109].mxu0  ;;  %6012 = vmatmul.mubr.msk.bf16.vlgmr.msra.gmra.mrb[0].mxu1 %vm1160_vm2, %v6794_v40  ;;  %v6830_v40 = vld [vmem:[%s8245_s3 + $0xa0] sm:$0xff]   ;;  %v6829_v41 = vld [vmem:[#allocation2 + $0x30] sm:$0xff]  }
 0x1ee   :  { %v875_v44 = vpop.f32.mrb[110].mxu0  ;;  %6032 = vmatpush3.bf16.msra.mxu1 %v6795_v39  ;;  %6015 = vmatprep.mubr.msk.bf16.mxu1 %vm6979_vm0, %v6978_v25 }
 0x1ef   :  { %v965_v46 = vmax.f32 %v873_v42, 0.0  ;;  %v876_v47 = vadd.f32 %v7407_v29, %v875_v44  ;;  %v877_v48 = vpop.f32.mrb[111].mxu0  ;;  %6033 = vmatprep.subr.bf16.mxu1 %v6978_v25 }
 0x1f0   :  { %v6833_v48 = vld [vmem:[%s8245_s3 + $0xa8] sm:$0xff]  }
 0x1f1   :  { %v1029_v49 = vpack.c.bf16 %v965_v46, %v965_v46  ;;  %v966_v50 = vmax.f32 %v876_v47, 0.0 }
 0x1f2   :  { %6034 = vmatpush3.bf16.msra.mxu1 %v6798_v45 }
 0x1f3   :  { %1094 = vst.msk [vmem:[#allocation2 + $0xd8] sm:$0xf] %vm1039_vm1, %v1029_v49  ;;  %v1030_v51 = vpack.c.bf16 %v966_v50, %v966_v50  ;;  %6055 = vmatprep.subr.bf16.mxu1 %v6978_v25 }
 0x1f4   :  { %v6806_v8 = vld [vmem:[#allocation2 + $0xd0] sm:$0xff]  }
 0x1f5   :  { %1095 = vst.msk [vmem:[#allocation2 + $0xdc] sm:$0xf] %vm1039_vm1, %v1030_v51  ;;  %6016 = vmatmul.mubr.msk.bf16.gmra.mrb[4].mxu1 %vm1160_vm2, %v6796_v52 }
 0x1f6   :  { %6019 = vmatprep.mubr.msk.bf16.mxu1 %vm6979_vm0, %v6978_v25 }
 0x1fa   :  { %v6807_v9 = vld [vmem:[#allocation2 + $0xd8] ss:$0 sps:$4 sm:$0xff]  }
 0x1fb   :  { %v6820_v22 = vld [vmem:[#allocation2 + $0xd4] sm:$0xff]  }
 0x1fc   :  { %v6821_v23 = vld [vmem:[#allocation2 + $0xdc] ss:$0 sps:$4 sm:$0xff]  }
 0x1fd   :  { %6020 = vmatmul.mubr.msk.bf16.gmra.mrb[8].mxu1 %vm1160_vm2, %v6797_v53 }
 0x1fe   :  { %6023 = vmatprep.mubr.msk.bf16.mxu1 %vm6979_vm0, %v6978_v25 }
 0x205   :  { %6024 = vmatmul.mubr.msk.bf16.gmra.mrb[12].mxu1 %vm1160_vm2, %v6799_v59  ;;  %v6835_v59 = vld [vmem:[#allocation2 + $0x78] ss:$0 sps:$4 sm:$0xff]  }
 0x206   :  { %6027 = vmatprep.mubr.msk.bf16.mxu1 %vm6979_vm0, %v6978_v25 }
 0x20d   :  { %6028 = vmatmul.mubr.msk.bf16.gmra.mrb[16].mxu1 %vm1160_vm2, %v6800_v2 }
 0x20e   :  { %6035 = vmatprep.mubr.msk.bf16.mxu1 %vm6979_vm0, %v6978_v25 }
 0x215   :  { %6036 = vmatmul.mubr.msk.bf16.vlgmr.msra.gmra.mrb[0].mxu1 %vm1160_vm2, %v6801_v4  ;;  %v6837_v4 = vld [vmem:[%s8245_s3 + $0xb0] sm:$0xff]  }
 0x216   :  { %6056 = vmatpush3.bf16.msra.mxu1 %v6802_v3  ;;  %6039 = vmatprep.mubr.msk.bf16.mxu1 %vm6979_vm0, %v6978_v25 }
 0x217   :  { %6057 = vmatprep.subr.bf16.mxu1 %v6978_v25 }
 0x21a   :  { %6058 = vmatpush3.bf16.msra.mxu1 %v6805_v5  ;;  %v6836_v5 = vld [vmem:[#allocation2 + $0x24] sm:$0xff]  }
 0x21b   :  { %6079 = vmatprep.subr.bf16.mxu1 %v6978_v25 }
 0x21d   :  { %6040 = vmatmul.mubr.msk.bf16.gmra.mrb[4].mxu1 %vm1160_vm2, %v6803_v6 }
 0x21e   :  { %6043 = vmatprep.mubr.msk.bf16.mxu1 %vm6979_vm0, %v6978_v25 }
 0x225   :  { %6044 = vmatmul.mubr.msk.bf16.gmra.mrb[8].mxu1 %vm1160_vm2, %v6804_v7 }
 0x226   :  { %6047 = vmatprep.mubr.msk.bf16.mxu1 %vm6979_vm0, %v6978_v25 }
 0x22d   :  { %6048 = vmatmul.mubr.msk.bf16.gmra.mrb[12].mxu1 %vm1160_vm2, %v6806_v8 }
 0x22e   :  { %6051 = vmatprep.mubr.msk.bf16.mxu1 %vm6979_vm0, %v6978_v25 }
 0x235   :  { %6052 = vmatmul.mubr.msk.bf16.gmra.mrb[16].mxu1 %vm1160_vm2, %v6807_v9 }
 0x236   :  { %6059 = vmatprep.mubr.msk.bf16.mxu1 %vm6979_vm0, %v6978_v25 }
 0x23d   :  { %6060 = vmatmul.mubr.msk.bf16.vlgmr.msra.gmra.mrb[0].mxu1 %vm1160_vm2, %v6808_v11 }
 0x23e   :  { %6080 = vmatpush3.bf16.msra.mxu1 %v6809_v10  ;;  %6063 = vmatprep.mubr.msk.bf16.mxu1 %vm6979_vm0, %v6978_v25 }
 0x23f   :  { %6081 = vmatprep.subr.bf16.mxu1 %v6978_v25 }
 0x242   :  { %6082 = vmatpush3.bf16.msra.mxu1 %v6812_v12  ;;  %v6840_v12 = vld [vmem:[%s8245_s3 + $0xb8] sm:$0xff]  }
 0x243   :  { %6103 = vmatprep.subr.bf16.mxu1 %v6978_v25 }
 0x245   :  { %6064 = vmatmul.mubr.msk.bf16.gmra.mrb[4].mxu1 %vm1160_vm2, %v6810_v13 }
 0x246   :  { %6067 = vmatprep.mubr.msk.bf16.mxu1 %vm6979_vm0, %v6978_v25 }
 0x24d   :  { %6068 = vmatmul.mubr.msk.bf16.gmra.mrb[8].mxu1 %vm1160_vm2, %v6811_v14 }
 0x24e   :  { %6071 = vmatprep.mubr.msk.bf16.mxu1 %vm6979_vm0, %v6978_v25 }
 0x255   :  { %6072 = vmatmul.mubr.msk.bf16.gmra.mrb[12].mxu1 %vm1160_vm2, %v6813_v15 }
 0x256   :  { %6075 = vmatprep.mubr.msk.bf16.mxu1 %vm6979_vm0, %v6978_v25 }
 0x25d   :  { %6076 = vmatmul.mubr.msk.bf16.gmra.mrb[16].mxu1 %vm1160_vm2, %v6814_v16 }
 0x25e   :  { %6083 = vmatprep.mubr.msk.bf16.mxu1 %vm6979_vm0, %v6978_v25 }
 0x265   :  { %6084 = vmatmul.mubr.msk.bf16.vlgmr.msra.gmra.mrb[0].mxu1 %vm1160_vm2, %v6815_v18 }
 0x266   :  { %6104 = vmatpush3.bf16.msra.mxu1 %v6816_v17  ;;  %6087 = vmatprep.mubr.msk.bf16.mxu1 %vm6979_vm0, %v6978_v25 }
 0x267   :  { %6105 = vmatprep.subr.bf16.mxu1 %v6978_v25 }
 0x26a   :  { %6106 = vmatpush3.bf16.msra.mxu1 %v6819_v19  ;;  %v6838_v19 = vld [vmem:[#allocation2 + $0x2c] ss:$24 sps:$4 sm:$0xff]  }
 0x26b   :  { %6127 = vmatprep.subr.bf16.mxu1 %v6978_v25 }
 0x26d   :  { %6088 = vmatmul.mubr.msk.bf16.gmra.mrb[4].mxu1 %vm1160_vm2, %v6817_v20 }
 0x26e   :  { %6091 = vmatprep.mubr.msk.bf16.mxu1 %vm6979_vm0, %v6978_v25 }
 0x275   :  { %6092 = vmatmul.mubr.msk.bf16.gmra.mrb[8].mxu1 %vm1160_vm2, %v6818_v21  ;;  %v6839_v21 = vld [vmem:[#allocation2 + $0x48] sm:$0xff]  }
 0x276   :  { %6095 = vmatprep.mubr.msk.bf16.mxu1 %vm6979_vm0, %v6978_v25 }
 0x27d   :  { %6096 = vmatmul.mubr.msk.bf16.gmra.mrb[12].mxu1 %vm1160_vm2, %v6820_v22  ;;  %v6842_v22 = vld [vmem:[#allocation2 + $0x6c] ss:$0 sps:$4 sm:$0xff]  }
 0x27e   :  { %6099 = vmatprep.mubr.msk.bf16.mxu1 %vm6979_vm0, %v6978_v25 }
 0x285   :  { %6100 = vmatmul.mubr.msk.bf16.gmra.mrb[16].mxu1 %vm1160_vm2, %v6821_v23  ;;  %v6866_v23 = vld [vmem:[%s8247_s5] sm:$0xff]  }
 0x286   :  { %6107 = vmatprep.mubr.msk.bf16.mxu1 %vm6979_vm0, %v6978_v25  ;;  %6296 = vmatpush3.bf16.msra.mxu0 %v6866_v23 }
 0x287   :  { %6297 = vmatprep.subr.bf16.mxu0 %v6978_v25 }
 0x288   :  { %v880_v32 = vpop.f32.mrb[112].mxu0 }
 0x289   :  { %v881_v33 = vadd.f32 %v7407_v29, %v880_v32  ;;  %v882_v35 = vpop.f32.mrb[113].mxu0  ;;  %v6851_v32 = vld [vmem:[%s8245_s3 + $0xd0] sm:$0xff]  }
 0x28a   :  { %v883_v36 = vpop.f32.mrb[114].mxu0  ;;  %v6854_v35 = vld [vmem:[%s8245_s3 + $0xd8] sm:$0xff]  }
 0x28b   :  { %v967_v37 = vmax.f32 %v881_v33, 0.0  ;;  %v884_v38 = vadd.f32 %v7407_v29, %v883_v36  ;;  %v885_v39 = vpop.f32.mrb[115].mxu0  ;;  %v6850_v33 = vld [vmem:[#allocation2 + $0xa0] sm:$0xff]  }
 0x28c   :  { %v6852_v36 = vld [vmem:[#allocation2 + $0xa8] ss:$24 sps:$4 sm:$0xff]  }
 0x28d   :  { %6108 = vmatmul.mubr.msk.bf16.vlgmr.msra.gmra.mrb[0].mxu1 %vm1160_vm2, %v6822_v26  ;;  %v1031_v42 = vpack.c.bf16 %v967_v37, %v967_v37  ;;  %v968_v43 = vmax.f32 %v884_v38, 0.0  ;;  %v6843_v26 = vld [vmem:[#allocation2 + $0x34] sm:$0xff]   ;;  %v6853_v37 = vld [vmem:[#allocation2 + $0xc4] sm:$0xff]  }
 0x28e   :  { %6128 = vmatpush3.bf16.msra.mxu1 %v6823_v24  ;;  %6111 = vmatprep.mubr.msk.bf16.mxu1 %vm6979_vm0, %v6978_v25  ;;  %v6844_v24 = vld [vmem:[%s8245_s3 + $0xc0] sm:$0xff]   ;;  %v6876_v38 = vld [vmem:[%s8247_s5 + $0x8] sm:$0xff]  }
 0x28f   :  { %6129 = vmatprep.subr.bf16.mxu1 %v6978_v25  ;;  %1096 = vst.msk [vmem:[#allocation2 + $0xe0] sm:$0xf] %vm1039_vm1, %v1031_v42  ;;  %v1032_v45 = vpack.c.bf16 %v968_v43, %v968_v43  ;;  %6298 = vmatpush3.bf16.msra.mxu0 %v6876_v38  ;;  %v6858_v43 = vld [vmem:[%s8245_s3 + $0xe0] sm:$0xff]  }
 0x290   :  { %6299 = vmatprep.subr.bf16.mxu0 %v6978_v25 }
 0x291   :  { %1097 = vst.msk [vmem:[#allocation2 + $0xe4] sm:$0xf] %vm1039_vm1, %v1032_v45  ;;  %v6861_v45 = vld [vmem:[%s8245_s3 + $0xe8] sm:$0xff]  }
 0x292   :  { %6130 = vmatpush3.bf16.msra.mxu1 %v6826_v27  ;;  %v6847_v27 = vld [vmem:[%s8245_s3 + $0xc8] sm:$0xff]  }
 0x293   :  { %6151 = vmatprep.subr.bf16.mxu1 %v6978_v25 }
 0x294   :  { %v888_v44 = vpop.f32.mrb[116].mxu0 }
 0x295   :  { %6112 = vmatmul.mubr.msk.bf16.gmra.mrb[4].mxu1 %vm1160_vm2, %v6824_v28  ;;  %v889_v46 = vadd.f32 %v7407_v29, %v888_v44  ;;  %v890_v47 = vpop.f32.mrb[117].mxu0  ;;  %v6845_v28 = vld [vmem:[#allocation2 + $0x3c] ss:$24 sps:$4 sm:$0xff]  }
 0x296   :  { %6115 = vmatprep.mubr.msk.bf16.mxu1 %vm6979_vm0, %v6978_v25  ;;  %v891_v49 = vpop.f32.mrb[118].mxu0  ;;  %v6857_v44 = vld [vmem:[#allocation2 + $0xb0] sm:$0xff]  }
 0x297   :  { %v969_v50 = vmax.f32 %v889_v46, 0.0  ;;  %v892_v51 = vadd.f32 %v7407_v29, %v891_v49  ;;  %v893_v52 = vpop.f32.mrb[119].mxu0  ;;  %v6859_v46 = vld [vmem:[#allocation2 + $0xb8] ss:$24 sps:$4 sm:$0xff]  }
 0x298   :  { %v6855_v39 = vld [vmem:[#allocation2 + $0xe0] sm:$0xff]   ;;  %v6860_v47 = vld [vmem:[#allocation2 + $0xd4] sm:$0xff]  }
 0x299   :  { %v1033_v53 = vpack.c.bf16 %v969_v50, %v969_v50  ;;  %v970_v54 = vmax.f32 %v892_v51, 0.0  ;;  %v6865_v50 = vld [vmem:[%s8245_s3 + $0xf0] sm:$0xff]   ;;  %v6864_v51 = vld [vmem:[#allocation2 + $0xa4] sm:$0xff]   ;;  %v6869_v52 = vld [vmem:[%s8245_s3 + $0xf8] sm:$0xff]  }
 0x29b   :  { %1098 = vst.msk [vmem:[#allocation2 + $0xe8] sm:$0xf] %vm1039_vm1, %v1033_v53  ;;  %v1034_v56 = vpack.c.bf16 %v970_v54, %v970_v54  ;;  %v6867_v53 = vld [vmem:[#allocation2 + $0xac] ss:$24 sps:$4 sm:$0xff]  }
 0x29c   :  { %v6868_v54 = vld [vmem:[#allocation2 + $0xc8] sm:$0xff]  }
 0x29d   :  { %6116 = vmatmul.mubr.msk.bf16.gmra.mrb[8].mxu1 %vm1160_vm2, %v6825_v34  ;;  %1099 = vst.msk [vmem:[#allocation2 + $0xec] sm:$0xf] %vm1039_vm1, %v1034_v56  ;;  %v6846_v34 = vld [vmem:[#allocation2 + $0x58] sm:$0xff]  }
 0x29e   :  { %6119 = vmatprep.mubr.msk.bf16.mxu1 %vm6979_vm0, %v6978_v25 }
 0x2a2   :  { %v6856_v42 = vld [vmem:[#allocation2 + $0xe8] ss:$0 sps:$4 sm:$0xff]  }
 0x2a4   :  { %v6871_v56 = vld [vmem:[#allocation2 + $0xec] ss:$0 sps:$4 sm:$0xff]  }
 0x2a5   :  { %6120 = vmatmul.mubr.msk.bf16.gmra.mrb[12].mxu1 %vm1160_vm2, %v6827_v30  ;;  %v6848_v30 = vld [vmem:[#allocation2 + $0x74] sm:$0xff]  }
 0x2a6   :  { %6123 = vmatprep.mubr.msk.bf16.mxu1 %vm6979_vm0, %v6978_v25 }
 0x2ad   :  { %6124 = vmatmul.mubr.msk.bf16.gmra.mrb[16].mxu1 %vm1160_vm2, %v6828_v31  ;;  %v896_v60 = vpop.f32.mrb[120].mxu0  ;;  %v6849_v31 = vld [vmem:[#allocation2 + $0x7c] ss:$0 sps:$4 sm:$0xff]  }
 0x2ae   :  { %6131 = vmatprep.mubr.msk.bf16.mxu1 %vm6979_vm0, %v6978_v25  ;;  %v897_v61 = vadd.f32 %v7407_v29, %v896_v60  ;;  %v898_v62 = vpop.f32.mrb[121].mxu0 }
 0x2af   :  { %v899_v63 = vpop.f32.mrb[122].mxu0  ;;  %v7728_v62 = vld [vmem:[%s8248_s4] ss:$0 sm:$0xff] }
 0x2b0   :  { %v971_v1 = vmax.f32 %v897_v61, 0.0  ;;  %v900_v2 = vadd.f32 %v7407_v29, %v899_v63  ;;  %v901_v3 = vpop.f32.mrb[123].mxu0 }
 0x2b2   :  { %v1035_v6 = vpack.c.bf16 %v971_v1, %v971_v1  ;;  %v972_v7 = vmax.f32 %v900_v2, 0.0 }
 0x2b4   :  { %1100 = vst.msk [vmem:[#allocation2 + $0xf0] sm:$0xf] %vm1039_vm1, %v1035_v6  ;;  %v1036_v9 = vpack.c.bf16 %v972_v7, %v972_v7  ;;  %v6880_v6 = vld [vmem:[%s8247_s5 + $0x20] sm:$0xff]  }
 0x2b5   :  { %6132 = vmatmul.mubr.msk.bf16.vlgmr.msra.gmra.mrb[0].mxu1 %vm1160_vm2, %v6829_v41  ;;  %v904_v8 = vpop.f32.mrb[124].mxu0  ;;  %v6879_v41 = vld [vmem:[%s8247_s5 + $0x18] sm:$0xff]  }
 0x2b6   :  { %6152 = vmatpush3.bf16.msra.mxu1 %v6830_v40  ;;  %6135 = vmatprep.mubr.msk.bf16.mxu1 %vm6979_vm0, %v6978_v25  ;;  %v905_v10 = vadd.f32 %v7407_v29, %v904_v8  ;;  %v906_v11 = vpop.f32.mrb[125].mxu0  ;;  %1101 = vst.msk [vmem:[#allocation2 + $0xf4] sm:$0xf] %vm1039_vm1, %v1036_v9  ;;  %v6878_v40 = vld [vmem:[%s8247_s5 + $0x10] sm:$0xff]   ;;  %v6881_v9 = vld [vmem:[%s8247_s5 + $0x28] sm:$0xff]  }
 0x2b7   :  { %6153 = vmatprep.subr.bf16.mxu1 %v6978_v25  ;;  %v907_v13 = vpop.f32.mrb[126].mxu0  ;;  %6300 = vmatpush3.bf16.msra.mxu0 %v6878_v40 }
 0x2b8   :  { %v973_v14 = vmax.f32 %v905_v10, 0.0  ;;  %v908_v15 = vadd.f32 %v7407_v29, %v907_v13  ;;  %v909_v16 = vpop.f32.mrb[127].mxu0  ;;  %v6841_v29 = vld [vmem:[#allocation2 + $0x64] sm:$0xff]   ;;  %6301 = vmatprep.subr.bf16.mxu0 %v6978_v25  ;;  %v6882_v13 = vld [vmem:[%s8247_s5 + $0x30] sm:$0xff]  }
 0x2b9   :  { %v6883_v16 = vld [vmem:[%s8247_s5 + $0x38] sm:$0xff]  }
 0x2ba   :  { %6154 = vmatpush3.bf16.msra.mxu1 %v6833_v48  ;;  %v1037_v17 = vpack.c.bf16 %v973_v14, %v973_v14  ;;  %v974_v18 = vmax.f32 %v908_v15, 0.0 }
 0x2bb   :  { %6175 = vmatprep.subr.bf16.mxu1 %v6978_v25  ;;  %6302 = vmatpush3.bf16.msra.mxu0 %v6879_v41 }
 0x2bc   :  { %1102 = vst.msk [vmem:[#allocation2 + $0xf8] sm:$0xf] %vm1039_vm1, %v1037_v17  ;;  %v1038_v20 = vpack.c.bf16 %v974_v18, %v974_v18  ;;  %6307 = vmatprep.subr.bf16.mxu0 %v6978_v25 }
 0x2bd   :  { %6136 = vmatmul.mubr.msk.bf16.gmra.mrb[4].mxu1 %vm1160_vm2, %v6831_v55  ;;  %v6862_v48 = vld [vmem:[#allocation2 + $0xf0] sm:$0xff]   ;;  %v6870_v55 = vld [vmem:[#allocation2 + $0xe4] sm:$0xff]  }
 0x2be   :  { %6139 = vmatprep.mubr.msk.bf16.mxu1 %vm6979_vm0, %v6978_v25  ;;  %1103 = vst.msk [vmem:[#allocation2 + $0xfc] sm:$0xf] %vm1039_vm1, %v1038_v20 }
 0x2c3   :  { %v6863_v49 = vld [vmem:[#allocation2 + $0xf8] ss:$0 sps:$4 sm:$0xff]  }
 0x2c4   :  { %v6875_v60 = vld [vmem:[#allocation2 + $0xf4] sm:$0xff]  }
 0x2c5   :  { %6140 = vmatmul.mubr.msk.bf16.gmra.mrb[8].mxu1 %vm1160_vm2, %v6832_v57  ;;  %v6872_v57 = vld [vmem:[#allocation2 + $0xb4] sm:$0xff]   ;;  %v6877_v61 = vld [vmem:[#allocation2 + $0xfc] ss:$0 sps:$4 sm:$0xff]  }
 0x2c6   :  { %6143 = vmatprep.mubr.msk.bf16.mxu1 %vm6979_vm0, %v6978_v25 }
 0x2cd   :  { %6144 = vmatmul.mubr.msk.bf16.gmra.mrb[12].mxu1 %vm1160_vm2, %v6834_v58  ;;  %v6873_v58 = vld [vmem:[#allocation2 + $0xbc] ss:$24 sps:$4 sm:$0xff]  }
 0x2ce   :  { %6147 = vmatprep.mubr.msk.bf16.mxu1 %vm6979_vm0, %v6978_v25 }
 0x2d5   :  { %6148 = vmatmul.mubr.msk.bf16.gmra.mrb[16].mxu1 %vm1160_vm2, %v6835_v59  ;;  %v6874_v59 = vld [vmem:[#allocation2 + $0xd8] sm:$0xff]  }
 0x2d6   :  { %6155 = vmatprep.mubr.msk.bf16.mxu1 %vm6979_vm0, %v6978_v25 }
 0x2dd   :  { %6156 = vmatmul.mubr.msk.bf16.vlgmr.msra.gmra.mrb[0].mxu1 %vm1160_vm2, %v6836_v5 }
 0x2de   :  { %6176 = vmatpush3.bf16.msra.mxu1 %v6837_v4  ;;  %6159 = vmatprep.mubr.msk.bf16.mxu1 %vm6979_vm0, %v6978_v25 }
 0x2df   :  { %6177 = vmatprep.subr.bf16.mxu1 %v6978_v25 }
 0x2e2   :  { %6178 = vmatpush3.bf16.msra.mxu1 %v6840_v12 }
 0x2e3   :  { %6199 = vmatprep.subr.bf16.mxu1 %v6978_v25 }
 0x2e5   :  { %6160 = vmatmul.mubr.msk.bf16.gmra.mrb[4].mxu1 %vm1160_vm2, %v6838_v19 }
 0x2e6   :  { %6163 = vmatprep.mubr.msk.bf16.mxu1 %vm6979_vm0, %v6978_v25 }
 0x2ed   :  { %6164 = vmatmul.mubr.msk.bf16.gmra.mrb[8].mxu1 %vm1160_vm2, %v6839_v21 }
 0x2ee   :  { %6167 = vmatprep.mubr.msk.bf16.mxu1 %vm6979_vm0, %v6978_v25 }
 0x2f5   :  { %6168 = vmatmul.mubr.msk.bf16.gmra.mrb[12].mxu1 %vm1160_vm2, %v6841_v29 }
 0x2f6   :  { %6171 = vmatprep.mubr.msk.bf16.mxu1 %vm6979_vm0, %v6978_v25 }
 0x2fd   :  { %6172 = vmatmul.mubr.msk.bf16.gmra.mrb[16].mxu1 %vm1160_vm2, %v6842_v22  ;;  %v6884_v22 = vld [vmem:[%s8247_s5 + $0x40] sm:$0xff]  }
 0x2fe   :  { %6179 = vmatprep.mubr.msk.bf16.mxu1 %vm6979_vm0, %v6978_v25 }
 0x305   :  { %6180 = vmatmul.mubr.msk.bf16.vlgmr.msra.gmra.mrb[0].mxu1 %vm1160_vm2, %v6843_v26  ;;  %v6885_v26 = vld [vmem:[%s8247_s5 + $0x48] sm:$0xff]  }
 0x306   :  { %6200 = vmatpush3.bf16.msra.mxu1 %v6844_v24  ;;  %6183 = vmatprep.mubr.msk.bf16.mxu1 %vm6979_vm0, %v6978_v25 }
 0x307   :  { %6201 = vmatprep.subr.bf16.mxu1 %v6978_v25 }
 0x30a   :  { %6202 = vmatpush3.bf16.msra.mxu1 %v6847_v27 }
 0x30b   :  { %6223 = vmatprep.subr.bf16.mxu1 %v6978_v25 }
 0x30d   :  { %6184 = vmatmul.mubr.msk.bf16.gmra.mrb[4].mxu1 %vm1160_vm2, %v6845_v28 }
 0x30e   :  { %6187 = vmatprep.mubr.msk.bf16.mxu1 %vm6979_vm0, %v6978_v25 }
 0x315   :  { %6188 = vmatmul.mubr.msk.bf16.gmra.mrb[8].mxu1 %vm1160_vm2, %v6846_v34 }
 0x316   :  { %6191 = vmatprep.mubr.msk.bf16.mxu1 %vm6979_vm0, %v6978_v25 }
 0x31d   :  { %6192 = vmatmul.mubr.msk.bf16.gmra.mrb[12].mxu1 %vm1160_vm2, %v6848_v30 }
 0x31e   :  { %6195 = vmatprep.mubr.msk.bf16.mxu1 %vm6979_vm0, %v6978_v25 }
 0x325   :  { %6196 = vmatmul.mubr.msk.bf16.gmra.mrb[16].mxu1 %vm1160_vm2, %v6849_v31 }
 0x326   :  { %6203 = vmatprep.mubr.msk.bf16.mxu1 %vm6979_vm0, %v6978_v25 }
 0x32d   :  { %6204 = vmatmul.mubr.msk.bf16.vlgmr.msra.gmra.mrb[0].mxu1 %vm1160_vm2, %v6850_v33 }
 0x32e   :  { %6224 = vmatpush3.bf16.msra.mxu1 %v6851_v32  ;;  %6207 = vmatprep.mubr.msk.bf16.mxu1 %vm6979_vm0, %v6978_v25  ;;  %v6886_v32 = vld [vmem:[%s8247_s5 + $0x50] sm:$0xff]  }
 0x32f   :  { %6225 = vmatprep.subr.bf16.mxu1 %v6978_v25 }
 0x332   :  { %6226 = vmatpush3.bf16.msra.mxu1 %v6854_v35 }
 0x333   :  { %6247 = vmatprep.subr.bf16.mxu1 %v6978_v25 }
 0x335   :  { %6208 = vmatmul.mubr.msk.bf16.gmra.mrb[4].mxu1 %vm1160_vm2, %v6852_v36  ;;  %v6887_v36 = vld [vmem:[%s8247_s5 + $0x58] sm:$0xff]  }
 0x336   :  { %6211 = vmatprep.mubr.msk.bf16.mxu1 %vm6979_vm0, %v6978_v25 }
 0x33d   :  { %6212 = vmatmul.mubr.msk.bf16.gmra.mrb[8].mxu1 %vm1160_vm2, %v6853_v37 }
 0x33e   :  { %6215 = vmatprep.mubr.msk.bf16.mxu1 %vm6979_vm0, %v6978_v25 }
 0x345   :  { %6216 = vmatmul.mubr.msk.bf16.gmra.mrb[12].mxu1 %vm1160_vm2, %v6855_v39 }
 0x346   :  { %6219 = vmatprep.mubr.msk.bf16.mxu1 %vm6979_vm0, %v6978_v25 }
 0x34d   :  { %6220 = vmatmul.mubr.msk.bf16.gmra.mrb[16].mxu1 %vm1160_vm2, %v6856_v42  ;;  %v6888_v42 = vld [vmem:[%s8247_s5 + $0x60] sm:$0xff]  }
 0x34e   :  { %6227 = vmatprep.mubr.msk.bf16.mxu1 %vm6979_vm0, %v6978_v25 }
 0x355   :  { %6228 = vmatmul.mubr.msk.bf16.vlgmr.msra.gmra.mrb[0].mxu1 %vm1160_vm2, %v6857_v44  ;;  %v6889_v44 = vld [vmem:[%s8247_s5 + $0x68] sm:$0xff]  }
 0x356   :  { %6248 = vmatpush3.bf16.msra.mxu1 %v6858_v43  ;;  %6231 = vmatprep.mubr.msk.bf16.mxu1 %vm6979_vm0, %v6978_v25 }
 0x357   :  { %6249 = vmatprep.subr.bf16.mxu1 %v6978_v25 }
 0x35a   :  { %6250 = vmatpush3.bf16.msra.mxu1 %v6861_v45  ;;  %v6890_v45 = vld [vmem:[%s8247_s5 + $0x70] sm:$0xff]  }
 0x35b   :  { %6271 = vmatprep.subr.bf16.mxu1 %v6978_v25 }
 0x35d   :  { %6232 = vmatmul.mubr.msk.bf16.gmra.mrb[4].mxu1 %vm1160_vm2, %v6859_v46 }
 0x35e   :  { %6235 = vmatprep.mubr.msk.bf16.mxu1 %vm6979_vm0, %v6978_v25 }
 0x365   :  { %6236 = vmatmul.mubr.msk.bf16.gmra.mrb[8].mxu1 %vm1160_vm2, %v6860_v47  ;;  %v6891_v47 = vld [vmem:[%s8247_s5 + $0x78] sm:$0xff]  }
 0x366   :  { %6239 = vmatprep.mubr.msk.bf16.mxu1 %vm6979_vm0, %v6978_v25 }
 0x36d   :  { %6240 = vmatmul.mubr.msk.bf16.gmra.mrb[12].mxu1 %vm1160_vm2, %v6862_v48 }
 0x36e   :  { %6243 = vmatprep.mubr.msk.bf16.mxu1 %vm6979_vm0, %v6978_v25 }
 0x375   :  { %6244 = vmatmul.mubr.msk.bf16.gmra.mrb[16].mxu1 %vm1160_vm2, %v6863_v49  ;;  %v6892_v49 = vld [vmem:[%s8247_s5 + $0x80] sm:$0xff]  }
 0x376   :  { %6251 = vmatprep.mubr.msk.bf16.mxu1 %vm6979_vm0, %v6978_v25 }
 0x37d   :  { %6252 = vmatmul.mubr.msk.bf16.vlgmr.msra.gmra.mrb[0].mxu1 %vm1160_vm2, %v6864_v51  ;;  %v6893_v51 = vld [vmem:[%s8247_s5 + $0x88] sm:$0xff]  }
 0x37e   :  { %6272 = vmatpush3.bf16.msra.mxu1 %v6865_v50  ;;  %6255 = vmatprep.mubr.msk.bf16.mxu1 %vm6979_vm0, %v6978_v25 }
 0x37f   :  { %6273 = vmatprep.subr.bf16.mxu1 %v6978_v25 }
 0x382   :  { %6274 = vmatpush3.bf16.msra.mxu1 %v6869_v52  ;;  %v6894_v52 = vld [vmem:[%s8247_s5 + $0x90] sm:$0xff]  }
 0x385   :  { %6256 = vmatmul.mubr.msk.bf16.gmra.mrb[4].mxu1 %vm1160_vm2, %v6867_v53  ;;  %v6895_v53 = vld [vmem:[%s8247_s5 + $0x98] sm:$0xff]  }
 0x386   :  { %6259 = vmatprep.mubr.msk.bf16.mxu1 %vm6979_vm0, %v6978_v25 }
 0x38d   :  { %6260 = vmatmul.mubr.msk.bf16.gmra.mrb[8].mxu1 %vm1160_vm2, %v6868_v54 }
 0x38e   :  { %6263 = vmatprep.mubr.msk.bf16.mxu1 %vm6979_vm0, %v6978_v25 }
 0x395   :  { %6264 = vmatmul.mubr.msk.bf16.gmra.mrb[12].mxu1 %vm1160_vm2, %v6870_v55  ;;  %v6896_v55 = vld [vmem:[%s8247_s5 + $0xa0] sm:$0xff]  }
 0x396   :  { %6267 = vmatprep.mubr.msk.bf16.mxu1 %vm6979_vm0, %v6978_v25 }
 0x39d   :  { %6268 = vmatmul.mubr.msk.bf16.gmra.mrb[16].mxu1 %vm1160_vm2, %v6871_v56 }
 0x39e   :  { %6275 = vmatprep.mubr.msk.bf16.mxu1 %vm6979_vm0, %v6978_v25 }
 0x3a5   :  { %6276 = vmatmul.mubr.msk.bf16.vlgmr.msra.gmra.mrb[0].mxu1 %vm1160_vm2, %v6872_v57  ;;  %v6897_v57 = vld [vmem:[%s8247_s5 + $0xa8] sm:$0xff]  }
 0x3a6   :  { %6279 = vmatprep.mubr.msk.bf16.mxu1 %vm6979_vm0, %v6978_v25 }
 0x3ad   :  { %6280 = vmatmul.mubr.msk.bf16.gmra.mrb[4].mxu1 %vm1160_vm2, %v6873_v58  ;;  %v6898_v58 = vld [vmem:[%s8247_s5 + $0xb0] sm:$0xff]  }
 0x3ae   :  { %6283 = vmatprep.mubr.msk.bf16.mxu1 %vm6979_vm0, %v6978_v25 }
 0x3b5   :  { %6284 = vmatmul.mubr.msk.bf16.gmra.mrb[8].mxu1 %vm1160_vm2, %v6874_v59  ;;  %v6899_v59 = vld [vmem:[%s8247_s5 + $0xb8] sm:$0xff]  }
 0x3b6   :  { %6287 = vmatprep.mubr.msk.bf16.mxu1 %vm6979_vm0, %v6978_v25 }
 0x3bd   :  { %6288 = vmatmul.mubr.msk.bf16.gmra.mrb[12].mxu1 %vm1160_vm2, %v6875_v60 }
 0x3be   :  { %6291 = vmatprep.mubr.msk.bf16.mxu1 %vm6979_vm0, %v6978_v25 }
 0x3c5   :  { %6292 = vmatmul.mubr.msk.bf16.gmra.mrb[16].mxu1 %vm1160_vm2, %v6877_v61  ;;  %v6900_v61 = vld [vmem:[%s8247_s5 + $0xc0] sm:$0xff]  }
 0x478   :  { %v3385_v63 = vpop.f32.mrb[0].mxu1 }
 0x479   :  { %v6403_v1 = vadd.f32 %v7728_v62, %v3385_v63  ;;  %v6277_v2 = vpop.f32.mrb[1].mxu1  ;;  %v6901_v63 = vld [vmem:[%s8247_s5 + $0xc8] sm:$0xff]  }
 0x47a   :  { %v3388_v3 = vpop.f32.mrb[2].mxu1  ;;  %v6903_v2 = vld [vmem:[%s8247_s5 + $0xd8] sm:$0xff]  }
 0x47b   :  { %v3432_v4 = vmax.f32 %v6403_v1, 0.0  ;;  %v6278_v5 = vpop.f32.mrb[3].mxu1  ;;  %v6404_v14 = vadd.f32 %v7728_v62, %v3388_v3  ;;  %v6902_v1 = vld [vmem:[%s8247_s5 + $0xd0] sm:$0xff]  }
 0x47d   :  { %v3449_v7 = vpack.c.bf16 %v3432_v4, %v3432_v4  ;;  %v3433_v17 = vmax.f32 %v6404_v14, 0.0  ;;  %v6904_v4 = vld [vmem:[%s8247_s5 + $0xe0] sm:$0xff]  }
 0x47e   :  { %v4144_v14 = vld [vmem:[%s8249_s7] sm:$0xff] }
 0x47f   :  { %6304 = vmatmul.mubr.msk.bf16.vlgmr.msra.gmra.mrb[128].mxu0 %vm3482_vm3, %v3449_v7  ;;  %v3527_v23 = vpack.c.bf16 %v3433_v17, %v3433_v17  ;;  %v6906_v7 = vld [vmem:[%s8247_s5 + $0xf0] sm:$0xff]  }
 0x480   :  { %6308 = vmatpush3.bf16.msra.mxu0 %v6880_v6  ;;  %v3393_v8 = vpop.f32.mrb[4].mxu1  ;;  %6315 = vmatprep.mubr.msk.bf16.mxu0 %vm6979_vm0, %v6978_v25  ;;  %v6905_v6 = vld [vmem:[%s8247_s5 + $0xe8] sm:$0xff]  }
 0x481   :  { %v6281_v10 = vpop.f32.mrb[5].mxu1  ;;  %6309 = vmatprep.subr.bf16.mxu0 %v6978_v25  ;;  %v6405_v33 = vadd.f32 %v7728_v62, %v3393_v8  ;;  %v6907_v8 = vld [vmem:[%s8247_s5 + $0xf8] sm:$0xff]  }
 0x482   :  { %v3396_v11 = vpop.f32.mrb[6].mxu1  ;;  %v6908_v10 = vld [vmem:[%s8247_s5 + $0x100] sm:$0xff]  }
 0x483   :  { %v6282_v12 = vpop.f32.mrb[7].mxu1  ;;  %v3434_v37 = vmax.f32 %v6405_v33, 0.0  ;;  %v6406_v46 = vadd.f32 %v7728_v62, %v3396_v11  ;;  %v4149_v33 = vld [vmem:[%s8249_s7 + $0x28] sm:$0xff] }
 0x484   :  { %6310 = vmatpush3.bf16.msra.mxu0 %v6881_v9  ;;  %v6909_v12 = vld [vmem:[%s8247_s5 + $0x108] sm:$0xff]  }
 0x485   :  { %6311 = vmatprep.subr.bf16.mxu0 %v6978_v25  ;;  %v3604_v43 = vpack.c.bf16 %v3434_v37, %v3434_v37  ;;  %v3435_v48 = vmax.f32 %v6406_v46, 0.0  ;;  %v5519_v37 = vld [vmem:[%s8251_s6] ss:$0 sm:$0xff] }
 0x487   :  { %v3681_v50 = vpack.c.bf16 %v3435_v48, %v3435_v48  ;;  %v4165_v48 = vld [vmem:[%s8249_s7 + $0xa8] sm:$0xff] }
 0x488   :  { %6312 = vmatpush3.bf16.msra.mxu0 %v6882_v13  ;;  %v3401_v15 = vpop.f32.mrb[8].mxu1  ;;  %v6910_v13 = vld [vmem:[%s8247_s5 + $0x110] sm:$0xff]  }
 0x489   :  { %v7750_v18 = vadd.f32 %v7728_v62, %v3401_v15  ;;  %v6285_v19 = vpop.f32.mrb[9].mxu1  ;;  %6313 = vmatprep.subr.bf16.mxu0 %v6978_v25  ;;  %v4148_v15 = vld [vmem:[%s8249_s7 + $0x20] sm:$0xff] }
 0x48a   :  { %v3404_v20 = vpop.f32.mrb[10].mxu1  ;;  %v4152_v19 = vld [vmem:[%s8249_s7 + $0x40] sm:$0xff] }
 0x48b   :  { %v7754_v21 = vadd.f32 %v7728_v62, %v3404_v20  ;;  %v6286_v29 = vpop.f32.mrb[11].mxu1  ;;  %v3436_v54 = vmax.f32 %v7750_v18, 0.0  ;;  %v5566_v18 = vcombine.high %v4144_v14, %v4148_v15  ;;  %v4156_v20 = vld [vmem:[%s8249_s7 + $0x60] sm:$0xff] }
 0x48c   :  { %6314 = vmatpush3.bf16.msra.mxu0 %v6883_v16  ;;  %v6911_v16 = vld [vmem:[%s8247_s5 + $0x118] sm:$0xff]  }
 0x48d   :  { %6319 = vmatprep.subr.bf16.mxu0 %v6978_v25  ;;  %v3758_v56 = vpack.c.bf16 %v3436_v54, %v3436_v54  ;;  %v3437_v60 = vmax.f32 %v7754_v21, 0.0  ;;  %v5565_v21 = vcombine.low %v4144_v14, %v4148_v15 }
 0x48f   :  { %6316 = vmatmul.mubr.msk.bf16.vlgmr.msra.gmra.mrb[128].mxu0 %vm3482_vm3, %v3527_v23  ;;  %v4160_v23 = vld [vmem:[%s8249_s7 + $0x80] sm:$0xff] }
 0x490   :  { %6320 = vmatpush3.bf16.msra.mxu0 %v6884_v22  ;;  %v3409_v24 = vpop.f32.mrb[12].mxu1  ;;  %6327 = vmatprep.mubr.msk.bf16.mxu0 %vm6979_vm0, %v6978_v25  ;;  %v5574_v22 = vcombine.high %v4152_v19, %v4156_v20 }
 0x491   :  { %v7767_v27 = vadd.f32 %v7728_v62, %v3409_v24  ;;  %v6289_v28 = vpop.f32.mrb[13].mxu1  ;;  %6321 = vmatprep.subr.bf16.mxu0 %v6978_v25  ;;  %v5573_v24 = vcombine.low %v4152_v19, %v4156_v20  ;;  %v4171_v20 = vld [vmem:[%s8249_s7 + $0xd8] sm:$0xff] }
 0x492   :  { %v3412_v34 = vpop.f32.mrb[14].mxu1  ;;  %v4168_v28 = vld [vmem:[%s8249_s7 + $0xc0] sm:$0xff] }
 0x493   :  { %v7771_v30 = vadd.f32 %v7728_v62, %v3412_v34  ;;  %v6290_v31 = vpop.f32.mrb[15].mxu1  ;;  %v3438_v3 = vmax.f32 %v7767_v27, 0.0  ;;  %v4172_v34 = vld [vmem:[%s8249_s7 + $0xe0] sm:$0xff] }
 0x494   :  { %6322 = vmatpush3.bf16.msra.mxu0 %v6885_v26  ;;  %v5589_v31 = vcombine.low %v4168_v28, %v4172_v34 }
 0x495   :  { %6323 = vmatprep.subr.bf16.mxu0 %v6978_v25  ;;  %v3912_v5 = vpack.c.bf16 %v3438_v3, %v3438_v3  ;;  %v3439_v9 = vmax.f32 %v7771_v30, 0.0  ;;  %v5590_v30 = vcombine.high %v4168_v28, %v4172_v34  ;;  %v6917_v28 = vld [vmem:[%s8250_s9 + $0x10] sm:$0xff]   ;;  %v6918_v34 = vld [vmem:[%s8250_s9 + $0x58] sm:$0xff]  }
 0x497   :  { %v3989_v11 = vpack.c.bf16 %v3439_v9, %v3439_v9  ;;  %v4151_v9 = vld [vmem:[%s8249_s7 + $0x38] sm:$0xff] }
 0x498   :  { %6324 = vmatpush3.bf16.msra.mxu0 %v6886_v32  ;;  %v3417_v35 = vpop.f32.mrb[16].mxu1  ;;  %v4145_v32 = vld [vmem:[%s8249_s7 + $0x8] sm:$0xff] }
 0x499   :  { %v7782_v38 = vadd.f32 %v7728_v62, %v3417_v35  ;;  %v6293_v39 = vpop.f32.mrb[17].mxu1  ;;  %6325 = vmatprep.subr.bf16.mxu0 %v6978_v25  ;;  %v3835_v62 = vpack.c.bf16 %v3437_v60, %v3437_v60  ;;  %v5567_v35 = vcombine.low %v4145_v32, %v4149_v33  ;;  %v4158_v60 = vld [vmem:[%s8249_s7 + $0x70] sm:$0xff] }
 0x49a   :  { %v3420_v40 = vpop.f32.mrb[18].mxu1  ;;  %v4153_v39 = vld [vmem:[%s8249_s7 + $0x48] sm:$0xff] }
 0x49b   :  { %v6294_v41 = vpop.f32.mrb[19].mxu1  ;;  %v3440_v17 = vmax.f32 %v7782_v38, 0.0  ;;  %v4157_v40 = vld [vmem:[%s8249_s7 + $0x68] sm:$0xff] }
 0x49c   :  { %6326 = vmatpush3.bf16.msra.mxu0 %v6887_v36  ;;  %v5568_v36 = vcombine.high %v4145_v32, %v4149_v33  ;;  %v5576_v46 = vcombine.high %v4153_v39, %v4157_v40  ;;  %v6921_v32 = vld [vmem:[%s8250_s9 + $0x20] sm:$0xff]   ;;  %v6922_v33 = vld [vmem:[%s8250_s9 + $0x68] sm:$0xff]  }
 0x49d   :  { %6331 = vmatprep.subr.bf16.mxu0 %v6978_v25  ;;  %v4066_v29 = vpack.c.bf16 %v3440_v17, %v3440_v17  ;;  %v4167_v17 = vld [vmem:[%s8249_s7 + $0xb8] sm:$0xff] }
 0x49f   :  { %6328 = vmatmul.mubr.msk.bf16.vlgmr.msra.gmra.mrb[128].mxu0 %vm3482_vm3, %v3604_v43 }
 0x4a0   :  { %6332 = vmatpush3.bf16.msra.mxu0 %v6888_v42  ;;  %6339 = vmatprep.mubr.msk.bf16.mxu0 %vm6979_vm0, %v6978_v25 }
 0x4a1   :  { %6333 = vmatprep.subr.bf16.mxu0 %v6978_v25 }
 0x4a4   :  { %6334 = vmatpush3.bf16.msra.mxu0 %v6889_v44 }
 0x4a5   :  { %6335 = vmatprep.subr.bf16.mxu0 %v6978_v25 }
 0x4a8   :  { %6336 = vmatpush3.bf16.msra.mxu0 %v6890_v45 }
 0x4a9   :  { %6337 = vmatprep.subr.bf16.mxu0 %v6978_v25 }
 0x4ac   :  { %6338 = vmatpush3.bf16.msra.mxu0 %v6891_v47  ;;  %v4161_v47 = vld [vmem:[%s8249_s7 + $0x88] sm:$0xff] }
 0x4ad   :  { %6343 = vmatprep.subr.bf16.mxu0 %v6978_v25 }
 0x4af   :  { %6340 = vmatmul.mubr.msk.bf16.vlgmr.msra.gmra.mrb[128].mxu0 %vm3482_vm3, %v3681_v50  ;;  %v5584_v50 = vcombine.high %v4161_v47, %v4165_v48 }
 0x4b0   :  { %6344 = vmatpush3.bf16.msra.mxu0 %v6892_v49  ;;  %6351 = vmatprep.mubr.msk.bf16.mxu0 %vm6979_vm0, %v6978_v25  ;;  %v5575_v49 = vcombine.low %v4153_v39, %v4157_v40  ;;  %v6927_v39 = vld [vmem:[%s8250_s9 + $0x38] sm:$0xff]   ;;  %v6928_v40 = vld [vmem:[%s8250_s9 + $0xc0] sm:$0xff]  }
 0x4b1   :  { %6345 = vmatprep.subr.bf16.mxu0 %v6978_v25 }
 0x4b4   :  { %6346 = vmatpush3.bf16.msra.mxu0 %v6893_v51  ;;  %v4169_v51 = vld [vmem:[%s8249_s7 + $0xc8] sm:$0xff] }
 0x4b5   :  { %6347 = vmatprep.subr.bf16.mxu0 %v6978_v25 }
 0x4b8   :  { %6348 = vmatpush3.bf16.msra.mxu0 %v6894_v52  ;;  %v4173_v52 = vld [vmem:[%s8249_s7 + $0xe8] sm:$0xff] }
 0x4b9   :  { %6349 = vmatprep.subr.bf16.mxu0 %v6978_v25  ;;  %v5592_v54 = vcombine.high %v4169_v51, %v4173_v52 }
 0x4bc   :  { %6350 = vmatpush3.bf16.msra.mxu0 %v6895_v53  ;;  %v5583_v53 = vcombine.low %v4161_v47, %v4165_v48 }
 0x4bd   :  { %6355 = vmatprep.subr.bf16.mxu0 %v6978_v25 }
 0x4bf   :  { %6352 = vmatmul.mubr.msk.bf16.vlgmr.msra.gmra.mrb[128].mxu0 %vm3482_vm3, %v3758_v56  ;;  %v4150_v56 = vld [vmem:[%s8249_s7 + $0x30] sm:$0xff] }
 0x4c0   :  { %6356 = vmatpush3.bf16.msra.mxu0 %v6896_v55  ;;  %6363 = vmatprep.mubr.msk.bf16.mxu0 %vm6979_vm0, %v6978_v25  ;;  %v4146_v55 = vld [vmem:[%s8249_s7 + $0x10] sm:$0xff] }
 0x4c1   :  { %6357 = vmatprep.subr.bf16.mxu0 %v6978_v25 }
 0x4c4   :  { %6358 = vmatpush3.bf16.msra.mxu0 %v6897_v57  ;;  %v5591_v57 = vcombine.low %v4169_v51, %v4173_v52 }
 0x4c5   :  { %6359 = vmatprep.subr.bf16.mxu0 %v6978_v25 }
 0x4c8   :  { %6360 = vmatpush3.bf16.msra.mxu0 %v6898_v58  ;;  %v5570_v58 = vcombine.high %v4146_v55, %v4150_v56 }
 0x4c9   :  { %6361 = vmatprep.subr.bf16.mxu0 %v6978_v25 }
 0x4cc   :  { %6362 = vmatpush3.bf16.msra.mxu0 %v6899_v59  ;;  %v4154_v59 = vld [vmem:[%s8249_s7 + $0x50] sm:$0xff] }
 0x4cd   :  { %6367 = vmatprep.subr.bf16.mxu0 %v6978_v25 }
 0x4cf   :  { %6364 = vmatmul.mubr.msk.bf16.vlgmr.msra.gmra.mrb[128].mxu0 %vm3482_vm3, %v3835_v62  ;;  %v5578_v62 = vcombine.high %v4154_v59, %v4158_v60 }
 0x4d0   :  { %6368 = vmatpush3.bf16.msra.mxu0 %v6900_v61  ;;  %6375 = vmatprep.mubr.msk.bf16.mxu0 %vm6979_vm0, %v6978_v25  ;;  %v5569_v61 = vcombine.low %v4146_v55, %v4150_v56 }
 0x4d1   :  { %6369 = vmatprep.subr.bf16.mxu0 %v6978_v25 }
 0x4d4   :  { %6370 = vmatpush3.bf16.msra.mxu0 %v6901_v63  ;;  %v4162_v63 = vld [vmem:[%s8249_s7 + $0x90] sm:$0xff] }
 0x4d5   :  { %6371 = vmatprep.subr.bf16.mxu0 %v6978_v25 }
 0x4d8   :  { %6372 = vmatpush3.bf16.msra.mxu0 %v6902_v1  ;;  %v4166_v1 = vld [vmem:[%s8249_s7 + $0xb0] sm:$0xff] }
 0x4d9   :  { %6373 = vmatprep.subr.bf16.mxu0 %v6978_v25  ;;  %v5586_v3 = vcombine.high %v4162_v63, %v4166_v1 }
 0x4dc   :  { %6374 = vmatpush3.bf16.msra.mxu0 %v6903_v2  ;;  %v5577_v2 = vcombine.low %v4154_v59, %v4158_v60  ;;  %v6930_v59 = vld [vmem:[%s8250_s9 + $0xc8] sm:$0xff]  }
 0x4dd   :  { %6379 = vmatprep.subr.bf16.mxu0 %v6978_v25  ;;  %v6931_v60 = vld [vmem:[%s8250_s9 + $0x88] sm:$0xff]  }
 0x4df   :  { %6376 = vmatmul.mubr.msk.bf16.vlgmr.msra.gmra.mrb[128].mxu0 %vm3482_vm3, %v3912_v5  ;;  %v4174_v5 = vld [vmem:[%s8249_s7 + $0xf0] sm:$0xff] }
 0x4e0   :  { %6380 = vmatpush3.bf16.msra.mxu0 %v6904_v4  ;;  %6387 = vmatprep.mubr.msk.bf16.mxu0 %vm6979_vm0, %v6978_v25  ;;  %v4170_v4 = vld [vmem:[%s8249_s7 + $0xd0] sm:$0xff] }
 0x4e1   :  { %6381 = vmatprep.subr.bf16.mxu0 %v6978_v25 }
 0x4e4   :  { %6382 = vmatpush3.bf16.msra.mxu0 %v6905_v6  ;;  %v5585_v6 = vcombine.low %v4162_v63, %v4166_v1  ;;  %v6933_v1 = vld [vmem:[%s8250_s9 + $0x90] sm:$0xff]  }
 0x4e5   :  { %6383 = vmatprep.subr.bf16.mxu0 %v6978_v25 }
 0x4e8   :  { %6384 = vmatpush3.bf16.msra.mxu0 %v6906_v7  ;;  %v5594_v7 = vcombine.high %v4170_v4, %v4174_v5 }
 0x4e9   :  { %6385 = vmatprep.subr.bf16.mxu0 %v6978_v25 }
 0x4ec   :  { %6386 = vmatpush3.bf16.msra.mxu0 %v6907_v8  ;;  %v4147_v8 = vld [vmem:[%s8249_s7 + $0x18] sm:$0xff] }
 0x4ed   :  { %6391 = vmatprep.subr.bf16.mxu0 %v6978_v25  ;;  %v5571_v14 = vcombine.low %v4147_v8, %v4151_v9 }
 0x4ef   :  { %6388 = vmatmul.mubr.msk.bf16.vlgmr.msra.gmra.mrb[128].mxu0 %vm3482_vm3, %v3989_v11  ;;  %v5572_v11 = vcombine.high %v4147_v8, %v4151_v9  ;;  %v6936_v9 = vld [vmem:[%s8250_s9 + $0xe0] sm:$0xff]  }
 0x4f0   :  { %6392 = vmatpush3.bf16.msra.mxu0 %v6908_v10  ;;  %6399 = vmatprep.mubr.msk.bf16.mxu0 %vm6979_vm0, %v6978_v25  ;;  %v5593_v10 = vcombine.low %v4170_v4, %v4174_v5 }
 0x4f1   :  { %6393 = vmatprep.subr.bf16.mxu0 %v6978_v25 }
 0x4f4   :  { %6394 = vmatpush3.bf16.msra.mxu0 %v6909_v12  ;;  %v4155_v12 = vld [vmem:[%s8249_s7 + $0x58] sm:$0xff] }
 0x4f5   :  { %6395 = vmatprep.subr.bf16.mxu0 %v6978_v25 }
 0x4f8   :  { %6396 = vmatpush3.bf16.msra.mxu0 %v6910_v13  ;;  %v4159_v13 = vld [vmem:[%s8249_s7 + $0x78] sm:$0xff] }
 0x4f9   :  { %6397 = vmatprep.subr.bf16.mxu0 %v6978_v25  ;;  %v4164_v25 = vld [vmem:[%s8249_s7 + $0xa0] sm:$0xff]  ;;  %v5580_v15 = vcombine.high %v4155_v12, %v4159_v13 }
 0x4fa   :  { %v5582_v26 = vcombine.high %v4160_v23, %v4164_v25  ;;  %v5581_v27 = vcombine.low %v4160_v23, %v4164_v25  ;;  %v6913_v25 = vld [vmem:[%s8250_s9] sm:$0xff]  }
 0x4fc   :  { %6398 = vmatpush3.bf16.msra.mxu0 %v6911_v16  ;;  %v4163_v16 = vld [vmem:[%s8249_s7 + $0x98] sm:$0xff] }
 0x4fd   :  { %4381 = vmatprep.subr.bf16.mxu0 %v5566_v18  ;;  %v5579_v18 = vcombine.low %v4155_v12, %v4159_v13  ;;  %v5588_v19 = vcombine.high %v4163_v16, %v4167_v17  ;;  %v6937_v12 = vld [vmem:[%s8250_s9 + $0xa0] sm:$0xff]  }
 0x4ff   :  { %6400 = vmatmul.mubr.msk.bf16.vlgmr.msra.gmra.mrb[128].mxu0 %vm3482_vm3, %v4066_v29  ;;  %v5587_v29 = vcombine.low %v4163_v16, %v4167_v17 }
 0x500   :  { %4382 = vmatpush1.bf16.msra.mxu0 %v5565_v21  ;;  %4413 = vmatprep.mubr.bf16.mxu0 %v6977_v0  ;;  %v4175_v21 = vld [vmem:[%s8249_s7 + $0xf8] sm:$0xff] }
 0x501   :  { %4383 = vmatprep.subr.bf16.mxu0 %v5574_v22  ;;  %v5596_v22 = vcombine.high %v4171_v20, %v4175_v21  ;;  %v5595_v23 = vcombine.low %v4171_v20, %v4175_v21  ;;  %v6941_v20 = vld [vmem:[%s8250_s9 + $0xb0] sm:$0xff]  }
 0x504   :  { %4384 = vmatpush1.bf16.msra.mxu0 %v5573_v24  ;;  %v6914_v24 = vld [vmem:[%s8250_s9 + $0x48] sm:$0xff]  }
 0x505   :  { %4385 = vmatprep.subr.bf16.mxu0 %v5582_v26  ;;  %v6915_v26 = vld [vmem:[%s8250_s9 + $0x8] sm:$0xff]  }
 0x508   :  { %4386 = vmatpush1.bf16.msra.mxu0 %v5581_v27  ;;  %v6916_v27 = vld [vmem:[%s8250_s9 + $0x50] sm:$0xff]  }
 0x509   :  { %4387 = vmatprep.subr.bf16.mxu0 %v5590_v30  ;;  %v6919_v30 = vld [vmem:[%s8250_s9 + $0x18] sm:$0xff]  }
 0x50c   :  { %4388 = vmatpush1.bf16.msra.mxu0 %v5589_v31  ;;  %v6920_v31 = vld [vmem:[%s8250_s9 + $0x60] sm:$0xff]  }
 0x50d   :  { %4422 = vmatprep.subr.bf16.mxu0 %v5568_v36  ;;  %v6924_v36 = vld [vmem:[%s8250_s9 + $0x70] sm:$0xff]  }
 0x5d2   :  { %v4136_v38 = vpop.f32.mrb[128].mxu0 }
 0x5d3   :  { %v6412_v41 = vadd.f32 %v5519_v37, %v4136_v38  ;;  %v6401_v42 = vpop.f32.mrb[129].mxu0  ;;  %v6925_v37 = vld [vmem:[%s8250_s9 + $0x30] sm:$0xff]   ;;  %v6926_v38 = vld [vmem:[%s8250_s9 + $0x78] sm:$0xff]  }
 0x5d4   :  { %v4139_v43 = vpop.f32.mrb[130].mxu0 }
 0x5d5   :  { %v7946_v44 = vpack.c.bf16 %v6412_v41, %v6412_v41  ;;  %v6402_v45 = vpop.f32.mrb[131].mxu0  ;;  %v4178_v41 = vlaneseq }
 0x5d7   :  { %5597 = vmatmul.mubr.msk.bf16.vlgmr.msra.gmra.mrb[132].mxu0 %vm3482_vm3, %v7946_v44  ;;  %v8070_v42 = vshrl.u32 %v4178_v41, 7 }
 0x5d8   :  { %4423 = vmatpush1.bf16.msra.mxu0 %v5567_v35  ;;  %4454 = vmatprep.mubr.bf16.mxu0 %v6977_v0  ;;  %v6923_v35 = vld [vmem:[%s8250_s9 + $0x28] sm:$0xff]  }
 0x5d9   :  { %4424 = vmatprep.subr.bf16.mxu0 %v5576_v46  ;;  %v4180_v43 = vsub.s32 0, %v8070_v42  ;;  %v4184_v45 = vsub.s32 1, %v8070_v42  ;;  %v4188_v13 = vsub.s32 2, %v8070_v42  ;;  %v4200_v16 = vsub.s32 5, %v8070_v42 }
 0x5dc   :  { %4425 = vmatpush1.bf16.msra.mxu0 %v5575_v49 }
 0x5dd   :  { %4426 = vmatprep.subr.bf16.mxu0 %v5584_v50 }
 0x5e0   :  { %4427 = vmatpush1.bf16.msra.mxu0 %v5583_v53 }
 0x5e1   :  { %4428 = vmatprep.subr.bf16.mxu0 %v5592_v54 }
 0x5e4   :  { %4429 = vmatpush1.bf16.msra.mxu0 %v5591_v57  ;;  %v6929_v57 = vld [vmem:[%s8250_s9 + $0x80] sm:$0xff]  }
 0x5e5   :  { %4463 = vmatprep.subr.bf16.mxu0 %v5570_v58 }
 0x5e7   :  { %5598 = vmatmul.mubr.msk.bf16.vlgmr.msra.gmra.mrb[136].mxu0 %vm3482_vm3, %v7946_v44 }
 0x5e8   :  { %4464 = vmatpush1.bf16.msra.mxu0 %v5569_v61  ;;  %4495 = vmatprep.mubr.bf16.mxu0 %v6977_v0  ;;  %v4192_v61 = vsub.s32 3, %v8070_v42 }
 0x5e9   :  { %4465 = vmatprep.subr.bf16.mxu0 %v5578_v62  ;;  %v6932_v62 = vld [vmem:[%s8250_s9 + $0xd0] sm:$0xff]  }
 0x5ec   :  { %4466 = vmatpush1.bf16.msra.mxu0 %v5577_v2  ;;  %v6934_v2 = vld [vmem:[%s8250_s9 + $0xd8] sm:$0xff]  }
 0x5ed   :  { %4467 = vmatprep.subr.bf16.mxu0 %v5586_v3 }
 0x5f0   :  { %4468 = vmatpush1.bf16.msra.mxu0 %v5585_v6 }
 0x5f1   :  { %4469 = vmatprep.subr.bf16.mxu0 %v5594_v7  ;;  %v6935_v7 = vld [vmem:[%s8250_s9 + $0x98] sm:$0xff]  }
 0x5f4   :  { %4470 = vmatpush1.bf16.msra.mxu0 %v5593_v10 }
 0x5f5   :  { %4504 = vmatprep.subr.bf16.mxu0 %v5572_v11 }
 0x5f7   :  { %5599 = vmatmul.mubr.msk.bf16.vlgmr.msra.gmra.mrb[140].mxu0 %vm3482_vm3, %v7946_v44 }
 0x5f8   :  { %4505 = vmatpush1.bf16.msra.mxu0 %v5571_v14  ;;  %4536 = vmatprep.mubr.bf16.mxu0 %v6977_v0  ;;  %v6912_v0 = vld [vmem:[%s8250_s9 + $0x40] sm:$0xff]   ;;  %v6938_v14 = vld [vmem:[%s8250_s9 + $0xe8] sm:$0xff]  }
 0x5f9   :  { %4506 = vmatprep.subr.bf16.mxu0 %v5580_v15  ;;  %v6939_v15 = vld [vmem:[%s8250_s9 + $0xa8] sm:$0xff]  }
 0x5fc   :  { %4507 = vmatpush1.bf16.msra.mxu0 %v5579_v18  ;;  %v6940_v18 = vld [vmem:[%s8250_s9 + $0xf0] sm:$0xff]  }
 0x5fd   :  { %4508 = vmatprep.subr.bf16.mxu0 %v5588_v19 }
 0x600   :  { %4509 = vmatpush1.bf16.msra.mxu0 %v5587_v29  ;;  %v6942_v29 = vld [vmem:[%s8250_s9 + $0xf8] sm:$0xff]  }
 0x601   :  { %4510 = vmatprep.subr.bf16.mxu0 %v5596_v22 }
 0x604   :  { %4511 = vmatpush1.bf16.msra.mxu0 %v5595_v23 }
 0x605   :  { %5823 = vmatprep.subr.bf16.mxu0 %v6912_v0 }
 0x607   :  { %5600 = vmatmul.mubr.msk.bf16.vlgmr.msra.gmra.mrb[144].mxu0 %vm3482_vm3, %v7946_v44  ;;  %v8076_v44 = vld [vmem:[%s8252_s8] sm:$0xff] }
 0x608   :  { %5824 = vmatpush3.bf16.msra.mxu0 %v6913_v25  ;;  %v4181_v46 = vrot.slane %v8076_v44, %v4180_v43  ;;  %v4185_v47 = vrot.slane %v8076_v44, %v4184_v45  ;;  %v4193_v63 = vrot.slane %v8076_v44, %v4192_v61  ;;  %v4189_v17 = vrot.slane %v8076_v44, %v4188_v13  ;;  %v6951_v43 = vld [vmem:[%s8250_s9 + $0x118] sm:$0xff]   ;;  %v6960_v61 = vld [vmem:[%s8250_s9 + $0x1c0] sm:$0xff]   ;;  %v6971_v13 = vld [vmem:[%s8250_s9 + $0x1a8] sm:$0xff]  }
 0x609   :  { %5825 = vmatprep.subr.bf16.mxu0 %v6914_v24  ;;  %v4201_v19 = vrot.slane %v8076_v44, %v4200_v16  ;;  %v6943_v24 = vld [vmem:[%s8250_s9 + $0xb8] sm:$0xff]  }
 0x60c   :  { %5826 = vmatpush3.bf16.msra.mxu0 %v6915_v26 }
 0x60d   :  { %5827 = vmatprep.subr.bf16.mxu0 %v6916_v27 }
 0x610   :  { %5828 = vmatpush3.bf16.msra.mxu0 %v6917_v28  ;;  %v6944_v28 = vld [vmem:[%s8250_s9 + $0x140] sm:$0xff]  }
 0x611   :  { %5829 = vmatprep.subr.bf16.mxu0 %v6918_v34 }
 0x614   :  { %5830 = vmatpush3.bf16.msra.mxu0 %v6919_v30  ;;  %v6945_v30 = vld [vmem:[%s8250_s9 + $0x100] sm:$0xff]  }
 0x615   :  { %5831 = vmatprep.subr.bf16.mxu0 %v6920_v31 }
 0x618   :  { %5832 = vmatpush3.bf16.msra.mxu0 %v6921_v32  ;;  %v6946_v32 = vld [vmem:[%s8250_s9 + $0x148] sm:$0xff]  }
 0x619   :  { %5833 = vmatprep.subr.bf16.mxu0 %v6922_v33 }
 0x61c   :  { %5834 = vmatpush3.bf16.msra.mxu0 %v6923_v35  ;;  %v6947_v35 = vld [vmem:[%s8250_s9 + $0x108] sm:$0xff]  }
 0x61d   :  { %5835 = vmatprep.subr.bf16.mxu0 %v6924_v36  ;;  %v6948_v36 = vld [vmem:[%s8250_s9 + $0x150] sm:$0xff]  }
 0x620   :  { %5836 = vmatpush3.bf16.msra.mxu0 %v6925_v37  ;;  %v6949_v37 = vld [vmem:[%s8250_s9 + $0x110] sm:$0xff]  }
 0x621   :  { %5837 = vmatprep.subr.bf16.mxu0 %v6926_v38  ;;  %v6950_v38 = vld [vmem:[%s8250_s9 + $0x158] sm:$0xff]  }
 0x624   :  { %5838 = vmatpush3.bf16.msra.mxu0 %v6927_v39 }
 0x625   :  { %5845 = vmatprep.subr.bf16.mxu0 %v6928_v40 }
 0x6aa   :  { %v4415_v48 = vpop.f32.mrb[132].mxu0 }
 0x6ab   :  { %v4416_v49 = vadd.f32 %v4415_v48, %v4181_v46  ;;  %v4417_v50 = vpop.f32.mrb[133].mxu0  ;;  %v6952_v46 = vld [vmem:[%s8250_s9 + $0x160] sm:$0xff]   ;;  %v4196_v48 = vsub.s32 4, %v8070_v42 }
 0x6ac   :  { %v4418_v51 = vadd.f32 %v4417_v50, %v4185_v47  ;;  %v4419_v52 = vpop.f32.mrb[134].mxu0  ;;  %v6953_v47 = vld [vmem:[%s8250_s9 + $0x120] sm:$0xff]   ;;  %v4208_v50 = vsub.s32 7, %v8070_v42 }
 0x6ad   :  { %v4545_v53 = vmax.f32 %v4416_v49, 0.0  ;;  %v4420_v54 = vpop.f32.mrb[135].mxu0  ;;  %v6954_v49 = vld [vmem:[%s8250_s9 + $0x168] sm:$0xff]   ;;  %v4197_v52 = vrot.slane %v8076_v44, %v4196_v48 }
 0x6ae   :  { %v4546_v55 = vmax.f32 %v4418_v51, 0.0  ;;  %v6955_v51 = vld [vmem:[%s8250_s9 + $0x128] sm:$0xff]   ;;  %v4209_v54 = vrot.slane %v8076_v44, %v4208_v50 }
 0x6af   :  { %v4553_v58 = vpack.c.bf16 %v4545_v53, %v4545_v53  ;;  %v6956_v53 = vld [vmem:[%s8250_s9 + $0x170] sm:$0xff]  }
 0x6b0   :  { %v4554_v56 = vpack.c.bf16 %v4546_v55, %v4546_v55  ;;  %v6957_v55 = vld [vmem:[%s8250_s9 + $0x130] sm:$0xff]  }
 0x6b2   :  { %5112 = vmatprep.mubr.bf16.mxu0 %v4554_v56 }
 0x6b3   :  { %5113 = vmatmul.mubr.bf16.vlgmr.msra.gmra.mrb[148].mxu0 %v4553_v58 }
 0x6b4   :  { %5846 = vmatpush3.bf16.msra.mxu0 %v6929_v57  ;;  %v6958_v57 = vld [vmem:[%s8250_s9 + $0x178] sm:$0xff]  }
 0x6b5   :  { %5847 = vmatprep.subr.bf16.mxu0 %v6930_v59  ;;  %v6959_v59 = vld [vmem:[%s8250_s9 + $0x138] sm:$0xff]  }
 0x6b8   :  { %5848 = vmatpush3.bf16.msra.mxu0 %v6931_v60 }
 0x6b9   :  { %5849 = vmatprep.subr.bf16.mxu0 %v6932_v62 }
 0x6ba   :  { %v4456_v3 = vpop.f32.mrb[136].mxu0 }
 0x6bb   :  { %v4458_v4 = vpop.f32.mrb[137].mxu0  ;;  %v4457_v21 = vadd.f32 %v4456_v3, %v4189_v17  ;;  %v6974_v17 = vld [vmem:[%s8250_s9 + $0x1f8] sm:$0xff]  }
 0x6bc   :  { %v4459_v5 = vadd.f32 %v4458_v4, %v4193_v63  ;;  %v4460_v6 = vpop.f32.mrb[138].mxu0  ;;  %5850 = vmatpush3.bf16.msra.mxu0 %v6933_v1  ;;  %v6961_v63 = vld [vmem:[%s8250_s9 + $0x180] sm:$0xff]   ;;  %v6963_v4 = vld [vmem:[%s8250_s9 + $0x188] sm:$0xff]  }
 0x6bd   :  { %v4461_v8 = vpop.f32.mrb[139].mxu0  ;;  %5851 = vmatprep.subr.bf16.mxu0 %v6934_v2  ;;  %v4547_v26 = vmax.f32 %v4457_v21, 0.0  ;;  %v6962_v2 = vld [vmem:[%s8250_s9 + $0x1c8] sm:$0xff]   ;;  %v6965_v6 = vld [vmem:[%s8250_s9 + $0x190] sm:$0xff]  }
 0x6be   :  { %v4548_v10 = vmax.f32 %v4459_v5, 0.0  ;;  %v6964_v5 = vld [vmem:[%s8250_s9 + $0x1d0] sm:$0xff]   ;;  %v6967_v8 = vld [vmem:[%s8250_s9 + $0x198] sm:$0xff]  }
 0x6bf   :  { %v4555_v31 = vpack.c.bf16 %v4547_v26, %v4547_v26 }
 0x6c0   :  { %v4556_v11 = vpack.c.bf16 %v4548_v10, %v4548_v10  ;;  %5852 = vmatpush3.bf16.msra.mxu0 %v6935_v7  ;;  %v6966_v7 = vld [vmem:[%s8250_s9 + $0x1d8] sm:$0xff]   ;;  %v6969_v10 = vld [vmem:[%s8250_s9 + $0x1a0] sm:$0xff]  }
 0x6c1   :  { %5853 = vmatprep.subr.bf16.mxu0 %v6936_v9  ;;  %v6968_v9 = vld [vmem:[%s8250_s9 + $0x1e0] sm:$0xff]  }
 0x6c2   :  { %5152 = vmatprep.mubr.bf16.mxu0 %v4556_v11  ;;  %v4204_v11 = vsub.s32 6, %v8070_v42  ;;  %v6973_v42 = vld [vmem:[%s8250_s9 + $0x1b0] sm:$0xff]  }
 0x6c4   :  { %5854 = vmatpush3.bf16.msra.mxu0 %v6937_v12  ;;  %v6970_v12 = vld [vmem:[%s8250_s9 + $0x1e8] sm:$0xff]  }
 0x6c5   :  { %5855 = vmatprep.subr.bf16.mxu0 %v6938_v14  ;;  %v4205_v14 = vrot.slane %v8076_v44, %v4204_v11  ;;  %v6975_v44 = vld [vmem:[%s8250_s9 + $0x1b8] sm:$0xff]  }
 0x6c8   :  { %5856 = vmatpush3.bf16.msra.mxu0 %v6939_v15  ;;  %v6972_v15 = vld [vmem:[%s8250_s9 + $0x1f0] sm:$0xff]  }
 0x6c9   :  { %5857 = vmatprep.subr.bf16.mxu0 %v6940_v18 }
 0x6ca   :  { %v4497_v22 = vpop.f32.mrb[140].mxu0 }
 0x6cb   :  { %v4499_v23 = vpop.f32.mrb[141].mxu0  ;;  %v4498_v56 = vadd.f32 %v4497_v22, %v4197_v52 }
 0x6cc   :  { %v4500_v0 = vadd.f32 %v4499_v23, %v4201_v19  ;;  %v4501_v25 = vpop.f32.mrb[142].mxu0  ;;  %5858 = vmatpush3.bf16.msra.mxu0 %v6941_v20 }
 0x6cd   :  { %v4502_v27 = vpop.f32.mrb[143].mxu0  ;;  %5859 = vmatprep.subr.bf16.mxu0 %v6942_v29  ;;  %v4549_v60 = vmax.f32 %v4498_v56, 0.0 }
 0x6ce   :  { %v4550_v34 = vmax.f32 %v4500_v0, 0.0  ;;  %v5601_v0 = vld [vmem:[%s8253_s10] ss:$0 sm:$0xff] }
 0x6cf   :  { %v4557_v1 = vpack.c.bf16 %v4549_v60, %v4549_v60 }
 0x6d0   :  { %5860 = vmatpush3.bf16.msra.mxu0 %v6943_v24  ;;  %v4558_v33 = vpack.c.bf16 %v4550_v34, %v4550_v34 }
 0x6d1   :  { %5867 = vmatprep.subr.bf16.mxu0 %v6944_v28 }
 0x6d3   :  { %5153 = vmatmul.mubr.bf16.vlgmr.msra.gmra.mrb[152].mxu0 %v4555_v31 }
 0x6d4   :  { %5868 = vmatpush3.bf16.msra.mxu0 %v6945_v30  ;;  %5192 = vmatprep.mubr.bf16.mxu0 %v4558_v33 }
 0x6d5   :  { %5869 = vmatprep.subr.bf16.mxu0 %v6946_v32 }
 0x6d8   :  { %5870 = vmatpush3.bf16.msra.mxu0 %v6947_v35 }
 0x6d9   :  { %5871 = vmatprep.subr.bf16.mxu0 %v6948_v36 }
 0x6da   :  { %v8153_v39 = vpop.f32.mrb[144].mxu0 }
 0x6db   :  { %v4540_v40 = vpop.f32.mrb[145].mxu0  ;;  %v4539_v16 = vadd.f32 %v8153_v39, %v4205_v14 }
 0x6dc   :  { %v4542_v41 = vpop.f32.mrb[146].mxu0  ;;  %5872 = vmatpush3.bf16.msra.mxu0 %v6949_v37  ;;  %v4541_v58 = vadd.f32 %v4540_v40, %v4209_v54 }
 0x6dd   :  { %v4543_v45 = vpop.f32.mrb[147].mxu0  ;;  %5873 = vmatprep.subr.bf16.mxu0 %v6950_v38  ;;  %v4551_v18 = vmax.f32 %v4539_v16, 0.0 }
 0x6de   :  { %v4552_v62 = vmax.f32 %v4541_v58, 0.0 }
 0x6df   :  { %v4559_v19 = vpack.c.bf16 %v4551_v18, %v4551_v18 }
 0x6e0   :  { %5874 = vmatpush3.bf16.msra.mxu0 %v6951_v43  ;;  %v4560_v3 = vpack.c.bf16 %v4552_v62, %v4552_v62 }
 0x6e1   :  { %5875 = vmatprep.subr.bf16.mxu0 %v6952_v46 }
 0x6e4   :  { %5876 = vmatpush3.bf16.msra.mxu0 %v6953_v47 }
 0x6e5   :  { %5877 = vmatprep.subr.bf16.mxu0 %v6954_v49 }
 0x6e8   :  { %5878 = vmatpush3.bf16.msra.mxu0 %v6955_v51 }
 0x6e9   :  { %5879 = vmatprep.subr.bf16.mxu0 %v6956_v53 }
 0x6ec   :  { %5880 = vmatpush3.bf16.msra.mxu0 %v6957_v55 }
 0x6ed   :  { %5881 = vmatprep.subr.bf16.mxu0 %v6958_v57 }
 0x6f0   :  { %5882 = vmatpush3.bf16.msra.mxu0 %v6959_v59 }
 0x6f1   :  { %5889 = vmatprep.subr.bf16.mxu0 %v6960_v61 }
 0x6f3   :  { %5193 = vmatmul.mubr.bf16.vlgmr.msra.gmra.mrb[156].mxu0 %v4557_v1 }
 0x6f4   :  { %5890 = vmatpush3.bf16.msra.mxu0 %v6961_v63  ;;  %5232 = vmatprep.mubr.bf16.mxu0 %v4560_v3 }
 0x6f5   :  { %5891 = vmatprep.subr.bf16.mxu0 %v6962_v2 }
 0x6f8   :  { %5892 = vmatpush3.bf16.msra.mxu0 %v6963_v4 }
 0x6f9   :  { %5893 = vmatprep.subr.bf16.mxu0 %v6964_v5 }
 0x6fc   :  { %5894 = vmatpush3.bf16.msra.mxu0 %v6965_v6 }
 0x6fd   :  { %5895 = vmatprep.subr.bf16.mxu0 %v6966_v7 }
 0x700   :  { %5896 = vmatpush3.bf16.msra.mxu0 %v6967_v8 }
 0x701   :  { %5897 = vmatprep.subr.bf16.mxu0 %v6968_v9 }
 0x704   :  { %5898 = vmatpush3.bf16.msra.mxu0 %v6969_v10 }
 0x705   :  { %5899 = vmatprep.subr.bf16.mxu0 %v6970_v12 }
 0x708   :  { %5900 = vmatpush3.bf16.msra.mxu0 %v6971_v13 }
 0x709   :  { %5901 = vmatprep.subr.bf16.mxu0 %v6972_v15 }
 0x70c   :  { %5902 = vmatpush3.bf16.msra.mxu0 %v6973_v42 }
 0x70d   :  { %5903 = vmatprep.subr.bf16.mxu0 %v6974_v17 }
 0x710   :  { %5904 = vmatpush3.bf16.msra.mxu0 %v6975_v44 }
 0x713   :  { %5233 = vmatmul.mubr.bf16.vlgmr.msra.gmra.mrb[160].mxu0 %v4559_v19 }
 0x786   :  { %v5839_v20 = vpop.f32.mrb[148].mxu0 }
 0x787   :  { %v5840_v21 = vpop.f32.mrb[149].mxu0 }
 0x788   :  { %v5841_v29 = vadd.f32 %v5840_v21, %v5839_v20  ;;  %v5842_v22 = vpop.f32.mrb[150].mxu0 }
 0x789   :  { %v5843_v23 = vpop.f32.mrb[151].mxu0 }
 0x78a   :  { %v5115_v26 = vadd.f32 %v5841_v29, %v5601_v0 }
 0x7a6   :  { %v5861_v25 = vpop.f32.mrb[152].mxu0 }
 0x7a7   :  { %v5862_v24 = vpop.f32.mrb[153].mxu0 }
 0x7a8   :  { %v5863_v27 = vadd.f32 %v5862_v24, %v5861_v25  ;;  %v5864_v28 = vpop.f32.mrb[154].mxu0 }
 0x7a9   :  { %v5865_v34 = vpop.f32.mrb[155].mxu0 }
 0x7aa   :  { %v5155_v30 = vadd.f32 %v5863_v27, %v5115_v26 }
 0x7c6   :  { %v5883_v31 = vpop.f32.mrb[156].mxu0 }
 0x7c7   :  { %v5884_v32 = vpop.f32.mrb[157].mxu0 }
 0x7c8   :  { %v5885_v33 = vadd.f32 %v5884_v32, %v5883_v31  ;;  %v5886_v35 = vpop.f32.mrb[158].mxu0 }
 0x7c9   :  { %v5887_v36 = vpop.f32.mrb[159].mxu0 }
 0x7ca   :  { %v5195_v37 = vadd.f32 %v5885_v33, %v5155_v30 }
 0x7e6   :  { %v5905_v38 = vpop.f32.mrb[160].mxu0 }
 0x7e7   :  { %v5906_v39 = vpop.f32.mrb[161].mxu0 }
 0x7e8   :  { %v5907_v40 = vadd.f32 %v5906_v39, %v5905_v38  ;;  %v5908_v41 = vpop.f32.mrb[162].mxu0 }
 0x7e9   :  { %v5909_v43 = vpop.f32.mrb[163].mxu0 }
 0x7ea   :  { %v5235_v45 = vadd.f32 %v5907_v40, %v5195_v37 }
 0x7ec   :  { %5240 = vst [vmem:[%s8254_s11] sm:$0xff] %v5235_v45 }

</bundles_post_ra>
